<compile_context>
chip_gen: v6e
topology: v6e:2x2x1
jax: 0.10.0
libtpu: 0.0.40
codegen_flags: <defaults>
</compile_context>

<pallas_src>
import numpy as np
import jax
import jax.numpy as jnp
from jax.experimental import pallas as pl
from jax.experimental.pallas import tpu as pltpu

# ---- module hyperparameters (from the PyTorch source) ----
IN_SZ = 60
KER_SZ = 30
INPUT_SIZE = 4      # conv in-channels
HIDDEN_SIZE = 4     # conv out-channels == fc in-features
OUTPUT_SIZE = 4     # fc out-features

OH = IN_SZ + 1 - KER_SZ             # 31 valid conv output rows/cols
S_VALID = OH * OH                   # 961 (AvgPool2d(31) == global mean of the conv map)

W_SLAB = 64                         # lane width per packed channel slab (60 padded to 64)
PACK = 2                            # input channels packed per 128-lane group
N_GROUP = INPUT_SIZE // PACK        # 2 channel-pair groups
W_LANE = PACK * W_SLAB              # 128 lanes per (group, kh) slab
N_LANE = 128                        # lane-dense column dim: HIDDEN_SIZE*OH = 124 padded to 128
N_VALID = HIDDEN_SIZE * OH          # 124 meaningful columns, index = co*OH + ow
FEAT = N_GROUP * KER_SZ * W_LANE    # 7680 on-chip im2col features, index = (g*K+kh)*128 + c2*64 + w


def _ffn_kernel(x_ref, wmat_ref, cbias_ref, q_ref, fcbias_ref, o_ref, l_ref):
    """One grid step == one batch element; everything stays in VMEM.

    x_ref      : (1, 2, 60, 128) bf16  channel-pair-packed input image
    wmat_ref   : (7680, 128)     bf16  banded conv weights  [(g,kh,c2,w), (co,ow)]
    cbias_ref  : (1, 128)        f32   conv bias replicated per (co, ow) column
    q_ref      : (128, 128)      f32   fused AvgPool+Linear weights [(co,ow), j]
    fcbias_ref : (1, 128)        f32   fc bias (lane-padded)
    o_ref      : (1, 1, 128)     f32   output row (first OUTPUT_SIZE lanes meaningful)
    l_ref      : (31, 7680)      bf16  scratch: height-only im2col of this image
    """
    # On-chip height-im2col: 60 static, 128-lane-aligned block copies.
    #   L[oh, (g*K + kh)*128 + c2*64 + w] = x[2g + c2, oh + kh, w]
    for g in range(N_GROUP):
        for kh in range(KER_SZ):
            base = (g * KER_SZ + kh) * W_LANE
            l_ref[:, base:base + W_LANE] = x_ref[0, g, kh:kh + OH, :]

    # Conv2d(valid) as a single MXU matmul: conv[oh, co*31 + ow], f32 accumulation.
    conv = jnp.dot(l_ref[...], wmat_ref[...], preferred_element_type=jnp.float32)  # (31, 128)
    z = jax.nn.sigmoid(conv + cbias_ref[...])                                      # (31, 128)

    # AvgPool2d(31) + flatten + Linear fused:
    #   y[j] = sum_{oh,co,ow} z[oh, co*31+ow] * w_fc[j, co] / 961 + b_fc[j]
    pooled = jnp.dot(z, q_ref[...], preferred_element_type=jnp.float32)  # (31, 128)
    y = jnp.sum(pooled, axis=0, keepdims=True) + fcbias_ref[...]         # (1, 128), lane-dense
    o_ref[...] = y.reshape(1, 1, N_LANE)


@jax.jit
def feedforward_net(x, w_conv, b_conv, w_fc, b_fc):
    """x: (B, 4, 60, 60); w_conv: (4,4,30,30); b_conv: (4,); w_fc: (4,4) [out,in]; b_fc: (4,)."""
    B = x.shape[0]

    # Channel-pair-packed, bf16, lane-padded input: (B, 2, 60, 128); lane = c2*64 + w.
    xpad = jnp.pad(x.astype(jnp.float32),
                   ((0, 0), (0, 0), (0, 0), (0, W_SLAB - IN_SZ)))        # (B, 4, 60, 64)
    xpk = (xpad.reshape(B, N_GROUP, PACK, IN_SZ, W_SLAB)
               .transpose(0, 1, 3, 2, 4)
               .reshape(B, N_GROUP, IN_SZ, W_LANE)
               .astype(jnp.bfloat16))                                    # (B, 2, 60, 128)

    # Banded conv-weight matrix:
    #   Wmat[(g*K+kh)*128 + c2*64 + w, co*OH + ow] = w_conv[co, 2g+c2, kh, w-ow]  (0 off-band)
    kw_i = jax.lax.broadcasted_iota(jnp.int32, (KER_SZ, W_SLAB, OH), 0)
    wl_i = jax.lax.broadcasted_iota(jnp.int32, (KER_SZ, W_SLAB, OH), 1)
    ow_i = jax.lax.broadcasted_iota(jnp.int32, (KER_SZ, W_SLAB, OH), 2)
    shift = (wl_i == ow_i + kw_i).astype(jnp.float32)                    # (K, 64, OH)
    wall = jnp.einsum('oihk,kpq->ihpoq', w_conv.astype(jnp.float32), shift)  # (ci,kh,64,co,ow)
    wmat = (wall.reshape(N_GROUP, PACK, KER_SZ, W_SLAB, HIDDEN_SIZE, OH)
                .transpose(0, 2, 1, 3, 4, 5)                             # (g, kh, c2, w, co, ow)
                .reshape(FEAT, N_VALID))                                 # (7680, 124)
    wmat = jnp.pad(wmat, ((0, 0), (0, N_LANE - N_VALID))).astype(jnp.bfloat16)

    # Conv bias replicated over ow, lane-padded to 128.
    cbias = jnp.pad(jnp.repeat(b_conv.astype(jnp.float32), OH),
                    (0, N_LANE - N_VALID)).reshape(1, N_LANE)

    # Fused AvgPool + Linear matrix: Q[co*OH + ow, j] = w_fc[j, co] / 961.
    q = jnp.repeat(w_fc.T.astype(jnp.float32) / float(S_VALID), OH, axis=0)  # (124, 4)
    q = jnp.pad(q, ((0, N_LANE - N_VALID), (0, N_LANE - OUTPUT_SIZE)))       # (128, 128)
    fcbias = jnp.pad(b_fc.astype(jnp.float32),
                     (0, N_LANE - OUTPUT_SIZE)).reshape(1, N_LANE)

    out = pl.pallas_call(
        _ffn_kernel,
        out_shape=jax.ShapeDtypeStruct((B, 1, N_LANE), jnp.float32),
        grid_spec=pltpu.PrefetchScalarGridSpec(
            num_scalar_prefetch=0,
            grid=(B,),
            in_specs=[
                pl.BlockSpec((1, N_GROUP, IN_SZ, W_LANE), lambda b: (b, 0, 0, 0)),
                pl.BlockSpec((FEAT, N_LANE), lambda b: (0, 0)),
                pl.BlockSpec((1, N_LANE), lambda b: (0, 0)),
                pl.BlockSpec((N_LANE, N_LANE), lambda b: (0, 0)),
                pl.BlockSpec((1, N_LANE), lambda b: (0, 0)),
            ],
            out_specs=pl.BlockSpec((1, 1, N_LANE), lambda b: (b, 0, 0)),
            scratch_shapes=[pltpu.VMEM((OH, FEAT), jnp.bfloat16)],
        ),
        compiler_params=pltpu.CompilerParams(
            dimension_semantics=("parallel",),       # batch axis -> both TCs on v7x when B >= 2
            vmem_limit_bytes=32 * 1024 * 1024,
        ),
    )(xpk, wmat, cbias, q, fcbias)

    return out[:, 0, :OUTPUT_SIZE]


def _reference(x, w_conv, b_conv, w_fc, b_fc):
    """Pure-JAX f32 reference of the PyTorch forward (for verification)."""
    conv = jax.lax.conv_general_dilated(
        x, w_conv, window_strides=(1, 1), padding="VALID",
        dimension_numbers=("NCHW", "OIHW", "NCHW"))
    conv = conv + b_conv[None, :, None, None]
    z = jax.nn.sigmoid(conv)
    h = jnp.mean(z, axis=(2, 3))          # AvgPool2d(31) + flatten
    return h @ w_fc.T + b_fc


if __name__ == "__main__":
    key = jax.random.PRNGKey(0)
    k_x, k_wc, k_wfc = jax.random.split(key, 3)

    B = 2
    x = jax.random.normal(k_x, (B, INPUT_SIZE, IN_SZ, IN_SZ), dtype=jnp.float32)

    # init_weights: normal(std=0.01, mean=0) for conv/linear weights, zeros for biases
    w_conv = 0.01 * jax.random.normal(k_wc, (HIDDEN_SIZE, INPUT_SIZE, KER_SZ, KER_SZ),
                                      dtype=jnp.float32)
    b_conv = jnp.zeros((HIDDEN_SIZE,), dtype=jnp.float32)
    w_fc = 0.01 * jax.random.normal(k_wfc, (OUTPUT_SIZE, HIDDEN_SIZE), dtype=jnp.float32)
    b_fc = jnp.zeros((OUTPUT_SIZE,), dtype=jnp.float32)

    y = feedforward_net(x, w_conv, b_conv, w_fc, b_fc)
    y = jax.block_until_ready(y)

    y_ref = jax.block_until_ready(_reference(x, w_conv, b_conv, w_fc, b_fc))
    # Conv operands (L / Wmat) go through the MXU in bf16 with f32 accumulation;
    # measured error is ~1e-5 absolute.
    np.testing.assert_allclose(np.asarray(y), np.asarray(y_ref), rtol=2e-2, atol=2e-4)

    print("KERNEL_OK")
</pallas_src>

<mosaic_0001>
module attributes {stable_mosaic.version = 11 : i64} {
  func.func @_ffn_kernel(%arg0: i32, %arg1: memref<1x2x60x128xbf16, #tpu.memory_space<vmem>>, %arg2: memref<7680x128xbf16, #tpu.memory_space<vmem>>, %arg3: memref<1x128xf32, #tpu.memory_space<vmem>>, %arg4: memref<128x128xf32, #tpu.memory_space<vmem>>, %arg5: memref<1x128xf32, #tpu.memory_space<vmem>>, %arg6: memref<1x1x128xf32, #tpu.memory_space<vmem>>, %arg7: memref<31x7680xbf16, #tpu.memory_space<vmem>>) attributes {dimension_semantics = [#tpu.dimension_semantics<parallel>], iteration_bounds = array<i64: 2>, scalar_prefetch = 0 : i64, scratch_operands = 1 : i64, tpu.core_type = #tpu.core_type<tc>, window_params = [{transform_indices = @transform_0, window_bounds = array<i64: 1, 2, 60, 128>}, {pipeline_mode = #tpu.pipeline_mode<synchronous>, transform_indices = @transform_1, window_bounds = array<i64: 7680, 128>}, {pipeline_mode = #tpu.pipeline_mode<synchronous>, transform_indices = @transform_2, window_bounds = array<i64: 1, 128>}, {pipeline_mode = #tpu.pipeline_mode<synchronous>, transform_indices = @transform_3, window_bounds = array<i64: 128, 128>}, {pipeline_mode = #tpu.pipeline_mode<synchronous>, transform_indices = @transform_4, window_bounds = array<i64: 1, 128>}, {transform_indices = @transform_5, window_bounds = array<i64: 1, 1, 128>}]} {
    %c0 = arith.constant 0 : index
    %c0_0 = arith.constant 0 : index
    %c0_1 = arith.constant 0 : index
    %c0_2 = arith.constant 0 : index
    %0 = vector.load %arg1[%c0, %c0_0, %c0_1, %c0_2] : memref<1x2x60x128xbf16, #tpu.memory_space<vmem>>, vector<1x1x31x128xbf16>
    %1 = vector.shape_cast %0 : vector<1x1x31x128xbf16> to vector<31x128xbf16>
    %c0_3 = arith.constant 0 : index
    %c0_4 = arith.constant 0 : index
    %2 = vector.load %arg7[%c0_3, %c0_4] : memref<31x7680xbf16, #tpu.memory_space<vmem>>, vector<31x128xbf16>
    tpu.vector_store %arg7[%c0_3, %c0_4], %1 {strides = array<i32>} : memref<31x7680xbf16, #tpu.memory_space<vmem>>, vector<31x128xbf16>,
    %c0_5 = arith.constant 0 : index
    %c0_6 = arith.constant 0 : index
    %c1 = arith.constant 1 : index
    %c0_7 = arith.constant 0 : index
    %3 = vector.load %arg1[%c0_5, %c0_6, %c1, %c0_7] : memref<1x2x60x128xbf16, #tpu.memory_space<vmem>>, vector<1x1x31x128xbf16>
    %4 = vector.shape_cast %3 : vector<1x1x31x128xbf16> to vector<31x128xbf16>
    %c0_8 = arith.constant 0 : index
    %c128 = arith.constant 128 : index
    %5 = vector.load %arg7[%c0_8, %c128] : memref<31x7680xbf16, #tpu.memory_space<vmem>>, vector<31x128xbf16>
    tpu.vector_store %arg7[%c0_8, %c128], %4 {strides = array<i32>} : memref<31x7680xbf16, #tpu.memory_space<vmem>>, vector<31x128xbf16>,
    %c0_9 = arith.constant 0 : index
    %c0_10 = arith.constant 0 : index
    %c2 = arith.constant 2 : index
    %c0_11 = arith.constant 0 : index
    %6 = vector.load %arg1[%c0_9, %c0_10, %c2, %c0_11] : memref<1x2x60x128xbf16, #tpu.memory_space<vmem>>, vector<1x1x31x128xbf16>
    %7 = vector.shape_cast %6 : vector<1x1x31x128xbf16> to vector<31x128xbf16>
    %c0_12 = arith.constant 0 : index
    %c256 = arith.constant 256 : index
    %8 = vector.load %arg7[%c0_12, %c256] : memref<31x7680xbf16, #tpu.memory_space<vmem>>, vector<31x128xbf16>
    tpu.vector_store %arg7[%c0_12, %c256], %7 {strides = array<i32>} : memref<31x7680xbf16, #tpu.memory_space<vmem>>, vector<31x128xbf16>,
    %c0_13 = arith.constant 0 : index
    %c0_14 = arith.constant 0 : index
    %c3 = arith.constant 3 : index
    %c0_15 = arith.constant 0 : index
    %9 = vector.load %arg1[%c0_13, %c0_14, %c3, %c0_15] : memref<1x2x60x128xbf16, #tpu.memory_space<vmem>>, vector<1x1x31x128xbf16>
    %10 = vector.shape_cast %9 : vector<1x1x31x128xbf16> to vector<31x128xbf16>
    %c0_16 = arith.constant 0 : index
    %c384 = arith.constant 384 : index
    %11 = vector.load %arg7[%c0_16, %c384] : memref<31x7680xbf16, #tpu.memory_space<vmem>>, vector<31x128xbf16>
    tpu.vector_store %arg7[%c0_16, %c384], %10 {strides = array<i32>} : memref<31x7680xbf16, #tpu.memory_space<vmem>>, vector<31x128xbf16>,
    %c0_17 = arith.constant 0 : index
    %c0_18 = arith.constant 0 : index
    %c4 = arith.constant 4 : index
    %c0_19 = arith.constant 0 : index
    %12 = vector.load %arg1[%c0_17, %c0_18, %c4, %c0_19] : memref<1x2x60x128xbf16, #tpu.memory_space<vmem>>, vector<1x1x31x128xbf16>
    %13 = vector.shape_cast %12 : vector<1x1x31x128xbf16> to vector<31x128xbf16>
    %c0_20 = arith.constant 0 : index
    %c512 = arith.constant 512 : index
    %14 = vector.load %arg7[%c0_20, %c512] : memref<31x7680xbf16, #tpu.memory_space<vmem>>, vector<31x128xbf16>
    tpu.vector_store %arg7[%c0_20, %c512], %13 {strides = array<i32>} : memref<31x7680xbf16, #tpu.memory_space<vmem>>, vector<31x128xbf16>,
    %c0_21 = arith.constant 0 : index
    %c0_22 = arith.constant 0 : index
    %c5 = arith.constant 5 : index
    %c0_23 = arith.constant 0 : index
    %15 = vector.load %arg1[%c0_21, %c0_22, %c5, %c0_23] : memref<1x2x60x128xbf16, #tpu.memory_space<vmem>>, vector<1x1x31x128xbf16>
    %16 = vector.shape_cast %15 : vector<1x1x31x128xbf16> to vector<31x128xbf16>
    %c0_24 = arith.constant 0 : index
    %c640 = arith.constant 640 : index
    %17 = vector.load %arg7[%c0_24, %c640] : memref<31x7680xbf16, #tpu.memory_space<vmem>>, vector<31x128xbf16>
    tpu.vector_store %arg7[%c0_24, %c640], %16 {strides = array<i32>} : memref<31x7680xbf16, #tpu.memory_space<vmem>>, vector<31x128xbf16>,
    %c0_25 = arith.constant 0 : index
    %c0_26 = arith.constant 0 : index
    %c6 = arith.constant 6 : index
    %c0_27 = arith.constant 0 : index
    %18 = vector.load %arg1[%c0_25, %c0_26, %c6, %c0_27] : memref<1x2x60x128xbf16, #tpu.memory_space<vmem>>, vector<1x1x31x128xbf16>
    %19 = vector.shape_cast %18 : vector<1x1x31x128xbf16> to vector<31x128xbf16>
    %c0_28 = arith.constant 0 : index
    %c768 = arith.constant 768 : index
    %20 = vector.load %arg7[%c0_28, %c768] : memref<31x7680xbf16, #tpu.memory_space<vmem>>, vector<31x128xbf16>
    tpu.vector_store %arg7[%c0_28, %c768], %19 {strides = array<i32>} : memref<31x7680xbf16, #tpu.memory_space<vmem>>, vector<31x128xbf16>,
    %c0_29 = arith.constant 0 : index
    %c0_30 = arith.constant 0 : index
    %c7 = arith.constant 7 : index
    %c0_31 = arith.constant 0 : index
    %21 = vector.load %arg1[%c0_29, %c0_30, %c7, %c0_31] : memref<1x2x60x128xbf16, #tpu.memory_space<vmem>>, vector<1x1x31x128xbf16>
    %22 = vector.shape_cast %21 : vector<1x1x31x128xbf16> to vector<31x128xbf16>
    %c0_32 = arith.constant 0 : index
    %c896 = arith.constant 896 : index
    %23 = vector.load %arg7[%c0_32, %c896] : memref<31x7680xbf16, #tpu.memory_space<vmem>>, vector<31x128xbf16>
    tpu.vector_store %arg7[%c0_32, %c896], %22 {strides = array<i32>} : memref<31x7680xbf16, #tpu.memory_space<vmem>>, vector<31x128xbf16>,
    %c0_33 = arith.constant 0 : index
    %c0_34 = arith.constant 0 : index
    %c8 = arith.constant 8 : index
    %c0_35 = arith.constant 0 : index
    %24 = vector.load %arg1[%c0_33, %c0_34, %c8, %c0_35] : memref<1x2x60x128xbf16, #tpu.memory_space<vmem>>, vector<1x1x31x128xbf16>
    %25 = vector.shape_cast %24 : vector<1x1x31x128xbf16> to vector<31x128xbf16>
    %c0_36 = arith.constant 0 : index
    %c1024 = arith.constant 1024 : index
    %26 = vector.load %arg7[%c0_36, %c1024] : memref<31x7680xbf16, #tpu.memory_space<vmem>>, vector<31x128xbf16>
    tpu.vector_store %arg7[%c0_36, %c1024], %25 {strides = array<i32>} : memref<31x7680xbf16, #tpu.memory_space<vmem>>, vector<31x128xbf16>,
    %c0_37 = arith.constant 0 : index
    %c0_38 = arith.constant 0 : index
    %c9 = arith.constant 9 : index
    %c0_39 = arith.constant 0 : index
    %27 = vector.load %arg1[%c0_37, %c0_38, %c9, %c0_39] : memref<1x2x60x128xbf16, #tpu.memory_space<vmem>>, vector<1x1x31x128xbf16>
    %28 = vector.shape_cast %27 : vector<1x1x31x128xbf16> to vector<31x128xbf16>
    %c0_40 = arith.constant 0 : index
    %c1152 = arith.constant 1152 : index
    %29 = vector.load %arg7[%c0_40, %c1152] : memref<31x7680xbf16, #tpu.memory_space<vmem>>, vector<31x128xbf16>
    tpu.vector_store %arg7[%c0_40, %c1152], %28 {strides = array<i32>} : memref<31x7680xbf16, #tpu.memory_space<vmem>>, vector<31x128xbf16>,
    %c0_41 = arith.constant 0 : index
    %c0_42 = arith.constant 0 : index
    %c10 = arith.constant 10 : index
    %c0_43 = arith.constant 0 : index
    %30 = vector.load %arg1[%c0_41, %c0_42, %c10, %c0_43] : memref<1x2x60x128xbf16, #tpu.memory_space<vmem>>, vector<1x1x31x128xbf16>
    %31 = vector.shape_cast %30 : vector<1x1x31x128xbf16> to vector<31x128xbf16>
    %c0_44 = arith.constant 0 : index
    %c1280 = arith.constant 1280 : index
    %32 = vector.load %arg7[%c0_44, %c1280] : memref<31x7680xbf16, #tpu.memory_space<vmem>>, vector<31x128xbf16>
    tpu.vector_store %arg7[%c0_44, %c1280], %31 {strides = array<i32>} : memref<31x7680xbf16, #tpu.memory_space<vmem>>, vector<31x128xbf16>,
    %c0_45 = arith.constant 0 : index
    %c0_46 = arith.constant 0 : index
    %c11 = arith.constant 11 : index
    %c0_47 = arith.constant 0 : index
    %33 = vector.load %arg1[%c0_45, %c0_46, %c11, %c0_47] : memref<1x2x60x128xbf16, #tpu.memory_space<vmem>>, vector<1x1x31x128xbf16>
    %34 = vector.shape_cast %33 : vector<1x1x31x128xbf16> to vector<31x128xbf16>
    %c0_48 = arith.constant 0 : index
    %c1408 = arith.constant 1408 : index
    %35 = vector.load %arg7[%c0_48, %c1408] : memref<31x7680xbf16, #tpu.memory_space<vmem>>, vector<31x128xbf16>
    tpu.vector_store %arg7[%c0_48, %c1408], %34 {strides = array<i32>} : memref<31x7680xbf16, #tpu.memory_space<vmem>>, vector<31x128xbf16>,
    %c0_49 = arith.constant 0 : index
    %c0_50 = arith.constant 0 : index
    %c12 = arith.constant 12 : index
    %c0_51 = arith.constant 0 : index
    %36 = vector.load %arg1[%c0_49, %c0_50, %c12, %c0_51] : memref<1x2x60x128xbf16, #tpu.memory_space<vmem>>, vector<1x1x31x128xbf16>
    %37 = vector.shape_cast %36 : vector<1x1x31x128xbf16> to vector<31x128xbf16>
    %c0_52 = arith.constant 0 : index
    %c1536 = arith.constant 1536 : index
    %38 = vector.load %arg7[%c0_52, %c1536] : memref<31x7680xbf16, #tpu.memory_space<vmem>>, vector<31x128xbf16>
    tpu.vector_store %arg7[%c0_52, %c1536], %37 {strides = array<i32>} : memref<31x7680xbf16, #tpu.memory_space<vmem>>, vector<31x128xbf16>,
    %c0_53 = arith.constant 0 : index
    %c0_54 = arith.constant 0 : index
    %c13 = arith.constant 13 : index
    %c0_55 = arith.constant 0 : index
    %39 = vector.load %arg1[%c0_53, %c0_54, %c13, %c0_55] : memref<1x2x60x128xbf16, #tpu.memory_space<vmem>>, vector<1x1x31x128xbf16>
    %40 = vector.shape_cast %39 : vector<1x1x31x128xbf16> to vector<31x128xbf16>
    %c0_56 = arith.constant 0 : index
    %c1664 = arith.constant 1664 : index
    %41 = vector.load %arg7[%c0_56, %c1664] : memref<31x7680xbf16, #tpu.memory_space<vmem>>, vector<31x128xbf16>
    tpu.vector_store %arg7[%c0_56, %c1664], %40 {strides = array<i32>} : memref<31x7680xbf16, #tpu.memory_space<vmem>>, vector<31x128xbf16>,
    %c0_57 = arith.constant 0 : index
    %c0_58 = arith.constant 0 : index
    %c14 = arith.constant 14 : index
    %c0_59 = arith.constant 0 : index
    %42 = vector.load %arg1[%c0_57, %c0_58, %c14, %c0_59] : memref<1x2x60x128xbf16, #tpu.memory_space<vmem>>, vector<1x1x31x128xbf16>
    %43 = vector.shape_cast %42 : vector<1x1x31x128xbf16> to vector<31x128xbf16>
    %c0_60 = arith.constant 0 : index
    %c1792 = arith.constant 1792 : index
    %44 = vector.load %arg7[%c0_60, %c1792] : memref<31x7680xbf16, #tpu.memory_space<vmem>>, vector<31x128xbf16>
    tpu.vector_store %arg7[%c0_60, %c1792], %43 {strides = array<i32>} : memref<31x7680xbf16, #tpu.memory_space<vmem>>, vector<31x128xbf16>,
    %c0_61 = arith.constant 0 : index
    %c0_62 = arith.constant 0 : index
    %c15 = arith.constant 15 : index
    %c0_63 = arith.constant 0 : index
    %45 = vector.load %arg1[%c0_61, %c0_62, %c15, %c0_63] : memref<1x2x60x128xbf16, #tpu.memory_space<vmem>>, vector<1x1x31x128xbf16>
    %46 = vector.shape_cast %45 : vector<1x1x31x128xbf16> to vector<31x128xbf16>
    %c0_64 = arith.constant 0 : index
    %c1920 = arith.constant 1920 : index
    %47 = vector.load %arg7[%c0_64, %c1920] : memref<31x7680xbf16, #tpu.memory_space<vmem>>, vector<31x128xbf16>
    tpu.vector_store %arg7[%c0_64, %c1920], %46 {strides = array<i32>} : memref<31x7680xbf16, #tpu.memory_space<vmem>>, vector<31x128xbf16>,
    %c0_65 = arith.constant 0 : index
    %c0_66 = arith.constant 0 : index
    %c16 = arith.constant 16 : index
    %c0_67 = arith.constant 0 : index
    %48 = vector.load %arg1[%c0_65, %c0_66, %c16, %c0_67] : memref<1x2x60x128xbf16, #tpu.memory_space<vmem>>, vector<1x1x31x128xbf16>
    %49 = vector.shape_cast %48 : vector<1x1x31x128xbf16> to vector<31x128xbf16>
    %c0_68 = arith.constant 0 : index
    %c2048 = arith.constant 2048 : index
    %50 = vector.load %arg7[%c0_68, %c2048] : memref<31x7680xbf16, #tpu.memory_space<vmem>>, vector<31x128xbf16>
    tpu.vector_store %arg7[%c0_68, %c2048], %49 {strides = array<i32>} : memref<31x7680xbf16, #tpu.memory_space<vmem>>, vector<31x128xbf16>,
    %c0_69 = arith.constant 0 : index
    %c0_70 = arith.constant 0 : index
    %c17 = arith.constant 17 : index
    %c0_71 = arith.constant 0 : index
    %51 = vector.load %arg1[%c0_69, %c0_70, %c17, %c0_71] : memref<1x2x60x128xbf16, #tpu.memory_space<vmem>>, vector<1x1x31x128xbf16>
    %52 = vector.shape_cast %51 : vector<1x1x31x128xbf16> to vector<31x128xbf16>
    %c0_72 = arith.constant 0 : index
    %c2176 = arith.constant 2176 : index
    %53 = vector.load %arg7[%c0_72, %c2176] : memref<31x7680xbf16, #tpu.memory_space<vmem>>, vector<31x128xbf16>
    tpu.vector_store %arg7[%c0_72, %c2176], %52 {strides = array<i32>} : memref<31x7680xbf16, #tpu.memory_space<vmem>>, vector<31x128xbf16>,
    %c0_73 = arith.constant 0 : index
    %c0_74 = arith.constant 0 : index
    %c18 = arith.constant 18 : index
    %c0_75 = arith.constant 0 : index
    %54 = vector.load %arg1[%c0_73, %c0_74, %c18, %c0_75] : memref<1x2x60x128xbf16, #tpu.memory_space<vmem>>, vector<1x1x31x128xbf16>
    %55 = vector.shape_cast %54 : vector<1x1x31x128xbf16> to vector<31x128xbf16>
    %c0_76 = arith.constant 0 : index
    %c2304 = arith.constant 2304 : index
    %56 = vector.load %arg7[%c0_76, %c2304] : memref<31x7680xbf16, #tpu.memory_space<vmem>>, vector<31x128xbf16>
    tpu.vector_store %arg7[%c0_76, %c2304], %55 {strides = array<i32>} : memref<31x7680xbf16, #tpu.memory_space<vmem>>, vector<31x128xbf16>,
    %c0_77 = arith.constant 0 : index
    %c0_78 = arith.constant 0 : index
    %c19 = arith.constant 19 : index
    %c0_79 = arith.constant 0 : index
    %57 = vector.load %arg1[%c0_77, %c0_78, %c19, %c0_79] : memref<1x2x60x128xbf16, #tpu.memory_space<vmem>>, vector<1x1x31x128xbf16>
    %58 = vector.shape_cast %57 : vector<1x1x31x128xbf16> to vector<31x128xbf16>
    %c0_80 = arith.constant 0 : index
    %c2432 = arith.constant 2432 : index
    %59 = vector.load %arg7[%c0_80, %c2432] : memref<31x7680xbf16, #tpu.memory_space<vmem>>, vector<31x128xbf16>
    tpu.vector_store %arg7[%c0_80, %c2432], %58 {strides = array<i32>} : memref<31x7680xbf16, #tpu.memory_space<vmem>>, vector<31x128xbf16>,
    %c0_81 = arith.constant 0 : index
    %c0_82 = arith.constant 0 : index
    %c20 = arith.constant 20 : index
    %c0_83 = arith.constant 0 : index
    %60 = vector.load %arg1[%c0_81, %c0_82, %c20, %c0_83] : memref<1x2x60x128xbf16, #tpu.memory_space<vmem>>, vector<1x1x31x128xbf16>
    %61 = vector.shape_cast %60 : vector<1x1x31x128xbf16> to vector<31x128xbf16>
    %c0_84 = arith.constant 0 : index
    %c2560 = arith.constant 2560 : index
    %62 = vector.load %arg7[%c0_84, %c2560] : memref<31x7680xbf16, #tpu.memory_space<vmem>>, vector<31x128xbf16>
    tpu.vector_store %arg7[%c0_84, %c2560], %61 {strides = array<i32>} : memref<31x7680xbf16, #tpu.memory_space<vmem>>, vector<31x128xbf16>,
    %c0_85 = arith.constant 0 : index
    %c0_86 = arith.constant 0 : index
    %c21 = arith.constant 21 : index
    %c0_87 = arith.constant 0 : index
    %63 = vector.load %arg1[%c0_85, %c0_86, %c21, %c0_87] : memref<1x2x60x128xbf16, #tpu.memory_space<vmem>>, vector<1x1x31x128xbf16>
    %64 = vector.shape_cast %63 : vector<1x1x31x128xbf16> to vector<31x128xbf16>
    %c0_88 = arith.constant 0 : index
    %c2688 = arith.constant 2688 : index
    %65 = vector.load %arg7[%c0_88, %c2688] : memref<31x7680xbf16, #tpu.memory_space<vmem>>, vector<31x128xbf16>
    tpu.vector_store %arg7[%c0_88, %c2688], %64 {strides = array<i32>} : memref<31x7680xbf16, #tpu.memory_space<vmem>>, vector<31x128xbf16>,
    %c0_89 = arith.constant 0 : index
    %c0_90 = arith.constant 0 : index
    %c22 = arith.constant 22 : index
    %c0_91 = arith.constant 0 : index
    %66 = vector.load %arg1[%c0_89, %c0_90, %c22, %c0_91] : memref<1x2x60x128xbf16, #tpu.memory_space<vmem>>, vector<1x1x31x128xbf16>
    %67 = vector.shape_cast %66 : vector<1x1x31x128xbf16> to vector<31x128xbf16>
    %c0_92 = arith.constant 0 : index
    %c2816 = arith.constant 2816 : index
    %68 = vector.load %arg7[%c0_92, %c2816] : memref<31x7680xbf16, #tpu.memory_space<vmem>>, vector<31x128xbf16>
    tpu.vector_store %arg7[%c0_92, %c2816], %67 {strides = array<i32>} : memref<31x7680xbf16, #tpu.memory_space<vmem>>, vector<31x128xbf16>,
    %c0_93 = arith.constant 0 : index
    %c0_94 = arith.constant 0 : index
    %c23 = arith.constant 23 : index
    %c0_95 = arith.constant 0 : index
    %69 = vector.load %arg1[%c0_93, %c0_94, %c23, %c0_95] : memref<1x2x60x128xbf16, #tpu.memory_space<vmem>>, vector<1x1x31x128xbf16>
    %70 = vector.shape_cast %69 : vector<1x1x31x128xbf16> to vector<31x128xbf16>
    %c0_96 = arith.constant 0 : index
    %c2944 = arith.constant 2944 : index
    %71 = vector.load %arg7[%c0_96, %c2944] : memref<31x7680xbf16, #tpu.memory_space<vmem>>, vector<31x128xbf16>
    tpu.vector_store %arg7[%c0_96, %c2944], %70 {strides = array<i32>} : memref<31x7680xbf16, #tpu.memory_space<vmem>>, vector<31x128xbf16>,
    %c0_97 = arith.constant 0 : index
    %c0_98 = arith.constant 0 : index
    %c24 = arith.constant 24 : index
    %c0_99 = arith.constant 0 : index
    %72 = vector.load %arg1[%c0_97, %c0_98, %c24, %c0_99] : memref<1x2x60x128xbf16, #tpu.memory_space<vmem>>, vector<1x1x31x128xbf16>
    %73 = vector.shape_cast %72 : vector<1x1x31x128xbf16> to vector<31x128xbf16>
    %c0_100 = arith.constant 0 : index
    %c3072 = arith.constant 3072 : index
    %74 = vector.load %arg7[%c0_100, %c3072] : memref<31x7680xbf16, #tpu.memory_space<vmem>>, vector<31x128xbf16>
    tpu.vector_store %arg7[%c0_100, %c3072], %73 {strides = array<i32>} : memref<31x7680xbf16, #tpu.memory_space<vmem>>, vector<31x128xbf16>,
    %c0_101 = arith.constant 0 : index
    %c0_102 = arith.constant 0 : index
    %c25 = arith.constant 25 : index
    %c0_103 = arith.constant 0 : index
    %75 = vector.load %arg1[%c0_101, %c0_102, %c25, %c0_103] : memref<1x2x60x128xbf16, #tpu.memory_space<vmem>>, vector<1x1x31x128xbf16>
    %76 = vector.shape_cast %75 : vector<1x1x31x128xbf16> to vector<31x128xbf16>
    %c0_104 = arith.constant 0 : index
    %c3200 = arith.constant 3200 : index
    %77 = vector.load %arg7[%c0_104, %c3200] : memref<31x7680xbf16, #tpu.memory_space<vmem>>, vector<31x128xbf16>
    tpu.vector_store %arg7[%c0_104, %c3200], %76 {strides = array<i32>} : memref<31x7680xbf16, #tpu.memory_space<vmem>>, vector<31x128xbf16>,
    %c0_105 = arith.constant 0 : index
    %c0_106 = arith.constant 0 : index
    %c26 = arith.constant 26 : index
    %c0_107 = arith.constant 0 : index
    %78 = vector.load %arg1[%c0_105, %c0_106, %c26, %c0_107] : memref<1x2x60x128xbf16, #tpu.memory_space<vmem>>, vector<1x1x31x128xbf16>
    %79 = vector.shape_cast %78 : vector<1x1x31x128xbf16> to vector<31x128xbf16>
    %c0_108 = arith.constant 0 : index
    %c3328 = arith.constant 3328 : index
    %80 = vector.load %arg7[%c0_108, %c3328] : memref<31x7680xbf16, #tpu.memory_space<vmem>>, vector<31x128xbf16>
    tpu.vector_store %arg7[%c0_108, %c3328], %79 {strides = array<i32>} : memref<31x7680xbf16, #tpu.memory_space<vmem>>, vector<31x128xbf16>,
    %c0_109 = arith.constant 0 : index
    %c0_110 = arith.constant 0 : index
    %c27 = arith.constant 27 : index
    %c0_111 = arith.constant 0 : index
    %81 = vector.load %arg1[%c0_109, %c0_110, %c27, %c0_111] : memref<1x2x60x128xbf16, #tpu.memory_space<vmem>>, vector<1x1x31x128xbf16>
    %82 = vector.shape_cast %81 : vector<1x1x31x128xbf16> to vector<31x128xbf16>
    %c0_112 = arith.constant 0 : index
    %c3456 = arith.constant 3456 : index
    %83 = vector.load %arg7[%c0_112, %c3456] : memref<31x7680xbf16, #tpu.memory_space<vmem>>, vector<31x128xbf16>
    tpu.vector_store %arg7[%c0_112, %c3456], %82 {strides = array<i32>} : memref<31x7680xbf16, #tpu.memory_space<vmem>>, vector<31x128xbf16>,
    %c0_113 = arith.constant 0 : index
    %c0_114 = arith.constant 0 : index
    %c28 = arith.constant 28 : index
    %c0_115 = arith.constant 0 : index
    %84 = vector.load %arg1[%c0_113, %c0_114, %c28, %c0_115] : memref<1x2x60x128xbf16, #tpu.memory_space<vmem>>, vector<1x1x31x128xbf16>
    %85 = vector.shape_cast %84 : vector<1x1x31x128xbf16> to vector<31x128xbf16>
    %c0_116 = arith.constant 0 : index
    %c3584 = arith.constant 3584 : index
    %86 = vector.load %arg7[%c0_116, %c3584] : memref<31x7680xbf16, #tpu.memory_space<vmem>>, vector<31x128xbf16>
    tpu.vector_store %arg7[%c0_116, %c3584], %85 {strides = array<i32>} : memref<31x7680xbf16, #tpu.memory_space<vmem>>, vector<31x128xbf16>,
    %c0_117 = arith.constant 0 : index
    %c0_118 = arith.constant 0 : index
    %c29 = arith.constant 29 : index
    %c0_119 = arith.constant 0 : index
    %87 = vector.load %arg1[%c0_117, %c0_118, %c29, %c0_119] : memref<1x2x60x128xbf16, #tpu.memory_space<vmem>>, vector<1x1x31x128xbf16>
    %88 = vector.shape_cast %87 : vector<1x1x31x128xbf16> to vector<31x128xbf16>
    %c0_120 = arith.constant 0 : index
    %c3712 = arith.constant 3712 : index
    %89 = vector.load %arg7[%c0_120, %c3712] : memref<31x7680xbf16, #tpu.memory_space<vmem>>, vector<31x128xbf16>
    tpu.vector_store %arg7[%c0_120, %c3712], %88 {strides = array<i32>} : memref<31x7680xbf16, #tpu.memory_space<vmem>>, vector<31x128xbf16>,
    %c0_121 = arith.constant 0 : index
    %c1_122 = arith.constant 1 : index
    %c0_123 = arith.constant 0 : index
    %c0_124 = arith.constant 0 : index
    %90 = vector.load %arg1[%c0_121, %c1_122, %c0_123, %c0_124] : memref<1x2x60x128xbf16, #tpu.memory_space<vmem>>, vector<1x1x31x128xbf16>
    %91 = vector.shape_cast %90 : vector<1x1x31x128xbf16> to vector<31x128xbf16>
    %c0_125 = arith.constant 0 : index
    %c3840 = arith.constant 3840 : index
    %92 = vector.load %arg7[%c0_125, %c3840] : memref<31x7680xbf16, #tpu.memory_space<vmem>>, vector<31x128xbf16>
    tpu.vector_store %arg7[%c0_125, %c3840], %91 {strides = array<i32>} : memref<31x7680xbf16, #tpu.memory_space<vmem>>, vector<31x128xbf16>,
    %c0_126 = arith.constant 0 : index
    %c1_127 = arith.constant 1 : index
    %c1_128 = arith.constant 1 : index
    %c0_129 = arith.constant 0 : index
    %93 = vector.load %arg1[%c0_126, %c1_127, %c1_128, %c0_129] : memref<1x2x60x128xbf16, #tpu.memory_space<vmem>>, vector<1x1x31x128xbf16>
    %94 = vector.shape_cast %93 : vector<1x1x31x128xbf16> to vector<31x128xbf16>
    %c0_130 = arith.constant 0 : index
    %c3968 = arith.constant 3968 : index
    %95 = vector.load %arg7[%c0_130, %c3968] : memref<31x7680xbf16, #tpu.memory_space<vmem>>, vector<31x128xbf16>
    tpu.vector_store %arg7[%c0_130, %c3968], %94 {strides = array<i32>} : memref<31x7680xbf16, #tpu.memory_space<vmem>>, vector<31x128xbf16>,
    %c0_131 = arith.constant 0 : index
    %c1_132 = arith.constant 1 : index
    %c2_133 = arith.constant 2 : index
    %c0_134 = arith.constant 0 : index
    %96 = vector.load %arg1[%c0_131, %c1_132, %c2_133, %c0_134] : memref<1x2x60x128xbf16, #tpu.memory_space<vmem>>, vector<1x1x31x128xbf16>
    %97 = vector.shape_cast %96 : vector<1x1x31x128xbf16> to vector<31x128xbf16>
    %c0_135 = arith.constant 0 : index
    %c4096 = arith.constant 4096 : index
    %98 = vector.load %arg7[%c0_135, %c4096] : memref<31x7680xbf16, #tpu.memory_space<vmem>>, vector<31x128xbf16>
    tpu.vector_store %arg7[%c0_135, %c4096], %97 {strides = array<i32>} : memref<31x7680xbf16, #tpu.memory_space<vmem>>, vector<31x128xbf16>,
    %c0_136 = arith.constant 0 : index
    %c1_137 = arith.constant 1 : index
    %c3_138 = arith.constant 3 : index
    %c0_139 = arith.constant 0 : index
    %99 = vector.load %arg1[%c0_136, %c1_137, %c3_138, %c0_139] : memref<1x2x60x128xbf16, #tpu.memory_space<vmem>>, vector<1x1x31x128xbf16>
    %100 = vector.shape_cast %99 : vector<1x1x31x128xbf16> to vector<31x128xbf16>
    %c0_140 = arith.constant 0 : index
    %c4224 = arith.constant 4224 : index
    %101 = vector.load %arg7[%c0_140, %c4224] : memref<31x7680xbf16, #tpu.memory_space<vmem>>, vector<31x128xbf16>
    tpu.vector_store %arg7[%c0_140, %c4224], %100 {strides = array<i32>} : memref<31x7680xbf16, #tpu.memory_space<vmem>>, vector<31x128xbf16>,
    %c0_141 = arith.constant 0 : index
    %c1_142 = arith.constant 1 : index
    %c4_143 = arith.constant 4 : index
    %c0_144 = arith.constant 0 : index
    %102 = vector.load %arg1[%c0_141, %c1_142, %c4_143, %c0_144] : memref<1x2x60x128xbf16, #tpu.memory_space<vmem>>, vector<1x1x31x128xbf16>
    %103 = vector.shape_cast %102 : vector<1x1x31x128xbf16> to vector<31x128xbf16>
    %c0_145 = arith.constant 0 : index
    %c4352 = arith.constant 4352 : index
    %104 = vector.load %arg7[%c0_145, %c4352] : memref<31x7680xbf16, #tpu.memory_space<vmem>>, vector<31x128xbf16>
    tpu.vector_store %arg7[%c0_145, %c4352], %103 {strides = array<i32>} : memref<31x7680xbf16, #tpu.memory_space<vmem>>, vector<31x128xbf16>,
    %c0_146 = arith.constant 0 : index
    %c1_147 = arith.constant 1 : index
    %c5_148 = arith.constant 5 : index
    %c0_149 = arith.constant 0 : index
    %105 = vector.load %arg1[%c0_146, %c1_147, %c5_148, %c0_149] : memref<1x2x60x128xbf16, #tpu.memory_space<vmem>>, vector<1x1x31x128xbf16>
    %106 = vector.shape_cast %105 : vector<1x1x31x128xbf16> to vector<31x128xbf16>
    %c0_150 = arith.constant 0 : index
    %c4480 = arith.constant 4480 : index
    %107 = vector.load %arg7[%c0_150, %c4480] : memref<31x7680xbf16, #tpu.memory_space<vmem>>, vector<31x128xbf16>
    tpu.vector_store %arg7[%c0_150, %c4480], %106 {strides = array<i32>} : memref<31x7680xbf16, #tpu.memory_space<vmem>>, vector<31x128xbf16>,
    %c0_151 = arith.constant 0 : index
    %c1_152 = arith.constant 1 : index
    %c6_153 = arith.constant 6 : index
    %c0_154 = arith.constant 0 : index
    %108 = vector.load %arg1[%c0_151, %c1_152, %c6_153, %c0_154] : memref<1x2x60x128xbf16, #tpu.memory_space<vmem>>, vector<1x1x31x128xbf16>
    %109 = vector.shape_cast %108 : vector<1x1x31x128xbf16> to vector<31x128xbf16>
    %c0_155 = arith.constant 0 : index
    %c4608 = arith.constant 4608 : index
    %110 = vector.load %arg7[%c0_155, %c4608] : memref<31x7680xbf16, #tpu.memory_space<vmem>>, vector<31x128xbf16>
    tpu.vector_store %arg7[%c0_155, %c4608], %109 {strides = array<i32>} : memref<31x7680xbf16, #tpu.memory_space<vmem>>, vector<31x128xbf16>,
    %c0_156 = arith.constant 0 : index
    %c1_157 = arith.constant 1 : index
    %c7_158 = arith.constant 7 : index
    %c0_159 = arith.constant 0 : index
    %111 = vector.load %arg1[%c0_156, %c1_157, %c7_158, %c0_159] : memref<1x2x60x128xbf16, #tpu.memory_space<vmem>>, vector<1x1x31x128xbf16>
    %112 = vector.shape_cast %111 : vector<1x1x31x128xbf16> to vector<31x128xbf16>
    %c0_160 = arith.constant 0 : index
    %c4736 = arith.constant 4736 : index
    %113 = vector.load %arg7[%c0_160, %c4736] : memref<31x7680xbf16, #tpu.memory_space<vmem>>, vector<31x128xbf16>
    tpu.vector_store %arg7[%c0_160, %c4736], %112 {strides = array<i32>} : memref<31x7680xbf16, #tpu.memory_space<vmem>>, vector<31x128xbf16>,
    %c0_161 = arith.constant 0 : index
    %c1_162 = arith.constant 1 : index
    %c8_163 = arith.constant 8 : index
    %c0_164 = arith.constant 0 : index
    %114 = vector.load %arg1[%c0_161, %c1_162, %c8_163, %c0_164] : memref<1x2x60x128xbf16, #tpu.memory_space<vmem>>, vector<1x1x31x128xbf16>
    %115 = vector.shape_cast %114 : vector<1x1x31x128xbf16> to vector<31x128xbf16>
    %c0_165 = arith.constant 0 : index
    %c4864 = arith.constant 4864 : index
    %116 = vector.load %arg7[%c0_165, %c4864] : memref<31x7680xbf16, #tpu.memory_space<vmem>>, vector<31x128xbf16>
    tpu.vector_store %arg7[%c0_165, %c4864], %115 {strides = array<i32>} : memref<31x7680xbf16, #tpu.memory_space<vmem>>, vector<31x128xbf16>,
    %c0_166 = arith.constant 0 : index
    %c1_167 = arith.constant 1 : index
    %c9_168 = arith.constant 9 : index
    %c0_169 = arith.constant 0 : index
    %117 = vector.load %arg1[%c0_166, %c1_167, %c9_168, %c0_169] : memref<1x2x60x128xbf16, #tpu.memory_space<vmem>>, vector<1x1x31x128xbf16>
    %118 = vector.shape_cast %117 : vector<1x1x31x128xbf16> to vector<31x128xbf16>
    %c0_170 = arith.constant 0 : index
    %c4992 = arith.constant 4992 : index
    %119 = vector.load %arg7[%c0_170, %c4992] : memref<31x7680xbf16, #tpu.memory_space<vmem>>, vector<31x128xbf16>
    tpu.vector_store %arg7[%c0_170, %c4992], %118 {strides = array<i32>} : memref<31x7680xbf16, #tpu.memory_space<vmem>>, vector<31x128xbf16>,
    %c0_171 = arith.constant 0 : index
    %c1_172 = arith.constant 1 : index
    %c10_173 = arith.constant 10 : index
    %c0_174 = arith.constant 0 : index
    %120 = vector.load %arg1[%c0_171, %c1_172, %c10_173, %c0_174] : memref<1x2x60x128xbf16, #tpu.memory_space<vmem>>, vector<1x1x31x128xbf16>
    %121 = vector.shape_cast %120 : vector<1x1x31x128xbf16> to vector<31x128xbf16>
    %c0_175 = arith.constant 0 : index
    %c5120 = arith.constant 5120 : index
    %122 = vector.load %arg7[%c0_175, %c5120] : memref<31x7680xbf16, #tpu.memory_space<vmem>>, vector<31x128xbf16>
    tpu.vector_store %arg7[%c0_175, %c5120], %121 {strides = array<i32>} : memref<31x7680xbf16, #tpu.memory_space<vmem>>, vector<31x128xbf16>,
    %c0_176 = arith.constant 0 : index
    %c1_177 = arith.constant 1 : index
    %c11_178 = arith.constant 11 : index
    %c0_179 = arith.constant 0 : index
    %123 = vector.load %arg1[%c0_176, %c1_177, %c11_178, %c0_179] : memref<1x2x60x128xbf16, #tpu.memory_space<vmem>>, vector<1x1x31x128xbf16>
    %124 = vector.shape_cast %123 : vector<1x1x31x128xbf16> to vector<31x128xbf16>
    %c0_180 = arith.constant 0 : index
    %c5248 = arith.constant 5248 : index
    %125 = vector.load %arg7[%c0_180, %c5248] : memref<31x7680xbf16, #tpu.memory_space<vmem>>, vector<31x128xbf16>
    tpu.vector_store %arg7[%c0_180, %c5248], %124 {strides = array<i32>} : memref<31x7680xbf16, #tpu.memory_space<vmem>>, vector<31x128xbf16>,
    %c0_181 = arith.constant 0 : index
    %c1_182 = arith.constant 1 : index
    %c12_183 = arith.constant 12 : index
    %c0_184 = arith.constant 0 : index
    %126 = vector.load %arg1[%c0_181, %c1_182, %c12_183, %c0_184] : memref<1x2x60x128xbf16, #tpu.memory_space<vmem>>, vector<1x1x31x128xbf16>
    %127 = vector.shape_cast %126 : vector<1x1x31x128xbf16> to vector<31x128xbf16>
    %c0_185 = arith.constant 0 : index
    %c5376 = arith.constant 5376 : index
    %128 = vector.load %arg7[%c0_185, %c5376] : memref<31x7680xbf16, #tpu.memory_space<vmem>>, vector<31x128xbf16>
    tpu.vector_store %arg7[%c0_185, %c5376], %127 {strides = array<i32>} : memref<31x7680xbf16, #tpu.memory_space<vmem>>, vector<31x128xbf16>,
    %c0_186 = arith.constant 0 : index
    %c1_187 = arith.constant 1 : index
    %c13_188 = arith.constant 13 : index
    %c0_189 = arith.constant 0 : index
    %129 = vector.load %arg1[%c0_186, %c1_187, %c13_188, %c0_189] : memref<1x2x60x128xbf16, #tpu.memory_space<vmem>>, vector<1x1x31x128xbf16>
    %130 = vector.shape_cast %129 : vector<1x1x31x128xbf16> to vector<31x128xbf16>
    %c0_190 = arith.constant 0 : index
    %c5504 = arith.constant 5504 : index
    %131 = vector.load %arg7[%c0_190, %c5504] : memref<31x7680xbf16, #tpu.memory_space<vmem>>, vector<31x128xbf16>
    tpu.vector_store %arg7[%c0_190, %c5504], %130 {strides = array<i32>} : memref<31x7680xbf16, #tpu.memory_space<vmem>>, vector<31x128xbf16>,
    %c0_191 = arith.constant 0 : index
    %c1_192 = arith.constant 1 : index
    %c14_193 = arith.constant 14 : index
    %c0_194 = arith.constant 0 : index
    %132 = vector.load %arg1[%c0_191, %c1_192, %c14_193, %c0_194] : memref<1x2x60x128xbf16, #tpu.memory_space<vmem>>, vector<1x1x31x128xbf16>
    %133 = vector.shape_cast %132 : vector<1x1x31x128xbf16> to vector<31x128xbf16>
    %c0_195 = arith.constant 0 : index
    %c5632 = arith.constant 5632 : index
    %134 = vector.load %arg7[%c0_195, %c5632] : memref<31x7680xbf16, #tpu.memory_space<vmem>>, vector<31x128xbf16>
    tpu.vector_store %arg7[%c0_195, %c5632], %133 {strides = array<i32>} : memref<31x7680xbf16, #tpu.memory_space<vmem>>, vector<31x128xbf16>,
    %c0_196 = arith.constant 0 : index
    %c1_197 = arith.constant 1 : index
    %c15_198 = arith.constant 15 : index
    %c0_199 = arith.constant 0 : index
    %135 = vector.load %arg1[%c0_196, %c1_197, %c15_198, %c0_199] : memref<1x2x60x128xbf16, #tpu.memory_space<vmem>>, vector<1x1x31x128xbf16>
    %136 = vector.shape_cast %135 : vector<1x1x31x128xbf16> to vector<31x128xbf16>
    %c0_200 = arith.constant 0 : index
    %c5760 = arith.constant 5760 : index
    %137 = vector.load %arg7[%c0_200, %c5760] : memref<31x7680xbf16, #tpu.memory_space<vmem>>, vector<31x128xbf16>
    tpu.vector_store %arg7[%c0_200, %c5760], %136 {strides = array<i32>} : memref<31x7680xbf16, #tpu.memory_space<vmem>>, vector<31x128xbf16>,
    %c0_201 = arith.constant 0 : index
    %c1_202 = arith.constant 1 : index
    %c16_203 = arith.constant 16 : index
    %c0_204 = arith.constant 0 : index
    %138 = vector.load %arg1[%c0_201, %c1_202, %c16_203, %c0_204] : memref<1x2x60x128xbf16, #tpu.memory_space<vmem>>, vector<1x1x31x128xbf16>
    %139 = vector.shape_cast %138 : vector<1x1x31x128xbf16> to vector<31x128xbf16>
    %c0_205 = arith.constant 0 : index
    %c5888 = arith.constant 5888 : index
    %140 = vector.load %arg7[%c0_205, %c5888] : memref<31x7680xbf16, #tpu.memory_space<vmem>>, vector<31x128xbf16>
    tpu.vector_store %arg7[%c0_205, %c5888], %139 {strides = array<i32>} : memref<31x7680xbf16, #tpu.memory_space<vmem>>, vector<31x128xbf16>,
    %c0_206 = arith.constant 0 : index
    %c1_207 = arith.constant 1 : index
    %c17_208 = arith.constant 17 : index
    %c0_209 = arith.constant 0 : index
    %141 = vector.load %arg1[%c0_206, %c1_207, %c17_208, %c0_209] : memref<1x2x60x128xbf16, #tpu.memory_space<vmem>>, vector<1x1x31x128xbf16>
    %142 = vector.shape_cast %141 : vector<1x1x31x128xbf16> to vector<31x128xbf16>
    %c0_210 = arith.constant 0 : index
    %c6016 = arith.constant 6016 : index
    %143 = vector.load %arg7[%c0_210, %c6016] : memref<31x7680xbf16, #tpu.memory_space<vmem>>, vector<31x128xbf16>
    tpu.vector_store %arg7[%c0_210, %c6016], %142 {strides = array<i32>} : memref<31x7680xbf16, #tpu.memory_space<vmem>>, vector<31x128xbf16>,
    %c0_211 = arith.constant 0 : index
    %c1_212 = arith.constant 1 : index
    %c18_213 = arith.constant 18 : index
    %c0_214 = arith.constant 0 : index
    %144 = vector.load %arg1[%c0_211, %c1_212, %c18_213, %c0_214] : memref<1x2x60x128xbf16, #tpu.memory_space<vmem>>, vector<1x1x31x128xbf16>
    %145 = vector.shape_cast %144 : vector<1x1x31x128xbf16> to vector<31x128xbf16>
    %c0_215 = arith.constant 0 : index
    %c6144 = arith.constant 6144 : index
    %146 = vector.load %arg7[%c0_215, %c6144] : memref<31x7680xbf16, #tpu.memory_space<vmem>>, vector<31x128xbf16>
    tpu.vector_store %arg7[%c0_215, %c6144], %145 {strides = array<i32>} : memref<31x7680xbf16, #tpu.memory_space<vmem>>, vector<31x128xbf16>,
    %c0_216 = arith.constant 0 : index
    %c1_217 = arith.constant 1 : index
    %c19_218 = arith.constant 19 : index
    %c0_219 = arith.constant 0 : index
    %147 = vector.load %arg1[%c0_216, %c1_217, %c19_218, %c0_219] : memref<1x2x60x128xbf16, #tpu.memory_space<vmem>>, vector<1x1x31x128xbf16>
    %148 = vector.shape_cast %147 : vector<1x1x31x128xbf16> to vector<31x128xbf16>
    %c0_220 = arith.constant 0 : index
    %c6272 = arith.constant 6272 : index
    %149 = vector.load %arg7[%c0_220, %c6272] : memref<31x7680xbf16, #tpu.memory_space<vmem>>, vector<31x128xbf16>
    tpu.vector_store %arg7[%c0_220, %c6272], %148 {strides = array<i32>} : memref<31x7680xbf16, #tpu.memory_space<vmem>>, vector<31x128xbf16>,
    %c0_221 = arith.constant 0 : index
    %c1_222 = arith.constant 1 : index
    %c20_223 = arith.constant 20 : index
    %c0_224 = arith.constant 0 : index
    %150 = vector.load %arg1[%c0_221, %c1_222, %c20_223, %c0_224] : memref<1x2x60x128xbf16, #tpu.memory_space<vmem>>, vector<1x1x31x128xbf16>
    %151 = vector.shape_cast %150 : vector<1x1x31x128xbf16> to vector<31x128xbf16>
    %c0_225 = arith.constant 0 : index
    %c6400 = arith.constant 6400 : index
    %152 = vector.load %arg7[%c0_225, %c6400] : memref<31x7680xbf16, #tpu.memory_space<vmem>>, vector<31x128xbf16>
    tpu.vector_store %arg7[%c0_225, %c6400], %151 {strides = array<i32>} : memref<31x7680xbf16, #tpu.memory_space<vmem>>, vector<31x128xbf16>,
    %c0_226 = arith.constant 0 : index
    %c1_227 = arith.constant 1 : index
    %c21_228 = arith.constant 21 : index
    %c0_229 = arith.constant 0 : index
    %153 = vector.load %arg1[%c0_226, %c1_227, %c21_228, %c0_229] : memref<1x2x60x128xbf16, #tpu.memory_space<vmem>>, vector<1x1x31x128xbf16>
    %154 = vector.shape_cast %153 : vector<1x1x31x128xbf16> to vector<31x128xbf16>
    %c0_230 = arith.constant 0 : index
    %c6528 = arith.constant 6528 : index
    %155 = vector.load %arg7[%c0_230, %c6528] : memref<31x7680xbf16, #tpu.memory_space<vmem>>, vector<31x128xbf16>
    tpu.vector_store %arg7[%c0_230, %c6528], %154 {strides = array<i32>} : memref<31x7680xbf16, #tpu.memory_space<vmem>>, vector<31x128xbf16>,
    %c0_231 = arith.constant 0 : index
    %c1_232 = arith.constant 1 : index
    %c22_233 = arith.constant 22 : index
    %c0_234 = arith.constant 0 : index
    %156 = vector.load %arg1[%c0_231, %c1_232, %c22_233, %c0_234] : memref<1x2x60x128xbf16, #tpu.memory_space<vmem>>, vector<1x1x31x128xbf16>
    %157 = vector.shape_cast %156 : vector<1x1x31x128xbf16> to vector<31x128xbf16>
    %c0_235 = arith.constant 0 : index
    %c6656 = arith.constant 6656 : index
    %158 = vector.load %arg7[%c0_235, %c6656] : memref<31x7680xbf16, #tpu.memory_space<vmem>>, vector<31x128xbf16>
    tpu.vector_store %arg7[%c0_235, %c6656], %157 {strides = array<i32>} : memref<31x7680xbf16, #tpu.memory_space<vmem>>, vector<31x128xbf16>,
    %c0_236 = arith.constant 0 : index
    %c1_237 = arith.constant 1 : index
    %c23_238 = arith.constant 23 : index
    %c0_239 = arith.constant 0 : index
    %159 = vector.load %arg1[%c0_236, %c1_237, %c23_238, %c0_239] : memref<1x2x60x128xbf16, #tpu.memory_space<vmem>>, vector<1x1x31x128xbf16>
    %160 = vector.shape_cast %159 : vector<1x1x31x128xbf16> to vector<31x128xbf16>
    %c0_240 = arith.constant 0 : index
    %c6784 = arith.constant 6784 : index
    %161 = vector.load %arg7[%c0_240, %c6784] : memref<31x7680xbf16, #tpu.memory_space<vmem>>, vector<31x128xbf16>
    tpu.vector_store %arg7[%c0_240, %c6784], %160 {strides = array<i32>} : memref<31x7680xbf16, #tpu.memory_space<vmem>>, vector<31x128xbf16>,
    %c0_241 = arith.constant 0 : index
    %c1_242 = arith.constant 1 : index
    %c24_243 = arith.constant 24 : index
    %c0_244 = arith.constant 0 : index
    %162 = vector.load %arg1[%c0_241, %c1_242, %c24_243, %c0_244] : memref<1x2x60x128xbf16, #tpu.memory_space<vmem>>, vector<1x1x31x128xbf16>
    %163 = vector.shape_cast %162 : vector<1x1x31x128xbf16> to vector<31x128xbf16>
    %c0_245 = arith.constant 0 : index
    %c6912 = arith.constant 6912 : index
    %164 = vector.load %arg7[%c0_245, %c6912] : memref<31x7680xbf16, #tpu.memory_space<vmem>>, vector<31x128xbf16>
    tpu.vector_store %arg7[%c0_245, %c6912], %163 {strides = array<i32>} : memref<31x7680xbf16, #tpu.memory_space<vmem>>, vector<31x128xbf16>,
    %c0_246 = arith.constant 0 : index
    %c1_247 = arith.constant 1 : index
    %c25_248 = arith.constant 25 : index
    %c0_249 = arith.constant 0 : index
    %165 = vector.load %arg1[%c0_246, %c1_247, %c25_248, %c0_249] : memref<1x2x60x128xbf16, #tpu.memory_space<vmem>>, vector<1x1x31x128xbf16>
    %166 = vector.shape_cast %165 : vector<1x1x31x128xbf16> to vector<31x128xbf16>
    %c0_250 = arith.constant 0 : index
    %c7040 = arith.constant 7040 : index
    %167 = vector.load %arg7[%c0_250, %c7040] : memref<31x7680xbf16, #tpu.memory_space<vmem>>, vector<31x128xbf16>
    tpu.vector_store %arg7[%c0_250, %c7040], %166 {strides = array<i32>} : memref<31x7680xbf16, #tpu.memory_space<vmem>>, vector<31x128xbf16>,
    %c0_251 = arith.constant 0 : index
    %c1_252 = arith.constant 1 : index
    %c26_253 = arith.constant 26 : index
    %c0_254 = arith.constant 0 : index
    %168 = vector.load %arg1[%c0_251, %c1_252, %c26_253, %c0_254] : memref<1x2x60x128xbf16, #tpu.memory_space<vmem>>, vector<1x1x31x128xbf16>
    %169 = vector.shape_cast %168 : vector<1x1x31x128xbf16> to vector<31x128xbf16>
    %c0_255 = arith.constant 0 : index
    %c7168 = arith.constant 7168 : index
    %170 = vector.load %arg7[%c0_255, %c7168] : memref<31x7680xbf16, #tpu.memory_space<vmem>>, vector<31x128xbf16>
    tpu.vector_store %arg7[%c0_255, %c7168], %169 {strides = array<i32>} : memref<31x7680xbf16, #tpu.memory_space<vmem>>, vector<31x128xbf16>,
    %c0_256 = arith.constant 0 : index
    %c1_257 = arith.constant 1 : index
    %c27_258 = arith.constant 27 : index
    %c0_259 = arith.constant 0 : index
    %171 = vector.load %arg1[%c0_256, %c1_257, %c27_258, %c0_259] : memref<1x2x60x128xbf16, #tpu.memory_space<vmem>>, vector<1x1x31x128xbf16>
    %172 = vector.shape_cast %171 : vector<1x1x31x128xbf16> to vector<31x128xbf16>
    %c0_260 = arith.constant 0 : index
    %c7296 = arith.constant 7296 : index
    %173 = vector.load %arg7[%c0_260, %c7296] : memref<31x7680xbf16, #tpu.memory_space<vmem>>, vector<31x128xbf16>
    tpu.vector_store %arg7[%c0_260, %c7296], %172 {strides = array<i32>} : memref<31x7680xbf16, #tpu.memory_space<vmem>>, vector<31x128xbf16>,
    %c0_261 = arith.constant 0 : index
    %c1_262 = arith.constant 1 : index
    %c28_263 = arith.constant 28 : index
    %c0_264 = arith.constant 0 : index
    %174 = vector.load %arg1[%c0_261, %c1_262, %c28_263, %c0_264] : memref<1x2x60x128xbf16, #tpu.memory_space<vmem>>, vector<1x1x31x128xbf16>
    %175 = vector.shape_cast %174 : vector<1x1x31x128xbf16> to vector<31x128xbf16>
    %c0_265 = arith.constant 0 : index
    %c7424 = arith.constant 7424 : index
    %176 = vector.load %arg7[%c0_265, %c7424] : memref<31x7680xbf16, #tpu.memory_space<vmem>>, vector<31x128xbf16>
    tpu.vector_store %arg7[%c0_265, %c7424], %175 {strides = array<i32>} : memref<31x7680xbf16, #tpu.memory_space<vmem>>, vector<31x128xbf16>,
    %c0_266 = arith.constant 0 : index
    %c1_267 = arith.constant 1 : index
    %c29_268 = arith.constant 29 : index
    %c0_269 = arith.constant 0 : index
    %177 = vector.load %arg1[%c0_266, %c1_267, %c29_268, %c0_269] : memref<1x2x60x128xbf16, #tpu.memory_space<vmem>>, vector<1x1x31x128xbf16>
    %178 = vector.shape_cast %177 : vector<1x1x31x128xbf16> to vector<31x128xbf16>
    %c0_270 = arith.constant 0 : index
    %c7552 = arith.constant 7552 : index
    %179 = vector.load %arg7[%c0_270, %c7552] : memref<31x7680xbf16, #tpu.memory_space<vmem>>, vector<31x128xbf16>
    tpu.vector_store %arg7[%c0_270, %c7552], %178 {strides = array<i32>} : memref<31x7680xbf16, #tpu.memory_space<vmem>>, vector<31x128xbf16>,
    %c0_271 = arith.constant 0 : index
    %c0_272 = arith.constant 0 : index
    %180 = vector.load %arg7[%c0_271, %c0_272] : memref<31x7680xbf16, #tpu.memory_space<vmem>>, vector<31x7680xbf16>
    %c0_273 = arith.constant 0 : index
    %c0_274 = arith.constant 0 : index
    %181 = vector.load %arg2[%c0_273, %c0_274] : memref<7680x128xbf16, #tpu.memory_space<vmem>>, vector<7680x128xbf16>
    %cst = arith.constant dense<0.000000e+00> : vector<31x128xf32>
    %182 = tpu.matmul %180, %181, %cst {dimension_numbers = #tpu.dot_dimension_numbers<[1], [0], [0], [1], [0, 0, 1, 1], [], []>} : vector<31x7680xbf16>, vector<7680x128xbf16>, vector<31x128xf32> -> vector<31x128xf32>
    %c0_275 = arith.constant 0 : index
    %c0_276 = arith.constant 0 : index
    %183 = vector.load %arg3[%c0_275, %c0_276] : memref<1x128xf32, #tpu.memory_space<vmem>>, vector<1x128xf32>
    %184 = vector.broadcast %183 : vector<1x128xf32> to vector<31x128xf32>
    %185 = arith.addf %182, %184 : vector<31x128xf32>
    %186 = arith.negf %185 : vector<31x128xf32>
    %187 = math.exp %186 : vector<31x128xf32>
    %cst_277 = arith.constant 1.000000e+00 : f32
    %188 = vector.broadcast %cst_277 : f32 to vector<31x128xf32>
    %189 = arith.addf %188, %187 : vector<31x128xf32>
    %190 = arith.divf %188, %189 : vector<31x128xf32>
    %c0_278 = arith.constant 0 : index
    %c0_279 = arith.constant 0 : index
    %191 = vector.load %arg4[%c0_278, %c0_279] : memref<128x128xf32, #tpu.memory_space<vmem>>, vector<128x128xf32>
    %cst_280 = arith.constant dense<0.000000e+00> : vector<31x128xf32>
    %192 = tpu.matmul %190, %191, %cst_280 {dimension_numbers = #tpu.dot_dimension_numbers<[1], [0], [0], [1], [0, 0, 1, 1], [], []>} : vector<31x128xf32>, vector<128x128xf32>, vector<31x128xf32> -> vector<31x128xf32>
    %cst_281 = arith.constant dense<0.000000e+00> : vector<128xf32>
    %193 = vector.multi_reduction <add>, %192, %cst_281 [0] : vector<31x128xf32> to vector<128xf32>
    %194 = vector.shape_cast %193 : vector<128xf32> to vector<1x128xf32>
    %c0_282 = arith.constant 0 : index
    %c0_283 = arith.constant 0 : index
    %195 = vector.load %arg5[%c0_282, %c0_283] : memref<1x128xf32, #tpu.memory_space<vmem>>, vector<1x128xf32>
    %196 = arith.addf %194, %195 : vector<1x128xf32>
    %197 = vector.shape_cast %196 : vector<1x128xf32> to vector<1x1x128xf32>
    %c0_284 = arith.constant 0 : index
    %c0_285 = arith.constant 0 : index
    %c0_286 = arith.constant 0 : index
    %198 = vector.load %arg6[%c0_284, %c0_285, %c0_286] : memref<1x1x128xf32, #tpu.memory_space<vmem>>, vector<1x1x128xf32>
    tpu.vector_store %arg6[%c0_284, %c0_285, %c0_286], %197 {strides = array<i32>} : memref<1x1x128xf32, #tpu.memory_space<vmem>>, vector<1x1x128xf32>,
    return
  }
  func.func @transform_0(%arg0: i32) -> (i32, i32, i32, i32) {
    %c0_i32 = arith.constant 0 : i32
    %c0_i32_0 = arith.constant 0 : i32
    %c0_i32_1 = arith.constant 0 : i32
    %c0_i32_2 = arith.constant 0 : i32
    return %arg0, %c0_i32, %c0_i32_0, %c0_i32_1 : i32, i32, i32, i32
  }
  func.func @transform_1(%arg0: i32) -> (i32, i32) {
    %c0_i32 = arith.constant 0 : i32
    %c0_i32_0 = arith.constant 0 : i32
    %c0_i32_1 = arith.constant 0 : i32
    return %c0_i32, %c0_i32_0 : i32, i32
  }
  func.func @transform_2(%arg0: i32) -> (i32, i32) {
    %c0_i32 = arith.constant 0 : i32
    %c0_i32_0 = arith.constant 0 : i32
    %c0_i32_1 = arith.constant 0 : i32
    return %c0_i32, %c0_i32_0 : i32, i32
  }
  func.func @transform_3(%arg0: i32) -> (i32, i32) {
    %c0_i32 = arith.constant 0 : i32
    %c0_i32_0 = arith.constant 0 : i32
    %c0_i32_1 = arith.constant 0 : i32
    return %c0_i32, %c0_i32_0 : i32, i32
  }
  func.func @transform_4(%arg0: i32) -> (i32, i32) {
    %c0_i32 = arith.constant 0 : i32
    %c0_i32_0 = arith.constant 0 : i32
    %c0_i32_1 = arith.constant 0 : i32
    return %c0_i32, %c0_i32_0 : i32, i32
  }
  func.func @transform_5(%arg0: i32) -> (i32, i32, i32) {
    %c0_i32 = arith.constant 0 : i32
    %c0_i32_0 = arith.constant 0 : i32
    %c0_i32_1 = arith.constant 0 : i32
    return %arg0, %c0_i32, %c0_i32_0 : i32, i32, i32
  }
}

</mosaic_0001>

<bundles_post_ra>
// kernel: feedforward_net.1
= control target key start
LH: loop header
LB: loop body
LE: loop exit
PB: predicated region body
PF: predicated region fallthrough
CT: control target
= control target key end

     0   :  { %10 = vsyncpa [#allocation4], 0  ;;  %s14590_s0 = inlined_call_operand.vmem [shape: bf16[2,2,60,128], index: 0, kind: input, shape index: {}]   ;;  %s14591_s1 = inlined_call_operand.vmem [shape: bf16[7680,128], index: 1, kind: input, shape index: {}]   ;;  %s14592_s2 = inlined_call_operand.vmem [shape: f32[1,128], index: 2, kind: input, shape index: {}]   ;;  %s14593_s3 = inlined_call_operand.vmem [shape: f32[128,128], index: 3, kind: input, shape index: {}]   ;;  %s14594_s4 = inlined_call_operand.vmem [shape: f32[1,128], index: 4, kind: input, shape index: {}]   ;;  %s14595_s5 = inlined_call_operand.hbm [shape: f32[2,1,128], index: 5, kind: output, shape index: {}]  }
   0x1   :  { %12 = vsyncpa [#allocation4 + $0x1], 0  ;;  %s11582_s18 = smov 0   ;;  %s11584_s19 = smov 0  }
   0x2   :  { %s11586_s20 = smov 0   ;;  %s11588_s21 = smov 0  }
   0x3 LB: > { %s11603_s22 = sadd.s32 4294967295, %s11549_s21   ;;  %s9059_s23 = sadd.s32 4294967294, %s11549_s21   ;;  %s11549_s21 = sphi %s11588_s21, %s14633_s21   ;;  %s11545_s20 = sphi %s11586_s20, %s14632_s20   ;;  %s11541_s19 = sphi %s11584_s19, %s14631_s19   ;;  %s11537_s18 = sphi %s11582_s18, %s14630_s18  }
   0x4   : > { %s11607_s24 = sadd.s32 1, %s11549_s21   ;;  %s135_s25 = sadd.s32 1, %s11545_s20 }
   0x5   : > { %s132_s26 = ssub.s32 %s11549_s21, %s11607_s24  ;;  %p145_p0 = scmp.ne.s32.totalorder %s11545_s20, %s11541_s19 }
   0x6   : > { %p133_p1 = scmp.eq.s32.totalorder %s132_s26, 0  ;;  %p146_p2 = scmp.eq.s32.totalorder %s11603_s22, 1 }
   0x7   : > { %p151_p3 = scmp.ne.s32.totalorder %s11541_s19, %s11537_s18  ;;  %p152_p4 = scmp.eq.s32.totalorder %s9059_s23, 1 }
   0x8   : > { %s11618_s27 = scalar_select %p133_p1, %s11545_s20, %s135_s25  }
   0x9   : > { %p11620_p5 = por %p146_p2, %p145_p0  ;;  %p11624_p6 = por %p152_p4, %p151_p3 }
   0xa   : > { %p9062_p7 = scmp.ge.s32.totalorder %s11549_s21, 1  ;;  %p190_p8 = scmp.lt.s32.totalorder %s11549_s21, 3 }
   0xc   : > { %p191_p9 = pnand %p9062_p7, %p190_p8 }
   0xe   : > { %194 = sbr.rel (%p191_p9) target bundleno = 1201 (0x4b1), region = 40 }
  0x13   : > { %v10813_v0 = vld [vmem:[%s14591_s1 + $0x78] sm:$0xff]   ;;  %v10817_v4 = vld [vmem:[%s14591_s1 + $0x70] sm:$0xff]   ;;  %v10821_v8 = vld [vmem:[%s14591_s1 + $0x68] sm:$0xff]   ;;  %p217_p10 = scmp.lt.s32.totalorder %s11603_s22, 1  ;;  %vm301_vm0 = vcmask 1042432   ;;  %vm302_vm1 = vcmask 1046532  }
  0x14   : > { %v10814_v1 = vld [vmem:[%s14591_s1 + $0xf8] sm:$0xff]   ;;  %9844 = vmatprep.subr.bf16.mxu0 %v10813_v0  ;;  %v10818_v5 = vld [vmem:[%s14591_s1 + $0xf0] sm:$0xff]   ;;  %v10822_v9 = vld [vmem:[%s14591_s1 + $0xe8] sm:$0xff]   ;;  %vm231_vm2 = vsmask.f32 3328  ;;  %vm230_vm9 = vcmask 1043456  }
  0x15   : > { %v10815_v2 = vld [vmem:[%s14591_s1 + $0x38] sm:$0xff]   ;;  %9872 = vmatprep.subr.bf16.mxu1 %v10814_v1  ;;  %v10819_v6 = vld [vmem:[%s14591_s1 + $0x30] sm:$0xff]   ;;  %v10823_v10 = vld [vmem:[%s14591_s1 + $0x28] sm:$0xff]   ;;  %s218_s30 = scalar_select %p217_p10, %s11603_s22, 1  ;;  %vm240_vm3 = vsmask.f32 7440 }
  0x16   : > { %v10816_v3 = vld [vmem:[%s14591_s1 + $0xb8] sm:$0xff]   ;;  %9845 = vmatpush3.bf16.msra.mxu0 %v10815_v2  ;;  %v10820_v7 = vld [vmem:[%s14591_s1 + $0xb0] sm:$0xff]   ;;  %v10824_v11 = vld [vmem:[%s14591_s1 + $0xa8] sm:$0xff]   ;;  %vm332_vm6 = vsmask.f32 2304  ;;  %vm403_vm11 = vcmask 1041408  }
  0x17   : > { %9873 = vmatpush3.bf16.msra.mxu1 %v10816_v3  ;;  %9846 = vmatprep.subr.bf16.mxu0 %v10817_v4  ;;  %v10825_v12 = vld [vmem:[%s14591_s1 + $0x60] sm:$0xff]   ;;  %v10829_v16 = vld [vmem:[%s14591_s1 + $0x58] sm:$0xff]   ;;  %v10833_v20 = vld [vmem:[%s14591_s1 + $0x50] sm:$0xff]   ;;  %s9843_s14 = sshll.u32 %s218_s30, 6  ;;  %vm333_vm7 = vsmask.f32 6416 }
  0x18   : > { %9874 = vmatprep.subr.bf16.mxu1 %v10818_v5  ;;  %v10826_v13 = vld [vmem:[%s14591_s1 + $0xe0] sm:$0xff]   ;;  %v10830_v17 = vld [vmem:[%s14591_s1 + $0xd8] sm:$0xff]   ;;  %v10834_v21 = vld [vmem:[%s14591_s1 + $0xd0] sm:$0xff]   ;;  %s11728_s8 = scalar_lea.vmem %s14590_s0, %s9843_s14  ;;  %vm404_vm12 = vcmask 1045508   ;;  %vm434_vm14 = vsmask.f32 1280 }
  0x19   : > { %v10827_v14 = vld [vmem:[%s14591_s1 + $0x20] sm:$0xff]   ;;  %v10831_v18 = vld [vmem:[%s14591_s1 + $0x18] sm:$0xff]   ;;  %v10835_v22 = vld [vmem:[%s14591_s1 + $0x10] sm:$0xff]   ;;  %vm505_vm15 = vcmask 1040384   ;;  %s9840_s10 = sshll.u32 %s11603_s22, 4  ;;  %s11551_s23 = smov [#allocation3]  }
  0x1a   : > { %9847 = vmatpush3.bf16.msra.mxu0 %v10819_v6  ;;  %v10828_v15 = vld [vmem:[%s14591_s1 + $0xa0] sm:$0xff]   ;;  %v10832_v19 = vld [vmem:[%s14591_s1 + $0x98] sm:$0xff]   ;;  %v10836_v23 = vld [vmem:[%s14591_s1 + $0x90] sm:$0xff]   ;;  %s9002_s15 = scalar_lea.hbm %s14595_s5, %s9840_s10  ;;  %s11493_s25 = sshll.u32 %s11551_s23, 4  ;;  %s11494_s25 = int_to_ptr.vmem [resolvable:$false] %s11493_s25 }
  0x1b   : > { %9875 = vmatpush3.bf16.msra.mxu1 %v10820_v7  ;;  %9848 = vmatprep.subr.bf16.mxu0 %v10821_v8  ;;  %v10837_v24 = vld [vmem:[%s14591_s1 + $0x48] sm:$0xff]   ;;  %v10841_v28 = vld [vmem:[%s14591_s1 + $0x40] sm:$0xff]   ;;  %vm11748_vm4 = vmor %vm301_vm0, %vm302_vm1  ;;  %vm506_vm0 = vcmask 1044484   ;;  %vm435_vm1 = vsmask.f32 5392  ;;  %s11495_s22 = scalar_lea.vmem %s11494_s25, 32 }
  0x1c   : > { %9876 = vmatprep.subr.bf16.mxu1 %v10822_v9  ;;  %v10838_v25 = vld [vmem:[%s14591_s1 + $0xc8] sm:$0xff]   ;;  %v10842_v29 = vld [vmem:[%s14591_s1 + $0xc0] sm:$0xff]   ;;  %vm11757_vm5 = vmor %vm231_vm2, %vm240_vm3 }
  0x1d   : > { %v10839_v26 = vld [vmem:[%s14591_s1 + $0x8] sm:$0xff]   ;;  %v10843_v30 = vld [vmem:[%s14591_s1] sm:$0xff]   ;;  %v10851_v63 = vld [vmem:[%s14591_s1 + $0x178] sm:$0xff]  }
  0x1e   : > { %9849 = vmatpush3.bf16.msra.mxu0 %v10823_v10  ;;  %v10840_v27 = vld [vmem:[%s14591_s1 + $0x88] sm:$0xff]   ;;  %v10844_v31 = vld [vmem:[%s14591_s1 + $0x80] sm:$0xff]   ;;  %v10852_v2 = vld [vmem:[%s14591_s1 + $0x1f8] sm:$0xff]  }
  0x1f   : > { %9877 = vmatpush3.bf16.msra.mxu1 %v10824_v11  ;;  %9850 = vmatprep.subr.bf16.mxu0 %v10825_v12  ;;  %v223_v32 = vld [vmem:[%s11728_s8] sm:$0xf]  ;;  %v224_v33 = vld [vmem:[%s11728_s8 + $0x4] sm:$0xf]  ;;  %v11738_v36 = vld [vmem:[%s11728_s8 + $0x8] sm:$0xf] }
  0x20   : > { %9878 = vmatprep.subr.bf16.mxu1 %v10826_v13  ;;  %227 = vst [vmem:[#allocation2] sm:$0xf] %v223_v32  ;;  %228 = vst [vmem:[#allocation2 + $0xf0] sm:$0xf] %v224_v33  ;;  %v236_v34 = vld [vmem:[%s11728_s8] sm:$0xf] }
  0x21   : > { %v237_v35 = vld [vmem:[%s11728_s8 + $0x4] sm:$0xf]  ;;  %v243_v37 = vshrl.u32 %v236_v34, 16  ;;  %v246_v38 = vshll.u32 %v236_v34, 16  ;;  %v262_v41 = vshll.u32 %v11738_v36, 16  ;;  %vm11783_vm8 = vmor %vm332_vm6, %vm333_vm7  ;;  %v10854_v33 = vld [vmem:[%s14591_s1 + $0x1b8] sm:$0xff]  }
  0x22   : > { %9851 = vmatpush3.bf16.msra.mxu0 %v10827_v14  ;;  %v252_v39 = vshll.u32 %v237_v35, 16  ;;  %v256_v40 = vshrl.u32 %v237_v35, 16  ;;  %v291_v42 = vld [vmem:[%s11728_s8] sm:$0xe]  ;;  %v292_v43 = vld [vmem:[%s11728_s8 + $0x4] sm:$0xf]  ;;  %vm11802_vm10 = vmand %vm230_vm9, %vm231_vm2 }
  0x23   : > { %9879 = vmatpush3.bf16.msra.mxu1 %v10828_v15  ;;  %9852 = vmatprep.subr.bf16.mxu0 %v10829_v16  ;;  %v245_v44 = vrot.slane %v243_v37, 4  ;;  %v248_v45 = vrot.slane %v246_v38, 5  ;;  %v11744_v48 = vld [vmem:[%s11728_s8 + $0x8] sm:$0xf]  ;;  %v11752_v50 = vrot.slane %v262_v41, 5  ;;  %v9065_v51 = vrot.slane %v291_v42, 9  ;;  %vm11903_vm13 = vmor %vm403_vm11, %vm404_vm12 }
  0x24   : > { %9880 = vmatprep.subr.bf16.mxu1 %v10830_v17  ;;  %v254_v46 = vrot.slane %v252_v39, 5  ;;  %v258_v47 = vrot.slane %v256_v40, 4  ;;  %v306_v52 = vrot.slane %v292_v43, 5  ;;  %v327_v53 = vld [vmem:[%s11728_s8] sm:$0xe]  ;;  %v309_v57 = vrot.slane %v11744_v48, 5  ;;  %vm11948_vm3 = vmor %vm505_vm15, %vm506_vm0 }
  0x25   : > { %v249_v55 = vor.u32 %v248_v45, %v245_v44  ;;  %v328_v58 = vld [vmem:[%s11728_s8 + $0x4] sm:$0xf]  ;;  %v336_v59 = vshrl.u32 %v327_v53, 16  ;;  %v329_v62 = vld [vmem:[%s11728_s8 + $0x8] sm:$0xf]  ;;  %v339_v5 = vshll.u32 %v327_v53, 16  ;;  %vm11959_vm6 = vmor %vm434_vm14, %vm435_vm1 }
  0x26   : > { %9853 = vmatpush3.bf16.msra.mxu0 %v10831_v18  ;;  %v259_v56 = vor.u32 %v258_v47, %v254_v46  ;;  %v307_v60 = vsel %vm11748_vm4, %v9065_v51, %v306_v52  ;;  %v308_v61 = vrot.slane %v306_v52, 4  ;;  %v345_v8 = vshrl.u32 %v328_v58, 16  ;;  %v10859_v34 = vld [vmem:[%s14591_s1 + $0x168] sm:$0xff]   ;;  %v10856_v35 = vld [vmem:[%s14591_s1 + $0x1f0] sm:$0xff]   ;;  %v10863_v40 = vld [vmem:[%s14591_s1 + $0x160] sm:$0xff]  }
  0x27   : > { %9881 = vmatpush3.bf16.msra.mxu1 %v10832_v19  ;;  %9854 = vmatprep.subr.bf16.mxu0 %v10833_v20  ;;  %v250_v0 = vrot.slane %v249_v55, 4  ;;  %321 = vst [vmem:[#allocation2 + $0x8] sm:$0xf] %v307_v60  ;;  %v338_v4 = vrot.slane %v336_v59, 5  ;;  %v348_v9 = vshll.u32 %v328_v58, 16  ;;  %v341_v10 = vrot.slane %v339_v5, 6 }
  0x28   : > { %9882 = vmatprep.subr.bf16.mxu1 %v10834_v21  ;;  %v260_v1 = vrot.slane %v259_v56, 4  ;;  %v310_v3 = vsel %vm11748_vm4, %v308_v61, %v309_v57  ;;  %v355_v11 = vshrl.u32 %v329_v62, 16  ;;  %v358_v12 = vshll.u32 %v329_v62, 16  ;;  %v10861_v38 = vld [vmem:[%s14591_s1 + $0x128] sm:$0xff]   ;;  %v10858_v41 = vld [vmem:[%s14591_s1 + $0x1b0] sm:$0xff]   ;;  %v10865_v44 = vld [vmem:[%s14591_s1 + $0x120] sm:$0xff]  }
  0x29   : > { %v255_v6 = vsel %vm11757_vm5, %v250_v0, %v254_v46  ;;  %322 = vst [vmem:[#allocation2 + $0xf8] sm:$0xf] %v310_v3  ;;  %v347_v13 = vrot.slane %v345_v8, 5  ;;  %v350_v14 = vrot.slane %v348_v9, 6  ;;  %v342_v15 = vor.u32 %v341_v10, %v338_v4  ;;  %v10860_v42 = vld [vmem:[%s14591_s1 + $0x1e8] sm:$0xff]   ;;  %v10867_v46 = vld [vmem:[%s14591_s1 + $0x158] sm:$0xff]  }
  0x2a   : > { %9855 = vmatpush3.bf16.msra.mxu0 %v10835_v22  ;;  %v265_v7 = vsel %vm11757_vm5, %v260_v1, %v11752_v50  ;;  %285 = vst [vmem:[#allocation2 + $0x4] sm:$0xf] %v255_v6  ;;  %v357_v16 = vrot.slane %v355_v11, 5  ;;  %v360_v17 = vrot.slane %v358_v12, 6  ;;  %v311_v43 = vrot.slane %v309_v57, 4  ;;  %v10862_v48 = vld [vmem:[%s14591_s1 + $0x1a8] sm:$0xff]  }
  0x2b   : > { %9883 = vmatpush3.bf16.msra.mxu1 %v10836_v23  ;;  %9856 = vmatprep.subr.bf16.mxu0 %v10837_v24  ;;  %286 = vst [vmem:[#allocation2 + $0xf4] sm:$0xf] %v265_v7  ;;  %v351_v19 = vor.u32 %v350_v14, %v347_v13  ;;  %v343_v20 = vrot.slane %v342_v15, 4  ;;  %v10845_v24 = vld [vmem:[#allocation2] ss:$240 sps:$4 sm:$0xff]   ;;  %v10869_v61 = vld [vmem:[%s14591_s1 + $0x118] sm:$0xff]  }
  0x2c   : > { %9884 = vmatprep.subr.bf16.mxu1 %v10838_v25  ;;  %v11787_v21 = vor.u32 %v360_v17, %v357_v16  ;;  %v225_v47 = vld [vmem:[%s11728_s8 + $0x8] sm:$0xf]  ;;  %v233_v52 = vld [vmem:[#allocation2 + $0x2d0] sm:$0xf]  ;;  %v239_v53 = vld [vmem:[%s11728_s8 + $0xc] sm:$0xf] }
  0x2d   : > { %v353_v22 = vrot.slane %v351_v19, 4  ;;  %v352_v23 = vsel %vm11783_vm8, %v343_v20, %v351_v19  ;;  %229 = vst [vmem:[#allocation2 + $0x1e0] sm:$0xf] %v225_v47  ;;  %v272_v56 = vshll.u32 %v239_v53, 16  ;;  %v276_v57 = vshrl.u32 %v239_v53, 16  ;;  %v10864_v60 = vld [vmem:[%s14591_s1 + $0x1e0] sm:$0xff]  }
  0x2e   : > { %9857 = vmatpush3.bf16.msra.mxu0 %v10839_v26  ;;  %387 = vst [vmem:[#allocation2 + $0xc] sm:$0xf] %v352_v23  ;;  %v363_v51 = vrot.slane %v11787_v21, 4  ;;  %v294_v58 = vld [vmem:[%s11728_s8 + $0xc] sm:$0xf]  ;;  %v10866_v1 = vld [vmem:[%s14591_s1 + $0x1a0] sm:$0xff]  }
  0x2f   : > { %9885 = vmatpush3.bf16.msra.mxu1 %v10840_v27  ;;  %9858 = vmatprep.subr.bf16.mxu0 %v10841_v28  ;;  %v362_v25 = vsel %vm11783_vm8, %v353_v22, %v11787_v21  ;;  %v10853_v27 = vld [vmem:[%s14591_s1 + $0x138] sm:$0xff]   ;;  %v266_v28 = vshrl.u32 %v11738_v36, 16  ;;  %v295_v59 = vld [vmem:[%s11728_s8 + $0x10] sm:$0x1]  ;;  %v312_v62 = vrot.slane %v294_v58, 5  ;;  %v278_v3 = vrot.slane %v276_v57, 4 }
  0x30   : > { %9886 = vmatprep.subr.bf16.mxu1 %v10842_v29  ;;  %388 = vst [vmem:[#allocation2 + $0xfc] sm:$0xf] %v362_v25  ;;  %v10855_v29 = vld [vmem:[%s14591_s1 + $0x170] sm:$0xff]   ;;  %v10848_v36 = vld [vmem:[#allocation2 + $0x8] ss:$240 sps:$4 sm:$0xff]   ;;  %v10886_v47 = vld [vmem:[%s14591_s1 + $0x1c0] sm:$0xff]  }
  0x31   : > { %v268_v32 = vrot.slane %v266_v28, 4  ;;  %v330_v0 = vld [vmem:[%s11728_s8 + $0xc] sm:$0xf]  ;;  %v331_v4 = vld [vmem:[%s11728_s8 + $0x10] sm:$0x1]  ;;  %v10868_v7 = vld [vmem:[%s14591_s1 + $0x1d8] sm:$0xff]   ;;  %v313_v9 = vsel %vm11748_vm4, %v311_v43, %v312_v62 }
  0x32   : > { %9859 = vmatpush3.bf16.msra.mxu0 %v10843_v30  ;;  %v10847_v26 = vld [vmem:[#allocation2 + $0x4] ss:$240 sps:$4 sm:$0xff]   ;;  %v365_v5 = vshrl.u32 %v330_v0, 16  ;;  %v368_v6 = vshll.u32 %v330_v0, 16  ;;  %v314_v10 = vrot.slane %v312_v62, 4  ;;  %v375_v12 = vshrl.u32 %v331_v4, 16 }
  0x33   : > { %9887 = vmatpush3.bf16.msra.mxu1 %v10844_v31  ;;  %9900 = vmatprep.subr.bf16.mxu0 %v10851_v63  ;;  %v10857_v31 = vld [vmem:[%s14591_s1 + $0x130] sm:$0xff]   ;;  %v269_v39 = vor.u32 %v268_v32, %v11752_v50  ;;  %v226_v50 = vld [vmem:[%s11728_s8 + $0xc] sm:$0xf]  ;;  %v315_v63 = vrot.slane %v295_v59, 5  ;;  %v324_v11 = vld [vmem:[#allocation2 + $0x2d8] sm:$0xf] }
  0x34   : > { %9928 = vmatprep.subr.bf16.mxu1 %v10852_v2  ;;  %7414 = vmatprep.mubr.bf16.mxu0 %v10847_v26  ;;  %v234_v55 = vsel %vm11802_vm10, %v226_v50, %v233_v52  ;;  %v274_v2 = vrot.slane %v272_v56, 5  ;;  %v288_v8 = vld [vmem:[#allocation2 + $0x2d4] sm:$0xf]  ;;  %v378_v13 = vshll.u32 %v331_v4, 16  ;;  %323 = vst [vmem:[#allocation2 + $0x1e8] sm:$0xf] %v313_v9 }
  0x35   : > { %7415 = vmatmul.mubr.bf16.vlgmr.msra.gmra.mxu0 %v10845_v24  ;;  %v270_v45 = vrot.slane %v269_v39, 4  ;;  %235 = vst [vmem:[#allocation2 + $0x2d0] sm:$0xf] %v234_v55  ;;  %v10876_v14 = vld [vmem:[%s14591_s1 + $0x150] sm:$0xff]   ;;  %v367_v17 = vrot.slane %v365_v5, 5  ;;  %v370_v19 = vrot.slane %v368_v6, 6  ;;  %v316_v20 = vsel %vm11748_vm4, %v314_v10, %v315_v63 }
  0x36   : > { %9901 = vmatpush3.bf16.msra.mxu0 %v10853_v27  ;;  %v279_v16 = vor.u32 %v278_v3, %v274_v2  ;;  %v377_v21 = vrot.slane %v375_v12, 5  ;;  %v380_v22 = vrot.slane %v378_v13, 6  ;;  %v10870_v23 = vld [vmem:[%s14591_s1 + $0x198] sm:$0xff]   ;;  %v325_v25 = vsel %vm11802_vm10, %v316_v20, %v324_v11  ;;  %v10883_v39 = vld [vmem:[%s14591_s1 + $0x108] sm:$0xff]   ;;  %v10888_v50 = vld [vmem:[%s14591_s1 + $0x180] sm:$0xff]  }
  0x37   : > { %9902 = vmatprep.subr.bf16.mxu0 %v10855_v29  ;;  %v10850_v37 = vld [vmem:[#allocation2 + $0xc] ss:$240 sps:$4 sm:$0xff]   ;;  %v275_v15 = vsel %vm11757_vm5, %v270_v45, %v274_v2  ;;  %v371_v26 = vor.u32 %v370_v19, %v367_v17  ;;  %326 = vst [vmem:[#allocation2 + $0x2d8] sm:$0xf] %v325_v25  ;;  %v10879_v29 = vld [vmem:[%s14591_s1 + $0x110] sm:$0xff]  }
  0x38   : > { %7463 = vmatprep.mubr.bf16.mxu1 %v10850_v37  ;;  %287 = vst [vmem:[#allocation2 + $0x1e4] sm:$0xf] %v275_v15  ;;  %v280_v24 = vrot.slane %v279_v16, 4  ;;  %v390_v27 = vld [vmem:[#allocation2 + $0x2dc] sm:$0xf]  ;;  %v381_v28 = vor.u32 %v380_v22, %v377_v21  ;;  %v10880_v37 = vld [vmem:[%s14591_s1 + $0x190] sm:$0xff]  }
  0x39   : > { %7464 = vmatmul.mubr.bf16.vlgmr.msra.gmra.mxu1 %v10848_v36  ;;  %v372_v32 = vsel %vm11783_vm8, %v363_v51, %v371_v26  ;;  %v10884_v43 = vld [vmem:[%s14591_s1 + $0x188] sm:$0xff]   ;;  %v393_v51 = vld [vmem:[%s11728_s8] sm:$0xc]  ;;  %vm536_vm2 = vsmask.f32 256  ;;  %v10896_v20 = vld [vmem:[%s14591_s1 + $0x2f8] sm:$0xff]  }
  0x3a   : > { %9903 = vmatpush3.bf16.msra.mxu0 %v10857_v31  ;;  %9929 = vmatpush3.bf16.msra.mxu1 %v10854_v33  ;;  %v289_v31 = vsel %vm11802_vm10, %v280_v24, %v288_v8  ;;  %v373_v33 = vrot.slane %v371_v26, 4  ;;  %389 = vst [vmem:[#allocation2 + $0x1ec] sm:$0xf] %v372_v32  ;;  %v11928_v52 = vld [vmem:[%s11728_s8 + $0x8] sm:$0xf]  ;;  %v9066_v56 = vrot.slane %v393_v51, 10 }
  0x3b   : > { %9904 = vmatprep.subr.bf16.mxu0 %v10859_v34  ;;  %9930 = vmatprep.subr.bf16.mxu1 %v10856_v35  ;;  %v10877_v34 = vld [vmem:[%s14591_s1 + $0x1d0] sm:$0xff]   ;;  %290 = vst [vmem:[#allocation2 + $0x2d4] sm:$0xf] %v289_v31  ;;  %v10881_v35 = vld [vmem:[%s14591_s1 + $0x148] sm:$0xff]   ;;  %v411_v58 = vrot.slane %v11928_v52, 6  ;;  %v11426_v17 = vld [vmem:[%s14591_s1 + $0xeb8] sm:$0xff]  }
  0x3c   : > { %v382_v36 = vsel %vm11783_vm8, %v373_v33, %v381_v28  ;;  %v429_v59 = vld [vmem:[%s11728_s8] sm:$0xc]  ;;  %v496_v12 = vld [vmem:[%s11728_s8 + $0x4] sm:$0xf]  ;;  %v497_v16 = vld [vmem:[%s11728_s8 + $0x8] sm:$0xf] }
  0x3d   : > { %v438_v62 = vshrl.u32 %v429_v59, 16  ;;  %v441_v63 = vshll.u32 %v429_v59, 16  ;;  %v495_v6 = vld [vmem:[%s11728_s8] sm:$0x8]  ;;  %v513_v24 = vrot.slane %v497_v16, 7  ;;  %v10897_v59 = vld [vmem:[%s14591_s1 + $0x238] sm:$0xff]  }
  0x3e   : > { %9905 = vmatpush3.bf16.msra.mxu0 %v10861_v38  ;;  %9931 = vmatpush3.bf16.msra.mxu1 %v10858_v41  ;;  %v391_v38 = vsel %vm11802_vm10, %v382_v36, %v390_v27  ;;  %v10882_v41 = vld [vmem:[%s14591_s1 + $0x1c8] sm:$0xff]   ;;  %v9067_v19 = vrot.slane %v495_v6, 11  ;;  %v531_v25 = vld [vmem:[%s11728_s8] sm:$0x8]  ;;  %v532_v26 = vld [vmem:[%s11728_s8 + $0x4] sm:$0xf] }
  0x3f   : > { %9906 = vmatprep.subr.bf16.mxu0 %v10863_v40  ;;  %9932 = vmatprep.subr.bf16.mxu1 %v10860_v42  ;;  %392 = vst [vmem:[#allocation2 + $0x2dc] sm:$0xf] %v391_v38  ;;  %v10885_v42 = vld [vmem:[%s14591_s1 + $0x140] sm:$0xff]   ;;  %v10878_v55 = vld [vmem:[#allocation2 + $0x1e8] ss:$240 sps:$4 sm:$0xff]   ;;  %v440_v8 = vrot.slane %v438_v62, 6 }
  0x40   : > { %v443_v9 = vrot.slane %v441_v63, 7  ;;  %vm537_vm7 = vsmask.f32 4368  ;;  %v540_v31 = vshrl.u32 %v531_v25, 16  ;;  %v545_v32 = vshrl.u32 %v532_v26, 16  ;;  %v8891_v30 = vld [vmem:[%s14593_s3 + $0x78] sm:$0xff] }
  0x41   : > { %vm11977_vm9 = vmor %vm536_vm2, %vm537_vm7  ;;  %v426_v62 = vld [vmem:[#allocation2 + $0x2e0] sm:$0xf] }
  0x42   : > { %9907 = vmatpush3.bf16.msra.mxu0 %v10865_v44  ;;  %9933 = vmatpush3.bf16.msra.mxu1 %v10862_v48  ;;  %v10887_v44 = vld [vmem:[%s14591_s1 + $0x100] sm:$0xff]   ;;  %v444_v21 = vor.u32 %v443_v9, %v440_v8  ;;  %v547_v38 = vrot.slane %v545_v32, 7  ;;  %v515_v8 = vrot.slane %v513_v24, 4  ;;  %v10898_v9 = vld [vmem:[%s14591_s1 + $0x2b8] sm:$0xff]   ;;  %v499_v32 = vld [vmem:[%s11728_s8 + $0x10] sm:$0x7] }
  0x43   : > { %9908 = vmatprep.subr.bf16.mxu0 %v10867_v46  ;;  %9934 = vmatprep.subr.bf16.mxu1 %v10864_v60  ;;  %v10871_v45 = vld [vmem:[#allocation2 + $0x1e4] ss:$240 sps:$4 sm:$0xff]   ;;  %v10873_v46 = vld [vmem:[#allocation2 + $0x1e0] ss:$240 sps:$4 sm:$0xff]  }
  0x44   : > { %7422 = vmatprep.mubr.bf16.mxu0 %v10871_v45  ;;  %v394_v48 = vld [vmem:[%s11728_s8 + $0x4] sm:$0xf]  ;;  %v445_v33 = vrot.slane %v444_v21, 4 }
  0x45   : > { %7423 = vmatmul.mubr.bf16.gmra.mxu0 %v10873_v46  ;;  %v408_v57 = vrot.slane %v394_v48, 6  ;;  %v430_v60 = vld [vmem:[%s11728_s8 + $0x4] sm:$0xf] }
  0x46   : > { %9909 = vmatpush3.bf16.msra.mxu0 %v10869_v61  ;;  %9935 = vmatpush3.bf16.msra.mxu1 %v10866_v1  ;;  %v10874_v53 = vld [vmem:[#allocation2 + $0x1ec] ss:$240 sps:$4 sm:$0xff]   ;;  %v431_v61 = vld [vmem:[%s11728_s8 + $0x8] sm:$0xf]  ;;  %v447_v0 = vshrl.u32 %v430_v60, 16  ;;  %v450_v1 = vshll.u32 %v430_v60, 16 }
  0x47   : > { %9910 = vmatprep.subr.bf16.mxu0 %v10876_v14  ;;  %9936 = vmatprep.subr.bf16.mxu1 %v10868_v7  ;;  %v409_v2 = vsel %vm11903_vm13, %v9066_v56, %v408_v57  ;;  %v410_v3 = vrot.slane %v408_v57, 4  ;;  %v457_v4 = vshrl.u32 %v431_v61, 16  ;;  %v460_v5 = vshll.u32 %v431_v61, 16  ;;  %v10895_v7 = vld [vmem:[%s14591_s1 + $0x278] sm:$0xff]   ;;  %v396_v57 = vld [vmem:[%s11728_s8 + $0xc] sm:$0xf] }
  0x48   : > { %7471 = vmatprep.mubr.bf16.mxu1 %v10874_v53  ;;  %423 = vst [vmem:[#allocation2 + $0x10] sm:$0xf] %v409_v2  ;;  %v449_v10 = vrot.slane %v447_v0, 6  ;;  %v452_v11 = vrot.slane %v450_v1, 7  ;;  %v413_v56 = vrot.slane %v411_v58, 4  ;;  %v414_v61 = vrot.slane %v396_v57, 6 }
  0x49   : > { %7472 = vmatmul.mubr.bf16.gmra.mxu1 %v10878_v55  ;;  %v412_v13 = vsel %vm11903_vm13, %v410_v3, %v411_v58  ;;  %v459_v14 = vrot.slane %v457_v4, 6  ;;  %v462_v15 = vrot.slane %v460_v5, 7  ;;  %v397_v60 = vld [vmem:[%s11728_s8 + $0x10] sm:$0x3]  ;;  %v432_v3 = vld [vmem:[%s11728_s8 + $0xc] sm:$0xf] }
  0x4a   : > { %9911 = vmatpush3.bf16.msra.mxu0 %v10879_v29  ;;  %9937 = vmatpush3.bf16.msra.mxu1 %v10870_v23  ;;  %424 = vst [vmem:[#allocation2 + $0x100] sm:$0xf] %v412_v13  ;;  %v453_v22 = vor.u32 %v452_v11, %v449_v10  ;;  %v510_v23 = vrot.slane %v496_v12, 7  ;;  %v533_v29 = vld [vmem:[%s11728_s8 + $0x8] sm:$0xf]  ;;  %v417_v0 = vrot.slane %v397_v60, 6  ;;  %v415_v52 = vsel %vm11903_vm13, %v413_v56, %v414_v61 }
  0x4b   : > { %9912 = vmatprep.subr.bf16.mxu0 %v10881_v35  ;;  %9938 = vmatprep.subr.bf16.mxu1 %v10877_v34  ;;  %v11963_v28 = vor.u32 %v462_v15, %v459_v14  ;;  %v557_v46 = vshll.u32 %v533_v29, 16  ;;  %v10899_v2 = vld [vmem:[%s14591_s1 + $0x270] sm:$0xff]   ;;  %v416_v58 = vrot.slane %v414_v61, 4  ;;  %425 = vst [vmem:[#allocation2 + $0x1f0] sm:$0xf] %v415_v52  ;;  %v467_v6 = vshrl.u32 %v432_v3, 16 }
  0x4c   : > { %v455_v34 = vrot.slane %v453_v22, 4  ;;  %v511_v35 = vsel %vm11948_vm3, %v9067_v19, %v510_v23  ;;  %v512_v36 = vrot.slane %v510_v23, 4  ;;  %v433_v4 = vld [vmem:[%s11728_s8 + $0x10] sm:$0x3]  ;;  %v10911_v61 = vld [vmem:[%s14591_s1 + $0x2a8] sm:$0xff]  }
  0x4d   : > { %525 = vst [vmem:[#allocation2 + $0x18] sm:$0xf] %v511_v35  ;;  %v465_v5 = vrot.slane %v11963_v28, 4  ;;  %v10901_v10 = vld [vmem:[%s14591_s1 + $0x230] sm:$0xff]   ;;  %v418_v11 = vsel %vm11903_vm13, %v416_v58, %v417_v0  ;;  %v477_v12 = vshrl.u32 %v433_v4, 16  ;;  %v480_v13 = vshll.u32 %v433_v4, 16 }
  0x4e   : > { %9913 = vmatpush3.bf16.msra.mxu0 %v10883_v39  ;;  %9939 = vmatpush3.bf16.msra.mxu1 %v10880_v37  ;;  %v9068_v37 = vrot.slane %v540_v31, 11  ;;  %v548_v39 = vshll.u32 %v532_v26, 16  ;;  %v10900_v15 = vld [vmem:[%s14591_s1 + $0x2f0] sm:$0xff]   ;;  %v427_v16 = vsel %vm11802_vm10, %v418_v11, %v426_v62  ;;  %v469_v19 = vrot.slane %v467_v6, 6  ;;  %v10906_v26 = vld [vmem:[%s14591_s1 + $0x268] sm:$0xff]   ;;  %v10916_v6 = vld [vmem:[%s14591_s1 + $0x2a0] sm:$0xff]  }
  0x4f   : > { %9914 = vmatprep.subr.bf16.mxu0 %v10885_v42  ;;  %9940 = vmatprep.subr.bf16.mxu1 %v10882_v41  ;;  %v554_v41 = vshrl.u32 %v533_v29, 16  ;;  %v454_v42 = vsel %vm11959_vm6, %v445_v33, %v453_v22  ;;  %428 = vst [vmem:[#allocation2 + $0x2e0] sm:$0xf] %v427_v16  ;;  %v479_v23 = vrot.slane %v477_v12, 6  ;;  %v482_v25 = vrot.slane %v480_v13, 7  ;;  %v10902_v29 = vld [vmem:[%s14591_s1 + $0x2b0] sm:$0xff]  }
  0x50   : > { %489 = vst [vmem:[#allocation2 + $0x14] sm:$0xf] %v454_v42  ;;  %v492_v31 = vld [vmem:[#allocation2 + $0x2e4] sm:$0xf]  ;;  %v535_v42 = vld [vmem:[%s11728_s8 + $0x10] sm:$0x7] }
  0x51   : > { %v11981_v51 = vrot.slane %v554_v41, 7  ;;  %v10889_v63 = vld [vmem:[#allocation2 + $0x10] ss:$240 sps:$4 sm:$0xff]   ;;  %v534_v41 = vld [vmem:[%s11728_s8 + $0xc] sm:$0xf]  ;;  %v575_v56 = vshll.u32 %v535_v42, 16 }
  0x52   : > { %9915 = vmatpush3.bf16.msra.mxu0 %v10887_v44  ;;  %9941 = vmatpush3.bf16.msra.mxu1 %v10884_v43  ;;  %v464_v43 = vsel %vm11959_vm6, %v455_v34, %v11963_v28  ;;  %v514_v44 = vsel %vm11948_vm3, %v512_v36, %v513_v24  ;;  %v498_v28 = vld [vmem:[%s11728_s8 + $0xc] sm:$0xf]  ;;  %v10920_v12 = vld [vmem:[%s14591_s1 + $0x298] sm:$0xff]   ;;  %v10921_v13 = vld [vmem:[%s14591_s1 + $0x250] sm:$0xff]  }
  0x53   : > { %9942 = vmatprep.subr.bf16.mxu1 %v10886_v47  ;;  %9956 = vmatprep.subr.bf16.mxu0 %v10895_v7  ;;  %490 = vst [vmem:[#allocation2 + $0x104] sm:$0xf] %v464_v43  ;;  %526 = vst [vmem:[#allocation2 + $0x108] sm:$0xf] %v514_v44  ;;  %v550_v47 = vor.u32 %v548_v39, %v547_v38  ;;  %v559_v53 = vor.u32 %v557_v46, %v11981_v51  ;;  %v470_v7 = vshll.u32 %v432_v3, 16  ;;  %v10910_v34 = vld [vmem:[%s14591_s1 + $0x228] sm:$0xff]  }
  0x54   : > { %v561_v14 = vrot.slane %v11981_v51, 4  ;;  %v516_v33 = vrot.slane %v498_v28, 7  ;;  %v519_v39 = vrot.slane %v499_v32, 7  ;;  %v528_v46 = vld [vmem:[#allocation2 + $0x2e8] sm:$0xf]  ;;  %v10917_v3 = vld [vmem:[%s14591_s1 + $0x258] sm:$0xff]  }
  0x55   : > { %v551_v48 = vsel %vm11977_vm9, %v9068_v37, %v550_v47  ;;  %v483_v37 = vor.u32 %v482_v25, %v479_v23  ;;  %v563_v47 = vshrl.u32 %v534_v41, 16  ;;  %v586_v0 = vld [vmem:[#allocation2 + $0x2ec] sm:$0xf]  ;;  %v10918_v51 = vld [vmem:[%s14591_s1 + $0x2d8] sm:$0xff]   ;;  %v10924_v16 = vld [vmem:[%s14591_s1 + $0x290] sm:$0xff]  }
  0x56   : > { %9943 = vmatpush3.bf16.msra.mxu1 %v10888_v50  ;;  %v552_v50 = vrot.slane %v547_v38, 4  ;;  %583 = vst [vmem:[#allocation2 + $0x1c] sm:$0xf] %v551_v48  ;;  %v10907_v38 = vld [vmem:[%s14591_s1 + $0x2e8] sm:$0xff]   ;;  %v517_v43 = vsel %vm11948_vm3, %v515_v8, %v516_v33  ;;  %v518_v44 = vrot.slane %v516_v33, 4  ;;  %v10913_v48 = vld [vmem:[%s14591_s1 + $0x260] sm:$0xff]  }
  0x57   : > { %9984 = vmatprep.subr.bf16.mxu1 %v10896_v20  ;;  %v472_v20 = vrot.slane %v470_v7, 7  ;;  %527 = vst [vmem:[#allocation2 + $0x1f8] sm:$0xf] %v517_v43  ;;  %v565_v60 = vrot.slane %v563_v47, 7  ;;  %v10905_v11 = vld [vmem:[#allocation2 + $0x1f0] ss:$240 sps:$4 sm:$0xff]  }
  0x58   : > { %v560_v55 = vsel %vm11977_vm9, %v552_v50, %v559_v53  ;;  %v566_v50 = vshll.u32 %v534_v41, 16  ;;  %v10927_v23 = vld [vmem:[%s14591_s1 + $0x208] sm:$0xff]   ;;  %v10929_v25 = vld [vmem:[%s14591_s1 + $0x240] sm:$0xff]  }
  0x59   : > { %584 = vst [vmem:[#allocation2 + $0x10c] sm:$0xf] %v560_v55  ;;  %v473_v24 = vor.u32 %v472_v20, %v469_v19  ;;  %v572_v55 = vshrl.u32 %v535_v42, 16  ;;  %v570_v58 = vrot.slane %v565_v60, 4  ;;  %v10931_v28 = vld [vmem:[%s14591_s1 + $0x200] sm:$0xff]  }
  0x5a   : > { %v10891_v1 = vld [vmem:[#allocation2 + $0x14] ss:$240 sps:$4 sm:$0xff]   ;;  %v10892_v21 = vld [vmem:[#allocation2 + $0x18] ss:$240 sps:$4 sm:$0xff]   ;;  %v568_v52 = vor.u32 %v566_v50, %v565_v60 }
  0x5b   : > { %7512 = vmatprep.mubr.bf16.mxu0 %v10891_v1  ;;  %v474_v35 = vsel %vm11959_vm6, %v465_v5, %v473_v24  ;;  %v475_v36 = vrot.slane %v473_v24, 4  ;;  %v10914_v1 = vld [vmem:[%s14591_s1 + $0x2e0] sm:$0xff]   ;;  %v10928_v24 = vld [vmem:[%s14591_s1 + $0x288] sm:$0xff]  }
  0x5c   : > { %7513 = vmatmul.mubr.bf16.vlgmr.msra.gmra.mxu0 %v10889_v63  ;;  %491 = vst [vmem:[#allocation2 + $0x1f4] sm:$0xf] %v474_v35  ;;  %v574_v63 = vrot.slane %v572_v55, 7  ;;  %v569_v5 = vsel %vm11977_vm9, %v561_v14, %v568_v52  ;;  %v10922_v14 = vld [vmem:[%s14591_s1 + $0x2d0] sm:$0xff]   ;;  %v590_v32 = vld [vmem:[%s11728_s8 + $0x8] sm:$0xf] }
  0x5d   : > { %9957 = vmatpush3.bf16.msra.mxu0 %v10897_v59  ;;  %v484_v53 = vsel %vm11959_vm6, %v475_v36, %v483_v37  ;;  %v520_v59 = vsel %vm11948_vm3, %v518_v44, %v519_v39  ;;  %585 = vst [vmem:[#allocation2 + $0x1fc] sm:$0xf] %v569_v5  ;;  %v599_v33 = vld [vmem:[%s11728_s8 + $0x4] sm:$0xf]  ;;  %594 = vst [vmem:[#allocation2 + $0x110] sm:$0xf] %v590_v32 }
  0x5e   : > { %9958 = vmatprep.subr.bf16.mxu0 %v10899_v2  ;;  %v493_v57 = vsel %vm11802_vm10, %v484_v53, %v492_v31  ;;  %v529_v62 = vsel %vm11802_vm10, %v520_v59, %v528_v46  ;;  %v10915_v2 = vld [vmem:[%s14591_s1 + $0x220] sm:$0xff]   ;;  %v577_v4 = vor.u32 %v575_v56, %v574_v63  ;;  %v601_v35 = vld [vmem:[%s11728_s8 + $0xc] sm:$0xf]  ;;  %v604_v36 = vshrl.u32 %v599_v33, 16  ;;  %v653_v44 = vld [vmem:[%s11728_s8 + $0x8] sm:$0xf] }
  0x5f   : > { %494 = vst [vmem:[#allocation2 + $0x2e4] sm:$0xf] %v493_v57  ;;  %530 = vst [vmem:[#allocation2 + $0x2e8] sm:$0xf] %v529_v62  ;;  %v589_v31 = vld [vmem:[%s11728_s8 + $0x4] sm:$0xf] }
  0x60   : > { %v10894_v22 = vld [vmem:[#allocation2 + $0x1c] ss:$240 sps:$4 sm:$0xff]   ;;  %v578_v7 = vsel %vm11977_vm9, %v570_v58, %v577_v4  ;;  %593 = vst [vmem:[#allocation2 + $0x20] sm:$0xf] %v589_v31  ;;  %v607_v37 = vshll.u32 %v599_v33, 16  ;;  %v623_v41 = vshll.u32 %v601_v35, 16 }
  0x61   : > { %7561 = vmatprep.mubr.bf16.mxu1 %v10894_v22  ;;  %9959 = vmatpush3.bf16.msra.mxu0 %v10901_v10  ;;  %v587_v8 = vsel %vm11802_vm10, %v578_v7, %v586_v0  ;;  %v10926_v22 = vld [vmem:[%s14591_s1 + $0x2c8] sm:$0xff]   ;;  %v627_v42 = vshrl.u32 %v601_v35, 16  ;;  %v652_v43 = vld [vmem:[%s11728_s8 + $0x4] sm:$0xe]  ;;  %v606_v46 = vrot.slane %v604_v36, 4  ;;  %v664_v57 = vrot.slane %v653_v44, 5 }
  0x62   : > { %7562 = vmatmul.mubr.bf16.vlgmr.msra.gmra.mxu1 %v10892_v21  ;;  %9960 = vmatprep.subr.bf16.mxu0 %v10906_v26  ;;  %588 = vst [vmem:[#allocation2 + $0x2ec] sm:$0xf] %v587_v8  ;;  %v10925_v21 = vld [vmem:[%s14591_s1 + $0x248] sm:$0xff]   ;;  %v10930_v26 = vld [vmem:[%s14591_s1 + $0x2c0] sm:$0xff]   ;;  %v609_v47 = vrot.slane %v607_v37, 5  ;;  %v625_v55 = vrot.slane %v623_v41, 5 }
  0x63   : > { %9985 = vmatpush3.bf16.msra.mxu1 %v10898_v9  ;;  %v10919_v9 = vld [vmem:[%s14591_s1 + $0x218] sm:$0xff]   ;;  %v12124_v53 = vld [vmem:[%s11728_s8 + $0xc] sm:$0xf]  ;;  %v9069_v56 = vrot.slane %v652_v43, 9  ;;  %v685_v60 = vld [vmem:[%s11728_s8 + $0x4] sm:$0xe] }
  0x64   : > { %9986 = vmatprep.subr.bf16.mxu1 %v10900_v15  ;;  %v10923_v15 = vld [vmem:[%s14591_s1 + $0x210] sm:$0xff]   ;;  %v667_v59 = vrot.slane %v12124_v53, 5  ;;  %v686_v63 = vld [vmem:[%s11728_s8 + $0x8] sm:$0xf]  ;;  %v687_v0 = vld [vmem:[%s11728_s8 + $0xc] sm:$0xf] }
  0x65   : > { %9961 = vmatpush3.bf16.msra.mxu0 %v10910_v34  ;;  %v600_v34 = vld [vmem:[%s11728_s8 + $0x8] sm:$0xf]  ;;  %v665_v52 = vsel %vm11748_vm4, %v9069_v56, %v664_v57  ;;  %v666_v58 = vrot.slane %v664_v57, 4  ;;  %v703_v4 = vshll.u32 %v686_v63, 16  ;;  %v10939_v5 = vld [vmem:[%s14591_s1 + $0x378] sm:$0xff]   ;;  %v10943_v44 = vld [vmem:[%s14591_s1 + $0x370] sm:$0xff]  }
  0x66   : > { %9962 = vmatprep.subr.bf16.mxu0 %v10913_v48  ;;  %v10903_v10 = vld [vmem:[#allocation2 + $0x1f4] ss:$240 sps:$4 sm:$0xff]   ;;  %v10912_v20 = vld [vmem:[#allocation2 + $0x1f8] ss:$240 sps:$4 sm:$0xff]   ;;  %v617_v39 = vshrl.u32 %v600_v34, 16 }
  0x67   : > { %9987 = vmatpush3.bf16.msra.mxu1 %v10902_v29  ;;  %7520 = vmatprep.mubr.bf16.mxu0 %v10903_v10  ;;  %v10932_v29 = vld [vmem:[%s14591_s1 + $0x280] sm:$0xff]   ;;  %679 = vst [vmem:[#allocation2 + $0x28] sm:$0xf] %v665_v52  ;;  %v591_v31 = vld [vmem:[%s11728_s8 + $0xc] sm:$0xf]  ;;  %v10942_v53 = vld [vmem:[%s14591_s1 + $0x3b8] sm:$0xff]  }
  0x68   : > { %9988 = vmatprep.subr.bf16.mxu1 %v10907_v38  ;;  %7521 = vmatmul.mubr.bf16.gmra.mxu0 %v10905_v11  ;;  %v613_v38 = vshll.u32 %v600_v34, 16  ;;  %v619_v48 = vrot.slane %v617_v39, 4  ;;  %v705_v11 = vrot.slane %v703_v4, 6  ;;  %v592_v33 = vld [vmem:[%s11728_s8 + $0x10] sm:$0xf]  ;;  %v10950_v57 = vld [vmem:[%s14591_s1 + $0x368] sm:$0xff]  }
  0x69   : > { %9963 = vmatpush3.bf16.msra.mxu0 %v10915_v2  ;;  %v10908_v19 = vld [vmem:[#allocation2 + $0x1fc] ss:$240 sps:$4 sm:$0xff]   ;;  %v694_v2 = vshll.u32 %v685_v60, 16  ;;  %595 = vst [vmem:[#allocation2 + $0x200] sm:$0xf] %v591_v31 }
  0x6a   : > { %9964 = vmatprep.subr.bf16.mxu0 %v10917_v3  ;;  %7569 = vmatprep.mubr.bf16.mxu1 %v10908_v19  ;;  %v615_v50 = vrot.slane %v613_v38, 5  ;;  %v700_v3 = vshrl.u32 %v686_v63, 16  ;;  %v713_v19 = vshll.u32 %v687_v0, 16  ;;  %v596_v34 = vld [vmem:[#allocation2 + $0x2f0] sm:$0xf] }
  0x6b   : > { %9989 = vmatpush3.bf16.msra.mxu1 %v10911_v61  ;;  %v610_v61 = vor.u32 %v609_v47, %v606_v46  ;;  %v602_v35 = vld [vmem:[%s11728_s8 + $0x10] sm:$0xf]  ;;  %v597_v37 = vsel %vm11802_vm10, %v592_v33, %v596_v34  ;;  %v649_v56 = vld [vmem:[#allocation2 + $0x2f4] sm:$0xf]  ;;  %v10958_v33 = vld [vmem:[%s14591_s1 + $0x3e0] sm:$0xff]  }
  0x6c   : > { %9990 = vmatprep.subr.bf16.mxu1 %v10914_v1  ;;  %7570 = vmatmul.mubr.bf16.gmra.mxu1 %v10912_v20  ;;  %v620_v62 = vor.u32 %v619_v48, %v615_v50  ;;  %v691_v1 = vshrl.u32 %v685_v60, 16  ;;  %v702_v10 = vrot.slane %v700_v3, 5  ;;  %v10933_v36 = vld [vmem:[#allocation2 + $0x20] ss:$240 sps:$4 sm:$0xff]   ;;  %v633_v39 = vshll.u32 %v602_v35, 16 }
  0x6d   : > { %9965 = vmatpush3.bf16.msra.mxu0 %v10919_v9  ;;  %v668_v9 = vsel %vm11748_vm4, %v666_v58, %v667_v59  ;;  %598 = vst [vmem:[#allocation2 + $0x2f0] sm:$0xf] %v597_v37  ;;  %v637_v43 = vshrl.u32 %v602_v35, 16  ;;  %v10945_v47 = vld [vmem:[%s14591_s1 + $0x330] sm:$0xff]   ;;  %v669_v48 = vrot.slane %v667_v59, 4  ;;  %v10961_v35 = vld [vmem:[%s14591_s1 + $0x358] sm:$0xff]  }
  0x6e   : > { %9966 = vmatprep.subr.bf16.mxu0 %v10921_v13  ;;  %v621_v7 = vrot.slane %v620_v62, 4  ;;  %v693_v8 = vrot.slane %v691_v1, 5  ;;  %v10940_v13 = vld [vmem:[%s14591_s1 + $0x3f8] sm:$0xff]   ;;  %680 = vst [vmem:[#allocation2 + $0x118] sm:$0xf] %v668_v9  ;;  %v706_v20 = vor.u32 %v705_v11, %v702_v10  ;;  %v635_v46 = vrot.slane %v633_v39, 5 }
  0x6f   : > { %9991 = vmatpush3.bf16.msra.mxu1 %v10916_v6  ;;  %v611_v6 = vrot.slane %v610_v61, 4  ;;  %v655_v60 = vld [vmem:[%s11728_s8 + $0x10] sm:$0xf]  ;;  %v656_v61 = vld [vmem:[%s11728_s8 + $0x14] sm:$0x1]  ;;  %v10960_v37 = vld [vmem:[%s14591_s1 + $0x3a0] sm:$0xff]  }
  0x70   : > { %9992 = vmatprep.subr.bf16.mxu1 %v10918_v51  ;;  %v696_v51 = vrot.slane %v694_v2, 6  ;;  %v670_v59 = vrot.slane %v655_v60, 5  ;;  %v673_v63 = vrot.slane %v656_v61, 5  ;;  %v688_v1 = vld [vmem:[%s11728_s8 + $0x10] sm:$0xf]  ;;  %v10972_v60 = vld [vmem:[%s14591_s1 + $0x388] sm:$0xff]  }
  0x71   : > { %9967 = vmatpush3.bf16.msra.mxu0 %v10923_v15  ;;  %v626_v15 = vsel %vm11757_vm5, %v621_v7, %v625_v55  ;;  %v720_v58 = vshrl.u32 %v688_v1, 16  ;;  %v10944_v3 = vld [vmem:[%s14591_s1 + $0x3f0] sm:$0xff]   ;;  %v10973_v61 = vld [vmem:[%s14591_s1 + $0x340] sm:$0xff]  }
  0x72   : > { %9968 = vmatprep.subr.bf16.mxu0 %v10925_v21  ;;  %647 = vst [vmem:[#allocation2 + $0x114] sm:$0xf] %v626_v15  ;;  %v689_v7 = vld [vmem:[%s11728_s8 + $0x14] sm:$0x1]  ;;  %v10951_v15 = vld [vmem:[%s14591_s1 + $0x3e8] sm:$0xff]  }
  0x73   : > { %9993 = vmatpush3.bf16.msra.mxu1 %v10920_v12  ;;  %v710_v12 = vshrl.u32 %v687_v0, 16  ;;  %v682_v0 = vld [vmem:[#allocation2 + $0x2f8] sm:$0xf]  ;;  %v722_v10 = vrot.slane %v720_v58, 5  ;;  %v730_v11 = vshrl.u32 %v689_v7, 16 }
  0x74   : > { %9994 = vmatprep.subr.bf16.mxu1 %v10922_v14  ;;  %v616_v14 = vsel %vm11757_vm5, %v611_v6, %v615_v50  ;;  %v639_v50 = vrot.slane %v637_v43, 4  ;;  %v672_v6 = vrot.slane %v670_v59, 4  ;;  %v10949_v39 = vld [vmem:[#allocation2 + $0x200] ss:$240 sps:$4 sm:$0xff]  }
  0x75   : > { %9969 = vmatpush3.bf16.msra.mxu0 %v10927_v23  ;;  %646 = vst [vmem:[#allocation2 + $0x24] sm:$0xf] %v616_v14  ;;  %v712_v21 = vrot.slane %v710_v12, 5  ;;  %v715_v23 = vrot.slane %v713_v19, 6  ;;  %v10936_v2 = vld [vmem:[#allocation2 + $0x28] ss:$240 sps:$4 sm:$0xff]  }
  0x76   : > { %9970 = vmatprep.subr.bf16.mxu0 %v10929_v25  ;;  %v640_v62 = vor.u32 %v639_v50, %v635_v46  ;;  %v733_v12 = vshll.u32 %v689_v7, 16  ;;  %v10965_v43 = vld [vmem:[%s14591_s1 + $0x350] sm:$0xff]   ;;  %v783_v7 = vld [vmem:[%s11728_s8 + $0xc] sm:$0xf] }
  0x77   : > { %9995 = vmatpush3.bf16.msra.mxu1 %v10924_v16  ;;  %v697_v16 = vor.u32 %v696_v51, %v693_v8  ;;  %v723_v8 = vshll.u32 %v688_v1, 16  ;;  %v10946_v51 = vld [vmem:[%s14591_s1 + $0x3b0] sm:$0xff]   ;;  %v749_v1 = vld [vmem:[%s11728_s8 + $0x8] sm:$0xf] }
  0x78   : > { %9996 = vmatprep.subr.bf16.mxu1 %v10926_v22  ;;  %v641_v4 = vrot.slane %v640_v62, 4  ;;  %v10974_v62 = vld [vmem:[%s14591_s1 + $0x3c0] sm:$0xff]   ;;  %v760_v58 = vrot.slane %v749_v1, 6 }
  0x79   : > { %9971 = vmatpush3.bf16.msra.mxu0 %v10931_v28  ;;  %v698_v22 = vrot.slane %v697_v16, 4  ;;  %v629_v28 = vrot.slane %v627_v42, 4  ;;  %v10941_v42 = vld [vmem:[%s14591_s1 + $0x338] sm:$0xff]   ;;  %v674_v16 = vsel %vm11748_vm4, %v672_v6, %v673_v63  ;;  %v725_v19 = vrot.slane %v723_v8, 6  ;;  %v10976_v63 = vld [vmem:[%s14591_s1 + $0x380] sm:$0xff]  }
  0x7a   : > { %10012 = vmatprep.subr.bf16.mxu0 %v10939_v5  ;;  %v671_v5 = vsel %vm11748_vm4, %v669_v48, %v670_v59  ;;  %v650_v14 = vsel %vm11802_vm10, %v641_v4, %v649_v56  ;;  %v10970_v56 = vld [vmem:[%s14591_s1 + $0x3c8] sm:$0xff]   ;;  %v10975_v59 = vld [vmem:[%s14591_s1 + $0x300] sm:$0xff]  }
  0x7b   : > { %9997 = vmatpush3.bf16.msra.mxu1 %v10928_v24  ;;  %v708_v24 = vrot.slane %v706_v20, 4  ;;  %v707_v25 = vsel %vm11783_vm8, %v698_v22, %v706_v20  ;;  %v630_v32 = vor.u32 %v629_v28, %v625_v55  ;;  %681 = vst [vmem:[#allocation2 + $0x208] sm:$0xf] %v671_v5  ;;  %v10957_v20 = vld [vmem:[%s14591_s1 + $0x360] sm:$0xff]   ;;  %651 = vst [vmem:[#allocation2 + $0x2f4] sm:$0xf] %v650_v14 }
  0x7c   : > { %9998 = vmatprep.subr.bf16.mxu1 %v10930_v26  ;;  %v12146_v26 = vor.u32 %v715_v23, %v712_v21  ;;  %742 = vst [vmem:[#allocation2 + $0x2c] sm:$0xf] %v707_v25  ;;  %v10935_v41 = vld [vmem:[#allocation2 + $0x24] ss:$240 sps:$4 sm:$0xff]   ;;  %v683_v21 = vsel %vm11802_vm10, %v674_v16, %v682_v0  ;;  %v732_v22 = vrot.slane %v730_v11, 5  ;;  %v735_v23 = vrot.slane %v733_v12, 6 }
  0x7d   : > { %v631_v38 = vrot.slane %v630_v32, 4  ;;  %7610 = vmatprep.mubr.bf16.mxu0 %v10935_v41  ;;  %684 = vst [vmem:[#allocation2 + $0x2f8] sm:$0xf] %v683_v21  ;;  %v745_v25 = vld [vmem:[#allocation2 + $0x2fc] sm:$0xf]  ;;  %v10955_v28 = vld [vmem:[%s14591_s1 + $0x3a8] sm:$0xff]  }
  0x7e   : > { %7611 = vmatmul.mubr.bf16.vlgmr.msra.gmra.mxu0 %v10933_v36  ;;  %v718_v9 = vrot.slane %v12146_v26, 4  ;;  %v10959_v32 = vld [vmem:[%s14591_s1 + $0x320] sm:$0xff]   ;;  %v10963_v41 = vld [vmem:[%s14591_s1 + $0x318] sm:$0xff]   ;;  %v782_v6 = vld [vmem:[%s11728_s8 + $0x8] sm:$0xf] }
  0x7f   : > { %9999 = vmatpush3.bf16.msra.mxu1 %v10932_v29  ;;  %v717_v29 = vsel %vm11783_vm8, %v708_v24, %v12146_v26  ;;  %v636_v55 = vsel %vm11757_vm5, %v631_v38, %v635_v46  ;;  %10013 = vmatpush3.bf16.msra.mxu0 %v10941_v42  ;;  %v726_v24 = vor.u32 %v725_v19, %v722_v10  ;;  %v10962_v42 = vld [vmem:[%s14591_s1 + $0x3d8] sm:$0xff]   ;;  %v10967_v46 = vld [vmem:[%s14591_s1 + $0x310] sm:$0xff]   ;;  %v748_v0 = vld [vmem:[%s11728_s8 + $0x4] sm:$0xc]  ;;  %v762_v10 = vrot.slane %v760_v58, 4 }
  0x80   : > { %10040 = vmatprep.subr.bf16.mxu1 %v10940_v13  ;;  %743 = vst [vmem:[#allocation2 + $0x11c] sm:$0xf] %v717_v29  ;;  %648 = vst [vmem:[#allocation2 + $0x204] sm:$0xf] %v636_v55  ;;  %10014 = vmatprep.subr.bf16.mxu0 %v10943_v44  ;;  %v10954_v13 = vld [vmem:[%s14591_s1 + $0x328] sm:$0xff]   ;;  %v736_v26 = vor.u32 %v735_v23, %v732_v22  ;;  %v10964_v44 = vld [vmem:[%s14591_s1 + $0x398] sm:$0xff]  }
  0x81   : > { %v727_v29 = vsel %vm11783_vm8, %v718_v9, %v726_v24  ;;  %v728_v31 = vrot.slane %v726_v24, 4  ;;  %v10969_v55 = vld [vmem:[%s14591_s1 + $0x348] sm:$0xff]   ;;  %v781_v4 = vld [vmem:[%s11728_s8 + $0x4] sm:$0xc]  ;;  %v10983_v5 = vld [vmem:[%s14591_s1 + $0x478] sm:$0xff]   ;;  %v796_v11 = vshrl.u32 %v782_v6, 16 }
  0x82   : > { %744 = vst [vmem:[#allocation2 + $0x20c] sm:$0xf] %v727_v29  ;;  %v787_v8 = vshrl.u32 %v781_v4, 16  ;;  %v799_v12 = vshll.u32 %v782_v6, 16  ;;  %v10984_v14 = vld [vmem:[%s14591_s1 + $0x4f8] sm:$0xff]   ;;  %v806_v19 = vshrl.u32 %v783_v7, 16 }
  0x83   : > { %10015 = vmatpush3.bf16.msra.mxu0 %v10945_v47  ;;  %v737_v34 = vsel %vm11783_vm8, %v728_v31, %v736_v26  ;;  %v10966_v47 = vld [vmem:[%s14591_s1 + $0x3d0] sm:$0xff]   ;;  %v845_v21 = vld [vmem:[%s11728_s8 + $0x8] sm:$0xf]  ;;  %v798_v23 = vrot.slane %v796_v11, 6 }
  0x84   : > { %10016 = vmatprep.subr.bf16.mxu0 %v10950_v57  ;;  %v746_v36 = vsel %vm11802_vm10, %v737_v34, %v745_v25  ;;  %v10956_v48 = vld [vmem:[#allocation2 + $0x208] ss:$240 sps:$4 sm:$0xff]   ;;  %v801_v24 = vrot.slane %v799_v12, 7  ;;  %v12291_v25 = vld [vmem:[%s11728_s8 + $0xc] sm:$0xf]  ;;  %v808_v29 = vrot.slane %v806_v19, 6 }
  0x85   : > { %747 = vst [vmem:[#allocation2 + $0x2fc] sm:$0xf] %v746_v36  ;;  %v10971_v57 = vld [vmem:[%s14591_s1 + $0x308] sm:$0xff]  }
  0x86   : > { %v802_v34 = vor.u32 %v801_v24, %v798_v23  ;;  %v878_v36 = vld [vmem:[%s11728_s8 + $0x8] sm:$0xf]  ;;  %v10986_v24 = vld [vmem:[%s14591_s1 + $0x4b8] sm:$0xff]  }
  0x87   : > { %v10938_v52 = vld [vmem:[#allocation2 + $0x2c] ss:$240 sps:$4 sm:$0xff]   ;;  %10017 = vmatpush3.bf16.msra.mxu0 %v10954_v13  ;;  %v10947_v38 = vld [vmem:[#allocation2 + $0x204] ss:$240 sps:$4 sm:$0xff]  }
  0x88   : > { %7659 = vmatprep.mubr.bf16.mxu1 %v10938_v52  ;;  %10018 = vmatprep.subr.bf16.mxu0 %v10957_v20  ;;  %v9070_v52 = vrot.slane %v748_v0, 10  ;;  %v844_v13 = vld [vmem:[%s11728_s8 + $0x4] sm:$0x8]  ;;  %v809_v20 = vshll.u32 %v783_v7, 16  ;;  %v778_v7 = vld [vmem:[#allocation2 + $0x300] sm:$0xf] }
  0x89   : > { %7660 = vmatmul.mubr.bf16.vlgmr.msra.gmra.mxu1 %v10936_v2  ;;  %7618 = vmatprep.mubr.bf16.mxu0 %v10947_v38  ;;  %v12270_v2 = vld [vmem:[%s11728_s8 + $0xc] sm:$0xf]  ;;  %v9071_v26 = vrot.slane %v844_v13, 11 }
  0x8a   : > { %10041 = vmatpush3.bf16.msra.mxu1 %v10942_v53  ;;  %7619 = vmatmul.mubr.bf16.gmra.mxu0 %v10949_v39  ;;  %v10968_v53 = vld [vmem:[%s14591_s1 + $0x390] sm:$0xff]   ;;  %v761_v9 = vsel %vm11903_vm13, %v9070_v52, %v760_v58  ;;  %v811_v31 = vrot.slane %v809_v20, 7 }
  0x8b   : > { %10042 = vmatprep.subr.bf16.mxu1 %v10944_v3  ;;  %10019 = vmatpush3.bf16.msra.mxu0 %v10959_v32  ;;  %v763_v3 = vrot.slane %v12270_v2, 6  ;;  %775 = vst [vmem:[#allocation2 + $0x30] sm:$0xf] %v761_v9  ;;  %v856_v32 = vrot.slane %v845_v21, 7  ;;  %v751_v58 = vld [vmem:[%s11728_s8 + $0x10] sm:$0xf] }
  0x8c   : > { %10020 = vmatprep.subr.bf16.mxu0 %v10961_v35  ;;  %v10952_v50 = vld [vmem:[#allocation2 + $0x20c] ss:$240 sps:$4 sm:$0xff]   ;;  %v859_v35 = vrot.slane %v12291_v25, 7  ;;  %v10990_v25 = vld [vmem:[%s14591_s1 + $0x4b0] sm:$0xff]  }
  0x8d   : > { %7667 = vmatprep.mubr.bf16.mxu1 %v10952_v50  ;;  %v764_v22 = vsel %vm11903_vm13, %v762_v10, %v763_v3  ;;  %v765_v1 = vrot.slane %v763_v3, 4  ;;  %v10985_v9 = vld [vmem:[%s14591_s1 + $0x438] sm:$0xff]  }
  0x8e   : > { %10043 = vmatpush3.bf16.msra.mxu1 %v10946_v51  ;;  %v790_v51 = vshll.u32 %v781_v4, 16  ;;  %776 = vst [vmem:[#allocation2 + $0x120] sm:$0xf] %v764_v22  ;;  %v752_v4 = vld [vmem:[%s11728_s8 + $0x14] sm:$0x3] }
  0x8f   : > { %10044 = vmatprep.subr.bf16.mxu1 %v10951_v15  ;;  %10021 = vmatpush3.bf16.msra.mxu0 %v10963_v41  ;;  %v789_v15 = vrot.slane %v787_v8, 6  ;;  %v12297_v41 = vor.u32 %v811_v31, %v808_v29  ;;  %v769_v6 = vrot.slane %v752_v4, 6  ;;  %v784_v8 = vld [vmem:[%s11728_s8 + $0x10] sm:$0xf]  ;;  %v10995_v4 = vld [vmem:[%s14591_s1 + $0x4e8] sm:$0xff]  }
  0x90   : > { %10022 = vmatprep.subr.bf16.mxu0 %v10965_v43  ;;  %v792_v16 = vrot.slane %v790_v51, 7  ;;  %v858_v43 = vrot.slane %v856_v32, 4  ;;  %v785_v51 = vld [vmem:[%s11728_s8 + $0x14] sm:$0x3]  ;;  %v816_v2 = vshrl.u32 %v784_v8, 16  ;;  %v819_v3 = vshll.u32 %v784_v8, 16 }
  0x91   : > { %7668 = vmatmul.mubr.bf16.gmra.mxu1 %v10956_v48  ;;  %v814_v10 = vrot.slane %v12297_v41, 4  ;;  %v826_v11 = vshrl.u32 %v785_v51, 16  ;;  %v829_v22 = vshll.u32 %v785_v51, 16  ;;  %v11001_v51 = vld [vmem:[%s14591_s1 + $0x460] sm:$0xff]  }
  0x92   : > { %10045 = vmatpush3.bf16.msra.mxu1 %v10955_v28  ;;  %v793_v28 = vor.u32 %v792_v16, %v789_v15  ;;  %v860_v48 = vsel %vm11948_vm3, %v858_v43, %v859_v35  ;;  %v10987_v16 = vld [vmem:[%s14591_s1 + $0x470] sm:$0xff]   ;;  %v818_v19 = vrot.slane %v816_v2, 6  ;;  %v821_v20 = vrot.slane %v819_v3, 7  ;;  %v11003_v3 = vld [vmem:[%s14591_s1 + $0x420] sm:$0xff]  }
  0x93   : > { %10046 = vmatprep.subr.bf16.mxu1 %v10958_v33  ;;  %10023 = vmatpush3.bf16.msra.mxu0 %v10967_v46  ;;  %v877_v33 = vld [vmem:[%s11728_s8 + $0x4] sm:$0x8]  ;;  %v888_v46 = vshrl.u32 %v878_v36, 16  ;;  %872 = vst [vmem:[#allocation2 + $0x128] sm:$0xf] %v860_v48  ;;  %v828_v21 = vrot.slane %v826_v11, 6 }
  0x94   : > { %10024 = vmatprep.subr.bf16.mxu0 %v10969_v55  ;;  %v883_v38 = vshrl.u32 %v877_v33, 16  ;;  %v794_v39 = vrot.slane %v793_v28, 4  ;;  %v822_v29 = vor.u32 %v821_v20, %v818_v19  ;;  %v831_v31 = vrot.slane %v829_v22, 7  ;;  %v847_v33 = vld [vmem:[%s11728_s8 + $0x10] sm:$0xf]  ;;  %v11006_v20 = vld [vmem:[%s14591_s1 + $0x4d8] sm:$0xff]  }
  0x95   : > { %v10977_v12 = vld [vmem:[#allocation2 + $0x30] ss:$240 sps:$4 sm:$0xff]   ;;  %v11008_v22 = vld [vmem:[%s14591_s1 + $0x498] sm:$0xff]  }
  0x96   : > { %10047 = vmatpush3.bf16.msra.mxu1 %v10960_v37  ;;  %v879_v37 = vld [vmem:[%s11728_s8 + $0xc] sm:$0xf]  ;;  %v803_v50 = vsel %vm11959_vm6, %v794_v39, %v802_v34  ;;  %v862_v39 = vrot.slane %v847_v33, 7  ;;  %v823_v43 = vsel %vm11959_vm6, %v814_v10, %v822_v29 }
  0x97   : > { %10048 = vmatprep.subr.bf16.mxu1 %v10962_v42  ;;  %10025 = vmatpush3.bf16.msra.mxu0 %v10971_v57  ;;  %v857_v42 = vsel %vm11948_vm3, %v9071_v26, %v856_v32  ;;  %v900_v55 = vshll.u32 %v879_v37, 16  ;;  %838 = vst [vmem:[#allocation2 + $0x34] sm:$0xf] %v803_v50  ;;  %v9072_v57 = vrot.slane %v883_v38, 11  ;;  %v10989_v26 = vld [vmem:[%s14591_s1 + $0x430] sm:$0xff]   ;;  %v861_v38 = vrot.slane %v859_v35, 4 }
  0x98   : > { %10026 = vmatprep.subr.bf16.mxu0 %v10973_v61  ;;  %871 = vst [vmem:[#allocation2 + $0x38] sm:$0xf] %v857_v42  ;;  %v841_v32 = vld [vmem:[#allocation2 + $0x304] sm:$0xf]  ;;  %840 = vst [vmem:[#allocation2 + $0x214] sm:$0xf] %v823_v43 }
  0x99   : > { %v864_v50 = vrot.slane %v862_v39, 4  ;;  %v10999_v10 = vld [vmem:[%s14591_s1 + $0x4a8] sm:$0xff]  }
  0x9a   : > { %10049 = vmatpush3.bf16.msra.mxu1 %v10964_v44  ;;  %v804_v44 = vrot.slane %v802_v34, 4  ;;  %v10988_v34 = vld [vmem:[%s14591_s1 + $0x4f0] sm:$0xff]   ;;  %v11014_v33 = vld [vmem:[%s14591_s1 + $0x4c8] sm:$0xff]  }
  0x9b   : > { %10050 = vmatprep.subr.bf16.mxu1 %v10966_v47  ;;  %10027 = vmatpush3.bf16.msra.mxu0 %v10975_v59  ;;  %v891_v47 = vshll.u32 %v878_v36, 16  ;;  %v10994_v36 = vld [vmem:[%s14591_s1 + $0x468] sm:$0xff]  }
  0x9c   : > { %10068 = vmatprep.subr.bf16.mxu0 %v10983_v5  ;;  %v766_v5 = vrot.slane %v751_v58, 6  ;;  %v933_v43 = vld [vmem:[%s11728_s8 + $0xc] sm:$0xf] }
  0x9d   : > { %937 = vst [vmem:[#allocation2 + $0x130] sm:$0xf] %v933_v43 }
  0x9e   : > { %10051 = vmatpush3.bf16.msra.mxu1 %v10968_v53  ;;  %v897_v53 = vshrl.u32 %v879_v37, 16  ;;  %v768_v15 = vrot.slane %v766_v5, 4  ;;  %v848_v37 = vld [vmem:[%s11728_s8 + $0x14] sm:$0x7] }
  0x9f   : > { %10052 = vmatprep.subr.bf16.mxu1 %v10970_v56  ;;  %v813_v56 = vsel %vm11959_vm6, %v804_v44, %v12297_v41  ;;  %v10980_v41 = vld [vmem:[#allocation2 + $0x38] ss:$240 sps:$4 sm:$0xff]   ;;  %v824_v44 = vrot.slane %v822_v29, 4  ;;  %v865_v48 = vrot.slane %v848_v37, 7  ;;  %v11017_v37 = vld [vmem:[%s14591_s1 + $0x440] sm:$0xff]  }
  0xa0   : > { %839 = vst [vmem:[#allocation2 + $0x124] sm:$0xf] %v813_v56  ;;  %v12310_v61 = vrot.slane %v897_v53, 7  ;;  %v770_v23 = vsel %vm11903_vm13, %v768_v15, %v769_v6  ;;  %v874_v53 = vld [vmem:[#allocation2 + $0x308] sm:$0xf]  ;;  %v11005_v15 = vld [vmem:[%s14591_s1 + $0x458] sm:$0xff]  }
  0xa1   : > { %v779_v28 = vsel %vm11802_vm10, %v770_v23, %v778_v7  ;;  %v881_v56 = vld [vmem:[%s11728_s8 + $0x14] sm:$0x7]  ;;  %v929_v6 = vld [vmem:[#allocation2 + $0x30c] sm:$0xf] }
  0xa2   : > { %10053 = vmatpush3.bf16.msra.mxu1 %v10972_v60  ;;  %v890_v60 = vrot.slane %v888_v46, 7  ;;  %780 = vst [vmem:[#allocation2 + $0x300] sm:$0xf] %v779_v28  ;;  %v832_v46 = vor.u32 %v831_v31, %v828_v21  ;;  %v11007_v21 = vld [vmem:[%s14591_s1 + $0x418] sm:$0xff]   ;;  %v11009_v23 = vld [vmem:[%s14591_s1 + $0x450] sm:$0xff]  }
  0xa3   : > { %10054 = vmatprep.subr.bf16.mxu1 %v10974_v62  ;;  %v11012_v31 = vld [vmem:[%s14591_s1 + $0x490] sm:$0xff]  }
  0xa4   : > { %v893_v62 = vor.u32 %v891_v47, %v890_v60  ;;  %v895_v59 = vrot.slane %v890_v60, 4  ;;  %v863_v47 = vsel %vm11948_vm3, %v861_v38, %v862_v39  ;;  %v833_v35 = vsel %vm11959_vm6, %v824_v44, %v832_v46  ;;  %v11018_v38 = vld [vmem:[%s14591_s1 + $0x4c0] sm:$0xff]   ;;  %v942_v44 = vld [vmem:[%s11728_s8 + $0x8] sm:$0xf]  ;;  %v943_v46 = vld [vmem:[%s11728_s8 + $0xc] sm:$0xf] }
  0xa5   : > { %873 = vst [vmem:[#allocation2 + $0x218] sm:$0xf] %v863_v47  ;;  %v11019_v39 = vld [vmem:[%s14591_s1 + $0x400] sm:$0xff]   ;;  %v12450_v47 = vld [vmem:[%s11728_s8 + $0x10] sm:$0xf] }
  0xa6   : > { %10055 = vmatpush3.bf16.msra.mxu1 %v10976_v63  ;;  %v902_v63 = vor.u32 %v900_v55, %v12310_v61  ;;  %v894_v0 = vsel %vm11977_vm9, %v9072_v57, %v893_v62  ;;  %v880_v55 = vld [vmem:[%s11728_s8 + $0x10] sm:$0xf]  ;;  %v904_v57 = vrot.slane %v12310_v61, 4  ;;  %v10998_v61 = vld [vmem:[%s14591_s1 + $0x428] sm:$0xff]  }
  0xa7   : > { %10096 = vmatprep.subr.bf16.mxu1 %v10984_v14  ;;  %926 = vst [vmem:[#allocation2 + $0x3c] sm:$0xf] %v894_v0  ;;  %v10979_v13 = vld [vmem:[#allocation2 + $0x34] ss:$240 sps:$4 sm:$0xff]   ;;  %v767_v14 = vsel %vm11903_vm13, %v765_v1, %v766_v5  ;;  %v906_v60 = vshrl.u32 %v880_v55, 16  ;;  %v909_v62 = vshll.u32 %v880_v55, 16 }
  0xa8   : > { %v903_v52 = vsel %vm11977_vm9, %v895_v59, %v902_v63  ;;  %777 = vst [vmem:[#allocation2 + $0x210] sm:$0xf] %v767_v14  ;;  %7708 = vmatprep.mubr.bf16.mxu0 %v10979_v13  ;;  %v842_v59 = vsel %vm11802_vm10, %v833_v35, %v841_v32  ;;  %v866_v63 = vsel %vm11948_vm3, %v864_v50, %v865_v48  ;;  %v915_v0 = vshrl.u32 %v881_v56, 16  ;;  %v11004_v14 = vld [vmem:[%s14591_s1 + $0x4a0] sm:$0xff]   ;;  %v11013_v32 = vld [vmem:[%s14591_s1 + $0x448] sm:$0xff]  }
  0xa9   : > { %927 = vst [vmem:[#allocation2 + $0x12c] sm:$0xf] %v903_v52  ;;  %7709 = vmatmul.mubr.bf16.vlgmr.msra.gmra.mxu0 %v10977_v12  ;;  %v918_v1 = vshll.u32 %v881_v56, 16  ;;  %843 = vst [vmem:[#allocation2 + $0x304] sm:$0xf] %v842_v59  ;;  %v875_v52 = vsel %vm11802_vm10, %v866_v63, %v874_v53  ;;  %v908_v58 = vrot.slane %v906_v60, 7 }
  0xaa   : > { %10069 = vmatpush3.bf16.msra.mxu0 %v10985_v9  ;;  %876 = vst [vmem:[#allocation2 + $0x308] sm:$0xf] %v875_v52  ;;  %v917_v5 = vrot.slane %v915_v0, 7  ;;  %v11002_v12 = vld [vmem:[%s14591_s1 + $0x4e0] sm:$0xff]   ;;  %v947_v50 = vshrl.u32 %v942_v44, 16  ;;  %v950_v48 = vshll.u32 %v942_v44, 16 }
  0xab   : > { %10070 = vmatprep.subr.bf16.mxu0 %v10987_v16  ;;  %v911_v7 = vor.u32 %v909_v62, %v908_v58  ;;  %v913_v8 = vrot.slane %v908_v58, 4  ;;  %v956_v53 = vshll.u32 %v943_v46, 16  ;;  %v960_v55 = vshrl.u32 %v943_v46, 16  ;;  %v995_v35 = vld [vmem:[%s11728_s8 + $0x8] sm:$0xe] }
  0xac   : > { %v920_v9 = vor.u32 %v918_v1, %v917_v5  ;;  %v949_v56 = vrot.slane %v947_v50, 4  ;;  %v996_v60 = vld [vmem:[%s11728_s8 + $0xc] sm:$0xf]  ;;  %v12456_v62 = vld [vmem:[%s11728_s8 + $0x10] sm:$0xf]  ;;  %v9073_v1 = vrot.slane %v995_v35, 9 }
  0xad   : > { %v912_v2 = vsel %vm11977_vm9, %v904_v57, %v911_v7  ;;  %v952_v57 = vrot.slane %v950_v48, 5  ;;  %v958_v59 = vrot.slane %v956_v53, 5  ;;  %v962_v63 = vrot.slane %v960_v55, 4  ;;  %v1028_v52 = vld [vmem:[%s11728_s8 + $0x8] sm:$0xe]  ;;  %v11031_v35 = vld [vmem:[%s14591_s1 + $0x570] sm:$0xff]  }
  0xae   : > { %10071 = vmatpush3.bf16.msra.mxu0 %v10989_v26  ;;  %v921_v11 = vsel %vm11977_vm9, %v913_v8, %v920_v9  ;;  %928 = vst [vmem:[#allocation2 + $0x21c] sm:$0xf] %v912_v2  ;;  %v11011_v26 = vld [vmem:[%s14591_s1 + $0x410] sm:$0xff]   ;;  %v1029_v5 = vld [vmem:[%s11728_s8 + $0xc] sm:$0xf]  ;;  %v1034_v8 = vshrl.u32 %v1028_v52, 16 }
  0xaf   : > { %10072 = vmatprep.subr.bf16.mxu0 %v10994_v36  ;;  %v930_v13 = vsel %vm11802_vm10, %v921_v11, %v929_v6  ;;  %v10993_v19 = vld [vmem:[#allocation2 + $0x210] ss:$240 sps:$4 sm:$0xff]   ;;  %v11016_v36 = vld [vmem:[%s14591_s1 + $0x488] sm:$0xff]   ;;  %v953_v58 = vor.u32 %v952_v57, %v949_v56  ;;  %v963_v7 = vor.u32 %v962_v63, %v958_v59  ;;  %v1043_v9 = vshrl.u32 %v1029_v5, 16  ;;  %v935_v50 = vld [vmem:[%s11728_s8 + $0x14] sm:$0xf] }
  0xb0   : > { %v10982_v42 = vld [vmem:[#allocation2 + $0x3c] ss:$240 sps:$4 sm:$0xff]   ;;  %v10991_v16 = vld [vmem:[#allocation2 + $0x214] ss:$240 sps:$4 sm:$0xff]   ;;  %931 = vst [vmem:[#allocation2 + $0x30c] sm:$0xf] %v930_v13 }
  0xb1   : > { %7757 = vmatprep.mubr.bf16.mxu1 %v10982_v42  ;;  %7716 = vmatprep.mubr.bf16.mxu0 %v10991_v16  ;;  %v11000_v29 = vld [vmem:[#allocation2 + $0x218] ss:$240 sps:$4 sm:$0xff]   ;;  %v1030_v6 = vld [vmem:[%s11728_s8 + $0x10] sm:$0xf]  ;;  %v954_v2 = vrot.slane %v953_v58, 4  ;;  %v1036_v16 = vrot.slane %v1034_v8, 5 }
  0xb2   : > { %7758 = vmatmul.mubr.bf16.vlgmr.msra.gmra.mxu1 %v10980_v41  ;;  %10073 = vmatpush3.bf16.msra.mxu0 %v10998_v61  ;;  %v11020_v41 = vld [vmem:[%s14591_s1 + $0x480] sm:$0xff]   ;;  %v932_v42 = vld [vmem:[%s11728_s8 + $0x8] sm:$0xf]  ;;  %v1007_v61 = vrot.slane %v996_v60, 5  ;;  %v11028_v13 = vld [vmem:[%s14591_s1 + $0x5f8] sm:$0xff]  }
  0xb3   : > { %10097 = vmatpush3.bf16.msra.mxu1 %v10986_v24  ;;  %10074 = vmatprep.subr.bf16.mxu0 %v11001_v51  ;;  %v11010_v24 = vld [vmem:[%s14591_s1 + $0x4d0] sm:$0xff]   ;;  %936 = vst [vmem:[#allocation2 + $0x40] sm:$0xf] %v932_v42  ;;  %v1037_v51 = vshll.u32 %v1028_v52, 16 }
  0xb4   : > { %10098 = vmatprep.subr.bf16.mxu1 %v10988_v34  ;;  %7717 = vmatmul.mubr.bf16.gmra.mxu0 %v10993_v19  ;;  %v11015_v34 = vld [vmem:[%s14591_s1 + $0x408] sm:$0xff]   ;;  %v1009_v11 = vrot.slane %v1007_v61, 4  ;;  %v934_v44 = vld [vmem:[%s11728_s8 + $0x10] sm:$0xf]  ;;  %v945_v53 = vld [vmem:[%s11728_s8 + $0x14] sm:$0xf] }
  0xb5   : > { %v1039_v19 = vrot.slane %v1037_v51, 6  ;;  %938 = vst [vmem:[#allocation2 + $0x220] sm:$0xf] %v934_v44  ;;  %v939_v48 = vld [vmem:[#allocation2 + $0x310] sm:$0xf]  ;;  %v976_v60 = vshll.u32 %v945_v53, 16 }
  0xb6   : > { %10075 = vmatpush3.bf16.msra.mxu0 %v11003_v3  ;;  %v1008_v3 = vsel %vm11748_vm4, %v9073_v1, %v1007_v61  ;;  %v940_v56 = vsel %vm11802_vm10, %v935_v50, %v939_v48  ;;  %v992_v51 = vld [vmem:[#allocation2 + $0x314] sm:$0xf] }
  0xb7   : > { %10099 = vmatpush3.bf16.msra.mxu1 %v10990_v25  ;;  %10076 = vmatprep.subr.bf16.mxu0 %v11005_v15  ;;  %v10996_v28 = vld [vmem:[#allocation2 + $0x21c] ss:$240 sps:$4 sm:$0xff]   ;;  %v966_v25 = vshll.u32 %v12450_v47, 16  ;;  %v964_v15 = vrot.slane %v963_v7, 4  ;;  %1022 = vst [vmem:[#allocation2 + $0x48] sm:$0xf] %v1008_v3 }
  0xb8   : > { %10100 = vmatprep.subr.bf16.mxu1 %v10995_v4  ;;  %7765 = vmatprep.mubr.bf16.mxu1 %v10996_v28  ;;  %v1010_v4 = vrot.slane %v12456_v62, 5  ;;  %941 = vst [vmem:[#allocation2 + $0x310] sm:$0xf] %v940_v56  ;;  %v978_v61 = vrot.slane %v976_v60, 5  ;;  %v11030_v62 = vld [vmem:[%s14591_s1 + $0x5b8] sm:$0xff]  }
  0xb9   : > { %v12458_v0 = vrot.slane %v966_v25, 5  ;;  %v11029_v25 = vld [vmem:[%s14591_s1 + $0x538] sm:$0xff]  }
  0xba   : > { %10077 = vmatpush3.bf16.msra.mxu0 %v11007_v21  ;;  %7766 = vmatmul.mubr.bf16.gmra.mxu1 %v11000_v29  ;;  %v959_v21 = vsel %vm11757_vm5, %v954_v2, %v958_v59  ;;  %v1040_v29 = vor.u32 %v1039_v19, %v1036_v16  ;;  %v980_v59 = vshrl.u32 %v945_v53, 16  ;;  %v11021_v63 = vld [vmem:[#allocation2 + $0x40] ss:$240 sps:$4 sm:$0xff]   ;;  %v11049_v56 = vld [vmem:[%s14591_s1 + $0x558] sm:$0xff]  }
  0xbb   : > { %10101 = vmatpush3.bf16.msra.mxu1 %v10999_v10  ;;  %10078 = vmatprep.subr.bf16.mxu0 %v11009_v23  ;;  %v11027_v10 = vld [vmem:[%s14591_s1 + $0x578] sm:$0xff]   ;;  %v969_v28 = vsel %vm11757_vm5, %v964_v15, %v12458_v0  ;;  %989 = vst [vmem:[#allocation2 + $0x44] sm:$0xf] %v959_v21 }
  0xbc   : > { %10102 = vmatprep.subr.bf16.mxu1 %v11002_v12  ;;  %v1046_v12 = vshll.u32 %v1029_v5, 16  ;;  %990 = vst [vmem:[#allocation2 + $0x134] sm:$0xf] %v969_v28  ;;  %v982_v5 = vrot.slane %v980_v59, 4 }
  0xbe   : > { %10079 = vmatpush3.bf16.msra.mxu0 %v11011_v26  ;;  %v1048_v23 = vrot.slane %v1046_v12, 6  ;;  %v983_v8 = vor.u32 %v982_v5, %v978_v61  ;;  %v1031_v12 = vld [vmem:[%s11728_s8 + $0x14] sm:$0xf]  ;;  %v11050_v5 = vld [vmem:[%s14591_s1 + $0x5d8] sm:$0xff]  }
  0xbf   : > { %10103 = vmatpush3.bf16.msra.mxu1 %v11004_v14  ;;  %10080 = vmatprep.subr.bf16.mxu0 %v11013_v32  ;;  %v1063_v16 = vshrl.u32 %v1031_v12, 16  ;;  %v1066_v19 = vshll.u32 %v1031_v12, 16  ;;  %v11037_v59 = vld [vmem:[#allocation2 + $0x220] ss:$240 sps:$4 sm:$0xff]   ;;  %v11057_v12 = vld [vmem:[%s14591_s1 + $0x548] sm:$0xff]  }
  0xc0   : > { %10104 = vmatprep.subr.bf16.mxu1 %v11006_v20  ;;  %v1045_v20 = vrot.slane %v1043_v9, 5  ;;  %v998_v9 = vld [vmem:[%s11728_s8 + $0x14] sm:$0xf] }
  0xc1   : > { %v1013_v2 = vrot.slane %v998_v9, 5  ;;  %v1065_v28 = vrot.slane %v1063_v16, 5 }
  0xc2   : > { %10081 = vmatpush3.bf16.msra.mxu0 %v11015_v34  ;;  %v1049_v34 = vor.u32 %v1048_v23, %v1045_v20 }
  0xc3   : > { %10105 = vmatpush3.bf16.msra.mxu1 %v11008_v22  ;;  %10082 = vmatprep.subr.bf16.mxu0 %v11017_v37  ;;  %v1011_v22 = vsel %vm11748_vm4, %v1009_v11, %v1010_v4  ;;  %v1041_v37 = vrot.slane %v1040_v29, 4  ;;  %v11023_v1 = vld [vmem:[#allocation2 + $0x44] ss:$240 sps:$4 sm:$0xff]   ;;  %v1025_v11 = vld [vmem:[#allocation2 + $0x318] sm:$0xf]  ;;  %v1015_v23 = vrot.slane %v1013_v2, 4 }
  0xc4   : > { %10106 = vmatprep.subr.bf16.mxu1 %v11010_v24  ;;  %v1053_v24 = vshrl.u32 %v1030_v6, 16  ;;  %1023 = vst [vmem:[#allocation2 + $0x138] sm:$0xf] %v1011_v22  ;;  %7806 = vmatprep.mubr.bf16.mxu0 %v11023_v1  ;;  %v1068_v29 = vrot.slane %v1066_v19, 6  ;;  %v11048_v1 = vld [vmem:[%s14591_s1 + $0x5a0] sm:$0xff]   ;;  %v11058_v19 = vld [vmem:[%s14591_s1 + $0x5c8] sm:$0xff]  }
  0xc6   : > { %10083 = vmatpush3.bf16.msra.mxu0 %v11019_v39  ;;  %v1051_v39 = vrot.slane %v1049_v34, 4 }
  0xc7   : > { %10107 = vmatpush3.bf16.msra.mxu1 %v11012_v31  ;;  %10124 = vmatprep.subr.bf16.mxu0 %v11027_v10  ;;  %v1056_v31 = vshll.u32 %v1030_v6, 16  ;;  %v1012_v6 = vrot.slane %v1010_v4, 4  ;;  %v999_v10 = vld [vmem:[%s11728_s8 + $0x18] sm:$0x1]  ;;  %v11038_v4 = vld [vmem:[%s14591_s1 + $0x568] sm:$0xff]  }
  0xc8   : > { %10108 = vmatprep.subr.bf16.mxu1 %v11014_v33  ;;  %v970_v33 = vshrl.u32 %v12450_v47, 16  ;;  %v1016_v3 = vrot.slane %v999_v10, 5  ;;  %v11054_v10 = vld [vmem:[%s14591_s1 + $0x5d0] sm:$0xff]  }
  0xc9   : > { %7807 = vmatmul.mubr.bf16.vlgmr.msra.gmra.mxu0 %v11021_v63  ;;  %v1014_v22 = vsel %vm11748_vm4, %v1012_v6, %v1013_v2 }
  0xca   : > { %v972_v46 = vrot.slane %v970_v33, 4  ;;  %10125 = vmatpush3.bf16.msra.mxu0 %v11029_v25  ;;  %1024 = vst [vmem:[#allocation2 + $0x228] sm:$0xf] %v1014_v22  ;;  %v11034_v33 = vld [vmem:[%s14591_s1 + $0x5b0] sm:$0xff]   ;;  %v11046_v25 = vld [vmem:[%s14591_s1 + $0x5e0] sm:$0xff]  }
  0xcb   : > { %10109 = vmatpush3.bf16.msra.mxu1 %v11016_v36  ;;  %v1055_v36 = vrot.slane %v1053_v24, 5  ;;  %10126 = vmatprep.subr.bf16.mxu0 %v11031_v35  ;;  %v11024_v20 = vld [vmem:[#allocation2 + $0x48] ss:$240 sps:$4 sm:$0xff]   ;;  %v11032_v24 = vld [vmem:[%s14591_s1 + $0x5f0] sm:$0xff]   ;;  %v11063_v22 = vld [vmem:[%s14591_s1 + $0x500] sm:$0xff]  }
  0xcc   : > { %10110 = vmatprep.subr.bf16.mxu1 %v11018_v38  ;;  %v1058_v38 = vrot.slane %v1056_v31, 6  ;;  %v973_v57 = vor.u32 %v972_v46, %v12458_v0  ;;  %v11033_v0 = vld [vmem:[%s14591_s1 + $0x530] sm:$0xff]   ;;  %v1088_v46 = vld [vmem:[#allocation2 + $0x31c] sm:$0xf] }
  0xce   : > { %v12486_v42 = vor.u32 %v1058_v38, %v1055_v36  ;;  %v974_v58 = vrot.slane %v973_v57, 4  ;;  %10127 = vmatpush3.bf16.msra.mxu0 %v11033_v0  ;;  %v11039_v38 = vld [vmem:[%s14591_s1 + $0x5e8] sm:$0xff]   ;;  %v11053_v0 = vld [vmem:[%s14591_s1 + $0x550] sm:$0xff]  }
  0xcf   : > { %10111 = vmatpush3.bf16.msra.mxu1 %v11020_v41  ;;  %v1050_v41 = vsel %vm11783_vm8, %v1041_v37, %v1049_v34  ;;  %v1017_v34 = vsel %vm11748_vm4, %v1015_v23, %v1016_v3  ;;  %v11042_v37 = vld [vmem:[%s14591_s1 + $0x528] sm:$0xff]   ;;  %10128 = vmatprep.subr.bf16.mxu0 %v11038_v4  ;;  %v11062_v23 = vld [vmem:[%s14591_s1 + $0x5c0] sm:$0xff]  }
  0xd0   : > { %10152 = vmatprep.subr.bf16.mxu1 %v11028_v13  ;;  %1085 = vst [vmem:[#allocation2 + $0x4c] sm:$0xf] %v1050_v41  ;;  %v1060_v47 = vsel %vm11783_vm8, %v1051_v39, %v12486_v42  ;;  %v979_v7 = vsel %vm11757_vm5, %v974_v58, %v978_v61  ;;  %v984_v13 = vrot.slane %v983_v8, 4  ;;  %v1061_v15 = vrot.slane %v12486_v42, 4  ;;  %v11051_v58 = vld [vmem:[%s14591_s1 + $0x518] sm:$0xff]  }
  0xd1   : > { %1086 = vst [vmem:[#allocation2 + $0x13c] sm:$0xf] %v1060_v47  ;;  %991 = vst [vmem:[#allocation2 + $0x224] sm:$0xf] %v979_v7  ;;  %v1026_v39 = vsel %vm11802_vm10, %v1017_v34, %v1025_v11  ;;  %v1069_v41 = vor.u32 %v1068_v29, %v1065_v28  ;;  %v11047_v47 = vld [vmem:[%s14591_s1 + $0x520] sm:$0xff]   ;;  %v11052_v8 = vld [vmem:[%s14591_s1 + $0x598] sm:$0xff]  }
  0xd2   : > { %1027 = vst [vmem:[#allocation2 + $0x318] sm:$0xf] %v1026_v39  ;;  %10129 = vmatpush3.bf16.msra.mxu0 %v11042_v37  ;;  %v12624_v28 = vld [vmem:[%s11728_s8 + $0x10] sm:$0xf]  ;;  %v11064_v29 = vld [vmem:[%s14591_s1 + $0x580] sm:$0xff]   ;;  %v11071_v37 = vld [vmem:[%s14591_s1 + $0x678] sm:$0xff]  }
  0xd3   : > { %v1070_v50 = vsel %vm11783_vm8, %v1061_v15, %v1069_v41  ;;  %v1071_v48 = vrot.slane %v1069_v41, 4  ;;  %v11059_v15 = vld [vmem:[%s14591_s1 + $0x508] sm:$0xff]   ;;  %v1106_v34 = vrot.slane %v12624_v28, 6  ;;  %v1126_v39 = vld [vmem:[%s11728_s8 + $0x10] sm:$0xf]  ;;  %v11073_v28 = vld [vmem:[%s14591_s1 + $0x638] sm:$0xff]  }
  0xd4   : > { %1087 = vst [vmem:[#allocation2 + $0x22c] sm:$0xf] %v1070_v50  ;;  %v1187_v50 = vld [vmem:[%s11728_s8 + $0x8] sm:$0x8] }
  0xd8   : > { %v11026_v21 = vld [vmem:[#allocation2 + $0x4c] ss:$240 sps:$4 sm:$0xff]  }
  0xd9   : > { %7855 = vmatprep.mubr.bf16.mxu1 %v11026_v21  ;;  %v11044_v2 = vld [vmem:[#allocation2 + $0x228] ss:$240 sps:$4 sm:$0xff]  }
  0xda   : > { %7856 = vmatmul.mubr.bf16.vlgmr.msra.gmra.mxu1 %v11024_v20  ;;  %v11061_v20 = vld [vmem:[%s14591_s1 + $0x540] sm:$0xff]   ;;  %v11060_v21 = vld [vmem:[%s14591_s1 + $0x588] sm:$0xff]  }
  0xdb   : > { %10153 = vmatpush3.bf16.msra.mxu1 %v11030_v62 }
  0xdc   : > { %10154 = vmatprep.subr.bf16.mxu1 %v11032_v24  ;;  %v1091_v24 = vld [vmem:[%s11728_s8 + $0x8] sm:$0xc] }
  0xdf   : > { %10155 = vmatpush3.bf16.msra.mxu1 %v11034_v33 }
  0xe0   : > { %10156 = vmatprep.subr.bf16.mxu1 %v11039_v38  ;;  %v1125_v38 = vld [vmem:[%s11728_s8 + $0xc] sm:$0xf] }
  0xf5   : > { %v9860_v14 = vpop.f32.mrf.mxu0 }
  0xf7   : > { %v9861_v26 = vpop.f32.mrf.mxu0 }
  0xf8   : > { %v12481_v32 = vadd.f32 %v9861_v26, %v9860_v14  ;;  %v1032_v14 = vld [vmem:[%s11728_s8 + $0x18] sm:$0x1]  ;;  %v993_v26 = vsel %vm11802_vm10, %v984_v13, %v992_v51  ;;  %v11055_v51 = vld [vmem:[%s14591_s1 + $0x510] sm:$0xff]  }
  0xf9   : > { %v9888_v43 = vpop.f32.mrf.mxu1  ;;  %v1073_v31 = vshrl.u32 %v1032_v14, 16  ;;  %994 = vst [vmem:[#allocation2 + $0x314] sm:$0xf] %v993_v26  ;;  %v1076_v36 = vshll.u32 %v1032_v14, 16  ;;  %v12562_v57 = vpop.f32.mrf.mxu0  ;;  %v11056_v13 = vld [vmem:[%s14591_s1 + $0x590] sm:$0xff]  }
  0xfa   : > { %v1092_v26 = vld [vmem:[%s11728_s8 + $0xc] sm:$0xf] }
  0xfb   : > { %v9889_v55 = vpop.f32.mrf.mxu1  ;;  %v1075_v42 = vrot.slane %v1073_v31, 5  ;;  %v1078_v44 = vrot.slane %v1076_v36, 6  ;;  %v12577_v6 = vpop.f32.mrf.mxu0  ;;  %v9074_v31 = vrot.slane %v1091_v24, 10  ;;  %v1103_v33 = vrot.slane %v1092_v26, 6  ;;  %v1124_v36 = vld [vmem:[%s11728_s8 + $0x8] sm:$0xc] }
  0xfc   : > { %v12503_v52 = vadd.f32 %v9889_v55, %v9888_v43  ;;  %v11045_v43 = vld [vmem:[%s14591_s1 + $0x560] sm:$0xff]   ;;  %v11043_v55 = vld [vmem:[%s14591_s1 + $0x5a8] sm:$0xff]   ;;  %v1130_v41 = vshrl.u32 %v1124_v36, 16 }
  0xfd   : > { %v1079_v53 = vor.u32 %v1078_v44, %v1075_v42  ;;  %10130 = vmatprep.subr.bf16.mxu0 %v11045_v43  ;;  %v12572_v61 = vpop.f32.mrf.mxu1  ;;  %10157 = vmatpush3.bf16.msra.mxu1 %v11043_v55  ;;  %v1133_v42 = vshll.u32 %v1124_v36, 16  ;;  %v1104_v43 = vsel %vm11903_vm13, %v9074_v31, %v1103_v33  ;;  %v1105_v44 = vrot.slane %v1103_v33, 4 }
  0xfe   : > { %10131 = vmatpush3.bf16.msra.mxu0 %v11047_v47  ;;  %10158 = vmatprep.subr.bf16.mxu1 %v11046_v25  ;;  %v1142_v47 = vshll.u32 %v1125_v38, 16  ;;  %1118 = vst [vmem:[#allocation2 + $0x50] sm:$0xf] %v1104_v43  ;;  %v1149_v25 = vshrl.u32 %v1126_v39, 16 }
  0xff   : > { %v1080_v35 = vsel %vm11783_vm8, %v1071_v48, %v1079_v53  ;;  %10132 = vmatprep.subr.bf16.mxu0 %v11049_v56  ;;  %v12588_v9 = vpop.f32.mrf.mxu1  ;;  %v11072_v48 = vld [vmem:[%s14591_s1 + $0x6f8] sm:$0xff]   ;;  %v1132_v53 = vrot.slane %v1130_v41, 6  ;;  %v1135_v55 = vrot.slane %v1133_v42, 7  ;;  %v1188_v56 = vld [vmem:[%s11728_s8 + $0xc] sm:$0xf] }
 0x100   : > { %v11035_v60 = vld [vmem:[#allocation2 + $0x224] ss:$240 sps:$4 sm:$0xff]   ;;  %v1089_v63 = vsel %vm11802_vm10, %v1080_v35, %v1088_v46  ;;  %v1139_v46 = vshrl.u32 %v1125_v38, 16  ;;  %v1152_v35 = vshll.u32 %v1126_v39, 16 }
 0x101   : > { %1090 = vst [vmem:[#allocation2 + $0x31c] sm:$0xf] %v1089_v63  ;;  %7814 = vmatprep.mubr.bf16.mxu0 %v11035_v60  ;;  %10159 = vmatpush3.bf16.msra.mxu1 %v11048_v1  ;;  %v1144_v1 = vrot.slane %v1142_v47, 7 }
 0x102   : > { %7815 = vmatmul.mubr.bf16.gmra.mxu0 %v11037_v59  ;;  %10160 = vmatprep.subr.bf16.mxu1 %v11050_v5  ;;  %v1107_v59 = vsel %vm11903_vm13, %v1105_v44, %v1106_v34  ;;  %v1141_v63 = vrot.slane %v1139_v46, 6  ;;  %v9075_v5 = vrot.slane %v1187_v50, 11 }
 0x103   : > { %10133 = vmatpush3.bf16.msra.mxu0 %v11051_v58  ;;  %v12650_v58 = vld [vmem:[%s11728_s8 + $0x10] sm:$0xf]  ;;  %1119 = vst [vmem:[#allocation2 + $0x140] sm:$0xf] %v1107_v59 }
 0x104   : > { %10134 = vmatprep.subr.bf16.mxu0 %v11053_v0  ;;  %v1136_v0 = vor.u32 %v1135_v55, %v1132_v53  ;;  %v1108_v55 = vrot.slane %v1106_v34, 4 }
 0x105   : > { %v9866_v7 = vpop.f32.mrf.mxu0  ;;  %10161 = vmatpush3.bf16.msra.mxu1 %v11052_v8  ;;  %v1154_v8 = vrot.slane %v1152_v35, 7  ;;  %v1094_v35 = vld [vmem:[%s11728_s8 + $0x14] sm:$0xf] }
 0x106   : > { %10162 = vmatprep.subr.bf16.mxu1 %v11054_v10  ;;  %v1220_v10 = vld [vmem:[%s11728_s8 + $0x8] sm:$0x8] }
 0x107   : > { %v9867_v62 = vpop.f32.mrf.mxu0  ;;  %10135 = vmatpush3.bf16.msra.mxu0 %v11055_v51  ;;  %v1199_v51 = vrot.slane %v1188_v56, 7  ;;  %v1095_v56 = vld [vmem:[%s11728_s8 + $0x18] sm:$0x3] }
 0x108   : > { %v11040_v4 = vld [vmem:[#allocation2 + $0x22c] ss:$240 sps:$4 sm:$0xff]   ;;  %v12593_v3 = vadd.f32 %v9867_v62, %v9866_v7  ;;  %10136 = vmatprep.subr.bf16.mxu0 %v11057_v12  ;;  %v1151_v7 = vrot.slane %v1149_v25, 6  ;;  %v1145_v62 = vor.u32 %v1144_v1, %v1141_v63  ;;  %v1226_v12 = vshrl.u32 %v1220_v10, 16 }
 0x109   : > { %v9894_v11 = vpop.f32.mrf.mxu1  ;;  %7863 = vmatprep.mubr.bf16.mxu1 %v11040_v4  ;;  %10163 = vmatpush3.bf16.msra.mxu1 %v11056_v13  ;;  %v12643_v60 = vpop.f32.mrf.mxu0  ;;  %v1202_v4 = vrot.slane %v12650_v58, 7  ;;  %v1137_v13 = vrot.slane %v1136_v0, 4  ;;  %v1109_v1 = vrot.slane %v1094_v35, 6  ;;  %v1121_v0 = vld [vmem:[#allocation2 + $0x320] sm:$0xf]  ;;  %v11078_v58 = vld [vmem:[%s14591_s1 + $0x6b0] sm:$0xff]  }
 0x10a   : > { %7864 = vmatmul.mubr.bf16.gmra.mxu1 %v11044_v2  ;;  %10164 = vmatprep.subr.bf16.mxu1 %v11058_v19  ;;  %v1221_v2 = vld [vmem:[%s11728_s8 + $0xc] sm:$0xf]  ;;  %v1201_v19 = vrot.slane %v1199_v51, 4  ;;  %v9076_v38 = vrot.slane %v1226_v12, 11  ;;  %v11065_v12 = vld [vmem:[#allocation2 + $0x50] ss:$240 sps:$4 sm:$0xff]  }
 0x10b   : > { %v9895_v14 = vpop.f32.mrf.mxu1  ;;  %10137 = vmatpush3.bf16.msra.mxu0 %v11059_v15  ;;  %v1200_v15 = vsel %vm11948_vm3, %v9075_v5, %v1199_v51  ;;  %v1234_v24 = vshll.u32 %v1221_v2, 16  ;;  %v1146_v26 = vsel %vm11959_vm6, %v1137_v13, %v1145_v62  ;;  %v1112_v5 = vrot.slane %v1095_v56, 6 }
 0x10c   : > { %v12604_v16 = vadd.f32 %v9895_v14, %v9894_v11  ;;  %10138 = vmatprep.subr.bf16.mxu0 %v11061_v20  ;;  %v1222_v11 = vld [vmem:[%s11728_s8 + $0x10] sm:$0xf]  ;;  %v12656_v14 = vor.u32 %v1154_v8, %v1151_v7  ;;  %v12660_v20 = vpop.f32.mrf.mxu0  ;;  %1214 = vst [vmem:[#allocation2 + $0x58] sm:$0xf] %v1200_v15  ;;  %1181 = vst [vmem:[#allocation2 + $0x54] sm:$0xf] %v1146_v26  ;;  %v1110_v15 = vsel %vm11903_vm13, %v1108_v55, %v1109_v1 }
 0x10d   : > { %10165 = vmatpush3.bf16.msra.mxu1 %v11060_v21  ;;  %v12662_v21 = vpop.f32.mrf.mxu1  ;;  %v1240_v31 = vshrl.u32 %v1222_v11, 16  ;;  %v1243_v33 = vshll.u32 %v1222_v11, 16  ;;  %v1127_v7 = vld [vmem:[%s11728_s8 + $0x14] sm:$0xf]  ;;  %v1128_v8 = vld [vmem:[%s11728_s8 + $0x18] sm:$0x3] }
 0x10e   : > { %10166 = vmatprep.subr.bf16.mxu1 %v11062_v23  ;;  %v1231_v23 = vshrl.u32 %v1221_v2, 16  ;;  %v1157_v34 = vrot.slane %v12656_v14, 4  ;;  %v1159_v10 = vshrl.u32 %v1127_v7, 16  ;;  %v1169_v2 = vshrl.u32 %v1128_v8, 16  ;;  %1120 = vst [vmem:[#allocation2 + $0x230] sm:$0xf] %v1110_v15 }
 0x10f   : > { %10139 = vmatpush3.bf16.msra.mxu0 %v11063_v22  ;;  %v1147_v22 = vrot.slane %v1145_v62, 4  ;;  %v12675_v41 = vrot.slane %v1240_v31, 7  ;;  %v12677_v42 = vpop.f32.mrf.mxu1  ;;  %v1162_v62 = vshll.u32 %v1127_v7, 16  ;;  %v11082_v55 = vld [vmem:[%s14591_s1 + $0x668] sm:$0xff]   ;;  %v1204_v35 = vrot.slane %v1202_v4, 4 }
 0x110   : > { %10180 = vmatprep.subr.bf16.mxu0 %v11071_v37  ;;  %v1233_v39 = vrot.slane %v1231_v23, 7  ;;  %v1161_v23 = vrot.slane %v1159_v10, 6  ;;  %v1171_v26 = vrot.slane %v1169_v2, 6  ;;  %v1223_v2 = vld [vmem:[%s11728_s8 + $0x14] sm:$0xf] }
 0x111   : > { %10167 = vmatpush3.bf16.msra.mxu1 %v11064_v29  ;;  %v1203_v29 = vsel %vm11948_vm3, %v1201_v19, %v1202_v4  ;;  %v1156_v37 = vsel %vm11959_vm6, %v1147_v22, %v12656_v14  ;;  %v1245_v47 = vor.u32 %v1243_v33, %v12675_v41  ;;  %v1111_v19 = vrot.slane %v1109_v1, 4  ;;  %v11075_v22 = vld [vmem:[%s14591_s1 + $0x670] sm:$0xff]  }
 0x112   : > { %10208 = vmatprep.subr.bf16.mxu1 %v11072_v48  ;;  %1215 = vst [vmem:[#allocation2 + $0x148] sm:$0xf] %v1203_v29  ;;  %1182 = vst [vmem:[#allocation2 + $0x144] sm:$0xf] %v1156_v37  ;;  %v1236_v44 = vor.u32 %v1234_v24, %v1233_v39  ;;  %v1238_v46 = vrot.slane %v1233_v39, 4  ;;  %v1164_v24 = vrot.slane %v1162_v62, 7 }
 0x113   : > { %v1172_v14 = vshll.u32 %v1128_v8, 16  ;;  %v1113_v31 = vsel %vm11903_vm13, %v1111_v19, %v1112_v5  ;;  %v11074_v37 = vld [vmem:[%s14591_s1 + $0x6b8] sm:$0xff]   ;;  %v1217_v62 = vld [vmem:[#allocation2 + $0x328] sm:$0xf] }
 0x114   : > { %v1237_v53 = vsel %vm11977_vm9, %v9076_v38, %v1236_v44  ;;  %v1246_v25 = vsel %vm11977_vm9, %v1238_v46, %v1245_v47  ;;  %v11077_v38 = vld [vmem:[%s14591_s1 + $0x630] sm:$0xff]   ;;  %v1122_v39 = vsel %vm11802_vm10, %v1113_v31, %v1121_v0  ;;  %v1165_v44 = vor.u32 %v1164_v24, %v1161_v23  ;;  %v1184_v47 = vld [vmem:[#allocation2 + $0x324] sm:$0xf] }
 0x115   : > { %1269 = vst [vmem:[#allocation2 + $0x5c] sm:$0xf] %v1237_v53  ;;  %1270 = vst [vmem:[#allocation2 + $0x14c] sm:$0xf] %v1246_v25  ;;  %v1174_v46 = vrot.slane %v1172_v14, 7  ;;  %v11076_v53 = vld [vmem:[%s14591_s1 + $0x6f0] sm:$0xff]  }
 0x116   : > { %1123 = vst [vmem:[#allocation2 + $0x320] sm:$0xf] %v1122_v39  ;;  %v1191_v25 = vld [vmem:[%s11728_s8 + $0x18] sm:$0x7]  ;;  %v1166_v5 = vsel %vm11959_vm6, %v1157_v34, %v1165_v44  ;;  %v1167_v0 = vrot.slane %v1165_v44, 4  ;;  %v11089_v44 = vld [vmem:[%s14591_s1 + $0x660] sm:$0xff]  }
 0x117   : > { %v1175_v7 = vor.u32 %v1174_v46, %v1171_v26  ;;  %1183 = vst [vmem:[#allocation2 + $0x234] sm:$0xf] %v1166_v5  ;;  %v1208_v10 = vrot.slane %v1191_v25, 7  ;;  %v1224_v34 = vld [vmem:[%s11728_s8 + $0x18] sm:$0x7]  ;;  %v11091_v25 = vld [vmem:[%s14591_s1 + $0x620] sm:$0xff]  }
 0x118   : > { %v1261_v23 = vshll.u32 %v1224_v34, 16  ;;  %v11092_v5 = vld [vmem:[%s14591_s1 + $0x6a0] sm:$0xff]  }
 0x119   : > { %v11067_v13 = vld [vmem:[#allocation2 + $0x54] ss:$240 sps:$4 sm:$0xff]   ;;  %v1176_v4 = vsel %vm11959_vm6, %v1167_v0, %v1175_v7  ;;  %v11093_v0 = vld [vmem:[%s14591_s1 + $0x658] sm:$0xff]  }
 0x11a   : > { %7904 = vmatprep.mubr.bf16.mxu0 %v11067_v13  ;;  %v1252_v13 = vshll.u32 %v1223_v2, 16  ;;  %v1185_v15 = vsel %vm11802_vm10, %v1176_v4, %v1184_v47  ;;  %v11095_v4 = vld [vmem:[%s14591_s1 + $0x618] sm:$0xff]  }
 0x11b   : > { %7905 = vmatmul.mubr.bf16.vlgmr.msra.gmra.mxu0 %v11065_v12  ;;  %v1249_v12 = vshrl.u32 %v1223_v2, 16  ;;  %1186 = vst [vmem:[#allocation2 + $0x324] sm:$0xf] %v1185_v15  ;;  %v11094_v2 = vld [vmem:[%s14591_s1 + $0x6d8] sm:$0xff]   ;;  %v11098_v15 = vld [vmem:[%s14591_s1 + $0x6d0] sm:$0xff]  }
 0x11c   : > { %v12670_v36 = vpop.f32.mrf.mxu0  ;;  %10181 = vmatpush3.bf16.msra.mxu0 %v11073_v28  ;;  %v11070_v1 = vld [vmem:[#allocation2 + $0x5c] ss:$240 sps:$4 sm:$0xff]  }
 0x11d   : > { %10182 = vmatprep.subr.bf16.mxu0 %v11075_v22  ;;  %7953 = vmatprep.mubr.bf16.mxu1 %v11070_v1  ;;  %v1258_v22 = vshrl.u32 %v1224_v34, 16  ;;  %v1251_v26 = vrot.slane %v1249_v12, 7 }
 0x11e   : > { %v12679_v43 = vpop.f32.mrf.mxu0 }
 0x11f   : > { %v1260_v31 = vrot.slane %v1258_v22, 7  ;;  %v1256_v39 = vrot.slane %v1251_v26, 4  ;;  %v11099_v22 = vld [vmem:[%s14591_s1 + $0x610] sm:$0xff]  }
 0x120   : > { %v9919_v48 = vpop.f32.mrf.mxu0  ;;  %10183 = vmatpush3.bf16.msra.mxu0 %v11077_v38  ;;  %v1272_v38 = vld [vmem:[#allocation2 + $0x32c] sm:$0xf] }
 0x121   : > { %10184 = vmatprep.subr.bf16.mxu0 %v11082_v55  ;;  %v1263_v47 = vor.u32 %v1261_v23, %v1260_v31  ;;  %v11103_v31 = vld [vmem:[%s14591_s1 + $0x608] sm:$0xff]  }
 0x122   : > { %v12682_v50 = vpop.f32.mrf.mxu1  ;;  %v9920_v63 = vpop.f32.mrf.mxu0 }
 0x123   : > { %v12696_v51 = vadd.f32 %v9920_v63, %v9919_v48  ;;  %v1190_v48 = vld [vmem:[%s11728_s8 + $0x14] sm:$0xf]  ;;  %v11068_v63 = vld [vmem:[#allocation2 + $0x58] ss:$240 sps:$4 sm:$0xff]  }
 0x124   : > { %v12692_v59 = vpop.f32.mrf.mxu1  ;;  %v1205_v56 = vrot.slane %v1190_v48, 7  ;;  %7954 = vmatmul.mubr.bf16.vlgmr.msra.gmra.mxu1 %v11068_v63  ;;  %v11087_v48 = vld [vmem:[%s14591_s1 + $0x6a8] sm:$0xff]   ;;  %v11090_v63 = vld [vmem:[%s14591_s1 + $0x6e0] sm:$0xff]  }
 0x125   : > { %10209 = vmatpush3.bf16.msra.mxu1 %v11074_v37  ;;  %v1254_v37 = vor.u32 %v1252_v13, %v1251_v26  ;;  %v11097_v13 = vld [vmem:[%s14591_s1 + $0x650] sm:$0xff]  }
 0x126   : > { %v9947_v11 = vpop.f32.mrf.mxu1  ;;  %v1206_v8 = vsel %vm11948_vm3, %v1204_v35, %v1205_v56  ;;  %v1207_v28 = vrot.slane %v1205_v56, 4  ;;  %10210 = vmatprep.subr.bf16.mxu1 %v11076_v53  ;;  %v1264_v56 = vsel %vm11977_vm9, %v1256_v39, %v1263_v47  ;;  %v11106_v39 = vld [vmem:[%s14591_s1 + $0x6c0] sm:$0xff]   ;;  %v1275_v47 = vld [vmem:[%s11728_s8 + $0xc] sm:$0xf] }
 0x127   : > { %1216 = vst [vmem:[#allocation2 + $0x238] sm:$0xf] %v1206_v8  ;;  %v1273_v1 = vsel %vm11802_vm10, %v1264_v56, %v1272_v38  ;;  %v11104_v38 = vld [vmem:[%s14591_s1 + $0x688] sm:$0xff]   ;;  %1279 = vst [vmem:[#allocation2 + $0x60] sm:$0xf] %v1275_v47 }
 0x128   : > { %v9948_v29 = vpop.f32.mrf.mxu1  ;;  %v1209_v19 = vsel %vm11948_vm3, %v1207_v28, %v1208_v10  ;;  %v9922_v14 = vpop.f32.mrf.mxu0  ;;  %v11079_v28 = vld [vmem:[#allocation2 + $0x234] ss:$240 sps:$4 sm:$0xff]   ;;  %v11081_v10 = vld [vmem:[#allocation2 + $0x230] ss:$240 sps:$4 sm:$0xff]   ;;  %1274 = vst [vmem:[#allocation2 + $0x32c] sm:$0xf] %v1273_v1 }
 0x129   : > { %v12709_v33 = vadd.f32 %v9948_v29, %v9947_v11  ;;  %v1247_v11 = vrot.slane %v12675_v41, 4  ;;  %v1218_v24 = vsel %vm11802_vm10, %v1209_v19, %v1217_v62  ;;  %v11086_v41 = vld [vmem:[%s14591_s1 + $0x628] sm:$0xff]   ;;  %10211 = vmatpush3.bf16.msra.mxu1 %v11078_v58  ;;  %7912 = vmatprep.mubr.bf16.mxu0 %v11079_v28 }
 0x12a   : > { %v11083_v29 = vld [vmem:[%s14591_s1 + $0x6e8] sm:$0xff]   ;;  %1219 = vst [vmem:[#allocation2 + $0x328] sm:$0xf] %v1218_v24  ;;  %v9923_v46 = vpop.f32.mrf.mxu0  ;;  %10185 = vmatpush3.bf16.msra.mxu0 %v11086_v41  ;;  %v11100_v41 = vld [vmem:[%s14591_s1 + $0x690] sm:$0xff]  }
 0x12b   : > { %v12759_v53 = vadd.f32 %v9923_v46, %v9922_v14  ;;  %v1255_v55 = vsel %vm11977_vm9, %v1247_v11, %v1254_v37  ;;  %10186 = vmatprep.subr.bf16.mxu0 %v11089_v44  ;;  %10212 = vmatprep.subr.bf16.mxu1 %v11083_v29  ;;  %v11096_v11 = vld [vmem:[%s14591_s1 + $0x698] sm:$0xff]   ;;  %v11101_v14 = vld [vmem:[%s14591_s1 + $0x648] sm:$0xff]   ;;  %v11105_v37 = vld [vmem:[%s14591_s1 + $0x640] sm:$0xff]  }
 0x12c   : > { %v9925_v35 = vpop.f32.mrf.mxu0  ;;  %1271 = vst [vmem:[#allocation2 + $0x23c] sm:$0xf] %v1255_v55  ;;  %v9950_v7 = vpop.f32.mrf.mxu1  ;;  %7913 = vmatmul.mubr.bf16.gmra.mxu0 %v11081_v10  ;;  %v11102_v29 = vld [vmem:[%s14591_s1 + $0x6c8] sm:$0xff]   ;;  %v11107_v44 = vld [vmem:[%s14591_s1 + $0x600] sm:$0xff]  }
 0x12d   : > { %10213 = vmatpush3.bf16.msra.mxu1 %v11087_v48  ;;  %v11108_v46 = vld [vmem:[%s14591_s1 + $0x680] sm:$0xff]   ;;  %v1276_v48 = vld [vmem:[%s11728_s8 + $0x10] sm:$0xf]  ;;  %v1285_v55 = vld [vmem:[%s11728_s8 + $0xc] sm:$0xf] }
 0x12e   : > { %v9926_v8 = vpop.f32.mrf.mxu0  ;;  %10187 = vmatpush3.bf16.msra.mxu0 %v11091_v25  ;;  %v9951_v58 = vpop.f32.mrf.mxu1  ;;  %10214 = vmatprep.subr.bf16.mxu1 %v11090_v63  ;;  %1280 = vst [vmem:[#allocation2 + $0x150] sm:$0xf] %v1276_v48  ;;  %v1286_v25 = vld [vmem:[%s11728_s8 + $0x10] sm:$0xf]  ;;  %v1290_v56 = vshrl.u32 %v1285_v55, 16  ;;  %v1293_v63 = vshll.u32 %v1285_v55, 16 }
 0x12f   : > { %v12779_v62 = vadd.f32 %v9926_v8, %v9925_v35  ;;  %10188 = vmatprep.subr.bf16.mxu0 %v11093_v0  ;;  %v12787_v34 = vadd.f32 %v9951_v58, %v9950_v7  ;;  %v12835_v35 = vld [vmem:[%s11728_s8 + $0x14] sm:$0xf]  ;;  %v1299_v1 = vshll.u32 %v1286_v25, 16  ;;  %v1338_v7 = vld [vmem:[%s11728_s8 + $0xc] sm:$0xe]  ;;  %v9865_v8 = vadd.f32 %v12577_v6, %v12562_v57 }
 0x130   : > { %v9953_v12 = vpop.f32.mrf.mxu1  ;;  %v1309_v0 = vshll.u32 %v12835_v35, 16  ;;  %v1292_v28 = vrot.slane %v1290_v56, 4  ;;  %v1295_v10 = vrot.slane %v1293_v63, 5  ;;  %v12843_v58 = vld [vmem:[%s11728_s8 + $0x14] sm:$0xf] }
 0x131   : > { %10215 = vmatpush3.bf16.msra.mxu1 %v11092_v5  ;;  %v11088_v26 = vld [vmem:[#allocation2 + $0x238] ss:$240 sps:$4 sm:$0xff]   ;;  %v1303_v5 = vshrl.u32 %v1286_v25, 16  ;;  %v1371_v57 = vld [vmem:[%s11728_s8 + $0xc] sm:$0xe] }
 0x132   : > { %10189 = vmatpush3.bf16.msra.mxu0 %v11095_v4  ;;  %v9954_v19 = vpop.f32.mrf.mxu1  ;;  %10216 = vmatprep.subr.bf16.mxu1 %v11094_v2  ;;  %v1339_v2 = vld [vmem:[%s11728_s8 + $0x10] sm:$0xf]  ;;  %v9893_v4 = vadd.f32 %v12588_v9, %v12572_v61  ;;  %v1296_v6 = vor.u32 %v1295_v10, %v1292_v28  ;;  %v1377_v9 = vshrl.u32 %v1371_v57, 16  ;;  %v1313_v28 = vshrl.u32 %v12835_v35, 16 }
 0x133   : > { %10190 = vmatprep.subr.bf16.mxu0 %v11097_v13  ;;  %v12801_v23 = vadd.f32 %v9954_v19, %v9953_v12  ;;  %v11084_v24 = vld [vmem:[#allocation2 + $0x23c] ss:$240 sps:$4 sm:$0xff]   ;;  %v1301_v12 = vrot.slane %v1299_v1, 5  ;;  %v1305_v13 = vrot.slane %v1303_v5, 4  ;;  %v9077_v19 = vrot.slane %v1338_v7, 9 }
 0x134   : > { %7961 = vmatprep.mubr.bf16.mxu1 %v11084_v24  ;;  %v1353_v24 = vrot.slane %v12843_v58, 5  ;;  %v9918_v7 = vadd.f32 %v12679_v43, %v12670_v36  ;;  %v11119_v58 = vld [vmem:[%s14591_s1 + $0x770] sm:$0xff]  }
 0x135   : > { %10217 = vmatpush3.bf16.msra.mxu1 %v11096_v11  ;;  %v9871_v11 = vadd.f32 %v12660_v20, %v12643_v60  ;;  %v1306_v61 = vor.u32 %v1305_v13, %v1301_v12  ;;  %v11115_v20 = vld [vmem:[%s14591_s1 + $0x778] sm:$0xff]   ;;  %v9946_v13 = vadd.f32 %v12692_v59, %v12682_v50 }
 0x136   : > { %10191 = vmatpush3.bf16.msra.mxu0 %v11099_v22  ;;  %7962 = vmatmul.mubr.bf16.gmra.mxu1 %v11088_v26  ;;  %v1350_v22 = vrot.slane %v1339_v2, 5  ;;  %v1372_v26 = vld [vmem:[%s11728_s8 + $0x10] sm:$0xf] }
 0x137   : > { %10218 = vmatprep.subr.bf16.mxu1 %v11098_v15  ;;  %10192 = vmatprep.subr.bf16.mxu0 %v11101_v14  ;;  %v12849_v15 = vrot.slane %v1309_v0, 5  ;;  %v9899_v14 = vadd.f32 %v12677_v42, %v12662_v21  ;;  %v1386_v60 = vshrl.u32 %v1372_v26, 16  ;;  %v1379_v21 = vrot.slane %v1377_v9, 5 }
 0x139   : > { %10219 = vmatpush3.bf16.msra.mxu1 %v11100_v41  ;;  %v1373_v41 = vld [vmem:[%s11728_s8 + $0x14] sm:$0xf]  ;;  %v1388_v47 = vrot.slane %v1386_v60, 5 }
 0x13a   : > { %10193 = vmatpush3.bf16.msra.mxu0 %v11103_v31  ;;  %10220 = vmatprep.subr.bf16.mxu1 %v11102_v29  ;;  %v1380_v29 = vshll.u32 %v1371_v57, 16  ;;  %v1297_v31 = vrot.slane %v1296_v6, 4  ;;  %v1396_v56 = vshrl.u32 %v1373_v41, 16  ;;  %v1399_v0 = vshll.u32 %v1373_v41, 16 }
 0x13b   : > { %10194 = vmatprep.subr.bf16.mxu0 %v11105_v37  ;;  %v1352_v37 = vrot.slane %v1350_v22, 4 }
 0x13c   : > { %v1382_v42 = vrot.slane %v1380_v29, 6  ;;  %v1302_v48 = vsel %vm11757_vm5, %v1297_v31, %v1301_v12  ;;  %v1398_v2 = vrot.slane %v1396_v56, 5  ;;  %v9235_v12 = vld [vmem:[%s14592_s2] ss:$0 sm:$0xff]  ;;  %v1401_v6 = vrot.slane %v1399_v0, 6 }
 0x13d   : > { %10221 = vmatpush3.bf16.msra.mxu1 %v11104_v38  ;;  %v1351_v38 = vsel %vm11748_vm4, %v9077_v19, %v1350_v22  ;;  %v1354_v55 = vsel %vm11748_vm4, %v1352_v37, %v1353_v24  ;;  %1332 = vst [vmem:[#allocation2 + $0x64] sm:$0xf] %v1302_v48  ;;  %v7417_v22 = vadd.f32 %v12481_v32, %v9235_v12  ;;  %v1315_v32 = vrot.slane %v1313_v28, 4  ;;  %v1277_v31 = vld [vmem:[%s11728_s8 + $0x14] sm:$0xf] }
 0x13e   : > { %10195 = vmatpush3.bf16.msra.mxu0 %v11107_v44  ;;  %10222 = vmatprep.subr.bf16.mxu1 %v11106_v39  ;;  %v1389_v39 = vshll.u32 %v1372_v26, 16  ;;  %v11116_v44 = vld [vmem:[%s14591_s1 + $0x7f8] sm:$0xff]   ;;  %1365 = vst [vmem:[#allocation2 + $0x68] sm:$0xf] %v1351_v38  ;;  %v9972_v63 = vpop.f32.mrf.mxu0  ;;  %1366 = vst [vmem:[#allocation2 + $0x158] sm:$0xf] %v1354_v55  ;;  %v1383_v5 = vor.u32 %v1382_v42, %v1379_v21  ;;  %v7420_v26 = vadd.f32 %v9865_v8, %v9235_v12 }
 0x13f   : > { %10236 = vmatprep.subr.bf16.mxu0 %v11115_v20  ;;  %v7425_v36 = vadd.f32 %v12593_v3, %v9235_v12  ;;  %v7428_v43 = vadd.f32 %v9871_v11, %v9235_v12  ;;  %v12886_v29 = vor.u32 %v1401_v6, %v1398_v2  ;;  %v7466_v50 = vadd.f32 %v12503_v52, %v7417_v22  ;;  %v11117_v11 = vld [vmem:[%s14591_s1 + $0x738] sm:$0xff]  }
 0x140   : > { %v1391_v25 = vrot.slane %v1389_v39, 6  ;;  %v9973_v19 = vpop.f32.mrf.mxu0  ;;  %v1384_v57 = vrot.slane %v1383_v5, 4  ;;  %v7469_v59 = vadd.f32 %v9893_v4, %v7420_v26  ;;  %v1278_v38 = vld [vmem:[%s11728_s8 + $0x18] sm:$0xf]  ;;  %1281 = vst [vmem:[#allocation2 + $0x240] sm:$0xf] %v1277_v31 }
 0x141   : > { %10223 = vmatpush3.bf16.msra.mxu1 %v11108_v46  ;;  %v1307_v46 = vrot.slane %v1306_v61, 4  ;;  %v9974_v35 = vadd.f32 %v9973_v19, %v9972_v63  ;;  %v7474_v8 = vadd.f32 %v12604_v16, %v7425_v36  ;;  %v7477_v20 = vadd.f32 %v9899_v14, %v7428_v43  ;;  %v1282_v39 = vld [vmem:[#allocation2 + $0x330] sm:$0xf]  ;;  %v1341_v2 = vld [vmem:[%s11728_s8 + $0x18] sm:$0xf]  ;;  %v11126_v43 = vld [vmem:[%s14591_s1 + $0x768] sm:$0xff]  }
 0x142   : > { %10264 = vmatprep.subr.bf16.mxu1 %v11116_v44  ;;  %v1392_v10 = vor.u32 %v1391_v25, %v1388_v47  ;;  %v9975_v61 = vpop.f32.mrf.mxu0  ;;  %v7515_v37 = vadd.f32 %v9918_v7, %v7466_v50  ;;  %v7518_v52 = vadd.f32 %v12696_v51, %v7469_v59  ;;  %v1288_v44 = vld [vmem:[%s11728_s8 + $0x18] sm:$0xf]  ;;  %v1316_v16 = vor.u32 %v1315_v32, %v12849_v15  ;;  %v11109_v47 = vld [vmem:[#allocation2 + $0x60] ss:$240 sps:$4 sm:$0xff]   ;;  %v1335_v19 = vld [vmem:[#allocation2 + $0x334] sm:$0xf] }
 0x143   : > { %v1312_v1 = vsel %vm11757_vm5, %v1307_v46, %v12849_v15  ;;  %v1355_v14 = vrot.slane %v1353_v24, 4  ;;  %v7523_v46 = vadd.f32 %v12759_v53, %v7474_v8  ;;  %v7526_v21 = vadd.f32 %v12779_v62, %v7477_v20  ;;  %v1368_v22 = vld [vmem:[#allocation2 + $0x338] sm:$0xf]  ;;  %v11120_v8 = vld [vmem:[%s14591_s1 + $0x7f0] sm:$0xff]  }
 0x144   : > { %1333 = vst [vmem:[#allocation2 + $0x154] sm:$0xf] %v1312_v1  ;;  %v1394_v41 = vrot.slane %v1392_v10, 4  ;;  %v1393_v9 = vsel %vm11783_vm8, %v1384_v57, %v1392_v10  ;;  %v9976_v42 = vpop.f32.mrf.mxu0  ;;  %v1283_v51 = vsel %vm11802_vm10, %v1278_v38, %v1282_v39  ;;  %v1319_v55 = vshll.u32 %v1288_v44, 16  ;;  %v1342_v57 = vld [vmem:[%s11728_s8 + $0x1c] sm:$0x1] }
 0x145   : > { %1428 = vst [vmem:[#allocation2 + $0x6c] sm:$0xf] %v1393_v9  ;;  %v7564_v25 = vadd.f32 %v9946_v13, %v7515_v37  ;;  %v7567_v56 = vadd.f32 %v12709_v33, %v7518_v52  ;;  %1284 = vst [vmem:[#allocation2 + $0x330] sm:$0xf] %v1283_v51  ;;  %v1317_v53 = vrot.slane %v1316_v16, 4  ;;  %v1323_v15 = vshrl.u32 %v1288_v44, 16 }
 0x146   : > { %v1403_v3 = vsel %vm11783_vm8, %v1394_v41, %v12886_v29  ;;  %v12912_v62 = vadd.f32 %v12787_v34, %v7523_v46  ;;  %v12915_v24 = vadd.f32 %v12801_v23, %v7526_v21  ;;  %v11121_v33 = vld [vmem:[%s14591_s1 + $0x730] sm:$0xff]   ;;  %v1321_v1 = vrot.slane %v1319_v55, 5  ;;  %v11118_v23 = vld [vmem:[%s14591_s1 + $0x7b8] sm:$0xff]   ;;  %v11130_v39 = vld [vmem:[%s14591_s1 + $0x728] sm:$0xff]  }
 0x147   : > { %1429 = vst [vmem:[#allocation2 + $0x15c] sm:$0xf] %v1403_v3  ;;  %v7613_v5 = vadd.f32 %v9974_v35, %v7564_v25  ;;  %v9977_v7 = vadd.f32 %v9976_v42, %v9975_v61  ;;  %v1325_v10 = vrot.slane %v1323_v15, 4  ;;  %v1404_v34 = vrot.slane %v12886_v29, 4  ;;  %v1374_v61 = vld [vmem:[%s11728_s8 + $0x18] sm:$0xf] }
 0x148   : > { %v1322_v13 = vsel %vm11757_vm5, %v1317_v53, %v1321_v1  ;;  %v1356_v6 = vrot.slane %v1341_v2, 5  ;;  %v1359_v35 = vrot.slane %v1342_v57, 5  ;;  %v1375_v9 = vld [vmem:[%s11728_s8 + $0x1c] sm:$0x1]  ;;  %v11112_v29 = vld [vmem:[#allocation2 + $0x68] ss:$240 sps:$4 sm:$0xff]  }
 0x149   : > { %v10000_v60 = vpop.f32.mrf.mxu1  ;;  %v7616_v41 = vadd.f32 %v9977_v7, %v7567_v56  ;;  %v1326_v36 = vor.u32 %v1325_v10, %v1321_v1  ;;  %1334 = vst [vmem:[#allocation2 + $0x244] sm:$0xf] %v1322_v13  ;;  %v1406_v3 = vshrl.u32 %v1374_v61, 16  ;;  %v1416_v31 = vshrl.u32 %v1375_v9, 16  ;;  %v11122_v37 = vld [vmem:[%s14591_s1 + $0x7b0] sm:$0xff]   ;;  %v11127_v16 = vld [vmem:[%s14591_s1 + $0x7e8] sm:$0xff]  }
 0x14a   : > { %v1357_v59 = vsel %vm11748_vm4, %v1355_v14, %v1356_v6  ;;  %v9978_v38 = vpop.f32.mrf.mxu0  ;;  %v1431_v25 = vld [vmem:[#allocation2 + $0x33c] sm:$0xf]  ;;  %v11133_v56 = vld [vmem:[%s14591_s1 + $0x760] sm:$0xff]   ;;  %v11131_v53 = vld [vmem:[%s14591_s1 + $0x7a8] sm:$0xff]  }
 0x14b   : > { %v10001_v4 = vpop.f32.mrf.mxu1  ;;  %v11111_v48 = vld [vmem:[#allocation2 + $0x64] ss:$240 sps:$4 sm:$0xff]   ;;  %v1327_v20 = vrot.slane %v1326_v36, 4  ;;  %1367 = vst [vmem:[#allocation2 + $0x248] sm:$0xf] %v1357_v59  ;;  %v1408_v46 = vrot.slane %v1406_v3, 5 }
 0x14c   : > { %8002 = vmatprep.mubr.bf16.mxu0 %v11111_v48  ;;  %v10002_v0 = vadd.f32 %v10001_v4, %v10000_v60  ;;  %v1358_v60 = vrot.slane %v1356_v6, 4  ;;  %v1419_v4 = vshll.u32 %v1375_v9, 16  ;;  %v9979_v42 = vpop.f32.mrf.mxu0  ;;  %v11134_v7 = vld [vmem:[%s14591_s1 + $0x7e0] sm:$0xff]   ;;  %v11137_v2 = vld [vmem:[%s14591_s1 + $0x758] sm:$0xff]   ;;  %v11145_v3 = vld [vmem:[%s14591_s1 + $0x748] sm:$0xff]  }
 0x14d   : > { %v10003_v63 = vpop.f32.mrf.mxu1  ;;  %8003 = vmatmul.mubr.bf16.vlgmr.msra.gmra.mxu0 %v11109_v47  ;;  %v1336_v44 = vsel %vm11802_vm10, %v1327_v20, %v1335_v19  ;;  %v1418_v47 = vrot.slane %v1416_v31, 5  ;;  %v9980_v51 = vadd.f32 %v9979_v42, %v9978_v38  ;;  %v11125_v57 = vld [vmem:[#allocation2 + $0x240] ss:$240 sps:$4 sm:$0xff]   ;;  %v11138_v36 = vld [vmem:[%s14591_s1 + $0x7d8] sm:$0xff]   ;;  %v11147_v31 = vld [vmem:[%s14591_s1 + $0x708] sm:$0xff]  }
 0x14e   : > { %10237 = vmatpush3.bf16.msra.mxu0 %v11117_v11  ;;  %v12928_v26 = vadd.f32 %v10002_v0, %v7613_v5  ;;  %v11114_v50 = vld [vmem:[#allocation2 + $0x6c] ss:$240 sps:$4 sm:$0xff]   ;;  %v1409_v11 = vshll.u32 %v1374_v61, 16  ;;  %v1360_v52 = vsel %vm11748_vm4, %v1358_v60, %v1359_v35  ;;  %1337 = vst [vmem:[#allocation2 + $0x334] sm:$0xf] %v1336_v44  ;;  %v1421_v48 = vrot.slane %v1419_v4, 6 }
 0x14f   : > { %v10004_v28 = vpop.f32.mrf.mxu1  ;;  %10238 = vmatprep.subr.bf16.mxu0 %v11119_v58  ;;  %8051 = vmatprep.mubr.bf16.mxu1 %v11114_v50  ;;  %v1369_v14 = vsel %vm11802_vm10, %v1360_v52, %v1368_v22  ;;  %v7621_v15 = vadd.f32 %v9980_v51, %v12912_v62  ;;  %v11135_v5 = vld [vmem:[%s14591_s1 + $0x720] sm:$0xff]   ;;  %v11139_v22 = vld [vmem:[%s14591_s1 + $0x718] sm:$0xff]   ;;  %v11142_v50 = vld [vmem:[%s14591_s1 + $0x7d0] sm:$0xff]  }
 0x150   : > { %v10005_v12 = vadd.f32 %v10004_v28, %v10003_v63  ;;  %8052 = vmatmul.mubr.bf16.vlgmr.msra.gmra.mxu1 %v11112_v29  ;;  %v1411_v21 = vrot.slane %v1409_v11, 6  ;;  %1370 = vst [vmem:[#allocation2 + $0x338] sm:$0xf] %v1369_v14  ;;  %v9981_v63 = vpop.f32.mrf.mxu0  ;;  %v1422_v58 = vor.u32 %v1421_v48, %v1418_v47  ;;  %v11140_v61 = vld [vmem:[%s14591_s1 + $0x798] sm:$0xff]   ;;  %v11143_v29 = vld [vmem:[%s14591_s1 + $0x710] sm:$0xff]   ;;  %v11146_v11 = vld [vmem:[%s14591_s1 + $0x7c8] sm:$0xff]  }
 0x151   : > { %10265 = vmatpush3.bf16.msra.mxu1 %v11118_v23  ;;  %v10006_v28 = vpop.f32.mrf.mxu1  ;;  %v11144_v20 = vld [vmem:[%s14591_s1 + $0x790] sm:$0xff]   ;;  %v11148_v38 = vld [vmem:[%s14591_s1 + $0x788] sm:$0xff]   ;;  %v11150_v52 = vld [vmem:[%s14591_s1 + $0x7c0] sm:$0xff]  }
 0x152   : > { %v12937_v32 = vadd.f32 %v10005_v12, %v7616_v41  ;;  %10239 = vmatpush3.bf16.msra.mxu0 %v11121_v33  ;;  %10266 = vmatprep.subr.bf16.mxu1 %v11120_v8  ;;  %v1412_v55 = vor.u32 %v1411_v21, %v1408_v46  ;;  %v9982_v0 = vpop.f32.mrf.mxu0  ;;  %v11136_v12 = vld [vmem:[%s14591_s1 + $0x7a0] sm:$0xff]   ;;  %v1434_v44 = vld [vmem:[%s11728_s8 + $0xc] sm:$0xc]  ;;  %v13035_v14 = vld [vmem:[%s11728_s8 + $0x14] sm:$0xf] }
 0x153   : > { %10240 = vmatprep.subr.bf16.mxu0 %v11126_v43  ;;  %v9983_v10 = vadd.f32 %v9982_v0, %v9981_v63  ;;  %v10007_v23 = vpop.f32.mrf.mxu1  ;;  %v11151_v4 = vld [vmem:[%s14591_s1 + $0x700] sm:$0xff]   ;;  %v9078_v46 = vrot.slane %v1434_v44, 10  ;;  %v1449_v42 = vrot.slane %v13035_v14, 6  ;;  %v1467_v47 = vld [vmem:[%s11728_s8 + $0xc] sm:$0xc]  ;;  %v11159_v48 = vld [vmem:[%s14591_s1 + $0x878] sm:$0xff]  }
 0x154   : > { %v1413_v33 = vsel %vm11783_vm8, %v1404_v34, %v1412_v55  ;;  %v1414_v1 = vrot.slane %v1412_v55, 4  ;;  %v10008_v6 = vadd.f32 %v10007_v23, %v10006_v28  ;;  %v1468_v51 = vld [vmem:[%s11728_s8 + $0x10] sm:$0xf]  ;;  %v1469_v55 = vld [vmem:[%s11728_s8 + $0x14] sm:$0xf] }
 0x155   : > { %10267 = vmatpush3.bf16.msra.mxu1 %v11122_v37  ;;  %1430 = vst [vmem:[#allocation2 + $0x24c] sm:$0xf] %v1413_v33  ;;  %v7624_v13 = vadd.f32 %v9983_v10, %v12915_v24  ;;  %v11123_v19 = vld [vmem:[#allocation2 + $0x244] ss:$240 sps:$4 sm:$0xff]   ;;  %v10009_v41 = vpop.f32.mrf.mxu1  ;;  %v9079_v33 = vld [vmem:[%s11728_s8 + $0x20] sm:$0xf] }
 0x156   : > { %10241 = vmatpush3.bf16.msra.mxu0 %v11130_v39  ;;  %10268 = vmatprep.subr.bf16.mxu1 %v11127_v16  ;;  %v1423_v62 = vsel %vm11783_vm8, %v1414_v1, %v1422_v58  ;;  %v12989_v43 = vadd.f32 %v10008_v6, %v7621_v15  ;;  %v11141_v24 = vld [vmem:[%s14591_s1 + $0x750] sm:$0xff]   ;;  %v11149_v37 = vld [vmem:[%s14591_s1 + $0x740] sm:$0xff]   ;;  %v1485_v15 = vshll.u32 %v1468_v51, 16  ;;  %v11160_v1 = vld [vmem:[%s14591_s1 + $0x8f8] sm:$0xff]   ;;  %v1495_v28 = vshll.u32 %v1469_v55, 16 }
 0x157   : > { %10242 = vmatprep.subr.bf16.mxu0 %v11133_v56  ;;  %v1432_v34 = vsel %vm11802_vm10, %v1423_v62, %v1431_v25  ;;  %8010 = vmatprep.mubr.bf16.mxu0 %v11123_v19  ;;  %v10010_v35 = vpop.f32.mrf.mxu1  ;;  %v11132_v8 = vld [vmem:[#allocation2 + $0x248] ss:$240 sps:$4 sm:$0xff]   ;;  %v11152_v39 = vld [vmem:[%s14591_s1 + $0x780] sm:$0xff]   ;;  %v1435_v16 = vld [vmem:[%s11728_s8 + $0x10] sm:$0xf]  ;;  %v1473_v25 = vshrl.u32 %v1467_v47, 16 }
 0x158   : > { %1433 = vst [vmem:[#allocation2 + $0x33c] sm:$0xf] %v1432_v34  ;;  %8011 = vmatmul.mubr.bf16.gmra.mxu0 %v11125_v57  ;;  %v10011_v9 = vadd.f32 %v10010_v35, %v10009_v41  ;;  %v1446_v21 = vrot.slane %v1435_v16, 6  ;;  %v1476_v56 = vshll.u32 %v1467_v47, 16  ;;  %v9080_v10 = vld [vmem:[%s11728_s8 + $0x24] sm:$0xf] }
 0x159   : > { %10269 = vmatpush3.bf16.msra.mxu1 %v11131_v53  ;;  %v1482_v53 = vshrl.u32 %v1468_v51, 16  ;;  %1535 = vst [vmem:[#allocation2 + $0x78] sm:$0xf] %v9079_v33  ;;  %v1487_v34 = vrot.slane %v1485_v15, 7  ;;  %1536 = vst [vmem:[#allocation2 + $0x168] sm:$0xf] %v9080_v10 }
 0x15a   : > { %10243 = vmatpush3.bf16.msra.mxu0 %v11135_v5  ;;  %10270 = vmatprep.subr.bf16.mxu1 %v11134_v7  ;;  %v13003_v59 = vadd.f32 %v10011_v9, %v7624_v13  ;;  %v1447_v63 = vsel %vm11903_vm13, %v9078_v46, %v1446_v21  ;;  %v1448_v58 = vrot.slane %v1446_v21, 4  ;;  %v1475_v5 = vrot.slane %v1473_v25, 6  ;;  %v9084_v23 = vld [vmem:[%s11728_s8 + $0x24] sm:$0xf]  ;;  %v13058_v6 = vld [vmem:[%s11728_s8 + $0x28] sm:$0xf] }
 0x15b   : > { %10244 = vmatprep.subr.bf16.mxu0 %v11137_v2  ;;  %1461 = vst [vmem:[#allocation2 + $0x70] sm:$0xf] %v1447_v63  ;;  %v1478_v0 = vrot.slane %v1476_v56, 7  ;;  %v1492_v7 = vshrl.u32 %v1469_v55, 16  ;;  %v1484_v2 = vrot.slane %v1482_v53, 6  ;;  %v1497_v57 = vrot.slane %v1495_v28, 7 }
 0x15c   : > { %v1450_v62 = vsel %vm11903_vm13, %v1448_v58, %v1449_v42  ;;  %v1559_v35 = vshrl.u32 %v9084_v23, 16  ;;  %v1437_v25 = vld [vmem:[%s11728_s8 + $0x18] sm:$0xf]  ;;  %v1451_v56 = vrot.slane %v1449_v42, 4  ;;  %v1569_v58 = vshrl.u32 %v13058_v6, 16 }
 0x15d   : > { %10271 = vmatpush3.bf16.msra.mxu1 %v11136_v12  ;;  %v9083_v12 = vld [vmem:[%s11728_s8 + $0x20] sm:$0xf]  ;;  %1462 = vst [vmem:[#allocation2 + $0x160] sm:$0xf] %v1450_v62  ;;  %v1479_v13 = vor.u32 %v1478_v0, %v1475_v5  ;;  %v1494_v19 = vrot.slane %v1492_v7, 6  ;;  %v1488_v41 = vor.u32 %v1487_v34, %v1484_v2  ;;  %v1452_v15 = vrot.slane %v1437_v25, 6 }
 0x15e   : > { %10245 = vmatpush3.bf16.msra.mxu0 %v11139_v22  ;;  %10272 = vmatprep.subr.bf16.mxu1 %v11138_v36  ;;  %v1546_v22 = vshrl.u32 %v9083_v12, 16  ;;  %v1549_v36 = vshll.u32 %v9083_v12, 16  ;;  %v1438_v53 = vld [vmem:[%s11728_s8 + $0x1c] sm:$0x3]  ;;  %v1470_v0 = vld [vmem:[%s11728_s8 + $0x18] sm:$0xf] }
 0x15f   : > { %10246 = vmatprep.subr.bf16.mxu0 %v11141_v24  ;;  %v11128_v60 = vld [vmem:[#allocation2 + $0x24c] ss:$240 sps:$4 sm:$0xff]   ;;  %v1555_v24 = vshll.u32 %v9084_v23, 16  ;;  %v13060_v9 = vor.u32 %v1497_v57, %v1494_v19  ;;  %v1455_v5 = vrot.slane %v1438_v53, 6  ;;  %v1453_v42 = vsel %vm11903_vm13, %v1451_v56, %v1452_v15  ;;  %v1464_v62 = vld [vmem:[#allocation2 + $0x340] sm:$0xf] }
 0x160   : > { %8059 = vmatprep.mubr.bf16.mxu1 %v11128_v60  ;;  %v1490_v60 = vrot.slane %v1488_v41, 4  ;;  %v1471_v7 = vld [vmem:[%s11728_s8 + $0x1c] sm:$0x3]  ;;  %v1454_v10 = vrot.slane %v1452_v15, 4  ;;  %v1502_v2 = vshrl.u32 %v1470_v0, 16  ;;  %v1505_v34 = vshll.u32 %v1470_v0, 16 }
 0x161   : > { %10273 = vmatpush3.bf16.msra.mxu1 %v11140_v61  ;;  %v1480_v61 = vrot.slane %v1479_v13, 4  ;;  %v1500_v28 = vrot.slane %v13060_v9, 4  ;;  %1463 = vst [vmem:[#allocation2 + $0x250] sm:$0xf] %v1453_v42  ;;  %v1512_v19 = vshrl.u32 %v1471_v7, 16  ;;  %v11166_v56 = vld [vmem:[%s14591_s1 + $0x8b0] sm:$0xff]  }
 0x162   : > { %10247 = vmatpush3.bf16.msra.mxu0 %v11143_v29  ;;  %8060 = vmatmul.mubr.bf16.gmra.mxu1 %v11132_v8  ;;  %v1548_v29 = vrot.slane %v1546_v22, 4  ;;  %v1551_v8 = vrot.slane %v1549_v36, 5  ;;  %v11163_v22 = vld [vmem:[%s14591_s1 + $0x870] sm:$0xff]   ;;  %v1504_v36 = vrot.slane %v1502_v2, 6  ;;  %v1591_v2 = vld [vmem:[#allocation2 + $0x34c] sm:$0xf] }
 0x163   : > { %10274 = vmatprep.subr.bf16.mxu1 %v11142_v50  ;;  %10248 = vmatprep.subr.bf16.mxu0 %v11145_v3  ;;  %v1565_v50 = vshll.u32 %v13058_v6, 16  ;;  %v1561_v3 = vrot.slane %v1559_v35, 4  ;;  %v1515_v35 = vshll.u32 %v1471_v7, 16 }
 0x164   : > { %v11153_v23 = vld [vmem:[#allocation2 + $0x70] ss:$240 sps:$4 sm:$0xff]  }
 0x165   : > { %10275 = vmatpush3.bf16.msra.mxu1 %v11144_v20  ;;  %v1557_v20 = vrot.slane %v1555_v24, 5  ;;  %v1507_v24 = vrot.slane %v1505_v34, 7  ;;  %v11175_v34 = vld [vmem:[%s14591_s1 + $0x8a8] sm:$0xff]  }
 0x166   : > { %10249 = vmatpush3.bf16.msra.mxu0 %v11147_v31  ;;  %10276 = vmatprep.subr.bf16.mxu1 %v11146_v11  ;;  %v1489_v31 = vsel %vm11959_vm6, %v1480_v61, %v1488_v41  ;;  %v1456_v41 = vsel %vm11903_vm13, %v1454_v10, %v1455_v5 }
 0x167   : > { %10250 = vmatprep.subr.bf16.mxu0 %v11149_v37  ;;  %v1499_v37 = vsel %vm11959_vm6, %v1490_v60, %v13060_v9  ;;  %1524 = vst [vmem:[#allocation2 + $0x74] sm:$0xf] %v1489_v31  ;;  %v1465_v9 = vsel %vm11802_vm10, %v1456_v41, %v1464_v62  ;;  %v9081_v31 = vld [vmem:[%s11728_s8 + $0x28] sm:$0xf] }
 0x168   : > { %1525 = vst [vmem:[#allocation2 + $0x164] sm:$0xf] %v1499_v37  ;;  %1466 = vst [vmem:[#allocation2 + $0x340] sm:$0xf] %v1465_v9  ;;  %v11156_v37 = vld [vmem:[#allocation2 + $0x78] ss:$240 sps:$4 sm:$0xff]  }
 0x169   : > { %10277 = vmatpush3.bf16.msra.mxu1 %v11148_v38  ;;  %v10028_v11 = vpop.f32.mrf.mxu0  ;;  %v13065_v38 = vrot.slane %v1565_v50, 5  ;;  %v1571_v50 = vrot.slane %v1569_v58, 4  ;;  %1537 = vst [vmem:[#allocation2 + $0x258] sm:$0xf] %v9081_v31 }
 0x16a   : > { %10251 = vmatpush3.bf16.msra.mxu0 %v11151_v4  ;;  %10278 = vmatprep.subr.bf16.mxu1 %v11150_v52  ;;  %v1552_v52 = vor.u32 %v1551_v8, %v1548_v29  ;;  %v1562_v4 = vor.u32 %v1561_v3, %v1557_v20  ;;  %v1514_v29 = vrot.slane %v1512_v19, 6  ;;  %v11165_v8 = vld [vmem:[%s14591_s1 + $0x830] sm:$0xff]   ;;  %v1517_v3 = vrot.slane %v1515_v35, 7 }
 0x16b   : > { %10292 = vmatprep.subr.bf16.mxu0 %v11159_v48 }
 0x16c   : > { %v1553_v16 = vrot.slane %v1552_v52, 4  ;;  %v1563_v46 = vrot.slane %v1562_v4, 4  ;;  %v1572_v52 = vor.u32 %v1571_v50, %v13065_v38 }
 0x16d   : > { %10279 = vmatpush3.bf16.msra.mxu1 %v11152_v39  ;;  %v10029_v39 = vpop.f32.mrf.mxu0 }
 0x16e   : > { %10320 = vmatprep.subr.bf16.mxu1 %v11160_v1  ;;  %v10030_v44 = vadd.f32 %v10029_v39, %v10028_v11  ;;  %v1558_v51 = vsel %vm11757_vm5, %v1553_v16, %v1557_v20  ;;  %v1568_v55 = vsel %vm11757_vm5, %v1563_v46, %v13065_v38  ;;  %v11161_v1 = vld [vmem:[%s14591_s1 + $0x838] sm:$0xff]   ;;  %v1508_v20 = vor.u32 %v1507_v24, %v1504_v36  ;;  %v1527_v11 = vld [vmem:[#allocation2 + $0x344] sm:$0xf]  ;;  %v1538_v38 = vld [vmem:[#allocation2 + $0x348] sm:$0xf] }
 0x16f   : > { %v10031_v21 = vpop.f32.mrf.mxu0  ;;  %1588 = vst [vmem:[#allocation2 + $0x7c] sm:$0xf] %v1558_v51  ;;  %1589 = vst [vmem:[#allocation2 + $0x16c] sm:$0xf] %v1568_v55  ;;  %v11155_v13 = vld [vmem:[#allocation2 + $0x74] ss:$240 sps:$4 sm:$0xff]   ;;  %v1518_v46 = vor.u32 %v1517_v3, %v1514_v29 }
 0x170   : > { %v7711_v48 = vadd.f32 %v10030_v44, %v12928_v26  ;;  %8100 = vmatprep.mubr.bf16.mxu0 %v11155_v13  ;;  %v1509_v44 = vsel %vm11959_vm6, %v1500_v28, %v1508_v20  ;;  %v1510_v16 = vrot.slane %v1508_v20, 4  ;;  %v9086_v51 = vld [vmem:[%s11728_s8 + $0x2c] sm:$0xf]  ;;  %v1573_v55 = vrot.slane %v1572_v52, 4  ;;  %v11179_v13 = vld [vmem:[%s14591_s1 + $0x820] sm:$0xff]   ;;  %v11186_v52 = vld [vmem:[%s14591_s1 + $0x8d0] sm:$0xff]  }
 0x171   : > { %v10032_v63 = vpop.f32.mrf.mxu0  ;;  %8101 = vmatmul.mubr.bf16.vlgmr.msra.gmra.mxu0 %v11153_v23  ;;  %1526 = vst [vmem:[#allocation2 + $0x254] sm:$0xf] %v1509_v44  ;;  %v1575_v53 = vshll.u32 %v9086_v51, 16  ;;  %v1579_v15 = vshrl.u32 %v9086_v51, 16  ;;  %v11178_v23 = vld [vmem:[%s14591_s1 + $0x8e0] sm:$0xff]  }
 0x172   : > { %v10056_v47 = vpop.f32.mrf.mxu1  ;;  %v10033_v33 = vadd.f32 %v10032_v63, %v10031_v21  ;;  %10293 = vmatpush3.bf16.msra.mxu0 %v11161_v1  ;;  %v11170_v21 = vld [vmem:[%s14591_s1 + $0x868] sm:$0xff]   ;;  %v1519_v63 = vsel %vm11959_vm6, %v1510_v16, %v1518_v46  ;;  %v11180_v24 = vld [vmem:[%s14591_s1 + $0x8a0] sm:$0xff]   ;;  %v11188_v46 = vld [vmem:[%s14591_s1 + $0x890] sm:$0xff]  }
 0x173   : > { %10294 = vmatprep.subr.bf16.mxu0 %v11163_v22  ;;  %v1528_v1 = vsel %vm11802_vm10, %v1519_v63, %v1527_v11  ;;  %v1577_v0 = vrot.slane %v1575_v53, 5  ;;  %v1581_v7 = vrot.slane %v1579_v15, 4  ;;  %v11169_v29 = vld [vmem:[#allocation2 + $0x250] ss:$240 sps:$4 sm:$0xff]   ;;  %v11184_v11 = vld [vmem:[%s14591_s1 + $0x898] sm:$0xff]  }
 0x174   : > { %v10057_v26 = vpop.f32.mrf.mxu1  ;;  %v7714_v6 = vadd.f32 %v10033_v33, %v12937_v32  ;;  %v11162_v32 = vld [vmem:[%s14591_s1 + $0x8b8] sm:$0xff]   ;;  %v10034_v25 = vpop.f32.mrf.mxu0  ;;  %v11177_v33 = vld [vmem:[%s14591_s1 + $0x860] sm:$0xff]   ;;  %1529 = vst [vmem:[#allocation2 + $0x344] sm:$0xf] %v1528_v1  ;;  %v13210_v53 = vld [vmem:[%s11728_s8 + $0x28] sm:$0xf] }
 0x175   : > { %v10058_v14 = vadd.f32 %v10057_v26, %v10056_v47  ;;  %v9082_v47 = vld [vmem:[%s11728_s8 + $0x2c] sm:$0xf]  ;;  %v1578_v10 = vsel %vm11757_vm5, %v1573_v55, %v1577_v0  ;;  %v1582_v62 = vor.u32 %v1581_v7, %v1577_v0  ;;  %v11193_v51 = vld [vmem:[%s14591_s1 + $0x840] sm:$0xff]   ;;  %v1609_v1 = vrot.slane %v13210_v53, 5  ;;  %v9095_v7 = vld [vmem:[%s11728_s8 + $0x28] sm:$0xf] }
 0x176   : > { %v10059_v12 = vpop.f32.mrf.mxu1  ;;  %v11158_v39 = vld [vmem:[#allocation2 + $0x7c] ss:$240 sps:$4 sm:$0xff]   ;;  %v1539_v58 = vsel %vm11802_vm10, %v9082_v47, %v1538_v38  ;;  %10295 = vmatpush3.bf16.msra.mxu0 %v11165_v8  ;;  %v10035_v5 = vpop.f32.mrf.mxu0  ;;  %1590 = vst [vmem:[#allocation2 + $0x25c] sm:$0xf] %v1578_v10  ;;  %v11194_v55 = vld [vmem:[%s14591_s1 + $0x8c0] sm:$0xff]  }
 0x177   : > { %v13089_v57 = vadd.f32 %v10058_v14, %v7711_v48  ;;  %v11164_v48 = vld [vmem:[%s14591_s1 + $0x8f0] sm:$0xff]   ;;  %8149 = vmatprep.mubr.bf16.mxu1 %v11158_v39  ;;  %v11174_v26 = vld [vmem:[%s14591_s1 + $0x828] sm:$0xff]   ;;  %1540 = vst [vmem:[#allocation2 + $0x348] sm:$0xf] %v1539_v58  ;;  %10296 = vmatprep.subr.bf16.mxu0 %v11170_v21  ;;  %v10036_v28 = vadd.f32 %v10035_v5, %v10034_v25  ;;  %v11182_v8 = vld [vmem:[%s14591_s1 + $0x8d8] sm:$0xff]  }
 0x178   : > { %v10060_v61 = vpop.f32.mrf.mxu1  ;;  %8150 = vmatmul.mubr.bf16.vlgmr.msra.gmra.mxu1 %v11156_v37  ;;  %v11171_v14 = vld [vmem:[%s14591_s1 + $0x8e8] sm:$0xff]   ;;  %v10037_v42 = vpop.f32.mrf.mxu0  ;;  %v11187_v37 = vld [vmem:[%s14591_s1 + $0x810] sm:$0xff]   ;;  %v11195_v25 = vld [vmem:[%s14591_s1 + $0x800] sm:$0xff]  }
 0x179   : > { %v10061_v60 = vadd.f32 %v10060_v61, %v10059_v12  ;;  %10321 = vmatpush3.bf16.msra.mxu1 %v11162_v32  ;;  %v7719_v12 = vadd.f32 %v10036_v28, %v12989_v43  ;;  %v11181_v43 = vld [vmem:[%s14591_s1 + $0x858] sm:$0xff]   ;;  %v11189_v21 = vld [vmem:[%s14591_s1 + $0x848] sm:$0xff]   ;;  %v9087_v63 = vld [vmem:[%s11728_s8 + $0x20] sm:$0xe] }
 0x17a   : > { %10322 = vmatprep.subr.bf16.mxu1 %v11164_v48  ;;  %10297 = vmatpush3.bf16.msra.mxu0 %v11174_v26  ;;  %v10038_v19 = vpop.f32.mrf.mxu0  ;;  %v10062_v22 = vpop.f32.mrf.mxu1  ;;  %v11190_v47 = vld [vmem:[%s14591_s1 + $0x8c8] sm:$0xff]   ;;  %v9088_v58 = vld [vmem:[%s11728_s8 + $0x24] sm:$0xf]  ;;  %v9092_v15 = vrot.slane %v9087_v63, 9  ;;  %v11203_v26 = vld [vmem:[%s14591_s1 + $0x978] sm:$0xff]  }
 0x17b   : > { %v13107_v4 = vadd.f32 %v10061_v60, %v7714_v6  ;;  %v1583_v6 = vrot.slane %v1582_v62, 4  ;;  %10298 = vmatprep.subr.bf16.mxu0 %v11177_v33  ;;  %v10039_v41 = vadd.f32 %v10038_v19, %v10037_v42  ;;  %v11167_v9 = vld [vmem:[#allocation2 + $0x254] ss:$240 sps:$4 sm:$0xff]   ;;  %v11183_v60 = vld [vmem:[%s14591_s1 + $0x818] sm:$0xff]   ;;  %v11191_v48 = vld [vmem:[%s14591_s1 + $0x808] sm:$0xff]   ;;  %v1606_v33 = vrot.slane %v9088_v58, 5 }
 0x17c   : > { %v10063_v35 = vpop.f32.mrf.mxu1  ;;  %8108 = vmatprep.mubr.bf16.mxu0 %v11167_v9  ;;  %v11192_v38 = vld [vmem:[%s14591_s1 + $0x888] sm:$0xff]   ;;  %v9093_v5 = vld [vmem:[%s11728_s8 + $0x20] sm:$0xe]  ;;  %v9094_v0 = vld [vmem:[%s11728_s8 + $0x24] sm:$0xf] }
 0x17d   : > { %10323 = vmatpush3.bf16.msra.mxu1 %v11166_v56  ;;  %v1592_v36 = vsel %vm11802_vm10, %v1583_v6, %v1591_v2  ;;  %v7722_v61 = vadd.f32 %v10039_v41, %v13003_v59  ;;  %v10064_v50 = vadd.f32 %v10063_v35, %v10062_v22  ;;  %8109 = vmatmul.mubr.bf16.gmra.mxu0 %v11169_v29  ;;  %v11185_v59 = vld [vmem:[%s14591_s1 + $0x850] sm:$0xff]   ;;  %v11196_v56 = vld [vmem:[%s14591_s1 + $0x880] sm:$0xff]   ;;  %v1633_v28 = vshrl.u32 %v9093_v5, 16 }
 0x17e   : > { %10324 = vmatprep.subr.bf16.mxu1 %v11171_v14  ;;  %1593 = vst [vmem:[#allocation2 + $0x34c] sm:$0xf] %v1592_v36  ;;  %10299 = vmatpush3.bf16.msra.mxu0 %v11179_v13  ;;  %v10065_v32 = vpop.f32.mrf.mxu1  ;;  %v11176_v16 = vld [vmem:[#allocation2 + $0x258] ss:$240 sps:$4 sm:$0xff]   ;;  %v1636_v14 = vshll.u32 %v9093_v5, 16  ;;  %v1642_v42 = vshrl.u32 %v9094_v0, 16  ;;  %v1607_v62 = vsel %vm11748_vm4, %v9092_v15, %v1606_v33 }
 0x17f   : > { %10300 = vmatprep.subr.bf16.mxu0 %v11181_v43  ;;  %v13164_v20 = vadd.f32 %v10064_v50, %v7719_v12  ;;  %v1645_v10 = vshll.u32 %v9094_v0, 16  ;;  %v1608_v2 = vrot.slane %v1606_v33, 4  ;;  %v1655_v12 = vshll.u32 %v9095_v7, 16  ;;  %v11204_v13 = vld [vmem:[%s14591_s1 + $0x9f8] sm:$0xff]   ;;  %1621 = vst [vmem:[#allocation2 + $0x80] sm:$0xf] %v1607_v62 }
 0x180   : > { %v10066_v3 = vpop.f32.mrf.mxu1  ;;  %v1635_v19 = vrot.slane %v1633_v28, 5  ;;  %v1638_v6 = vrot.slane %v1636_v14, 6  ;;  %v1644_v22 = vrot.slane %v1642_v42, 5  ;;  %v9099_v43 = vld [vmem:[%s11728_s8 + $0x24] sm:$0xf] }
 0x181   : > { %10325 = vmatpush3.bf16.msra.mxu1 %v11175_v34  ;;  %v10067_v31 = vadd.f32 %v10066_v3, %v10065_v32  ;;  %v1652_v34 = vshrl.u32 %v9095_v7, 16  ;;  %v1647_v41 = vrot.slane %v1645_v10, 6  ;;  %v1610_v36 = vsel %vm11748_vm4, %v1608_v2, %v1609_v1 }
 0x182   : > { %10326 = vmatprep.subr.bf16.mxu1 %v11178_v23  ;;  %10301 = vmatpush3.bf16.msra.mxu0 %v11183_v60  ;;  %v9098_v23 = vld [vmem:[%s11728_s8 + $0x20] sm:$0xc]  ;;  %v1657_v35 = vrot.slane %v1655_v12, 6  ;;  %1622 = vst [vmem:[#allocation2 + $0x170] sm:$0xf] %v1610_v36  ;;  %v1639_v29 = vor.u32 %v1638_v6, %v1635_v19  ;;  %v1702_v60 = vrot.slane %v9099_v43, 6 }
 0x183   : > { %10302 = vmatprep.subr.bf16.mxu0 %v11185_v59  ;;  %v13178_v39 = vadd.f32 %v10067_v31, %v7722_v61  ;;  %v13231_v61 = vld [vmem:[%s11728_s8 + $0x28] sm:$0xf]  ;;  %v9103_v9 = vrot.slane %v9098_v23, 10  ;;  %v1648_v50 = vor.u32 %v1647_v41, %v1644_v22  ;;  %v9105_v59 = vld [vmem:[%s11728_s8 + $0x24] sm:$0xf]  ;;  %v1611_v43 = vrot.slane %v1609_v1, 4 }
 0x184   : > { %v1705_v32 = vrot.slane %v13231_v61, 6  ;;  %v9090_v19 = vld [vmem:[%s11728_s8 + $0x2c] sm:$0xf]  ;;  %v9091_v6 = vld [vmem:[%s11728_s8 + $0x30] sm:$0x1] }
 0x185   : > { %10327 = vmatpush3.bf16.msra.mxu1 %v11180_v24  ;;  %v11172_v44 = vld [vmem:[#allocation2 + $0x25c] ss:$240 sps:$4 sm:$0xff]   ;;  %v1654_v24 = vrot.slane %v1652_v34, 5  ;;  %v1612_v36 = vrot.slane %v9090_v19, 5  ;;  %v11207_v1 = vld [vmem:[%s14591_s1 + $0x970] sm:$0xff]  }
 0x186   : > { %10328 = vmatprep.subr.bf16.mxu1 %v11182_v8  ;;  %10303 = vmatpush3.bf16.msra.mxu0 %v11187_v37  ;;  %v9104_v8 = vld [vmem:[%s11728_s8 + $0x20] sm:$0xc] }
 0x187   : > { %8157 = vmatprep.mubr.bf16.mxu1 %v11172_v44  ;;  %10304 = vmatprep.subr.bf16.mxu0 %v11189_v21  ;;  %v13236_v3 = vor.u32 %v1657_v35, %v1654_v24  ;;  %v1729_v31 = vshrl.u32 %v9104_v8, 16  ;;  %v1732_v37 = vshll.u32 %v9104_v8, 16  ;;  %v1640_v44 = vrot.slane %v1639_v29, 4  ;;  %v1624_v35 = vld [vmem:[#allocation2 + $0x350] sm:$0xf] }
 0x188   : > { %8158 = vmatmul.mubr.bf16.gmra.mxu1 %v11176_v16  ;;  %v1650_v16 = vrot.slane %v1648_v50, 4  ;;  %v1704_v21 = vrot.slane %v1702_v60, 4  ;;  %v1615_v24 = vrot.slane %v9091_v6, 5 }
 0x189   : > { %10329 = vmatpush3.bf16.msra.mxu1 %v11184_v11  ;;  %v9106_v11 = vld [vmem:[%s11728_s8 + $0x28] sm:$0xf]  ;;  %v11197_v29 = vld [vmem:[#allocation2 + $0x80] ss:$240 sps:$4 sm:$0xff]  }
 0x18a   : > { %10330 = vmatprep.subr.bf16.mxu1 %v11186_v52  ;;  %10305 = vmatpush3.bf16.msra.mxu0 %v11191_v48  ;;  %v1738_v52 = vshrl.u32 %v9105_v59, 16  ;;  %v1734_v48 = vrot.slane %v1732_v37, 7  ;;  %v1706_v63 = vsel %vm11903_vm13, %v1704_v21, %v1705_v32  ;;  %v1748_v58 = vshrl.u32 %v9106_v11, 16  ;;  %v11209_v21 = vld [vmem:[%s14591_s1 + $0x930] sm:$0xff]  }
 0x18b   : > { %10306 = vmatprep.subr.bf16.mxu0 %v11193_v51  ;;  %v1741_v51 = vshll.u32 %v9105_v59, 16  ;;  %1718 = vst [vmem:[#allocation2 + $0x178] sm:$0xf] %v1706_v63  ;;  %v1751_v33 = vshll.u32 %v9106_v11, 16  ;;  %v1613_v59 = vsel %vm11748_vm4, %v1611_v43, %v1612_v36  ;;  %v1614_v11 = vrot.slane %v1612_v36, 4 }
 0x18c   : > { %v1750_v0 = vrot.slane %v1748_v58, 6  ;;  %v1660_v37 = vrot.slane %v13236_v3, 4  ;;  %1623 = vst [vmem:[#allocation2 + $0x260] sm:$0xf] %v1613_v59  ;;  %v11214_v58 = vld [vmem:[%s14591_s1 + $0x968] sm:$0xff]  }
 0x18d   : > { %10331 = vmatpush3.bf16.msra.mxu1 %v11188_v46  ;;  %v1703_v46 = vsel %vm11903_vm13, %v9103_v9, %v1702_v60  ;;  %v1753_v42 = vrot.slane %v1751_v33, 7 }
 0x18e   : > { %10332 = vmatprep.subr.bf16.mxu1 %v11190_v47  ;;  %10307 = vmatpush3.bf16.msra.mxu0 %v11195_v25  ;;  %1717 = vst [vmem:[#allocation2 + $0x88] sm:$0xf] %v1703_v46  ;;  %v1731_v47 = vrot.slane %v1729_v31, 6  ;;  %v1649_v25 = vsel %vm11783_vm8, %v1640_v44, %v1648_v50  ;;  %v9096_v31 = vld [vmem:[%s11728_s8 + $0x2c] sm:$0xf] }
 0x18f   : > { %10348 = vmatprep.subr.bf16.mxu0 %v11203_v26  ;;  %1684 = vst [vmem:[#allocation2 + $0x84] sm:$0xf] %v1649_v25  ;;  %v1743_v26 = vrot.slane %v1741_v51, 7  ;;  %v13253_v12 = vor.u32 %v1753_v42, %v1750_v0  ;;  %v1662_v44 = vshrl.u32 %v9096_v31, 16  ;;  %v11206_v25 = vld [vmem:[%s14591_s1 + $0x9b8] sm:$0xff]  }
 0x190   : > { %v1735_v15 = vor.u32 %v1734_v48, %v1731_v47  ;;  %v9102_v0 = vld [vmem:[%s11728_s8 + $0x30] sm:$0x3] }
 0x191   : > { %10333 = vmatpush3.bf16.msra.mxu1 %v11192_v38  ;;  %v1740_v38 = vrot.slane %v1738_v52, 6  ;;  %v9097_v52 = vld [vmem:[%s11728_s8 + $0x30] sm:$0x1] }
 0x192   : > { %10334 = vmatprep.subr.bf16.mxu1 %v11194_v55  ;;  %v10084_v55 = vpop.f32.mrf.mxu0  ;;  %v1736_v28 = vrot.slane %v1735_v15, 4  ;;  %v1672_v47 = vshrl.u32 %v9097_v52, 16  ;;  %v1675_v48 = vshll.u32 %v9097_v52, 16  ;;  %v9101_v15 = vld [vmem:[%s11728_s8 + $0x2c] sm:$0xf]  ;;  %v11221_v52 = vld [vmem:[%s14591_s1 + $0x960] sm:$0xff]  }
 0x193   : > { %v1744_v14 = vor.u32 %v1743_v26, %v1740_v38  ;;  %v11208_v26 = vld [vmem:[%s14591_s1 + $0x9f0] sm:$0xff]  }
 0x194   : > { %v10085_v5 = vpop.f32.mrf.mxu0  ;;  %v1677_v63 = vrot.slane %v1675_v48, 6  ;;  %v11219_v48 = vld [vmem:[%s14591_s1 + $0x9a8] sm:$0xff]  }
 0x195   : > { %10335 = vmatpush3.bf16.msra.mxu1 %v11196_v56  ;;  %v1659_v56 = vsel %vm11783_vm8, %v1650_v16, %v13236_v3  ;;  %v10086_v7 = vadd.f32 %v10085_v5, %v10084_v55  ;;  %v1745_v2 = vsel %vm11959_vm6, %v1736_v28, %v1744_v14  ;;  %v1746_v34 = vrot.slane %v1744_v14, 4  ;;  %v1687_v5 = vld [vmem:[#allocation2 + $0x354] sm:$0xf]  ;;  %v1720_v28 = vld [vmem:[#allocation2 + $0x358] sm:$0xf] }
 0x196   : > { %10376 = vmatprep.subr.bf16.mxu1 %v11204_v13  ;;  %1685 = vst [vmem:[#allocation2 + $0x174] sm:$0xf] %v1659_v56  ;;  %v10087_v10 = vpop.f32.mrf.mxu0  ;;  %1780 = vst [vmem:[#allocation2 + $0x8c] sm:$0xf] %v1745_v2  ;;  %v1665_v16 = vshll.u32 %v9096_v31, 16  ;;  %v1616_v3 = vsel %vm11748_vm4, %v1614_v11, %v1615_v24  ;;  %v1674_v56 = vrot.slane %v1672_v47, 5 }
 0x197   : > { %v7809_v62 = vadd.f32 %v10086_v7, %v13089_v57  ;;  %v1755_v41 = vsel %vm11959_vm6, %v1746_v34, %v13253_v12  ;;  %v11205_v57 = vld [vmem:[%s14591_s1 + $0x938] sm:$0xff]   ;;  %v1625_v61 = vsel %vm11802_vm10, %v1616_v3, %v1624_v35  ;;  %v1708_v7 = vrot.slane %v9101_v15, 6  ;;  %v11215_v31 = vld [vmem:[%s14591_s1 + $0x9e8] sm:$0xff]   ;;  %v11224_v15 = vld [vmem:[%s14591_s1 + $0x9a0] sm:$0xff]  }
 0x198   : > { %v10088_v13 = vpop.f32.mrf.mxu0  ;;  %1781 = vst [vmem:[#allocation2 + $0x17c] sm:$0xf] %v1755_v41  ;;  %v1667_v51 = vrot.slane %v1665_v16, 6  ;;  %1626 = vst [vmem:[#allocation2 + $0x350] sm:$0xf] %v1625_v61  ;;  %v1756_v14 = vrot.slane %v13253_v12, 4  ;;  %v1678_v34 = vor.u32 %v1677_v63, %v1674_v56 }
 0x199   : > { %v10089_v22 = vadd.f32 %v10088_v13, %v10087_v10  ;;  %v9107_v41 = vld [vmem:[%s11728_s8 + $0x2c] sm:$0xf]  ;;  %v11210_v12 = vld [vmem:[%s14591_s1 + $0x9b0] sm:$0xff]   ;;  %v1783_v47 = vld [vmem:[#allocation2 + $0x35c] sm:$0xf] }
 0x19a   : > { %v10112_v23 = vpop.f32.mrf.mxu1  ;;  %v1758_v36 = vshrl.u32 %v9107_v41, 16  ;;  %v1761_v24 = vshll.u32 %v9107_v41, 16 }
 0x19b   : > { %v7812_v60 = vadd.f32 %v10089_v22, %v13107_v4  ;;  %v1707_v4 = vrot.slane %v1705_v32, 4  ;;  %v1664_v32 = vrot.slane %v1662_v44, 5  ;;  %v1710_v22 = vrot.slane %v1708_v7, 4 }
 0x19c   : > { %v10113_v9 = vpop.f32.mrf.mxu1 }
 0x19d   : > { %v10114_v50 = vadd.f32 %v10113_v9, %v10112_v23  ;;  %v11199_v8 = vld [vmem:[#allocation2 + $0x84] ss:$240 sps:$4 sm:$0xff]   ;;  %v1668_v33 = vor.u32 %v1667_v51, %v1664_v32  ;;  %v1711_v23 = vrot.slane %v9102_v0, 6  ;;  %v1709_v6 = vsel %vm11903_vm13, %v1707_v4, %v1708_v7 }
 0x19e   : > { %v10115_v53 = vpop.f32.mrf.mxu1  ;;  %8198 = vmatprep.mubr.bf16.mxu0 %v11199_v8  ;;  %1719 = vst [vmem:[#allocation2 + $0x268] sm:$0xf] %v1709_v6  ;;  %v11223_v32 = vld [vmem:[%s14591_s1 + $0x920] sm:$0xff]   ;;  %v11231_v6 = vld [vmem:[%s14591_s1 + $0x910] sm:$0xff]  }
 0x19f   : > { %v13276_v46 = vadd.f32 %v10114_v50, %v7809_v62  ;;  %8199 = vmatmul.mubr.bf16.vlgmr.msra.gmra.mxu0 %v11197_v29  ;;  %v11200_v62 = vld [vmem:[#allocation2 + $0x88] ss:$240 sps:$4 sm:$0xff]   ;;  %v11202_v2 = vld [vmem:[#allocation2 + $0x8c] ss:$240 sps:$4 sm:$0xff]   ;;  %v1669_v13 = vsel %vm11783_vm8, %v1660_v37, %v1668_v33  ;;  %v1670_v19 = vrot.slane %v1668_v33, 4 }
 0x1a0   : > { %v10116_v38 = vpop.f32.mrf.mxu1  ;;  %10349 = vmatpush3.bf16.msra.mxu0 %v11205_v57  ;;  %v9108_v57 = vld [vmem:[%s11728_s8 + $0x30] sm:$0x3]  ;;  %8247 = vmatprep.mubr.bf16.mxu1 %v11202_v2  ;;  %1686 = vst [vmem:[#allocation2 + $0x264] sm:$0xf] %v1669_v13  ;;  %v11218_v29 = vld [vmem:[%s14591_s1 + $0x928] sm:$0xff]   ;;  %v11228_v2 = vld [vmem:[%s14591_s1 + $0x998] sm:$0xff]  }
 0x1a1   : > { %v10117_v55 = vadd.f32 %v10116_v38, %v10115_v53  ;;  %10350 = vmatprep.subr.bf16.mxu0 %v11207_v1  ;;  %v1768_v35 = vshrl.u32 %v9108_v57, 16  ;;  %v1771_v9 = vshll.u32 %v9108_v57, 16  ;;  %8248 = vmatmul.mubr.bf16.vlgmr.msra.gmra.mxu1 %v11200_v62  ;;  %v1679_v50 = vsel %vm11783_vm8, %v1670_v19, %v1678_v34  ;;  %v11230_v13 = vld [vmem:[%s14591_s1 + $0x9d0] sm:$0xff]  }
 0x1a2   : > { %10377 = vmatpush3.bf16.msra.mxu1 %v11206_v25  ;;  %v1688_v11 = vsel %vm11802_vm10, %v1679_v50, %v1687_v5  ;;  %v1760_v53 = vrot.slane %v1758_v36, 6  ;;  %v1763_v1 = vrot.slane %v1761_v24, 7  ;;  %v11222_v25 = vld [vmem:[%s14591_s1 + $0x9e0] sm:$0xff]   ;;  %v11235_v36 = vld [vmem:[%s14591_s1 + $0x908] sm:$0xff]  }
 0x1a3   : > { %v13297_v42 = vadd.f32 %v10117_v55, %v7812_v60  ;;  %v1712_v60 = vsel %vm11903_vm13, %v1710_v22, %v1711_v23  ;;  %10378 = vmatprep.subr.bf16.mxu1 %v11208_v26  ;;  %1689 = vst [vmem:[#allocation2 + $0x354] sm:$0xf] %v1688_v11  ;;  %v1770_v44 = vrot.slane %v1768_v35, 6  ;;  %v1773_v16 = vrot.slane %v1771_v9, 7  ;;  %v11225_v26 = vld [vmem:[%s14591_s1 + $0x958] sm:$0xff]   ;;  %v11229_v23 = vld [vmem:[%s14591_s1 + $0x950] sm:$0xff]  }
 0x1a4   : > { %10351 = vmatpush3.bf16.msra.mxu0 %v11209_v21  ;;  %v1721_v37 = vsel %vm11802_vm10, %v1712_v60, %v1720_v28  ;;  %v1764_v3 = vor.u32 %v1763_v1, %v1760_v53  ;;  %v11213_v28 = vld [vmem:[#allocation2 + $0x260] ss:$240 sps:$4 sm:$0xff]   ;;  %v11236_v24 = vld [vmem:[%s14591_s1 + $0x988] sm:$0xff]  }
 0x1a5   : > { %10352 = vmatprep.subr.bf16.mxu0 %v11214_v58  ;;  %1722 = vst [vmem:[#allocation2 + $0x358] sm:$0xf] %v1721_v37  ;;  %v1774_v61 = vor.u32 %v1773_v16, %v1770_v44  ;;  %v11232_v22 = vld [vmem:[%s14591_s1 + $0x990] sm:$0xff]   ;;  %v11237_v35 = vld [vmem:[%s14591_s1 + $0x940] sm:$0xff]   ;;  %v9117_v44 = vld [vmem:[%s11728_s8 + $0x28] sm:$0xf] }
 0x1a6   : > { %10379 = vmatpush3.bf16.msra.mxu1 %v11210_v12  ;;  %v1766_v55 = vrot.slane %v1764_v3, 4  ;;  %v11234_v12 = vld [vmem:[%s14591_s1 + $0x9c8] sm:$0xff]   ;;  %v11238_v9 = vld [vmem:[%s14591_s1 + $0x9c0] sm:$0xff]  }
 0x1a7   : > { %10380 = vmatprep.subr.bf16.mxu1 %v11215_v31  ;;  %v11240_v50 = vld [vmem:[%s14591_s1 + $0x980] sm:$0xff]   ;;  %v11247_v31 = vld [vmem:[%s14591_s1 + $0xa78] sm:$0xff]  }
 0x1a8   : > { %10353 = vmatpush3.bf16.msra.mxu0 %v11218_v29  ;;  %v1775_v58 = vsel %vm11959_vm6, %v1766_v55, %v1774_v61  ;;  %v11239_v29 = vld [vmem:[%s14591_s1 + $0x900] sm:$0xff]   ;;  %v1842_v61 = vshll.u32 %v9117_v44, 16  ;;  %v9122_v55 = vld [vmem:[%s11728_s8 + $0x28] sm:$0xf] }
 0x1a9   : > { %10354 = vmatprep.subr.bf16.mxu0 %v11221_v52  ;;  %v1784_v5 = vsel %vm11802_vm10, %v1775_v58, %v1783_v47  ;;  %v9109_v60 = vld [vmem:[%s11728_s8 + $0x20] sm:$0x8]  ;;  %v9116_v52 = vld [vmem:[%s11728_s8 + $0x24] sm:$0xf]  ;;  %1879 = vst [vmem:[#allocation2 + $0x188] sm:$0xf] %v9122_v55 }
 0x1aa   : > { %v11211_v7 = vld [vmem:[#allocation2 + $0x264] ss:$240 sps:$4 sm:$0xff]   ;;  %1785 = vst [vmem:[#allocation2 + $0x35c] sm:$0xf] %v1784_v5  ;;  %10381 = vmatpush3.bf16.msra.mxu1 %v11219_v48  ;;  %v9114_v11 = vrot.slane %v9109_v60, 11 }
 0x1ab   : > { %10382 = vmatprep.subr.bf16.mxu1 %v11222_v25  ;;  %8206 = vmatprep.mubr.bf16.mxu0 %v11211_v7  ;;  %v9115_v1 = vld [vmem:[%s11728_s8 + $0x20] sm:$0x8]  ;;  %v9125_v25 = vld [vmem:[%s11728_s8 + $0x24] sm:$0xf]  ;;  %v9126_v58 = vld [vmem:[%s11728_s8 + $0x28] sm:$0xf] }
 0x1ac   : > { %10355 = vmatpush3.bf16.msra.mxu0 %v11223_v32  ;;  %v11220_v57 = vld [vmem:[#allocation2 + $0x268] ss:$240 sps:$4 sm:$0xff]   ;;  %v1825_v16 = vshrl.u32 %v9115_v1, 16  ;;  %v9121_v32 = vld [vmem:[%s11728_s8 + $0x24] sm:$0xf] }
 0x1ad   : > { %10356 = vmatprep.subr.bf16.mxu0 %v11225_v26  ;;  %8207 = vmatmul.mubr.bf16.gmra.mxu0 %v11213_v28  ;;  %1878 = vst [vmem:[#allocation2 + $0x98] sm:$0xf] %v9121_v32  ;;  %v1889_v26 = vshrl.u32 %v9125_v25, 16 }
 0x1ae   : > { %10383 = vmatpush3.bf16.msra.mxu1 %v11224_v15  ;;  %v13425_v15 = vld [vmem:[%s11728_s8 + $0x2c] sm:$0xf] }
 0x1af   : > { %v1891_v28 = vrot.slane %v1889_v26, 4  ;;  %v1912_v60 = vshrl.u32 %v13425_v15, 16 }
 0x1c2   : > { %v10090_v10 = vpop.f32.mrf.mxu0 }
 0x1c4   : > { %v10091_v43 = vpop.f32.mrf.mxu0 }
 0x1c5   : > { %v10092_v8 = vadd.f32 %v10091_v43, %v10090_v10  ;;  %v11227_v10 = vld [vmem:[%s14591_s1 + $0x918] sm:$0xff]   ;;  %v11233_v43 = vld [vmem:[%s14591_s1 + $0x948] sm:$0xff]  }
 0x1c6   : > { %v10093_v59 = vpop.f32.mrf.mxu0  ;;  %10357 = vmatpush3.bf16.msra.mxu0 %v11227_v10  ;;  %v1902_v10 = vshrl.u32 %v9126_v58, 16 }
 0x1c7   : > { %v7817_v4 = vadd.f32 %v10092_v8, %v13164_v20  ;;  %v1765_v20 = vsel %vm11959_vm6, %v1756_v14, %v1764_v3  ;;  %10358 = vmatprep.subr.bf16.mxu0 %v11229_v23  ;;  %v9110_v8 = vld [vmem:[%s11728_s8 + $0x24] sm:$0xf]  ;;  %v11248_v3 = vld [vmem:[%s14591_s1 + $0xaf8] sm:$0xff]  }
 0x1c8   : > { %v10094_v21 = vpop.f32.mrf.mxu0  ;;  %1782 = vst [vmem:[#allocation2 + $0x26c] sm:$0xf] %v1765_v20  ;;  %v1798_v37 = vrot.slane %v9110_v8, 7 }
 0x1c9   : > { %v10095_v38 = vadd.f32 %v10094_v21, %v10093_v59  ;;  %v13400_v59 = vld [vmem:[%s11728_s8 + $0x28] sm:$0xf]  ;;  %v1833_v21 = vshll.u32 %v9116_v52, 16 }
 0x1ca   : > { %v10118_v51 = vpop.f32.mrf.mxu1  ;;  %10359 = vmatpush3.bf16.msra.mxu0 %v11231_v6  ;;  %v1801_v53 = vrot.slane %v13400_v59, 7  ;;  %v1799_v47 = vsel %vm11948_vm3, %v9114_v11, %v1798_v37  ;;  %v1800_v48 = vrot.slane %v1798_v37, 4  ;;  %v9113_v37 = vld [vmem:[%s11728_s8 + $0x30] sm:$0x7] }
 0x1cb   : > { %v7820_v56 = vadd.f32 %v10095_v38, %v13178_v39  ;;  %v11226_v39 = vld [vmem:[%s14591_s1 + $0x9d8] sm:$0xff]   ;;  %10360 = vmatprep.subr.bf16.mxu0 %v11233_v43  ;;  %v1839_v38 = vshrl.u32 %v9117_v44, 16  ;;  %1813 = vst [vmem:[#allocation2 + $0x90] sm:$0xf] %v1799_v47  ;;  %v9118_v47 = vld [vmem:[%s11728_s8 + $0x2c] sm:$0xf] }
 0x1cc   : > { %v10119_v63 = vpop.f32.mrf.mxu1  ;;  %10384 = vmatprep.subr.bf16.mxu1 %v11226_v39  ;;  %v1892_v39 = vshll.u32 %v9125_v25, 16  ;;  %v11251_v59 = vld [vmem:[%s14591_s1 + $0xa70] sm:$0xff]  }
 0x1cd   : > { %v10120_v33 = vadd.f32 %v10119_v63, %v10118_v51  ;;  %10385 = vmatpush3.bf16.msra.mxu1 %v11228_v2  ;;  %v9120_v51 = vrot.slane %v1825_v16, 11  ;;  %v13421_v63 = vrot.slane %v1839_v38, 7  ;;  %v1803_v16 = vrot.slane %v1801_v53, 4 }
 0x1ce   : > { %v10121_v0 = vpop.f32.mrf.mxu1  ;;  %10386 = vmatprep.subr.bf16.mxu1 %v11230_v13  ;;  %10361 = vmatpush3.bf16.msra.mxu0 %v11235_v36  ;;  %v1894_v23 = vrot.slane %v1892_v39, 5 }
 0x1cf   : > { %v13351_v14 = vadd.f32 %v10120_v33, %v7817_v4  ;;  %v11216_v41 = vld [vmem:[#allocation2 + $0x26c] ss:$240 sps:$4 sm:$0xff]   ;;  %10362 = vmatprep.subr.bf16.mxu0 %v11237_v35  ;;  %v1830_v4 = vshrl.u32 %v9116_v52, 16  ;;  %v1844_v7 = vor.u32 %v1842_v61, %v13421_v63  ;;  %v1846_v38 = vrot.slane %v13421_v63, 4 }
 0x1d0   : > { %v10122_v62 = vpop.f32.mrf.mxu1  ;;  %8255 = vmatprep.mubr.bf16.mxu1 %v11216_v41  ;;  %v1895_v43 = vor.u32 %v1894_v23, %v1891_v28  ;;  %v9124_v23 = vld [vmem:[%s11728_s8 + $0x30] sm:$0xf] }
 0x1d1   : > { %v10123_v34 = vadd.f32 %v10122_v62, %v10121_v0  ;;  %8256 = vmatmul.mubr.bf16.gmra.mxu1 %v11220_v57  ;;  %v1832_v20 = vrot.slane %v1830_v4, 7  ;;  %v1898_v0 = vshll.u32 %v9126_v58, 16  ;;  %v1908_v62 = vshll.u32 %v13425_v15, 16 }
 0x1d2   : > { %10387 = vmatpush3.bf16.msra.mxu1 %v11232_v22  ;;  %10363 = vmatpush3.bf16.msra.mxu0 %v11239_v29  ;;  %v1904_v22 = vrot.slane %v1902_v10, 4  ;;  %v1896_v35 = vrot.slane %v1895_v43, 4  ;;  %v1851_v58 = vshll.u32 %v9118_v47, 16  ;;  %v11258_v10 = vld [vmem:[%s14591_s1 + $0xa68] sm:$0xff]  }
 0x1d3   : > { %v13365_v19 = vadd.f32 %v10123_v34, %v7820_v56  ;;  %10388 = vmatprep.subr.bf16.mxu1 %v11234_v12  ;;  %10404 = vmatprep.subr.bf16.mxu0 %v11247_v31  ;;  %v1802_v56 = vsel %vm11948_vm3, %v1800_v48, %v1801_v53  ;;  %v1835_v33 = vor.u32 %v1833_v21, %v1832_v20  ;;  %v1837_v5 = vrot.slane %v1832_v20, 4  ;;  %v9112_v31 = vld [vmem:[%s11728_s8 + $0x2c] sm:$0xf]  ;;  %v9119_v48 = vld [vmem:[%s11728_s8 + $0x30] sm:$0x7] }
 0x1d4   : > { %1814 = vst [vmem:[#allocation2 + $0x180] sm:$0xf] %v1802_v56  ;;  %v1900_v13 = vrot.slane %v1898_v0, 5  ;;  %v13433_v41 = vrot.slane %v1908_v62, 5  ;;  %v1804_v4 = vrot.slane %v9112_v31, 7  ;;  %v1807_v21 = vrot.slane %v9113_v37, 7 }
 0x1d5   : > { %v1836_v34 = vsel %vm11977_vm9, %v9120_v51, %v1835_v33  ;;  %v1845_v6 = vsel %vm11977_vm9, %v1837_v5, %v1844_v7  ;;  %v1848_v53 = vshrl.u32 %v9118_v47, 16  ;;  %v1857_v15 = vshrl.u32 %v9119_v48, 16 }
 0x1d6   : > { %10389 = vmatpush3.bf16.msra.mxu1 %v11236_v24  ;;  %1868 = vst [vmem:[#allocation2 + $0x94] sm:$0xf] %v1836_v34  ;;  %1869 = vst [vmem:[#allocation2 + $0x184] sm:$0xf] %v1845_v6  ;;  %v1905_v36 = vor.u32 %v1904_v22, %v1900_v13  ;;  %v1901_v11 = vsel %vm11757_vm5, %v1896_v35, %v1900_v13  ;;  %v1805_v25 = vsel %vm11948_vm3, %v1803_v16, %v1804_v4  ;;  %v9123_v34 = vld [vmem:[%s11728_s8 + $0x2c] sm:$0xf] }
 0x1d7   : > { %10390 = vmatprep.subr.bf16.mxu1 %v11238_v9  ;;  %1931 = vst [vmem:[#allocation2 + $0x9c] sm:$0xf] %v1901_v11  ;;  %v1806_v56 = vrot.slane %v1804_v4, 4  ;;  %1815 = vst [vmem:[#allocation2 + $0x270] sm:$0xf] %v1805_v25  ;;  %v1860_v26 = vshll.u32 %v9119_v48, 16 }
 0x1d8   : > { %v1850_v7 = vrot.slane %v1848_v53, 7  ;;  %v1859_v28 = vrot.slane %v1857_v15, 7  ;;  %v1914_v62 = vrot.slane %v1912_v60, 4  ;;  %v1881_v13 = vld [vmem:[#allocation2 + $0x368] sm:$0xf]  ;;  %v11252_v22 = vld [vmem:[%s14591_s1 + $0xaf0] sm:$0xff]  }
 0x1d9   : > { %v1808_v33 = vsel %vm11948_vm3, %v1806_v56, %v1807_v21  ;;  %1880 = vst [vmem:[#allocation2 + $0x278] sm:$0xf] %v9123_v34  ;;  %v9128_v35 = vld [vmem:[%s11728_s8 + $0x30] sm:$0xf]  ;;  %v11259_v4 = vld [vmem:[%s14591_s1 + $0xae8] sm:$0xff]   ;;  %v11265_v48 = vld [vmem:[%s14591_s1 + $0xa60] sm:$0xff]  }
 0x1da   : > { %10391 = vmatpush3.bf16.msra.mxu1 %v11240_v50  ;;  %v1906_v50 = vrot.slane %v1905_v36, 4  ;;  %v1855_v43 = vrot.slane %v1850_v7, 4  ;;  %v1871_v36 = vld [vmem:[#allocation2 + $0x364] sm:$0xf]  ;;  %v1918_v60 = vshll.u32 %v9128_v35, 16  ;;  %v1922_v37 = vshrl.u32 %v9128_v35, 16 }
 0x1db   : > { %10432 = vmatprep.subr.bf16.mxu1 %v11248_v3  ;;  %v10140_v2 = vpop.f32.mrf.mxu0  ;;  %v1816_v3 = vld [vmem:[#allocation2 + $0x360] sm:$0xf]  ;;  %v11263_v56 = vld [vmem:[%s14591_s1 + $0xaa8] sm:$0xff]  }
 0x1dc   : > { %v1911_v44 = vsel %vm11757_vm5, %v1906_v50, %v13433_v41  ;;  %v11241_v20 = vld [vmem:[#allocation2 + $0x90] ss:$240 sps:$4 sm:$0xff]   ;;  %v1817_v0 = vsel %vm11802_vm10, %v1808_v33, %v1816_v3  ;;  %v1915_v50 = vor.u32 %v1914_v62, %v13433_v41  ;;  %v1924_v21 = vrot.slane %v1922_v37, 4  ;;  %v11279_v35 = vld [vmem:[%s14591_s1 + $0xa08] sm:$0xff]  }
 0x1dd   : > { %v10141_v57 = vpop.f32.mrf.mxu0  ;;  %1932 = vst [vmem:[#allocation2 + $0x18c] sm:$0xf] %v1911_v44  ;;  %v11243_v55 = vld [vmem:[#allocation2 + $0x94] ss:$240 sps:$4 sm:$0xff]   ;;  %1818 = vst [vmem:[#allocation2 + $0x360] sm:$0xf] %v1817_v0 }
 0x1de   : > { %v10142_v12 = vadd.f32 %v10141_v57, %v10140_v2  ;;  %8296 = vmatprep.mubr.bf16.mxu0 %v11243_v55  ;;  %v11250_v2 = vld [vmem:[%s14591_s1 + $0xab8] sm:$0xff]   ;;  %v1853_v57 = vor.u32 %v1851_v58, %v1850_v7  ;;  %v1916_v44 = vrot.slane %v1915_v50, 4  ;;  %v11266_v15 = vld [vmem:[%s14591_s1 + $0xae0] sm:$0xff]   ;;  %v11273_v62 = vld [vmem:[%s14591_s1 + $0xa50] sm:$0xff]  }
 0x1df   : > { %v10143_v24 = vpop.f32.mrf.mxu0  ;;  %8297 = vmatmul.mubr.bf16.vlgmr.msra.gmra.mxu0 %v11241_v20  ;;  %v11267_v20 = vld [vmem:[%s14591_s1 + $0xa20] sm:$0xff]   ;;  %v11269_v58 = vld [vmem:[%s14591_s1 + $0xa58] sm:$0xff]   ;;  %v11280_v50 = vld [vmem:[%s14591_s1 + $0xa88] sm:$0xff]  }
 0x1e0   : > { %v7907_v29 = vadd.f32 %v10142_v12, %v13276_v46  ;;  %v11249_v46 = vld [vmem:[%s14591_s1 + $0xa38] sm:$0xff]   ;;  %v1862_v12 = vor.u32 %v1860_v26, %v1859_v28  ;;  %v1854_v11 = vsel %vm11977_vm9, %v1846_v38, %v1853_v57  ;;  %v13572_v37 = vld [vmem:[%s11728_s8 + $0x2c] sm:$0xf] }
 0x1e1   : > { %v10144_v8 = vpop.f32.mrf.mxu0  ;;  %10405 = vmatpush3.bf16.msra.mxu0 %v11249_v46  ;;  %1870 = vst [vmem:[#allocation2 + $0x274] sm:$0xf] %v1854_v11  ;;  %v1920_v46 = vrot.slane %v1918_v60, 5  ;;  %v11271_v7 = vld [vmem:[%s14591_s1 + $0xa18] sm:$0xff]   ;;  %v11283_v60 = vld [vmem:[%s14591_s1 + $0xa00] sm:$0xff]  }
 0x1e2   : > { %v10145_v52 = vadd.f32 %v10144_v8, %v10143_v24  ;;  %10406 = vmatprep.subr.bf16.mxu0 %v11251_v59  ;;  %v1882_v24 = vsel %vm11802_vm10, %v9124_v23, %v1881_v13  ;;  %v1863_v31 = vsel %vm11977_vm9, %v1855_v43, %v1862_v12  ;;  %v11272_v23 = vld [vmem:[%s14591_s1 + $0xa98] sm:$0xff]   ;;  %v11275_v13 = vld [vmem:[%s14591_s1 + $0xa10] sm:$0xff]   ;;  %v9129_v11 = vld [vmem:[%s11728_s8 + $0x24] sm:$0xe] }
 0x1e3   : > { %1883 = vst [vmem:[#allocation2 + $0x368] sm:$0xf] %v1882_v24  ;;  %v1872_v41 = vsel %vm11802_vm10, %v1863_v31, %v1871_v36  ;;  %v1921_v47 = vsel %vm11757_vm5, %v1916_v44, %v1920_v46  ;;  %v11277_v36 = vld [vmem:[%s14591_s1 + $0xa48] sm:$0xff]   ;;  %v11276_v24 = vld [vmem:[%s14591_s1 + $0xa90] sm:$0xff]   ;;  %v1952_v44 = vrot.slane %v13572_v37, 5 }
 0x1e4   : > { %v10168_v9 = vpop.f32.mrf.mxu1  ;;  %v7910_v51 = vadd.f32 %v10145_v52, %v13297_v42  ;;  %v11253_v42 = vld [vmem:[%s14591_s1 + $0xa30] sm:$0xff]   ;;  %1873 = vst [vmem:[#allocation2 + $0x364] sm:$0xf] %v1872_v41  ;;  %1933 = vst [vmem:[#allocation2 + $0x27c] sm:$0xf] %v1921_v47 }
 0x1e5   : > { %10407 = vmatpush3.bf16.msra.mxu0 %v11253_v42  ;;  %v11254_v52 = vld [vmem:[%s14591_s1 + $0xab0] sm:$0xff]   ;;  %v9130_v31 = vld [vmem:[%s11728_s8 + $0x28] sm:$0xf] }
 0x1e6   : > { %v10169_v1 = vpop.f32.mrf.mxu1  ;;  %10408 = vmatprep.subr.bf16.mxu0 %v11258_v10  ;;  %v11257_v33 = vld [vmem:[#allocation2 + $0x270] ss:$240 sps:$4 sm:$0xff]   ;;  %v1949_v41 = vrot.slane %v9130_v31, 5 }
 0x1e7   : > { %v10170_v61 = vadd.f32 %v10169_v1, %v10168_v9  ;;  %v11244_v9 = vld [vmem:[#allocation2 + $0x98] ss:$240 sps:$4 sm:$0xff]  }
 0x1e8   : > { %v10171_v32 = vpop.f32.mrf.mxu1  ;;  %v11262_v1 = vld [vmem:[%s14591_s1 + $0xa28] sm:$0xff]  }
 0x1e9   : > { %v13463_v5 = vadd.f32 %v10170_v61, %v7907_v29  ;;  %v11246_v29 = vld [vmem:[#allocation2 + $0x9c] ss:$240 sps:$4 sm:$0xff]   ;;  %v1925_v61 = vor.u32 %v1924_v21, %v1920_v46  ;;  %10409 = vmatpush3.bf16.msra.mxu0 %v11262_v1  ;;  %v11284_v1 = vld [vmem:[%s14591_s1 + $0xa80] sm:$0xff]  }
 0x1ea   : > { %v10172_v63 = vpop.f32.mrf.mxu1  ;;  %8345 = vmatprep.mubr.bf16.mxu1 %v11246_v29  ;;  %10410 = vmatprep.subr.bf16.mxu0 %v11265_v48  ;;  %v11264_v12 = vld [vmem:[#allocation2 + $0x278] ss:$240 sps:$4 sm:$0xff]   ;;  %v11281_v29 = vld [vmem:[%s14591_s1 + $0xa40] sm:$0xff]   ;;  %v9137_v21 = vld [vmem:[%s11728_s8 + $0x2c] sm:$0xf] }
 0x1eb   : > { %v10173_v39 = vadd.f32 %v10172_v63, %v10171_v32  ;;  %8346 = vmatmul.mubr.bf16.vlgmr.msra.gmra.mxu1 %v11244_v9  ;;  %v1934_v32 = vld [vmem:[#allocation2 + $0x36c] sm:$0xf]  ;;  %v1926_v25 = vrot.slane %v1925_v61, 4  ;;  %v11255_v42 = vld [vmem:[#allocation2 + $0x274] ss:$240 sps:$4 sm:$0xff]  }
 0x1ec   : > { %v10146_v8 = vpop.f32.mrf.mxu0  ;;  %10433 = vmatpush3.bf16.msra.mxu1 %v11250_v2  ;;  %8304 = vmatprep.mubr.bf16.mxu0 %v11255_v42  ;;  %v11278_v9 = vld [vmem:[%s14591_s1 + $0xac8] sm:$0xff]   ;;  %v9135_v46 = vld [vmem:[%s11728_s8 + $0x24] sm:$0xe] }
 0x1ed   : > { %v13475_v6 = vadd.f32 %v10173_v39, %v7910_v51  ;;  %10434 = vmatprep.subr.bf16.mxu1 %v11252_v22  ;;  %10411 = vmatpush3.bf16.msra.mxu0 %v11267_v20  ;;  %v11268_v39 = vld [vmem:[%s14591_s1 + $0xaa0] sm:$0xff]   ;;  %v11274_v22 = vld [vmem:[%s14591_s1 + $0xad0] sm:$0xff]   ;;  %v1979_v47 = vshll.u32 %v9135_v46, 16  ;;  %v11292_v20 = vld [vmem:[%s14591_s1 + $0xbf8] sm:$0xff]  }
 0x1ee   : > { %v10147_v16 = vpop.f32.mrf.mxu0  ;;  %10412 = vmatprep.subr.bf16.mxu0 %v11269_v58  ;;  %8305 = vmatmul.mubr.bf16.gmra.mxu0 %v11257_v33 }
 0x1ef   : > { %v10148_v3 = vadd.f32 %v10147_v16, %v10146_v8  ;;  %v11282_v8 = vld [vmem:[%s14591_s1 + $0xac0] sm:$0xff]   ;;  %v11291_v16 = vld [vmem:[%s14591_s1 + $0xb78] sm:$0xff]  }
 0x1f0   : > { %v10149_v38 = vpop.f32.mrf.mxu0  ;;  %10435 = vmatpush3.bf16.msra.mxu1 %v11254_v52  ;;  %v9134_v52 = vrot.slane %v9129_v11, 9 }
 0x1f1   : > { %v7915_v51 = vadd.f32 %v10148_v3, %v13351_v14  ;;  %10436 = vmatprep.subr.bf16.mxu1 %v11259_v4  ;;  %v1935_v14 = vsel %vm11802_vm10, %v1926_v25, %v1934_v32  ;;  %10413 = vmatpush3.bf16.msra.mxu0 %v11271_v7  ;;  %v9136_v4 = vld [vmem:[%s11728_s8 + $0x28] sm:$0xf]  ;;  %v1976_v3 = vshrl.u32 %v9135_v46, 16  ;;  %v1981_v25 = vrot.slane %v1979_v47, 6  ;;  %v9146_v7 = vld [vmem:[%s11728_s8 + $0x24] sm:$0xc] }
 0x1f2   : > { %v10150_v55 = vpop.f32.mrf.mxu0  ;;  %1936 = vst [vmem:[#allocation2 + $0x36c] sm:$0xf] %v1935_v14  ;;  %10414 = vmatprep.subr.bf16.mxu0 %v11273_v62  ;;  %v1950_v48 = vsel %vm11748_vm4, %v9134_v52, %v1949_v41  ;;  %v1985_v61 = vshrl.u32 %v9136_v4, 16  ;;  %v1988_v32 = vshll.u32 %v9136_v4, 16  ;;  %v9147_v62 = vld [vmem:[%s11728_s8 + $0x28] sm:$0xf] }
 0x1f3   : > { %v10151_v53 = vadd.f32 %v10150_v55, %v10149_v38  ;;  %v1951_v38 = vrot.slane %v1949_v41, 4  ;;  %1964 = vst [vmem:[#allocation2 + $0xa0] sm:$0xf] %v1950_v48  ;;  %v1978_v55 = vrot.slane %v1976_v3, 5 }
 0x1f4   : > { %10437 = vmatpush3.bf16.msra.mxu1 %v11263_v56  ;;  %v1995_v56 = vshrl.u32 %v9137_v21, 16  ;;  %v1987_v14 = vrot.slane %v1985_v61, 5 }
 0x1f5   : > { %v7918_v63 = vadd.f32 %v10151_v53, %v13365_v19  ;;  %v11270_v19 = vld [vmem:[%s14591_s1 + $0xad8] sm:$0xff]   ;;  %10438 = vmatprep.subr.bf16.mxu1 %v11266_v15  ;;  %10415 = vmatpush3.bf16.msra.mxu0 %v11275_v13  ;;  %v9141_v53 = vld [vmem:[%s11728_s8 + $0x28] sm:$0xf]  ;;  %v1953_v58 = vsel %vm11748_vm4, %v1951_v38, %v1952_v44  ;;  %v1990_v15 = vrot.slane %v1988_v32, 6  ;;  %v1982_v42 = vor.u32 %v1981_v25, %v1978_v55  ;;  %v9132_v25 = vld [vmem:[%s11728_s8 + $0x30] sm:$0xf] }
 0x1f6   : > { %v10174_v59 = vpop.f32.mrf.mxu1  ;;  %10416 = vmatprep.subr.bf16.mxu0 %v11277_v36  ;;  %1965 = vst [vmem:[#allocation2 + $0x190] sm:$0xf] %v1953_v58  ;;  %v1997_v33 = vrot.slane %v1995_v56, 5  ;;  %v9133_v58 = vld [vmem:[%s11728_s8 + $0x34] sm:$0x1] }
 0x1f8   : > { %v10175_v26 = vpop.f32.mrf.mxu1  ;;  %10439 = vmatpush3.bf16.msra.mxu1 %v11268_v39 }
 0x1f9   : > { %v10176_v0 = vadd.f32 %v10175_v26, %v10174_v59  ;;  %v11260_v43 = vld [vmem:[#allocation2 + $0x27c] ss:$240 sps:$4 sm:$0xff]   ;;  %10440 = vmatprep.subr.bf16.mxu1 %v11270_v19  ;;  %10417 = vmatpush3.bf16.msra.mxu0 %v11279_v35  ;;  %v1998_v59 = vshll.u32 %v9137_v21, 16  ;;  %v2081_v35 = vshrl.u32 %v9147_v62, 16 }
 0x1fa   : > { %v10177_v28 = vpop.f32.mrf.mxu1  ;;  %8353 = vmatprep.mubr.bf16.mxu1 %v11260_v43  ;;  %10418 = vmatprep.subr.bf16.mxu0 %v11281_v29  ;;  %v13596_v26 = vld [vmem:[%s11728_s8 + $0x2c] sm:$0xf] }
 0x1fb   : > { %v13529_v10 = vadd.f32 %v10176_v0, %v7915_v51  ;;  %8354 = vmatmul.mubr.bf16.gmra.mxu1 %v11264_v12  ;;  %v9140_v51 = vld [vmem:[%s11728_s8 + $0x24] sm:$0xc]  ;;  %v2000_v39 = vrot.slane %v1998_v59, 6  ;;  %v2045_v0 = vrot.slane %v9141_v53, 6  ;;  %v2048_v19 = vrot.slane %v13596_v26, 6  ;;  %v11293_v53 = vld [vmem:[%s14591_s1 + $0xb38] sm:$0xff]  }
 0x1fc   : > { %v10178_v2 = vpop.f32.mrf.mxu1  ;;  %10441 = vmatpush3.bf16.msra.mxu1 %v11272_v23  ;;  %v1983_v23 = vrot.slane %v1982_v42, 4  ;;  %v11296_v26 = vld [vmem:[%s14591_s1 + $0xbf0] sm:$0xff]  }
 0x1fd   : > { %v10179_v34 = vadd.f32 %v10178_v2, %v10177_v28  ;;  %10442 = vmatprep.subr.bf16.mxu1 %v11274_v22  ;;  %10419 = vmatpush3.bf16.msra.mxu0 %v11283_v60  ;;  %v1991_v28 = vor.u32 %v1990_v15, %v1987_v14  ;;  %v9148_v2 = vld [vmem:[%s11728_s8 + $0x2c] sm:$0xf]  ;;  %v13602_v13 = vor.u32 %v2000_v39, %v1997_v33  ;;  %v2047_v43 = vrot.slane %v2045_v0, 4  ;;  %v1967_v15 = vld [vmem:[#allocation2 + $0x370] sm:$0xf] }
 0x1fe   : > { %10460 = vmatprep.subr.bf16.mxu0 %v11291_v16  ;;  %v2084_v60 = vshll.u32 %v9147_v62, 16  ;;  %v2094_v52 = vshll.u32 %v9148_v2, 16  ;;  %v1955_v14 = vrot.slane %v9132_v25, 5  ;;  %v1958_v33 = vrot.slane %v9133_v58, 5  ;;  %v9138_v39 = vld [vmem:[%s11728_s8 + $0x30] sm:$0xf] }
 0x1ff   : > { %v13543_v57 = vadd.f32 %v10179_v34, %v7918_v63  ;;  %v9145_v63 = vrot.slane %v9140_v51, 10  ;;  %v2072_v34 = vshrl.u32 %v9146_v7, 16  ;;  %v1993_v12 = vrot.slane %v1991_v28, 4  ;;  %v11285_v62 = vld [vmem:[#allocation2 + $0xa0] ss:$240 sps:$4 sm:$0xff]  }
 0x200   : > { %10443 = vmatpush3.bf16.msra.mxu1 %v11276_v24  ;;  %v2075_v24 = vshll.u32 %v9146_v7, 16  ;;  %v1992_v29 = vsel %vm11783_vm8, %v1983_v23, %v1991_v28  ;;  %v2086_v46 = vrot.slane %v2084_v60, 7  ;;  %v2096_v3 = vrot.slane %v2094_v52, 7  ;;  %v11295_v23 = vld [vmem:[%s14591_s1 + $0xb70] sm:$0xff]   ;;  %v2063_v58 = vld [vmem:[#allocation2 + $0x378] sm:$0xf] }
 0x201   : > { %10444 = vmatprep.subr.bf16.mxu1 %v11278_v9  ;;  %v2046_v22 = vsel %vm11903_vm13, %v9145_v63, %v2045_v0  ;;  %v2074_v36 = vrot.slane %v2072_v34, 6  ;;  %v2002_v11 = vsel %vm11783_vm8, %v1993_v12, %v13602_v13  ;;  %2027 = vst [vmem:[#allocation2 + $0xa4] sm:$0xf] %v1992_v29  ;;  %v9139_v0 = vld [vmem:[%s11728_s8 + $0x34] sm:$0x1] }
 0x202   : > { %2060 = vst [vmem:[#allocation2 + $0xa8] sm:$0xf] %v2046_v22  ;;  %v2077_v31 = vrot.slane %v2075_v24, 7  ;;  %2028 = vst [vmem:[#allocation2 + $0x194] sm:$0xf] %v2002_v11  ;;  %v2005_v22 = vshrl.u32 %v9138_v39, 16 }
 0x203   : > { %v2015_v12 = vshrl.u32 %v9139_v0, 16  ;;  %v2018_v24 = vshll.u32 %v9139_v0, 16  ;;  %v11297_v29 = vld [vmem:[%s14591_s1 + $0xb30] sm:$0xff]  }
 0x204   : > { %10445 = vmatpush3.bf16.msra.mxu1 %v11280_v50  ;;  %v2049_v50 = vsel %vm11903_vm13, %v2047_v43, %v2048_v19  ;;  %v2078_v21 = vor.u32 %v2077_v31, %v2074_v36  ;;  %v2008_v43 = vshll.u32 %v9138_v39, 16  ;;  %v2003_v36 = vrot.slane %v13602_v13, 4  ;;  %v9143_v31 = vld [vmem:[%s11728_s8 + $0x30] sm:$0xf]  ;;  %v11306_v39 = vld [vmem:[%s14591_s1 + $0xb28] sm:$0xff]  }
 0x205   : > { %10446 = vmatprep.subr.bf16.mxu1 %v11282_v8  ;;  %v2091_v8 = vshrl.u32 %v9148_v2, 16  ;;  %2061 = vst [vmem:[#allocation2 + $0x198] sm:$0xf] %v2049_v50  ;;  %v2007_v60 = vrot.slane %v2005_v22, 5  ;;  %v2017_v11 = vrot.slane %v2015_v12, 5  ;;  %v2020_v13 = vrot.slane %v2018_v24, 6 }
 0x206   : > { %v2079_v61 = vrot.slane %v2078_v21, 4  ;;  %v9144_v21 = vld [vmem:[%s11728_s8 + $0x34] sm:$0x3]  ;;  %v11309_v22 = vld [vmem:[%s14591_s1 + $0xb60] sm:$0xff]  }
 0x207   : > { %v2093_v16 = vrot.slane %v2091_v8, 6  ;;  %v2010_v8 = vrot.slane %v2008_v43, 6 }
 0x208   : > { %10447 = vmatpush3.bf16.msra.mxu1 %v11284_v1  ;;  %v2083_v1 = vrot.slane %v2081_v35, 6 }
 0x209   : > { %10488 = vmatprep.subr.bf16.mxu1 %v11292_v20  ;;  %v13616_v32 = vor.u32 %v2096_v3, %v2093_v16  ;;  %v11287_v2 = vld [vmem:[#allocation2 + $0xa4] ss:$240 sps:$4 sm:$0xff]   ;;  %v2051_v3 = vrot.slane %v9143_v31, 6 }
 0x20a   : > { %v2087_v48 = vor.u32 %v2086_v46, %v2083_v1  ;;  %8394 = vmatprep.mubr.bf16.mxu0 %v11287_v2  ;;  %v2050_v1 = vrot.slane %v2048_v19, 4  ;;  %v2011_v46 = vor.u32 %v2010_v8, %v2007_v60  ;;  %v2030_v16 = vld [vmem:[#allocation2 + $0x374] sm:$0xf]  ;;  %v2021_v19 = vor.u32 %v2020_v13, %v2017_v11  ;;  %v11311_v11 = vld [vmem:[%s14591_s1 + $0xb20] sm:$0xff]  }
 0x20b   : > { %8395 = vmatmul.mubr.bf16.vlgmr.msra.gmra.mxu0 %v11285_v62 }
 0x20c   : > { %v2089_v55 = vrot.slane %v2087_v48, 4  ;;  %v2088_v59 = vsel %vm11959_vm6, %v2079_v61, %v2087_v48  ;;  %10461 = vmatpush3.bf16.msra.mxu0 %v11293_v53  ;;  %v2054_v48 = vrot.slane %v9144_v21, 6  ;;  %v9150_v61 = vld [vmem:[%s11728_s8 + $0x34] sm:$0x3]  ;;  %v2012_v25 = vsel %vm11783_vm8, %v2003_v36, %v2011_v46  ;;  %v2126_v36 = vld [vmem:[#allocation2 + $0x37c] sm:$0xf] }
 0x20d   : > { %v10196_v9 = vpop.f32.mrf.mxu0  ;;  %2123 = vst [vmem:[#allocation2 + $0xac] sm:$0xf] %v2088_v59  ;;  %10462 = vmatprep.subr.bf16.mxu0 %v11295_v23  ;;  %v2052_v59 = vsel %vm11903_vm13, %v2050_v1, %v2051_v3  ;;  %2029 = vst [vmem:[#allocation2 + $0x284] sm:$0xf] %v2012_v25  ;;  %v2053_v53 = vrot.slane %v2051_v3, 4  ;;  %v11310_v1 = vld [vmem:[%s14591_s1 + $0xbe0] sm:$0xff]  }
 0x20e   : > { %v2098_v42 = vsel %vm11959_vm6, %v2089_v55, %v13616_v32  ;;  %2062 = vst [vmem:[#allocation2 + $0x288] sm:$0xf] %v2052_v59  ;;  %v11319_v25 = vld [vmem:[%s14591_s1 + $0xb10] sm:$0xff]  }
 0x20f   : > { %v10197_v41 = vpop.f32.mrf.mxu0  ;;  %2124 = vst [vmem:[#allocation2 + $0x19c] sm:$0xf] %v2098_v42  ;;  %v11318_v59 = vld [vmem:[%s14591_s1 + $0xbd0] sm:$0xff]  }
 0x210   : > { %v10198_v4 = vadd.f32 %v10197_v41, %v10196_v9  ;;  %v10224_v51 = vpop.f32.mrf.mxu1  ;;  %v11294_v41 = vld [vmem:[%s14591_s1 + $0xbb8] sm:$0xff]   ;;  %10463 = vmatpush3.bf16.msra.mxu0 %v11297_v29 }
 0x211   : > { %v10199_v47 = vpop.f32.mrf.mxu0 }
 0x212   : > { %v8005_v38 = vadd.f32 %v10198_v4, %v13463_v5  ;;  %v1954_v5 = vrot.slane %v1952_v44, 4  ;;  %v10225_v63 = vpop.f32.mrf.mxu1  ;;  %v1957_v44 = vrot.slane %v1955_v14, 4  ;;  %v11302_v4 = vld [vmem:[%s14591_s1 + $0xb68] sm:$0xff]  }
 0x213   : > { %v10200_v20 = vpop.f32.mrf.mxu0  ;;  %v10226_v7 = vadd.f32 %v10225_v63, %v10224_v51  ;;  %v11298_v63 = vld [vmem:[%s14591_s1 + $0xbb0] sm:$0xff]   ;;  %10464 = vmatprep.subr.bf16.mxu0 %v11302_v4  ;;  %v11312_v4 = vld [vmem:[%s14591_s1 + $0xba0] sm:$0xff]  }
 0x214   : > { %v10201_v56 = vadd.f32 %v10200_v20, %v10199_v47  ;;  %v1956_v37 = vsel %vm11748_vm4, %v1954_v5, %v1955_v14  ;;  %v10227_v34 = vpop.f32.mrf.mxu1  ;;  %v2099_v47 = vrot.slane %v13616_v32, 4  ;;  %v11288_v20 = vld [vmem:[#allocation2 + $0xa8] ss:$240 sps:$4 sm:$0xff]   ;;  %10465 = vmatpush3.bf16.msra.mxu0 %v11306_v39  ;;  %v11327_v39 = vld [vmem:[%s14591_s1 + $0xb00] sm:$0xff]  }
 0x215   : > { %1966 = vst [vmem:[#allocation2 + $0x280] sm:$0xf] %v1956_v37  ;;  %v13641_v35 = vadd.f32 %v10226_v7, %v8005_v38  ;;  %v9149_v38 = vld [vmem:[%s11728_s8 + $0x30] sm:$0xf]  ;;  %v11303_v37 = vld [vmem:[%s14591_s1 + $0xbe8] sm:$0xff]   ;;  %10466 = vmatprep.subr.bf16.mxu0 %v11309_v22 }
 0x216   : > { %v8008_v28 = vadd.f32 %v10201_v56, %v13475_v6  ;;  %v1959_v6 = vsel %vm11748_vm4, %v1957_v44, %v1958_v33  ;;  %v10228_v9 = vpop.f32.mrf.mxu1  ;;  %v11290_v55 = vld [vmem:[#allocation2 + $0xac] ss:$240 sps:$4 sm:$0xff]   ;;  %v2013_v56 = vrot.slane %v2011_v46, 4  ;;  %v2101_v5 = vshrl.u32 %v9149_v38, 16  ;;  %v9158_v22 = vld [vmem:[%s11728_s8 + $0x28] sm:$0xf] }
 0x217   : > { %v1968_v50 = vsel %vm11802_vm10, %v1959_v6, %v1967_v15  ;;  %v10229_v52 = vadd.f32 %v10228_v9, %v10227_v34  ;;  %v2104_v14 = vshll.u32 %v9149_v38, 16  ;;  %v2111_v15 = vshrl.u32 %v9150_v61, 16  ;;  %8443 = vmatprep.mubr.bf16.mxu1 %v11290_v55  ;;  %v11307_v9 = vld [vmem:[%s14591_s1 + $0xba8] sm:$0xff]   ;;  %v11316_v55 = vld [vmem:[%s14591_s1 + $0xb98] sm:$0xff]  }
 0x218   : > { %1969 = vst [vmem:[#allocation2 + $0x370] sm:$0xf] %v1968_v50  ;;  %v10202_v32 = vpop.f32.mrf.mxu0  ;;  %v2022_v42 = vsel %vm11783_vm8, %v2013_v56, %v2021_v19  ;;  %v2114_v33 = vshll.u32 %v9150_v61, 16  ;;  %8444 = vmatmul.mubr.bf16.vlgmr.msra.gmra.mxu1 %v11288_v20  ;;  %v2103_v62 = vrot.slane %v2101_v5, 6  ;;  %10467 = vmatpush3.bf16.msra.mxu0 %v11311_v11  ;;  %v11315_v19 = vld [vmem:[%s14591_s1 + $0xb18] sm:$0xff]   ;;  %v11317_v61 = vld [vmem:[%s14591_s1 + $0xb50] sm:$0xff]  }
 0x219   : > { %v13664_v51 = vadd.f32 %v10229_v52, %v8008_v28  ;;  %v2031_v7 = vsel %vm11802_vm10, %v2022_v42, %v2030_v16  ;;  %v2055_v28 = vsel %vm11903_vm13, %v2053_v53, %v2054_v48  ;;  %v2106_v2 = vrot.slane %v2104_v14, 7  ;;  %10489 = vmatpush3.bf16.msra.mxu1 %v11294_v41  ;;  %v11313_v52 = vld [vmem:[%s14591_s1 + $0xb58] sm:$0xff]   ;;  %v11321_v5 = vld [vmem:[%s14591_s1 + $0xb48] sm:$0xff]   ;;  %v11325_v42 = vld [vmem:[%s14591_s1 + $0xb40] sm:$0xff]  }
 0x21a   : > { %v10203_v0 = vpop.f32.mrf.mxu0  ;;  %2032 = vst [vmem:[#allocation2 + $0x374] sm:$0xf] %v2031_v7  ;;  %v2064_v44 = vsel %vm11802_vm10, %v2055_v28, %v2063_v58  ;;  %v2113_v34 = vrot.slane %v2111_v15, 6  ;;  %v2116_v23 = vrot.slane %v2114_v33, 7  ;;  %10490 = vmatprep.subr.bf16.mxu1 %v11296_v26  ;;  %10468 = vmatprep.subr.bf16.mxu0 %v11313_v52  ;;  %v11320_v58 = vld [vmem:[%s14591_s1 + $0xb90] sm:$0xff]   ;;  %v11322_v14 = vld [vmem:[%s14591_s1 + $0xbc8] sm:$0xff]  }
 0x21b   : > { %v10204_v43 = vadd.f32 %v10203_v0, %v10202_v32  ;;  %2065 = vst [vmem:[#allocation2 + $0x378] sm:$0xf] %v2064_v44  ;;  %v2107_v6 = vor.u32 %v2106_v2, %v2103_v62  ;;  %v11323_v15 = vld [vmem:[%s14591_s1 + $0xb08] sm:$0xff]   ;;  %v11326_v33 = vld [vmem:[%s14591_s1 + $0xbc0] sm:$0xff]  }
 0x21c   : > { %v10205_v12 = vpop.f32.mrf.mxu0  ;;  %v2117_v24 = vor.u32 %v2116_v23, %v2113_v34  ;;  %10469 = vmatpush3.bf16.msra.mxu0 %v11315_v19  ;;  %v11328_v0 = vld [vmem:[%s14591_s1 + $0xb80] sm:$0xff]   ;;  %v9152_v28 = vld [vmem:[%s11728_s8 + $0x28] sm:$0xf]  ;;  %v9153_v62 = vld [vmem:[%s11728_s8 + $0x2c] sm:$0xf] }
 0x21d   : > { %v8013_v29 = vadd.f32 %v10204_v43, %v13529_v10  ;;  %v2108_v60 = vsel %vm11959_vm6, %v2099_v47, %v2107_v6  ;;  %v2109_v8 = vrot.slane %v2107_v6, 4  ;;  %10491 = vmatpush3.bf16.msra.mxu1 %v11298_v63  ;;  %10470 = vmatprep.subr.bf16.mxu0 %v11317_v61  ;;  %v11324_v63 = vld [vmem:[%s14591_s1 + $0xb88] sm:$0xff]   ;;  %v9151_v7 = vld [vmem:[%s11728_s8 + $0x24] sm:$0x8]  ;;  %v2144_v44 = vrot.slane %v9153_v62, 7  ;;  %v11335_v23 = vld [vmem:[%s14591_s1 + $0xc78] sm:$0xff]  }
 0x21e   : > { %v10206_v50 = vpop.f32.mrf.mxu0  ;;  %2125 = vst [vmem:[#allocation2 + $0x28c] sm:$0xf] %v2108_v60  ;;  %10492 = vmatprep.subr.bf16.mxu1 %v11303_v37  ;;  %v9156_v2 = vrot.slane %v9151_v7, 11  ;;  %v2141_v37 = vrot.slane %v9152_v28, 7  ;;  %v9157_v34 = vld [vmem:[%s11728_s8 + $0x24] sm:$0x8] }
 0x21f   : > { %v10207_v31 = vadd.f32 %v10206_v50, %v10205_v12  ;;  %v2118_v10 = vsel %vm11959_vm6, %v2109_v8, %v2117_v24  ;;  %v11301_v47 = vld [vmem:[#allocation2 + $0x280] ss:$240 sps:$4 sm:$0xff]   ;;  %v9159_v43 = vld [vmem:[%s11728_s8 + $0x2c] sm:$0xf]  ;;  %v2168_v12 = vshrl.u32 %v9157_v34, 16  ;;  %v11336_v6 = vld [vmem:[%s14591_s1 + $0xcf8] sm:$0xff]  }
 0x220   : > { %v2127_v16 = vsel %vm11802_vm10, %v2118_v10, %v2126_v36  ;;  %10471 = vmatpush3.bf16.msra.mxu0 %v11319_v25  ;;  %v2142_v36 = vsel %vm11948_vm3, %v9156_v2, %v2141_v37  ;;  %v2143_v24 = vrot.slane %v2141_v37, 4  ;;  %v9163_v50 = vld [vmem:[%s11728_s8 + $0x28] sm:$0xf]  ;;  %v2182_v60 = vshrl.u32 %v9159_v43, 16  ;;  %v9164_v11 = vld [vmem:[%s11728_s8 + $0x2c] sm:$0xf] }
 0x221   : > { %v8016_v46 = vadd.f32 %v10207_v31, %v13543_v57  ;;  %v11299_v3 = vld [vmem:[#allocation2 + $0x284] ss:$240 sps:$4 sm:$0xff]   ;;  %2128 = vst [vmem:[#allocation2 + $0x37c] sm:$0xf] %v2127_v16  ;;  %10493 = vmatpush3.bf16.msra.mxu1 %v11307_v9  ;;  %v11314_v57 = vld [vmem:[%s14591_s1 + $0xbd8] sm:$0xff]   ;;  %10472 = vmatprep.subr.bf16.mxu0 %v11321_v5  ;;  %v2173_v9 = vshrl.u32 %v9158_v22, 16 }
 0x222   : > { %v10230_v13 = vpop.f32.mrf.mxu1  ;;  %8402 = vmatprep.mubr.bf16.mxu0 %v11299_v3  ;;  %10494 = vmatprep.subr.bf16.mxu1 %v11310_v1  ;;  %v11308_v53 = vld [vmem:[#allocation2 + $0x288] ss:$240 sps:$4 sm:$0xff]   ;;  %2156 = vst [vmem:[#allocation2 + $0xb0] sm:$0xf] %v2142_v36  ;;  %v2185_v8 = vshll.u32 %v9159_v43, 16  ;;  %v9162_v31 = vrot.slane %v2168_v12, 11 }
 0x223   : > { %8403 = vmatmul.mubr.bf16.gmra.mxu0 %v11301_v47  ;;  %2221 = vst [vmem:[#allocation2 + $0xb8] sm:$0xf] %v9163_v50  ;;  %v2175_v1 = vrot.slane %v2173_v9, 7  ;;  %2222 = vst [vmem:[#allocation2 + $0x1a8] sm:$0xf] %v9164_v11  ;;  %v11339_v50 = vld [vmem:[%s14591_s1 + $0xc70] sm:$0xff]  }
 0x224   : > { %v10231_v41 = vpop.f32.mrf.mxu1  ;;  %10473 = vmatpush3.bf16.msra.mxu0 %v11323_v15  ;;  %v9167_v10 = vld [vmem:[%s11728_s8 + $0x28] sm:$0xf]  ;;  %v9168_v52 = vld [vmem:[%s11728_s8 + $0x2c] sm:$0xf]  ;;  %v9154_v34 = vld [vmem:[%s11728_s8 + $0x30] sm:$0xf] }
 0x225   : > { %v10232_v21 = vadd.f32 %v10231_v41, %v10230_v13  ;;  %10495 = vmatpush3.bf16.msra.mxu1 %v11312_v4  ;;  %10474 = vmatprep.subr.bf16.mxu0 %v11325_v42  ;;  %v2145_v13 = vsel %vm11948_vm3, %v2143_v24, %v2144_v44  ;;  %v13782_v41 = vrot.slane %v2182_v60, 7  ;;  %v2232_v16 = vshrl.u32 %v9167_v10, 16  ;;  %v2159_v36 = vld [vmem:[#allocation2 + $0x380] sm:$0xf]  ;;  %v9160_v24 = vld [vmem:[%s11728_s8 + $0x30] sm:$0xf] }
 0x226   : > { %v10233_v26 = vpop.f32.mrf.mxu1  ;;  %10496 = vmatprep.subr.bf16.mxu1 %v11314_v57  ;;  %2157 = vst [vmem:[#allocation2 + $0x1a0] sm:$0xf] %v2145_v13  ;;  %v2235_v4 = vshll.u32 %v9167_v10, 16  ;;  %v2180_v47 = vrot.slane %v2175_v1, 4  ;;  %v2147_v12 = vrot.slane %v9154_v34, 7  ;;  %v2191_v60 = vshrl.u32 %v9160_v24, 16 }
 0x227   : > { %v13716_v48 = vadd.f32 %v10232_v21, %v8013_v29  ;;  %v2176_v29 = vshll.u32 %v9158_v22, 16  ;;  %v2241_v21 = vshll.u32 %v9168_v52, 16  ;;  %v2187_v57 = vor.u32 %v2185_v8, %v13782_v41  ;;  %v9161_v9 = vld [vmem:[%s11728_s8 + $0x34] sm:$0x7] }
 0x228   : > { %v10234_v38 = vpop.f32.mrf.mxu1  ;;  %v11304_v32 = vld [vmem:[#allocation2 + $0x28c] ss:$240 sps:$4 sm:$0xff]   ;;  %10475 = vmatpush3.bf16.msra.mxu0 %v11327_v39  ;;  %v2237_v61 = vrot.slane %v2235_v4, 5  ;;  %v2146_v39 = vrot.slane %v2144_v44, 4  ;;  %v2189_v44 = vrot.slane %v13782_v41, 4  ;;  %v2194_v8 = vshll.u32 %v9160_v24, 16 }
 0x229   : > { %v10235_v20 = vadd.f32 %v10234_v38, %v10233_v26  ;;  %8451 = vmatprep.mubr.bf16.mxu1 %v11304_v32  ;;  %10497 = vmatpush3.bf16.msra.mxu1 %v11316_v55  ;;  %v2178_v3 = vor.u32 %v2176_v29, %v2175_v1  ;;  %v2245_v26 = vshrl.u32 %v9168_v52, 16  ;;  %v2234_v38 = vrot.slane %v2232_v16, 4 }
 0x22a   : > { %8452 = vmatmul.mubr.bf16.gmra.mxu1 %v11308_v53  ;;  %10498 = vmatprep.subr.bf16.mxu1 %v11318_v59  ;;  %v2188_v53 = vsel %vm11977_vm9, %v2180_v47, %v2187_v57  ;;  %v2200_v11 = vshrl.u32 %v9161_v9, 16  ;;  %v2203_v13 = vshll.u32 %v9161_v9, 16  ;;  %v2148_v52 = vsel %vm11948_vm3, %v2146_v39, %v2147_v12 }
 0x22b   : > { %v13730_v56 = vadd.f32 %v10235_v20, %v8016_v46  ;;  %10516 = vmatprep.subr.bf16.mxu0 %v11335_v23  ;;  %v13785_v46 = vld [vmem:[%s11728_s8 + $0x30] sm:$0xf]  ;;  %v2243_v20 = vrot.slane %v2241_v21, 5  ;;  %v2179_v25 = vsel %vm11977_vm9, %v9162_v31, %v2178_v3  ;;  %v2247_v59 = vrot.slane %v2245_v26, 4  ;;  %2212 = vst [vmem:[#allocation2 + $0x1a4] sm:$0xf] %v2188_v53 }
 0x22c   : > { %v2251_v19 = vshll.u32 %v13785_v46, 16  ;;  %2211 = vst [vmem:[#allocation2 + $0xb4] sm:$0xf] %v2179_v25  ;;  %v2255_v37 = vshrl.u32 %v13785_v46, 16  ;;  %v9155_v23 = vld [vmem:[%s11728_s8 + $0x34] sm:$0x7] }
 0x22d   : > { %10499 = vmatpush3.bf16.msra.mxu1 %v11320_v58  ;;  %v2238_v58 = vor.u32 %v2237_v61, %v2234_v38  ;;  %v11329_v1 = vld [vmem:[#allocation2 + $0xb0] ss:$240 sps:$4 sm:$0xff]   ;;  %v2149_v41 = vrot.slane %v2147_v12, 4  ;;  %2158 = vst [vmem:[#allocation2 + $0x290] sm:$0xf] %v2148_v52  ;;  %v2193_v4 = vrot.slane %v2191_v60, 7 }
 0x22e   : > { %10500 = vmatprep.subr.bf16.mxu1 %v11322_v14  ;;  %v13791_v32 = vrot.slane %v2251_v19, 5  ;;  %v2248_v14 = vor.u32 %v2247_v59, %v2243_v20  ;;  %v2202_v21 = vrot.slane %v2200_v11, 7  ;;  %v2214_v3 = vld [vmem:[#allocation2 + $0x384] sm:$0xf]  ;;  %v11341_v26 = vld [vmem:[%s14591_s1 + $0xc30] sm:$0xff]   ;;  %v11346_v25 = vld [vmem:[%s14591_s1 + $0xc68] sm:$0xff]  }
 0x22f   : > { %v2196_v61 = vor.u32 %v2194_v8, %v2193_v4  ;;  %v9165_v59 = vld [vmem:[%s11728_s8 + $0x30] sm:$0xf]  ;;  %v9166_v53 = vld [vmem:[%s11728_s8 + $0x34] sm:$0xf]  ;;  %v11351_v60 = vld [vmem:[%s14591_s1 + $0xca8] sm:$0xff]  }
 0x230   : > { %2223 = vst [vmem:[#allocation2 + $0x298] sm:$0xf] %v9165_v59 }
 0x231   : > { %10501 = vmatpush3.bf16.msra.mxu1 %v11324_v63  ;;  %v10252_v55 = vpop.f32.mrf.mxu0  ;;  %v2239_v63 = vrot.slane %v2238_v58, 4  ;;  %v2224_v58 = vld [vmem:[#allocation2 + $0x388] sm:$0xf] }
 0x232   : > { %10502 = vmatprep.subr.bf16.mxu1 %v11326_v33  ;;  %v2249_v33 = vrot.slane %v2248_v14, 4  ;;  %v2257_v14 = vrot.slane %v2255_v37, 4 }
 0x233   : > { %v10253_v5 = vpop.f32.mrf.mxu0  ;;  %v2244_v28 = vsel %vm11757_vm5, %v2239_v63, %v2243_v20  ;;  %v11331_v10 = vld [vmem:[#allocation2 + $0xb4] ss:$240 sps:$4 sm:$0xff]   ;;  %v2198_v20 = vrot.slane %v2193_v4, 4  ;;  %v11332_v63 = vld [vmem:[#allocation2 + $0xb8] ss:$240 sps:$4 sm:$0xff]  }
 0x234   : > { %v10254_v15 = vadd.f32 %v10253_v5, %v10252_v55  ;;  %v2254_v2 = vsel %vm11757_vm5, %v2249_v33, %v13791_v32  ;;  %2274 = vst [vmem:[#allocation2 + $0xbc] sm:$0xf] %v2244_v28  ;;  %8492 = vmatprep.mubr.bf16.mxu0 %v11331_v10  ;;  %v2205_v55 = vor.u32 %v2203_v13, %v2202_v21  ;;  %v9170_v5 = vld [vmem:[%s11728_s8 + $0x34] sm:$0xf]  ;;  %v11354_v13 = vld [vmem:[%s14591_s1 + $0xce0] sm:$0xff]   ;;  %v11357_v10 = vld [vmem:[%s14591_s1 + $0xc58] sm:$0xff]  }
 0x235   : > { %10503 = vmatpush3.bf16.msra.mxu1 %v11328_v0  ;;  %v10255_v42 = vpop.f32.mrf.mxu0  ;;  %2275 = vst [vmem:[#allocation2 + $0x1ac] sm:$0xf] %v2254_v2  ;;  %8493 = vmatmul.mubr.bf16.vlgmr.msra.gmra.mxu0 %v11329_v1  ;;  %v2197_v33 = vsel %vm11977_vm9, %v2189_v44, %v2196_v61  ;;  %v11340_v28 = vld [vmem:[%s14591_s1 + $0xcf0] sm:$0xff]   ;;  %v2258_v2 = vor.u32 %v2257_v14, %v13791_v32  ;;  %v2265_v37 = vshrl.u32 %v9170_v5, 16  ;;  %v11356_v21 = vld [vmem:[%s14591_s1 + $0xca0] sm:$0xff]   ;;  %v11365_v14 = vld [vmem:[%s14591_s1 + $0xc48] sm:$0xff]  }
 0x236   : > { %10544 = vmatprep.subr.bf16.mxu1 %v11336_v6  ;;  %v8103_v7 = vadd.f32 %v10254_v15, %v13641_v35  ;;  %v11337_v35 = vld [vmem:[%s14591_s1 + $0xc38] sm:$0xff]   ;;  %v2150_v6 = vrot.slane %v9155_v23, 7  ;;  %v2206_v39 = vsel %vm11977_vm9, %v2198_v20, %v2205_v55  ;;  %2213 = vst [vmem:[#allocation2 + $0x294] sm:$0xf] %v2197_v33  ;;  %v11342_v23 = vld [vmem:[%s14591_s1 + $0xcb0] sm:$0xff]   ;;  %v11366_v33 = vld [vmem:[%s14591_s1 + $0xcc8] sm:$0xff]  }
 0x237   : > { %v10256_v62 = vpop.f32.mrf.mxu0  ;;  %10517 = vmatpush3.bf16.msra.mxu0 %v11337_v35  ;;  %v2259_v32 = vrot.slane %v2258_v2, 4  ;;  %v2267_v35 = vrot.slane %v2265_v37, 4  ;;  %v11360_v20 = vld [vmem:[%s14591_s1 + $0xc98] sm:$0xff]   ;;  %v9172_v2 = vld [vmem:[%s11728_s8 + $0x2c] sm:$0xf]  ;;  %v11372_v37 = vld [vmem:[%s14591_s1 + $0xc80] sm:$0xff]  }
 0x238   : > { %v10280_v0 = vpop.f32.mrf.mxu1  ;;  %v10257_v43 = vadd.f32 %v10256_v62, %v10255_v42  ;;  %v2151_v19 = vsel %vm11948_vm3, %v2149_v41, %v2150_v6  ;;  %10518 = vmatprep.subr.bf16.mxu0 %v11339_v50  ;;  %v2215_v62 = vsel %vm11802_vm10, %v2206_v39, %v2214_v3  ;;  %v11353_v6 = vld [vmem:[%s14591_s1 + $0xc60] sm:$0xff]  }
 0x239   : > { %v2160_v38 = vsel %vm11802_vm10, %v2151_v19, %v2159_v36  ;;  %2216 = vst [vmem:[#allocation2 + $0x384] sm:$0xf] %v2215_v62  ;;  %v11369_v39 = vld [vmem:[%s14591_s1 + $0xc40] sm:$0xff]   ;;  %v9171_v62 = vld [vmem:[%s11728_s8 + $0x28] sm:$0xe] }
 0x23a   : > { %v10281_v22 = vpop.f32.mrf.mxu1  ;;  %v8106_v16 = vadd.f32 %v10257_v43, %v13664_v51  ;;  %v11338_v51 = vld [vmem:[%s14591_s1 + $0xcb8] sm:$0xff]   ;;  %2161 = vst [vmem:[#allocation2 + $0x380] sm:$0xf] %v2160_v38  ;;  %v11347_v43 = vld [vmem:[%s14591_s1 + $0xce8] sm:$0xff]  }
 0x23b   : > { %v10282_v29 = vadd.f32 %v10281_v22, %v10280_v0  ;;  %v2225_v0 = vsel %vm11802_vm10, %v9166_v53, %v2224_v58  ;;  %v11350_v22 = vld [vmem:[%s14591_s1 + $0xc28] sm:$0xff]   ;;  %10519 = vmatpush3.bf16.msra.mxu0 %v11341_v26  ;;  %v11359_v26 = vld [vmem:[%s14591_s1 + $0xc18] sm:$0xff]  }
 0x23c   : > { %v10283_v31 = vpop.f32.mrf.mxu1  ;;  %v11334_v42 = vld [vmem:[#allocation2 + $0xbc] ss:$240 sps:$4 sm:$0xff]   ;;  %2226 = vst [vmem:[#allocation2 + $0x388] sm:$0xf] %v2225_v0  ;;  %10520 = vmatprep.subr.bf16.mxu0 %v11346_v25  ;;  %v11363_v25 = vld [vmem:[%s14591_s1 + $0xc10] sm:$0xff]  }
 0x23d   : > { %v13815_v46 = vadd.f32 %v10282_v29, %v8103_v7  ;;  %v2261_v7 = vshll.u32 %v9170_v5, 16  ;;  %v10258_v34 = vpop.f32.mrf.mxu0  ;;  %8541 = vmatprep.mubr.bf16.mxu1 %v11334_v42  ;;  %v2277_v29 = vld [vmem:[#allocation2 + $0x38c] sm:$0xf]  ;;  %v11362_v5 = vld [vmem:[%s14591_s1 + $0xcd0] sm:$0xff]  }
 0x23e   : > { %v10284_v47 = vpop.f32.mrf.mxu1  ;;  %8542 = vmatmul.mubr.bf16.vlgmr.msra.gmra.mxu1 %v11332_v63  ;;  %v11364_v63 = vld [vmem:[%s14591_s1 + $0xc90] sm:$0xff]   ;;  %v11367_v42 = vld [vmem:[%s14591_s1 + $0xc08] sm:$0xff]  }
 0x23f   : > { %v10285_v57 = vadd.f32 %v10284_v47, %v10283_v31  ;;  %v2263_v44 = vrot.slane %v2261_v7, 5  ;;  %v10259_v12 = vpop.f32.mrf.mxu0  ;;  %10545 = vmatpush3.bf16.msra.mxu1 %v11338_v51  ;;  %10521 = vmatpush3.bf16.msra.mxu0 %v11350_v22  ;;  %v11355_v31 = vld [vmem:[%s14591_s1 + $0xc20] sm:$0xff]   ;;  %v11368_v0 = vld [vmem:[%s14591_s1 + $0xc88] sm:$0xff]  }
 0x240   : > { %v10260_v36 = vadd.f32 %v10259_v12, %v10258_v34  ;;  %10546 = vmatprep.subr.bf16.mxu1 %v11340_v28  ;;  %10522 = vmatprep.subr.bf16.mxu0 %v11353_v6  ;;  %v11371_v7 = vld [vmem:[%s14591_s1 + $0xc00] sm:$0xff]   ;;  %v13933_v34 = vld [vmem:[%s11728_s8 + $0x30] sm:$0xf]  ;;  %v9177_v22 = vld [vmem:[%s11728_s8 + $0x28] sm:$0xe] }
 0x241   : > { %v13834_v15 = vadd.f32 %v10285_v57, %v8106_v16  ;;  %v2264_v24 = vsel %vm11757_vm5, %v2259_v32, %v2263_v44  ;;  %v2268_v9 = vor.u32 %v2267_v35, %v2263_v44  ;;  %v10261_v50 = vpop.f32.mrf.mxu0  ;;  %v11345_v16 = vld [vmem:[#allocation2 + $0x290] ss:$240 sps:$4 sm:$0xff]   ;;  %v11358_v57 = vld [vmem:[%s14591_s1 + $0xcd8] sm:$0xff]   ;;  %v2292_v44 = vrot.slane %v9172_v2, 5  ;;  %v9178_v32 = vld [vmem:[%s11728_s8 + $0x2c] sm:$0xf] }
 0x242   : > { %2276 = vst [vmem:[#allocation2 + $0x29c] sm:$0xf] %v2264_v24  ;;  %v8111_v8 = vadd.f32 %v10260_v36, %v13716_v48  ;;  %v11343_v48 = vld [vmem:[#allocation2 + $0x294] ss:$240 sps:$4 sm:$0xff]   ;;  %v9179_v35 = vld [vmem:[%s11728_s8 + $0x30] sm:$0xf] }
 0x243   : > { %v2269_v11 = vrot.slane %v2268_v9, 4  ;;  %v10262_v1 = vpop.f32.mrf.mxu0  ;;  %10547 = vmatpush3.bf16.msra.mxu1 %v11342_v23  ;;  %8500 = vmatprep.mubr.bf16.mxu0 %v11343_v48  ;;  %v11352_v53 = vld [vmem:[#allocation2 + $0x298] ss:$240 sps:$4 sm:$0xff]   ;;  %v11370_v28 = vld [vmem:[%s14591_s1 + $0xcc0] sm:$0xff]   ;;  %v9176_v23 = vrot.slane %v9171_v62, 9  ;;  %v2319_v12 = vshrl.u32 %v9177_v22, 16 }
 0x244   : > { %v10263_v41 = vadd.f32 %v10262_v1, %v10261_v50  ;;  %10548 = vmatprep.subr.bf16.mxu1 %v11347_v43  ;;  %10523 = vmatpush3.bf16.msra.mxu0 %v11355_v31  ;;  %v2295_v43 = vrot.slane %v13933_v34, 5  ;;  %v2294_v36 = vrot.slane %v2292_v44, 4  ;;  %v2322_v24 = vshll.u32 %v9177_v22, 16  ;;  %v11379_v50 = vld [vmem:[%s14591_s1 + $0xd78] sm:$0xff]   ;;  %v9183_v31 = vld [vmem:[%s11728_s8 + $0x2c] sm:$0xf] }
 0x245   : > { %v2278_v4 = vsel %vm11802_vm10, %v2269_v11, %v2277_v29  ;;  %8501 = vmatmul.mubr.bf16.gmra.mxu0 %v11345_v16  ;;  %10524 = vmatprep.subr.bf16.mxu0 %v11357_v10  ;;  %v2293_v6 = vsel %vm11748_vm4, %v9176_v23, %v2292_v44  ;;  %v2328_v9 = vshrl.u32 %v9178_v32, 16  ;;  %v9182_v29 = vld [vmem:[%s11728_s8 + $0x28] sm:$0xc]  ;;  %v2338_v11 = vshrl.u32 %v9179_v35, 16  ;;  %v11380_v16 = vld [vmem:[%s14591_s1 + $0xdf8] sm:$0xff]  }
 0x246   : > { %2279 = vst [vmem:[#allocation2 + $0x38c] sm:$0xf] %v2278_v4  ;;  %v8114_v47 = vadd.f32 %v10263_v41, %v13730_v56  ;;  %v11361_v56 = vld [vmem:[%s14591_s1 + $0xc50] sm:$0xff]   ;;  %2307 = vst [vmem:[#allocation2 + $0xc0] sm:$0xf] %v2293_v6  ;;  %v2296_v1 = vsel %vm11748_vm4, %v2294_v36, %v2295_v43  ;;  %v2324_v10 = vrot.slane %v2322_v24, 6 }
 0x247   : > { %10549 = vmatpush3.bf16.msra.mxu1 %v11351_v60  ;;  %v2321_v60 = vrot.slane %v2319_v12, 5  ;;  %v13951_v41 = vld [vmem:[%s11728_s8 + $0x30] sm:$0xf]  ;;  %v9187_v48 = vrot.slane %v9182_v29, 10  ;;  %2308 = vst [vmem:[#allocation2 + $0x1b0] sm:$0xf] %v2296_v1 }
 0x248   : > { %v10286_v52 = vpop.f32.mrf.mxu1  ;;  %10550 = vmatprep.subr.bf16.mxu1 %v11354_v13  ;;  %10525 = vmatpush3.bf16.msra.mxu0 %v11359_v26  ;;  %v2341_v13 = vshll.u32 %v9179_v35, 16  ;;  %v9188_v26 = vld [vmem:[%s11728_s8 + $0x28] sm:$0xc]  ;;  %v9175_v1 = vld [vmem:[%s11728_s8 + $0x38] sm:$0x1] }
 0x249   : > { %10526 = vmatprep.subr.bf16.mxu0 %v11361_v56  ;;  %v9190_v56 = vld [vmem:[%s11728_s8 + $0x30] sm:$0xf]  ;;  %v9181_v34 = vld [vmem:[%s11728_s8 + $0x38] sm:$0x1] }
 0x24a   : > { %v10287_v3 = vpop.f32.mrf.mxu1 }
 0x24b   : > { %v10288_v19 = vadd.f32 %v10287_v3, %v10286_v52  ;;  %10551 = vmatpush3.bf16.msra.mxu1 %v11356_v21  ;;  %v2330_v52 = vrot.slane %v2328_v9, 5  ;;  %v2340_v21 = vrot.slane %v2338_v11, 5  ;;  %v2343_v3 = vrot.slane %v2341_v13, 6 }
 0x24c   : > { %v10289_v51 = vpop.f32.mrf.mxu1  ;;  %10552 = vmatprep.subr.bf16.mxu1 %v11358_v57  ;;  %10527 = vmatpush3.bf16.msra.mxu0 %v11363_v25  ;;  %v2391_v57 = vrot.slane %v13951_v41, 6  ;;  %v2406_v41 = vld [vmem:[#allocation2 + $0x398] sm:$0xf] }
 0x24d   : > { %v13887_v38 = vadd.f32 %v10288_v19, %v8111_v8  ;;  %v11348_v59 = vld [vmem:[#allocation2 + $0x29c] ss:$240 sps:$4 sm:$0xff]   ;;  %10528 = vmatprep.subr.bf16.mxu0 %v11365_v14  ;;  %v2331_v8 = vshll.u32 %v9178_v32, 16  ;;  %v2325_v19 = vor.u32 %v2324_v10, %v2321_v60  ;;  %v2418_v14 = vshll.u32 %v9188_v26, 16 }
 0x24e   : > { %v10290_v61 = vpop.f32.mrf.mxu1  ;;  %8549 = vmatprep.mubr.bf16.mxu1 %v11348_v59  ;;  %v2297_v10 = vrot.slane %v2295_v43, 4 }
 0x24f   : > { %v10291_v55 = vadd.f32 %v10290_v61, %v10289_v51  ;;  %8550 = vmatmul.mubr.bf16.gmra.mxu1 %v11352_v53  ;;  %v2333_v4 = vrot.slane %v2331_v8, 6  ;;  %v9189_v51 = vld [vmem:[%s11728_s8 + $0x2c] sm:$0xf]  ;;  %v2415_v61 = vshrl.u32 %v9188_v26, 16  ;;  %v2326_v53 = vrot.slane %v2325_v19, 4  ;;  %v11381_v26 = vld [vmem:[%s14591_s1 + $0xd38] sm:$0xff]  }
 0x250   : > { %10553 = vmatpush3.bf16.msra.mxu1 %v11360_v20  ;;  %10529 = vmatpush3.bf16.msra.mxu0 %v11367_v42  ;;  %v2420_v62 = vrot.slane %v2418_v14, 7 }
 0x251   : > { %v13898_v58 = vadd.f32 %v10291_v55, %v8114_v47  ;;  %10554 = vmatprep.subr.bf16.mxu1 %v11362_v5  ;;  %10530 = vmatprep.subr.bf16.mxu0 %v11369_v39  ;;  %v2388_v47 = vrot.slane %v9183_v31, 6  ;;  %v2334_v20 = vor.u32 %v2333_v4, %v2330_v52  ;;  %v13960_v55 = vor.u32 %v2343_v3, %v2340_v21  ;;  %v9174_v31 = vld [vmem:[%s11728_s8 + $0x34] sm:$0xf]  ;;  %v2310_v21 = vld [vmem:[#allocation2 + $0x390] sm:$0xf] }
 0x252   : > { %v2417_v5 = vrot.slane %v2415_v61, 6  ;;  %v2427_v39 = vshll.u32 %v9189_v51, 16  ;;  %v2301_v4 = vrot.slane %v9175_v1, 5  ;;  %v9180_v3 = vld [vmem:[%s11728_s8 + $0x34] sm:$0xf] }
 0x253   : > { %v2389_v25 = vsel %vm11903_vm13, %v9187_v48, %v2388_v47  ;;  %v2390_v59 = vrot.slane %v2388_v47, 4  ;;  %v2336_v42 = vrot.slane %v2334_v20, 4  ;;  %v2346_v52 = vrot.slane %v13960_v55, 4  ;;  %v11373_v61 = vld [vmem:[#allocation2 + $0xc0] ss:$240 sps:$4 sm:$0xff]  }
 0x254   : > { %10555 = vmatpush3.bf16.msra.mxu1 %v11364_v63  ;;  %10531 = vmatpush3.bf16.msra.mxu0 %v11371_v7  ;;  %2403 = vst [vmem:[#allocation2 + $0xc8] sm:$0xf] %v2389_v25  ;;  %v2424_v63 = vshrl.u32 %v9189_v51, 16  ;;  %v2429_v44 = vrot.slane %v2427_v39, 7  ;;  %v2421_v35 = vor.u32 %v2420_v62, %v2417_v5  ;;  %v2348_v43 = vshrl.u32 %v9180_v3, 16 }
 0x255   : > { %10556 = vmatprep.subr.bf16.mxu1 %v11366_v33  ;;  %10572 = vmatprep.subr.bf16.mxu0 %v11379_v50  ;;  %v2392_v33 = vsel %vm11903_vm13, %v2390_v59, %v2391_v57  ;;  %v2345_v23 = vsel %vm11783_vm8, %v2336_v42, %v13960_v55  ;;  %v2351_v19 = vshll.u32 %v9180_v3, 16  ;;  %v2361_v42 = vshll.u32 %v9181_v34, 16 }
 0x256   : > { %2404 = vst [vmem:[#allocation2 + $0x1b8] sm:$0xf] %v2392_v33  ;;  %v2426_v2 = vrot.slane %v2424_v63, 6  ;;  %2371 = vst [vmem:[#allocation2 + $0x1b4] sm:$0xf] %v2345_v23  ;;  %v2422_v9 = vrot.slane %v2421_v35, 4 }
 0x257   : > { %v2350_v5 = vrot.slane %v2348_v43, 5  ;;  %v2353_v14 = vrot.slane %v2351_v19, 6  ;;  %v2358_v63 = vshrl.u32 %v9181_v34, 16  ;;  %v2363_v62 = vrot.slane %v2361_v42, 6  ;;  %v11385_v23 = vld [vmem:[%s14591_s1 + $0xd30] sm:$0xff]   ;;  %v11397_v19 = vld [vmem:[%s14591_s1 + $0xd60] sm:$0xff]  }
 0x258   : > { %10557 = vmatpush3.bf16.msra.mxu1 %v11368_v0  ;;  %v2434_v0 = vshrl.u32 %v9190_v56, 16  ;;  %v2430_v36 = vor.u32 %v2429_v44, %v2426_v2  ;;  %v2373_v2 = vld [vmem:[#allocation2 + $0x394] sm:$0xf]  ;;  %v11395_v42 = vld [vmem:[%s14591_s1 + $0xda8] sm:$0xff]  }
 0x259   : > { %10558 = vmatprep.subr.bf16.mxu1 %v11370_v28  ;;  %v2335_v28 = vsel %vm11783_vm8, %v2326_v53, %v2334_v20  ;;  %v11383_v53 = vld [vmem:[%s14591_s1 + $0xd70] sm:$0xff]  }
 0x25a   : > { %2370 = vst [vmem:[#allocation2 + $0xc4] sm:$0xf] %v2335_v28  ;;  %v2436_v22 = vrot.slane %v2434_v0, 6  ;;  %v2432_v60 = vrot.slane %v2430_v36, 4  ;;  %v2431_v13 = vsel %vm11959_vm6, %v2422_v9, %v2430_v36  ;;  %v2360_v28 = vrot.slane %v2358_v63, 5  ;;  %v11390_v9 = vld [vmem:[%s14591_s1 + $0xd68] sm:$0xff]  }
 0x25b   : > { %2466 = vst [vmem:[#allocation2 + $0xcc] sm:$0xf] %v2431_v13  ;;  %v9185_v44 = vld [vmem:[%s11728_s8 + $0x34] sm:$0xf]  ;;  %v2469_v63 = vld [vmem:[#allocation2 + $0x39c] sm:$0xf] }
 0x25c   : > { %10559 = vmatpush3.bf16.msra.mxu1 %v11372_v37  ;;  %v2437_v37 = vshll.u32 %v9190_v56, 16 }
 0x25d   : > { %10600 = vmatprep.subr.bf16.mxu1 %v11380_v16 }
 0x25e   : > { %v2439_v12 = vrot.slane %v2437_v37, 7  ;;  %v11382_v37 = vld [vmem:[%s14591_s1 + $0xdb8] sm:$0xff]  }
 0x25f   : > { %v10308_v7 = vpop.f32.mrf.mxu0 }
 0x260   : > { %v13973_v29 = vor.u32 %v2439_v12, %v2436_v22  ;;  %v9186_v22 = vld [vmem:[%s11728_s8 + $0x38] sm:$0x3]  ;;  %v11384_v12 = vld [vmem:[%s14591_s1 + $0xdf0] sm:$0xff]  }
 0x261   : > { %v10309_v32 = vpop.f32.mrf.mxu0  ;;  %v10336_v8 = vpop.f32.mrf.mxu1  ;;  %v11375_v20 = vld [vmem:[#allocation2 + $0xc4] ss:$240 sps:$4 sm:$0xff]  }
 0x262   : > { %v10310_v6 = vadd.f32 %v10309_v32, %v10308_v7  ;;  %v2441_v16 = vsel %vm11959_vm6, %v2432_v60, %v13973_v29  ;;  %8590 = vmatprep.mubr.bf16.mxu0 %v11375_v20  ;;  %v2354_v7 = vor.u32 %v2353_v14, %v2350_v5  ;;  %v2393_v32 = vrot.slane %v2391_v57, 4  ;;  %v11376_v57 = vld [vmem:[#allocation2 + $0xc8] ss:$240 sps:$4 sm:$0xff]  }
 0x263   : > { %v10311_v24 = vpop.f32.mrf.mxu0  ;;  %v10337_v47 = vpop.f32.mrf.mxu1  ;;  %2467 = vst [vmem:[#allocation2 + $0x1bc] sm:$0xf] %v2441_v16  ;;  %8591 = vmatmul.mubr.bf16.vlgmr.msra.gmra.mxu0 %v11373_v61  ;;  %v11386_v16 = vld [vmem:[%s14591_s1 + $0xdb0] sm:$0xff]  }
 0x264   : > { %v8201_v50 = vadd.f32 %v10310_v6, %v13815_v46  ;;  %v2298_v46 = vrot.slane %v9174_v31, 5  ;;  %v10338_v51 = vadd.f32 %v10337_v47, %v10336_v8  ;;  %10573 = vmatpush3.bf16.msra.mxu0 %v11381_v26  ;;  %v2355_v6 = vsel %vm11783_vm8, %v2346_v52, %v2354_v7  ;;  %v9192_v52 = vld [vmem:[%s11728_s8 + $0x38] sm:$0x3]  ;;  %v11394_v47 = vld [vmem:[%s14591_s1 + $0xd28] sm:$0xff]  }
 0x265   : > { %v10312_v11 = vpop.f32.mrf.mxu0  ;;  %v10339_v59 = vpop.f32.mrf.mxu1  ;;  %10574 = vmatprep.subr.bf16.mxu0 %v11383_v53  ;;  %v2356_v36 = vrot.slane %v2354_v7, 4  ;;  %2372 = vst [vmem:[#allocation2 + $0x2a4] sm:$0xf] %v2355_v6  ;;  %v2397_v8 = vrot.slane %v9186_v22, 6  ;;  %v2454_v3 = vshrl.u32 %v9192_v52, 16  ;;  %v2457_v43 = vshll.u32 %v9192_v52, 16 }
 0x266   : > { %v10313_v48 = vadd.f32 %v10312_v11, %v10311_v24  ;;  %v2299_v55 = vsel %vm11748_vm4, %v2297_v10, %v2298_v46  ;;  %v2300_v25 = vrot.slane %v2298_v46, 4  ;;  %v13999_v33 = vadd.f32 %v10338_v51, %v8201_v50  ;;  %v9191_v10 = vld [vmem:[%s11728_s8 + $0x34] sm:$0xf]  ;;  %v11401_v53 = vld [vmem:[%s14591_s1 + $0xd58] sm:$0xff]  }
 0x267   : > { %2309 = vst [vmem:[#allocation2 + $0x2a0] sm:$0xf] %v2299_v55  ;;  %v10340_v39 = vpop.f32.mrf.mxu1  ;;  %v2364_v24 = vor.u32 %v2363_v62, %v2360_v28  ;;  %v2394_v50 = vrot.slane %v9185_v44, 6  ;;  %v2456_v20 = vrot.slane %v2454_v3, 6  ;;  %v11399_v55 = vld [vmem:[%s14591_s1 + $0xd20] sm:$0xff]  }
 0x268   : > { %v8204_v56 = vadd.f32 %v10313_v48, %v13834_v15  ;;  %v2302_v15 = vsel %vm11748_vm4, %v2300_v25, %v2301_v4  ;;  %v10341_v35 = vadd.f32 %v10340_v39, %v10339_v59  ;;  %v2442_v48 = vrot.slane %v13973_v29, 4  ;;  %10575 = vmatpush3.bf16.msra.mxu0 %v11385_v23  ;;  %v11391_v29 = vld [vmem:[%s14591_s1 + $0xde8] sm:$0xff]   ;;  %v11398_v62 = vld [vmem:[%s14591_s1 + $0xde0] sm:$0xff]  }
 0x269   : > { %v2311_v0 = vsel %vm11802_vm10, %v2302_v15, %v2310_v21  ;;  %v2365_v13 = vsel %vm11783_vm8, %v2356_v36, %v2364_v24  ;;  %v2395_v31 = vsel %vm11903_vm13, %v2393_v32, %v2394_v50  ;;  %v2396_v1 = vrot.slane %v2394_v50, 4  ;;  %10576 = vmatprep.subr.bf16.mxu0 %v11390_v9  ;;  %v11403_v36 = vld [vmem:[%s14591_s1 + $0xd18] sm:$0xff]   ;;  %v11413_v3 = vld [vmem:[%s14591_s1 + $0xd40] sm:$0xff]  }
 0x26a   : > { %2312 = vst [vmem:[#allocation2 + $0x390] sm:$0xf] %v2311_v0  ;;  %v11378_v60 = vld [vmem:[#allocation2 + $0xcc] ss:$240 sps:$4 sm:$0xff]   ;;  %v14021_v11 = vadd.f32 %v10341_v35, %v8204_v56  ;;  %v2374_v46 = vsel %vm11802_vm10, %v2365_v13, %v2373_v2  ;;  %2405 = vst [vmem:[#allocation2 + $0x2a8] sm:$0xf] %v2395_v31 }
 0x26b   : > { %8639 = vmatprep.mubr.bf16.mxu1 %v11378_v60  ;;  %v2444_v4 = vshrl.u32 %v9191_v10, 16  ;;  %v2447_v21 = vshll.u32 %v9191_v10, 16  ;;  %2375 = vst [vmem:[#allocation2 + $0x394] sm:$0xf] %v2374_v46  ;;  %v2398_v34 = vsel %vm11903_vm13, %v2396_v1, %v2397_v8  ;;  %v2459_v59 = vrot.slane %v2457_v43, 7  ;;  %v11402_v9 = vld [vmem:[%s14591_s1 + $0xdd8] sm:$0xff]  }
 0x26c   : > { %8640 = vmatmul.mubr.bf16.vlgmr.msra.gmra.mxu1 %v11376_v57  ;;  %v2407_v51 = vsel %vm11802_vm10, %v2398_v34, %v2406_v41  ;;  %10577 = vmatpush3.bf16.msra.mxu0 %v11394_v47  ;;  %v11404_v57 = vld [vmem:[%s14591_s1 + $0xd98] sm:$0xff]   ;;  %v11407_v8 = vld [vmem:[%s14591_s1 + $0xd10] sm:$0xff]   ;;  %v11409_v10 = vld [vmem:[%s14591_s1 + $0xd48] sm:$0xff]  }
 0x26d   : > { %v10314_v26 = vpop.f32.mrf.mxu0  ;;  %10601 = vmatpush3.bf16.msra.mxu1 %v11382_v37  ;;  %v2446_v56 = vrot.slane %v2444_v4, 6  ;;  %v2449_v61 = vrot.slane %v2447_v21, 7  ;;  %2408 = vst [vmem:[#allocation2 + $0x398] sm:$0xf] %v2407_v51  ;;  %v2460_v39 = vor.u32 %v2459_v59, %v2456_v20  ;;  %10578 = vmatprep.subr.bf16.mxu0 %v11397_v19  ;;  %v11406_v31 = vld [vmem:[%s14591_s1 + $0xdd0] sm:$0xff]   ;;  %v11410_v46 = vld [vmem:[%s14591_s1 + $0xdc8] sm:$0xff]  }
 0x26e   : > { %10602 = vmatprep.subr.bf16.mxu1 %v11384_v12  ;;  %v11408_v1 = vld [vmem:[%s14591_s1 + $0xd90] sm:$0xff]   ;;  %v11411_v4 = vld [vmem:[%s14591_s1 + $0xd08] sm:$0xff]   ;;  %v11414_v47 = vld [vmem:[%s14591_s1 + $0xdc0] sm:$0xff]  }
 0x26f   : > { %v10315_v25 = vpop.f32.mrf.mxu0  ;;  %v2450_v14 = vor.u32 %v2449_v61, %v2446_v56  ;;  %v11412_v21 = vld [vmem:[%s14591_s1 + $0xd88] sm:$0xff]   ;;  %v14123_v19 = vld [vmem:[%s11728_s8 + $0x30] sm:$0xf]  ;;  %v11423_v56 = vld [vmem:[%s14591_s1 + $0xe78] sm:$0xff]  }
 0x270   : > { %v10316_v5 = vadd.f32 %v10315_v25, %v10314_v26  ;;  %10579 = vmatpush3.bf16.msra.mxu0 %v11399_v55  ;;  %v11415_v26 = vld [vmem:[%s14591_s1 + $0xd00] sm:$0xff]   ;;  %v9193_v34 = vld [vmem:[%s11728_s8 + $0x28] sm:$0x8]  ;;  %v9194_v43 = vld [vmem:[%s11728_s8 + $0x2c] sm:$0xf]  ;;  %v2487_v20 = vrot.slane %v14123_v19, 7 }
 0x271   : > { %v10317_v15 = vpop.f32.mrf.mxu0  ;;  %10603 = vmatpush3.bf16.msra.mxu1 %v11386_v16  ;;  %v2451_v7 = vsel %vm11959_vm6, %v2442_v48, %v2450_v14  ;;  %v2452_v28 = vrot.slane %v2450_v14, 4  ;;  %v11389_v22 = vld [vmem:[#allocation2 + $0x2a0] ss:$240 sps:$4 sm:$0xff]   ;;  %10580 = vmatprep.subr.bf16.mxu0 %v11401_v53  ;;  %v9198_v51 = vrot.slane %v9193_v34, 11  ;;  %v2484_v61 = vrot.slane %v9194_v43, 7  ;;  %v11425_v43 = vld [vmem:[%s14591_s1 + $0xe38] sm:$0xff]  }
 0x272   : > { %v8209_v0 = vadd.f32 %v10316_v5, %v13887_v38  ;;  %10604 = vmatprep.subr.bf16.mxu1 %v11391_v29  ;;  %2468 = vst [vmem:[#allocation2 + $0x2ac] sm:$0xf] %v2451_v7  ;;  %v11387_v44 = vld [vmem:[#allocation2 + $0x2a4] ss:$240 sps:$4 sm:$0xff]   ;;  %v9199_v55 = vld [vmem:[%s11728_s8 + $0x28] sm:$0x8] }
 0x273   : > { %v10318_v2 = vpop.f32.mrf.mxu0  ;;  %v2461_v32 = vsel %vm11959_vm6, %v2452_v28, %v2460_v39  ;;  %v11400_v38 = vld [vmem:[%s14591_s1 + $0xda0] sm:$0xff]   ;;  %8598 = vmatprep.mubr.bf16.mxu0 %v11387_v44  ;;  %v9200_v25 = vld [vmem:[%s11728_s8 + $0x2c] sm:$0xf]  ;;  %v9201_v59 = vld [vmem:[%s11728_s8 + $0x30] sm:$0xf]  ;;  %v2511_v53 = vshrl.u32 %v9199_v55, 16 }
 0x274   : > { %v10319_v23 = vadd.f32 %v10318_v2, %v10317_v15  ;;  %v2470_v35 = vsel %vm11802_vm10, %v2461_v32, %v2469_v63  ;;  %8599 = vmatmul.mubr.bf16.gmra.mxu0 %v11389_v22  ;;  %v11396_v16 = vld [vmem:[#allocation2 + $0x2a8] ss:$240 sps:$4 sm:$0xff]   ;;  %v11416_v29 = vld [vmem:[%s14591_s1 + $0xd80] sm:$0xff]   ;;  %v2516_v5 = vshrl.u32 %v9200_v25, 16  ;;  %v2519_v14 = vshll.u32 %v9200_v25, 16 }
 0x275   : > { %2471 = vst [vmem:[#allocation2 + $0x39c] sm:$0xf] %v2470_v35  ;;  %10605 = vmatpush3.bf16.msra.mxu1 %v11395_v42  ;;  %10581 = vmatpush3.bf16.msra.mxu0 %v11403_v36  ;;  %v11424_v63 = vld [vmem:[%s14591_s1 + $0xef8] sm:$0xff]   ;;  %v2485_v42 = vsel %vm11948_vm3, %v9198_v51, %v2484_v61  ;;  %v2486_v15 = vrot.slane %v2484_v61, 4  ;;  %v2525_v39 = vshrl.u32 %v9201_v59, 16  ;;  %v9204_v28 = vrot.slane %v2511_v53, 11 }
 0x276   : > { %v8212_v6 = vadd.f32 %v10319_v23, %v13898_v58  ;;  %10606 = vmatprep.subr.bf16.mxu1 %v11398_v62  ;;  %v11405_v58 = vld [vmem:[%s14591_s1 + $0xd50] sm:$0xff]   ;;  %v9205_v7 = vld [vmem:[%s11728_s8 + $0x2c] sm:$0xf]  ;;  %2499 = vst [vmem:[#allocation2 + $0xd0] sm:$0xf] %v2485_v42  ;;  %v2518_v62 = vrot.slane %v2516_v5, 7 }
 0x277   : > { %10582 = vmatprep.subr.bf16.mxu0 %v11405_v58  ;;  %v9206_v2 = vld [vmem:[%s11728_s8 + $0x30] sm:$0xf]  ;;  %2564 = vst [vmem:[#allocation2 + $0xd8] sm:$0xf] %v9205_v7  ;;  %v2488_v23 = vsel %vm11948_vm3, %v2486_v15, %v2487_v20  ;;  %v14142_v44 = vrot.slane %v2525_v39, 7  ;;  %v2489_v19 = vrot.slane %v2487_v20, 4 }
 0x278   : > { %2565 = vst [vmem:[#allocation2 + $0x1c8] sm:$0xf] %v9206_v2  ;;  %v9210_v22 = vld [vmem:[%s11728_s8 + $0x30] sm:$0xf]  ;;  %v9211_v32 = vld [vmem:[%s11728_s8 + $0x34] sm:$0xf]  ;;  %v2521_v35 = vor.u32 %v2519_v14, %v2518_v62 }
 0x279   : > { %10607 = vmatpush3.bf16.msra.mxu1 %v11400_v38  ;;  %10583 = vmatpush3.bf16.msra.mxu0 %v11407_v8  ;;  %2500 = vst [vmem:[#allocation2 + $0x1c0] sm:$0xf] %v2488_v23  ;;  %v2584_v36 = vshll.u32 %v9210_v22, 16  ;;  %v2594_v58 = vshll.u32 %v9211_v32, 16  ;;  %v2502_v61 = vld [vmem:[#allocation2 + $0x3a0] sm:$0xf] }
 0x27a   : > { %10608 = vmatprep.subr.bf16.mxu1 %v11402_v9  ;;  %10584 = vmatprep.subr.bf16.mxu0 %v11409_v10  ;;  %v9202_v55 = vld [vmem:[%s11728_s8 + $0x34] sm:$0xf]  ;;  %v9203_v25 = vld [vmem:[%s11728_s8 + $0x38] sm:$0x7] }
 0x27b   : > { %v2586_v8 = vrot.slane %v2584_v36, 5  ;;  %v14153_v10 = vrot.slane %v2594_v58, 5  ;;  %v11427_v20 = vld [vmem:[%s14591_s1 + $0xe70] sm:$0xff]   ;;  %v2534_v39 = vshrl.u32 %v9202_v55, 16  ;;  %v2543_v7 = vshrl.u32 %v9203_v25, 16 }
 0x27c   : > { %v11392_v48 = vld [vmem:[#allocation2 + $0x2ac] ss:$240 sps:$4 sm:$0xff]  }
 0x27d   : > { %10609 = vmatpush3.bf16.msra.mxu1 %v11404_v57  ;;  %8647 = vmatprep.mubr.bf16.mxu1 %v11392_v48  ;;  %v2522_v57 = vsel %vm11977_vm9, %v9204_v28, %v2521_v35  ;;  %v2546_v28 = vshll.u32 %v9203_v25, 16  ;;  %v2536_v23 = vrot.slane %v2534_v39, 7  ;;  %v9207_v35 = vld [vmem:[%s11728_s8 + $0x34] sm:$0xf]  ;;  %v11439_v39 = vld [vmem:[%s14591_s1 + $0xea8] sm:$0xff]  }
 0x27e   : > { %10610 = vmatprep.subr.bf16.mxu1 %v11406_v31  ;;  %8648 = vmatmul.mubr.bf16.gmra.mxu1 %v11396_v16  ;;  %2554 = vst [vmem:[#allocation2 + $0xd4] sm:$0xf] %v2522_v57  ;;  %v2557_v57 = vld [vmem:[#allocation2 + $0x3a4] sm:$0xf]  ;;  %2566 = vst [vmem:[#allocation2 + $0x2b8] sm:$0xf] %v9207_v35 }
 0x27f   : > { %10585 = vmatpush3.bf16.msra.mxu0 %v11411_v4 }
 0x280   : > { %10586 = vmatprep.subr.bf16.mxu0 %v11413_v3  ;;  %v2598_v3 = vshrl.u32 %v9211_v32, 16  ;;  %v11417_v5 = vld [vmem:[#allocation2 + $0xd0] ss:$240 sps:$4 sm:$0xff]  }
 0x281   : > { %10611 = vmatpush3.bf16.msra.mxu1 %v11408_v1 }
 0x282   : > { %10612 = vmatprep.subr.bf16.mxu1 %v11410_v46  ;;  %v2600_v32 = vrot.slane %v2598_v3, 4 }
 0x283   : > { %10587 = vmatpush3.bf16.msra.mxu0 %v11415_v26  ;;  %v9196_v26 = vld [vmem:[%s11728_s8 + $0x34] sm:$0xf] }
 0x284   : > { %10628 = vmatprep.subr.bf16.mxu0 %v11423_v56  ;;  %v2490_v51 = vrot.slane %v9196_v26, 7 }
 0x285   : > { %10613 = vmatpush3.bf16.msra.mxu1 %v11412_v21 }
 0x286   : > { %10614 = vmatprep.subr.bf16.mxu1 %v11414_v47  ;;  %v2492_v42 = vrot.slane %v2490_v51, 4 }
 0x289   : > { %10615 = vmatpush3.bf16.msra.mxu1 %v11416_v29  ;;  %v9197_v29 = vld [vmem:[%s11728_s8 + $0x38] sm:$0x7] }
 0x28a   : > { %10656 = vmatprep.subr.bf16.mxu1 %v11424_v63  ;;  %v2493_v56 = vrot.slane %v9197_v29, 7  ;;  %v2491_v63 = vsel %vm11948_vm3, %v2489_v19, %v2490_v51  ;;  %v11430_v29 = vld [vmem:[%s14591_s1 + $0xeb0] sm:$0xff]   ;;  %v11435_v19 = vld [vmem:[%s14591_s1 + $0xee8] sm:$0xff]  }
 0x28b   : > { %2501 = vst [vmem:[#allocation2 + $0x2b0] sm:$0xf] %v2491_v63  ;;  %v11443_v63 = vld [vmem:[%s14591_s1 + $0xe20] sm:$0xff]  }
 0x28c   : > { %v2494_v2 = vsel %vm11948_vm3, %v2492_v42, %v2493_v56 }
 0x291   : > { %v10342_v37 = vpop.f32.mrf.mxu1 }
 0x293   : > { %v10343_v12 = vpop.f32.mrf.mxu1 }
 0x294   : > { %v10344_v24 = vadd.f32 %v10343_v12, %v10342_v37  ;;  %v9209_v37 = vld [vmem:[%s11728_s8 + $0x2c] sm:$0xf]  ;;  %v2523_v12 = vrot.slane %v2518_v62, 4  ;;  %v11429_v62 = vld [vmem:[%s14591_s1 + $0xe30] sm:$0xff]  }
 0x295   : > { %v10345_v50 = vpop.f32.mrf.mxu1  ;;  %v2575_v38 = vshrl.u32 %v9209_v37, 16 }
 0x296   : > { %v14080_v41 = vadd.f32 %v10344_v24, %v8209_v0  ;;  %v2528_v0 = vshll.u32 %v9201_v59, 16  ;;  %v2532_v59 = vrot.slane %v14142_v44, 4 }
 0x297   : > { %v10346_v60 = vpop.f32.mrf.mxu1  ;;  %v2577_v9 = vrot.slane %v2575_v38, 4 }
 0x298   : > { %v10347_v13 = vadd.f32 %v10346_v60, %v10345_v50  ;;  %v2530_v24 = vor.u32 %v2528_v0, %v14142_v44  ;;  %v2588_v50 = vshrl.u32 %v9210_v22, 16  ;;  %v2537_v0 = vshll.u32 %v9202_v55, 16  ;;  %v11434_v22 = vld [vmem:[%s14591_s1 + $0xe68] sm:$0xff]   ;;  %v11441_v55 = vld [vmem:[%s14591_s1 + $0xe60] sm:$0xff]  }
 0x299   : > { %v2545_v44 = vrot.slane %v2543_v7, 7  ;;  %v11445_v7 = vld [vmem:[%s14591_s1 + $0xe58] sm:$0xff]  }
 0x29a   : > { %v14097_v52 = vadd.f32 %v10347_v13, %v8212_v6  ;;  %v2578_v6 = vshll.u32 %v9209_v37, 16  ;;  %v2531_v31 = vsel %vm11977_vm9, %v2523_v12, %v2530_v24  ;;  %v2590_v1 = vrot.slane %v2588_v50, 4  ;;  %v9208_v12 = vld [vmem:[%s11728_s8 + $0x38] sm:$0xf]  ;;  %v11428_v24 = vld [vmem:[%s14591_s1 + $0xef0] sm:$0xff]  }
 0x29b   : > { %2555 = vst [vmem:[#allocation2 + $0x1c4] sm:$0xf] %v2531_v31  ;;  %v2503_v37 = vsel %vm11802_vm10, %v2494_v2, %v2502_v61  ;;  %v2541_v50 = vrot.slane %v2536_v23, 4  ;;  %v2548_v58 = vor.u32 %v2546_v28, %v2545_v44  ;;  %v11420_v31 = vld [vmem:[#allocation2 + $0xd8] ss:$240 sps:$4 sm:$0xff]   ;;  %v11444_v44 = vld [vmem:[%s14591_s1 + $0xea0] sm:$0xff]  }
 0x29c   : > { %v2580_v60 = vrot.slane %v2578_v6, 5  ;;  %v2591_v16 = vor.u32 %v2590_v1, %v2586_v8  ;;  %2504 = vst [vmem:[#allocation2 + $0x3a0] sm:$0xf] %v2503_v37  ;;  %v2567_v6 = vld [vmem:[#allocation2 + $0x3a8] sm:$0xf] }
 0x29e   : > { %v2581_v48 = vor.u32 %v2580_v60, %v2577_v9  ;;  %v2592_v21 = vrot.slane %v2591_v16, 4  ;;  %v2539_v9 = vor.u32 %v2537_v0, %v2536_v23  ;;  %v2568_v60 = vsel %vm11802_vm10, %v9208_v12, %v2567_v6  ;;  %v11446_v12 = vld [vmem:[%s14591_s1 + $0xed8] sm:$0xff]  }
 0x29f   : > { %v14149_v13 = vpop.f32.mrf.mxu0  ;;  %2569 = vst [vmem:[#allocation2 + $0x3a8] sm:$0xf] %v2568_v60  ;;  %v11450_v60 = vld [vmem:[%s14591_s1 + $0xed0] sm:$0xff]  }
 0x2a0   : > { %v2582_v46 = vrot.slane %v2581_v48, 4  ;;  %v2597_v34 = vsel %vm11757_vm5, %v2592_v21, %v14153_v10  ;;  %v2601_v48 = vor.u32 %v2600_v32, %v14153_v10  ;;  %v2549_v21 = vsel %vm11977_vm9, %v2541_v50, %v2548_v58  ;;  %v11448_v50 = vld [vmem:[%s14591_s1 + $0xe98] sm:$0xff]   ;;  %v11451_v58 = vld [vmem:[%s14591_s1 + $0xe10] sm:$0xff]  }
 0x2a1   : > { %v14155_v4 = vpop.f32.mrf.mxu0  ;;  %2618 = vst [vmem:[#allocation2 + $0x1cc] sm:$0xf] %v2597_v34  ;;  %v2558_v10 = vsel %vm11802_vm10, %v2549_v21, %v2557_v57  ;;  %v11454_v21 = vld [vmem:[%s14591_s1 + $0xec8] sm:$0xff]  }
 0x2a2   : > { %v2587_v47 = vsel %vm11757_vm5, %v2582_v46, %v2586_v8  ;;  %v11419_v14 = vld [vmem:[#allocation2 + $0xd4] ss:$240 sps:$4 sm:$0xff]   ;;  %v9212_v8 = vld [vmem:[%s11728_s8 + $0x38] sm:$0xf]  ;;  %v2540_v46 = vsel %vm11977_vm9, %v2532_v59, %v2539_v9  ;;  %v2602_v34 = vrot.slane %v2601_v48, 4  ;;  %v11453_v48 = vld [vmem:[%s14591_s1 + $0xe48] sm:$0xff]  }
 0x2a3   : > { %2617 = vst [vmem:[#allocation2 + $0xdc] sm:$0xf] %v2587_v47  ;;  %v14170_v53 = vpop.f32.mrf.mxu0  ;;  %8688 = vmatprep.mubr.bf16.mxu0 %v11419_v14  ;;  %v2604_v16 = vshll.u32 %v9212_v8, 16  ;;  %v2608_v3 = vshrl.u32 %v9212_v8, 16  ;;  %v11438_v47 = vld [vmem:[%s14591_s1 + $0xe28] sm:$0xff]  }
 0x2a4   : > { %8689 = vmatmul.mubr.bf16.vlgmr.msra.gmra.mxu0 %v11417_v5  ;;  %2556 = vst [vmem:[#allocation2 + $0x2b4] sm:$0xf] %v2540_v46  ;;  %2559 = vst [vmem:[#allocation2 + $0x3a4] sm:$0xf] %v2558_v10  ;;  %v2620_v5 = vld [vmem:[#allocation2 + $0x3ac] sm:$0xf] }
 0x2a5   : > { %v14189_v38 = vpop.f32.mrf.mxu0  ;;  %10629 = vmatpush3.bf16.msra.mxu0 %v11425_v43  ;;  %v2606_v43 = vrot.slane %v2604_v16, 5  ;;  %v2610_v51 = vrot.slane %v2608_v3, 4  ;;  %v11433_v23 = vld [vmem:[#allocation2 + $0x2b0] ss:$240 sps:$4 sm:$0xff]   ;;  %v11455_v46 = vld [vmem:[%s14591_s1 + $0xe08] sm:$0xff]  }
 0x2a6   : > { %10630 = vmatprep.subr.bf16.mxu0 %v11427_v20  ;;  %v11452_v16 = vld [vmem:[%s14591_s1 + $0xe90] sm:$0xff]   ;;  %v11457_v3 = vld [vmem:[%s14591_s1 + $0xe40] sm:$0xff]   ;;  %v9213_v10 = vld [vmem:[%s11728_s8 + $0x2c] sm:$0xe] }
 0x2a7   : > { %v2607_v61 = vsel %vm11757_vm5, %v2602_v34, %v2606_v43  ;;  %v2611_v59 = vor.u32 %v2610_v51, %v2606_v43  ;;  %v9214_v34 = vld [vmem:[%s11728_s8 + $0x30] sm:$0xf]  ;;  %v14297_v43 = vld [vmem:[%s11728_s8 + $0x34] sm:$0xf] }
 0x2a8   : > { %2619 = vst [vmem:[#allocation2 + $0x2bc] sm:$0xf] %v2607_v61  ;;  %v2635_v51 = vrot.slane %v9214_v34, 5  ;;  %v9219_v61 = vld [vmem:[%s11728_s8 + $0x2c] sm:$0xe] }
 0x2a9   : > { %10631 = vmatpush3.bf16.msra.mxu0 %v11429_v62  ;;  %v2612_v20 = vrot.slane %v2611_v59, 4  ;;  %v2662_v59 = vshrl.u32 %v9219_v61, 16 }
 0x2aa   : > { %v11422_v1 = vld [vmem:[#allocation2 + $0xdc] ss:$240 sps:$4 sm:$0xff]   ;;  %10632 = vmatprep.subr.bf16.mxu0 %v11434_v22 }
 0x2ab   : > { %v14174_v15 = vpop.f32.mrf.mxu1  ;;  %8737 = vmatprep.mubr.bf16.mxu1 %v11422_v1  ;;  %v2621_v2 = vsel %vm11802_vm10, %v2612_v20, %v2620_v5  ;;  %v11431_v37 = vld [vmem:[#allocation2 + $0x2b4] ss:$240 sps:$4 sm:$0xff]   ;;  %v2665_v5 = vshll.u32 %v9219_v61, 16 }
 0x2ac   : > { %8738 = vmatmul.mubr.bf16.vlgmr.msra.gmra.mxu1 %v11420_v31  ;;  %2622 = vst [vmem:[#allocation2 + $0x3ac] sm:$0xf] %v2621_v2  ;;  %8696 = vmatprep.mubr.bf16.mxu0 %v11431_v37  ;;  %v11440_v31 = vld [vmem:[#allocation2 + $0x2b8] ss:$240 sps:$4 sm:$0xff]  }
 0x2ad   : > { %v14196_v36 = vpop.f32.mrf.mxu1  ;;  %10657 = vmatpush3.bf16.msra.mxu1 %v11426_v17  ;;  %10633 = vmatpush3.bf16.msra.mxu0 %v11438_v47  ;;  %v11447_v17 = vld [vmem:[%s14591_s1 + $0xe18] sm:$0xff]   ;;  %v11456_v47 = vld [vmem:[%s14591_s1 + $0xe88] sm:$0xff]  }
 0x2ae   : > { %v10370_v26 = vpop.f32.mrf.mxu0  ;;  %10658 = vmatprep.subr.bf16.mxu1 %v11428_v24  ;;  %10634 = vmatprep.subr.bf16.mxu0 %v11441_v55  ;;  %v11449_v24 = vld [vmem:[%s14591_s1 + $0xe50] sm:$0xff]  }
 0x2af   : > { %v14217_v45 = vpop.f32.mrf.mxu1  ;;  %8697 = vmatmul.mubr.bf16.gmra.mxu0 %v11433_v23  ;;  %v9220_v55 = vld [vmem:[%s11728_s8 + $0x30] sm:$0xf] }
 0x2b0   : > { %v10371_v56 = vpop.f32.mrf.mxu0  ;;  %v2671_v20 = vshrl.u32 %v9220_v55, 16 }
 0x2b1   : > { %v10372_v25 = vadd.f32 %v10371_v56, %v10370_v26  ;;  %v14230_v42 = vpop.f32.mrf.mxu1  ;;  %10659 = vmatpush3.bf16.msra.mxu1 %v11430_v29  ;;  %10635 = vmatpush3.bf16.msra.mxu0 %v11443_v63  ;;  %v11459_v26 = vld [vmem:[%s14591_s1 + $0xe00] sm:$0xff]   ;;  %v2638_v56 = vrot.slane %v14297_v43, 5 }
 0x2b2   : > { %v10373_v14 = vpop.f32.mrf.mxu0  ;;  %10660 = vmatprep.subr.bf16.mxu1 %v11435_v19  ;;  %10636 = vmatprep.subr.bf16.mxu0 %v11445_v7  ;;  %v11458_v29 = vld [vmem:[%s14591_s1 + $0xec0] sm:$0xff]   ;;  %v9218_v19 = vrot.slane %v9213_v10, 9  ;;  %v2664_v7 = vrot.slane %v2662_v59, 5  ;;  %v2673_v23 = vrot.slane %v2671_v20, 5  ;;  %v9222_v59 = vld [vmem:[%s11728_s8 + $0x38] sm:$0xf] }
 0x2b3   : > { %v8307_v54 = vadd.f32 %v10372_v25, %v14080_v41  ;;  %v11442_v41 = vld [vmem:[%s14591_s1 + $0xee0] sm:$0xff]   ;;  %v11436_v8 = vld [vmem:[#allocation2 + $0x2bc] ss:$240 sps:$4 sm:$0xff]   ;;  %v9221_v25 = vld [vmem:[%s11728_s8 + $0x34] sm:$0xf] }
 0x2b4   : > { %v10374_v0 = vpop.f32.mrf.mxu0  ;;  %8745 = vmatprep.mubr.bf16.mxu1 %v11436_v8  ;;  %v2636_v63 = vsel %vm11748_vm4, %v9218_v19, %v2635_v51  ;;  %v2684_v2 = vshll.u32 %v9221_v25, 16  ;;  %v9217_v19 = vld [vmem:[%s11728_s8 + $0x3c] sm:$0x1] }
 0x2b5   : > { %v10375_v62 = vadd.f32 %v10374_v0, %v10373_v14  ;;  %10661 = vmatpush3.bf16.msra.mxu1 %v11439_v39  ;;  %10637 = vmatpush3.bf16.msra.mxu0 %v11447_v17  ;;  %v11460_v14 = vld [vmem:[%s14591_s1 + $0xe80] sm:$0xff]   ;;  %v2674_v39 = vshll.u32 %v9220_v55, 16  ;;  %v9224_v0 = vld [vmem:[%s11728_s8 + $0x2c] sm:$0xc]  ;;  %2650 = vst [vmem:[#allocation2 + $0xe0] sm:$0xf] %v2636_v63 }
 0x2b6   : > { %10662 = vmatprep.subr.bf16.mxu1 %v11442_v41  ;;  %10638 = vmatprep.subr.bf16.mxu0 %v11449_v24  ;;  %v9225_v41 = vld [vmem:[%s11728_s8 + $0x30] sm:$0xf]  ;;  %v9230_v24 = vld [vmem:[%s11728_s8 + $0x2c] sm:$0xc]  ;;  %v2640_v63 = vrot.slane %v2638_v56, 4 }
 0x2b7   : > { %v8310_v32 = vadd.f32 %v10375_v62, %v14097_v52  ;;  %8746 = vmatmul.mubr.bf16.gmra.mxu1 %v11440_v31  ;;  %v2681_v62 = vshrl.u32 %v9221_v25, 16  ;;  %v9223_v20 = vld [vmem:[%s11728_s8 + $0x3c] sm:$0x1] }
 0x2b9   : > { %10663 = vmatpush3.bf16.msra.mxu1 %v11444_v44  ;;  %10639 = vmatpush3.bf16.msra.mxu0 %v11451_v58  ;;  %v2676_v44 = vrot.slane %v2674_v39, 6  ;;  %v9231_v58 = vld [vmem:[%s11728_s8 + $0x30] sm:$0xf] }
 0x2ba   : > { %10664 = vmatprep.subr.bf16.mxu1 %v11446_v12  ;;  %10640 = vmatprep.subr.bf16.mxu0 %v11453_v48  ;;  %v2686_v12 = vrot.slane %v2684_v2, 6  ;;  %v2770_v34 = vshll.u32 %v9231_v58, 16 }
 0x2bb   : > { %v10398_v28 = vpop.f32.mrf.mxu1 }
 0x2bd   : > { %v10399_v22 = vpop.f32.mrf.mxu1  ;;  %10665 = vmatpush3.bf16.msra.mxu1 %v11448_v50  ;;  %10641 = vmatpush3.bf16.msra.mxu0 %v11455_v46 }
 0x2be   : > { %v10400_v35 = vadd.f32 %v10399_v22, %v10398_v28  ;;  %10666 = vmatprep.subr.bf16.mxu1 %v11450_v60  ;;  %10642 = vmatprep.subr.bf16.mxu0 %v11457_v3  ;;  %v2667_v28 = vrot.slane %v2665_v5, 6  ;;  %v14313_v22 = vld [vmem:[%s11728_s8 + $0x34] sm:$0xf]  ;;  %v2758_v60 = vshrl.u32 %v9230_v24, 16  ;;  %v2761_v3 = vshll.u32 %v9230_v24, 16 }
 0x2bf   : > { %v10401_v6 = vpop.f32.mrf.mxu1  ;;  %v2734_v50 = vrot.slane %v14313_v22, 6  ;;  %v2772_v5 = vrot.slane %v2770_v34, 7  ;;  %v2704_v24 = vshll.u32 %v9223_v20, 16 }
 0x2c0   : > { %v14257_v52 = vadd.f32 %v10400_v35, %v8307_v54  ;;  %v2637_v54 = vrot.slane %v2635_v51, 4  ;;  %v2668_v17 = vor.u32 %v2667_v28, %v2664_v7  ;;  %v2683_v35 = vrot.slane %v2681_v62, 5 }
 0x2c1   : > { %v10402_v9 = vpop.f32.mrf.mxu1  ;;  %10667 = vmatpush3.bf16.msra.mxu1 %v11452_v16  ;;  %10643 = vmatpush3.bf16.msra.mxu0 %v11459_v26  ;;  %v9216_v26 = vld [vmem:[%s11728_s8 + $0x38] sm:$0xf]  ;;  %v2763_v61 = vrot.slane %v2761_v3, 7  ;;  %v2644_v7 = vrot.slane %v9217_v19, 5  ;;  %v2706_v49 = vrot.slane %v2704_v24, 6 }
 0x2c2   : > { %v10403_v57 = vadd.f32 %v10402_v9, %v10401_v6  ;;  %10668 = vmatprep.subr.bf16.mxu1 %v11454_v21  ;;  %v2639_v37 = vsel %vm11748_vm4, %v2637_v54, %v2638_v56  ;;  %v2731_v6 = vrot.slane %v9225_v41, 6  ;;  %v2677_v9 = vor.u32 %v2676_v44, %v2673_v23  ;;  %v2749_v19 = vld [vmem:[#allocation2 + $0x3b8] sm:$0xf]  ;;  %10704 = vmatprep.subr.mxu0 %v8891_v30 }
 0x2c3   : > { %2651 = vst [vmem:[#allocation2 + $0x1d0] sm:$0xf] %v2639_v37  ;;  %v2669_v8 = vrot.slane %v2668_v17, 4  ;;  %v14319_v31 = vor.u32 %v2686_v12, %v2683_v35  ;;  %v2760_v21 = vrot.slane %v2758_v60, 6  ;;  %v2641_v54 = vrot.slane %v9216_v26, 5 }
 0x2c4   : > { %v14268_v1 = vadd.f32 %v10403_v57, %v8310_v32  ;;  %v9229_v32 = vrot.slane %v9224_v0, 10  ;;  %v9232_v57 = vld [vmem:[%s11728_s8 + $0x34] sm:$0xf]  ;;  %v2733_v16 = vrot.slane %v2731_v6, 4  ;;  %v2679_v46 = vrot.slane %v2677_v9, 4 }
 0x2c5   : > { %10669 = vmatpush3.bf16.msra.mxu1 %v11456_v47  ;;  %v2767_v47 = vshrl.u32 %v9231_v58, 16  ;;  %v2777_v43 = vshrl.u32 %v9232_v57, 16  ;;  %v2780_v25 = vshll.u32 %v9232_v57, 16  ;;  %v2764_v39 = vor.u32 %v2763_v61, %v2760_v21  ;;  %v2653_v37 = vld [vmem:[#allocation2 + $0x3b0] sm:$0xf] }
 0x2c6   : > { %10670 = vmatprep.subr.bf16.mxu1 %v11458_v29  ;;  %v2732_v48 = vsel %vm11903_vm13, %v9229_v32, %v2731_v6  ;;  %v2678_v29 = vsel %vm11783_vm8, %v2669_v8, %v2677_v9  ;;  %v2735_v10 = vsel %vm11903_vm13, %v2733_v16, %v2734_v50  ;;  %v2688_v51 = vsel %vm11783_vm8, %v2679_v46, %v14319_v31  ;;  %v9227_v17 = vld [vmem:[%s11728_s8 + $0x38] sm:$0xf]  ;;  %v9228_v9 = vld [vmem:[%s11728_s8 + $0x3c] sm:$0x3] }
 0x2c7   : > { %2746 = vst [vmem:[#allocation2 + $0xe8] sm:$0xf] %v2732_v48  ;;  %2713 = vst [vmem:[#allocation2 + $0xe4] sm:$0xf] %v2678_v29  ;;  %v2769_v55 = vrot.slane %v2767_v47, 6  ;;  %v2782_v0 = vrot.slane %v2780_v25, 7  ;;  %v2642_v2 = vsel %vm11748_vm4, %v2640_v63, %v2641_v54 }
 0x2c8   : > { %2747 = vst [vmem:[#allocation2 + $0x1d8] sm:$0xf] %v2735_v10  ;;  %2714 = vst [vmem:[#allocation2 + $0x1d4] sm:$0xf] %v2688_v51  ;;  %v2689_v28 = vrot.slane %v14319_v31, 4  ;;  %v2643_v41 = vrot.slane %v2641_v54, 4 }
 0x2c9   : > { %10671 = vmatpush3.bf16.msra.mxu1 %v11460_v14  ;;  %v2779_v14 = vrot.slane %v2777_v43, 6  ;;  %v2773_v62 = vor.u32 %v2772_v5, %v2769_v55  ;;  %v2691_v23 = vshrl.u32 %v9222_v59, 16  ;;  %v2765_v44 = vrot.slane %v2764_v39, 4  ;;  %2652 = vst [vmem:[#allocation2 + $0x2c0] sm:$0xf] %v2642_v2 }
 0x2ca   : > { %v2694_v56 = vshll.u32 %v9222_v59, 16  ;;  %v2701_v32 = vshrl.u32 %v9223_v20, 16  ;;  %v2645_v12 = vsel %vm11748_vm4, %v2643_v41, %v2644_v7  ;;  %v9233_v31 = vld [vmem:[%s11728_s8 + $0x38] sm:$0xf]  ;;  %v2736_v16 = vrot.slane %v2734_v50, 4  ;;  %10742 = vmatprep.subr.mxu1 %v8891_v30 }
 0x2cb   : > { %v2783_v22 = vor.u32 %v2782_v0, %v2779_v14  ;;  %v2775_v35 = vrot.slane %v2773_v62, 4  ;;  %v2693_v6 = vrot.slane %v2691_v23, 5  ;;  %v2774_v58 = vsel %vm11959_vm6, %v2765_v44, %v2773_v62  ;;  %v9234_v21 = vld [vmem:[%s11728_s8 + $0x3c] sm:$0x3]  ;;  %v11461_v3 = vld [vmem:[#allocation2 + $0xe0] ss:$240 sps:$4 sm:$0xff]  }
 0x2cc   : > { %v2654_v57 = vsel %vm11802_vm10, %v2645_v12, %v2653_v37  ;;  %v2696_v60 = vrot.slane %v2694_v56, 6  ;;  %v2703_v8 = vrot.slane %v2701_v32, 5  ;;  %2809 = vst [vmem:[#allocation2 + $0xec] sm:$0xf] %v2774_v58  ;;  %v2737_v46 = vrot.slane %v9227_v17, 6  ;;  %s215_s8 = sand.u32 1, %s11541_s19  }
 0x2cd   : > { %v2784_v48 = vsel %vm11959_vm6, %v2775_v35, %v2783_v22  ;;  %2655 = vst [vmem:[#allocation2 + $0x3b0] sm:$0xf] %v2654_v57  ;;  %v2740_v29 = vrot.slane %v9228_v9, 6  ;;  %v2716_v55 = vld [vmem:[#allocation2 + $0x3b4] sm:$0xf]  ;;  %v2787_v50 = vshrl.u32 %v9233_v31, 16 }
 0x2ce   : > { %2810 = vst [vmem:[#allocation2 + $0x1dc] sm:$0xf] %v2784_v48  ;;  %v2697_v26 = vor.u32 %v2696_v60, %v2693_v6  ;;  %v2707_v10 = vor.u32 %v2706_v49, %v2703_v8  ;;  %v2738_v34 = vsel %vm11903_vm13, %v2736_v16, %v2737_v46  ;;  %v2739_v43 = vrot.slane %v2737_v46, 4  ;;  %v2812_v44 = vld [vmem:[#allocation2 + $0x3bc] sm:$0xf]  ;;  %v14367_v6 = vpop.f32.mrf.mxu0  ;;  %v8890_v60 = vld [vmem:[%s14593_s3 + $0x70] sm:$0xff] }
 0x2cf   : > { %v11463_v47 = vld [vmem:[#allocation2 + $0xe4] ss:$240 sps:$4 sm:$0xff]   ;;  %2748 = vst [vmem:[#allocation2 + $0x2c8] sm:$0xf] %v2738_v34  ;;  %v2790_v25 = vshll.u32 %v9233_v31, 16  ;;  %v2785_v5 = vrot.slane %v2783_v22, 4 }
 0x2d0   : > { %8786 = vmatprep.mubr.bf16.mxu0 %v11463_v47  ;;  %v2698_v51 = vsel %vm11783_vm8, %v2689_v28, %v2697_v26  ;;  %v2699_v61 = vrot.slane %v2697_v26, 4  ;;  %v2741_v59 = vsel %vm11903_vm13, %v2739_v43, %v2740_v29  ;;  %v2797_v14 = vshrl.u32 %v9234_v21, 16  ;;  %v11464_v2 = vld [vmem:[#allocation2 + $0xe8] ss:$240 sps:$4 sm:$0xff]   ;;  %v14369_v24 = vpop.f32.mrf.mxu0  ;;  %v8888_v49 = vld [vmem:[%s14593_s3 + $0x60] sm:$0xff]  ;;  %s216_s11 = scalar_lea.vmem [#allocation3], %s215_s8 }
 0x2d1   : > { %8787 = vmatmul.mubr.bf16.vlgmr.msra.gmra.mxu0 %v11461_v3  ;;  %2715 = vst [vmem:[#allocation2 + $0x2c4] sm:$0xf] %v2698_v51  ;;  %v2800_v63 = vshll.u32 %v9234_v21, 16  ;;  %v2750_v20 = vsel %vm11802_vm10, %v2741_v59, %v2749_v19  ;;  %v2789_v39 = vrot.slane %v2787_v50, 6  ;;  %v2792_v0 = vrot.slane %v2790_v25, 7  ;;  %v8889_v31 = vld [vmem:[%s14593_s3 + $0x68] sm:$0xff] }
 0x2d2   : > { %v2708_v54 = vsel %vm11783_vm8, %v2699_v61, %v2707_v10  ;;  %2751 = vst [vmem:[#allocation2 + $0x3b8] sm:$0xf] %v2750_v20  ;;  %v2799_v28 = vrot.slane %v2797_v14, 6  ;;  %v14371_v9 = vpop.f32.mrf.mxu0  ;;  %10705 = vmatpush3.msra.mxu0 %v8891_v30  ;;  %v8887_v46 = vld [vmem:[%s14593_s3 + $0x58] sm:$0xff]  ;;  %v8886_v3 = vld [vmem:[%s14593_s3 + $0x50] sm:$0xff]  ;;  %v8885_v26 = vld [vmem:[%s14593_s3 + $0x48] sm:$0xff] }
 0x2d3   : > { %v2717_v7 = vsel %vm11802_vm10, %v2708_v54, %v2716_v55  ;;  %v2802_v62 = vrot.slane %v2800_v63, 7  ;;  %v2793_v40 = vor.u32 %v2792_v0, %v2789_v39  ;;  %10706 = vmatprep.subr.mxu0 %v8890_v60  ;;  %v8884_v34 = vld [vmem:[%s14593_s3 + $0x40] sm:$0xff]  ;;  %v8883_v19 = vld [vmem:[%s14593_s3 + $0x38] sm:$0xff]  ;;  %v8882_v61 = vld [vmem:[%s14593_s3 + $0x30] sm:$0xff]  ;;  %vm8979_vm4 = vcmask 1046528   ;;  %s9004_s12 = sshll.u32 %s216_s11, 4  ;;  %s9005_s12 = int_to_ptr.vmem [resolvable:$true] %s9004_s12 }
 0x2d4   : > { %2718 = vst [vmem:[#allocation2 + $0x3b4] sm:$0xf] %v2717_v7  ;;  %v11467_v32 = vld [vmem:[#allocation2 + $0x2c0] ss:$240 sps:$4 sm:$0xff]   ;;  %v14373_v27 = vpop.f32.mrf.mxu0  ;;  %10707 = vmatpush3.msra.mxu0 %v8890_v60  ;;  %v8881_v50 = vld [vmem:[%s14593_s3 + $0x28] sm:$0xff]  ;;  %v8879_v14 = vld [vmem:[%s14593_s3 + $0x18] sm:$0xff]  ;;  %p11496_p0 = scmp.lt.s32.totalorder %s9005_s12, %s11494_s25 }
 0x2d5   : > { %v11466_v41 = vld [vmem:[#allocation2 + $0xec] ss:$240 sps:$4 sm:$0xff]   ;;  %v2803_v37 = vor.u32 %v2802_v62, %v2799_v28  ;;  %v2794_v18 = vsel %vm11959_vm6, %v2785_v5, %v2793_v40  ;;  %v2795_v23 = vrot.slane %v2793_v40, 4  ;;  %10708 = vmatprep.subr.mxu0 %v8889_v31  ;;  %v8880_v59 = vld [vmem:[%s14593_s3 + $0x20] sm:$0xff]  ;;  %v8878_v54 = vld [vmem:[%s14593_s3 + $0x10] sm:$0xff]  ;;  %s8992_s16 = scalar_lea.sflag [#allocation4], %s215_s8 }
 0x2d6   : > { %8835 = vmatprep.mubr.bf16.mxu1 %v11466_v41  ;;  %2811 = vst [vmem:[#allocation2 + $0x2cc] sm:$0xf] %v2794_v18  ;;  %10709 = vmatpush3.msra.mxu0 %v8889_v31  ;;  %v8877_v20 = vld [vmem:[%s14593_s3 + $0x8] sm:$0xff]  ;;  %v8876_v7 = vld [vmem:[%s14593_s3] sm:$0xff]  ;;  %s11489_s17 = scalar_lea.vmem %s9005_s12, 16 }
 0x2d7   : > { %8836 = vmatmul.mubr.bf16.vlgmr.msra.gmra.mxu1 %v11464_v2  ;;  %v2804_v22 = vsel %vm11959_vm6, %v2795_v23, %v2803_v37  ;;  %10710 = vmatprep.subr.mxu0 %v8888_v49  ;;  %p11490_p11 = scmp.ne.s32.totalorder %s9005_s12, %s11489_s17  ;;  %p11497_p1 = scmp.lt.s32.totalorder %s11495_s22, %s11489_s17 }
 0x2d8   : > { %v2813_v56 = vsel %vm11802_vm10, %v2804_v22, %v2812_v44  ;;  %v14375_v58 = vpop.f32.mrf.mxu1  ;;  %10758 = vmatpush3.msra.mxu1 %v8891_v30  ;;  %10711 = vmatpush3.msra.mxu0 %v8888_v49 }
 0x2d9   : > { %2814 = vst [vmem:[#allocation2 + $0x3bc] sm:$0xf] %v2813_v56  ;;  %v11470_v35 = vld [vmem:[#allocation2 + $0x2c8] ss:$240 sps:$4 sm:$0xff]   ;;  %10743 = vmatprep.subr.mxu1 %v8890_v60  ;;  %10712 = vmatprep.subr.mxu0 %v8887_v46  ;;  %p11491_p12 = pnand %p11490_p11, %p11620_p5  ;;  %p11498_p2 = por %p11497_p1, %p11496_p0 }
 0x2da   : > { %v14385_v8 = vpop.f32.mrf.mxu1  ;;  %10759 = vmatpush3.msra.mxu1 %v8890_v60  ;;  %10713 = vmatpush3.msra.mxu0 %v8887_v46 }
 0x2db   : > { %v11469_v17 = vld [vmem:[#allocation2 + $0x2c4] ss:$240 sps:$4 sm:$0xff]   ;;  %10744 = vmatprep.subr.mxu1 %v8889_v31  ;;  %10714 = vmatprep.subr.mxu0 %v8886_v3  ;;  %p11492_p13 = pneg %p11491_p12 }
 0x2dc   : > { %8794 = vmatprep.mubr.bf16.mxu0 %v11469_v17  ;;  %10760 = vmatpush3.msra.mxu1 %v8889_v31  ;;  %v14395_v16 = vpop.f32.mrf.mxu1 }
 0x2dd   : > { %8795 = vmatmul.mubr.bf16.gmra.mxu0 %v11467_v32  ;;  %10745 = vmatprep.subr.mxu1 %v8888_v49  ;;  %p11499_p3 = pnand %p11498_p2, %p11492_p13 }
 0x2de   : > { %10761 = vmatpush3.msra.mxu1 %v8888_v49  ;;  %v14405_v47 = vpop.f32.mrf.mxu1  ;;  %10715 = vmatpush3.msra.mxu0 %v8886_v3 }
 0x2df   : > { %10746 = vmatprep.subr.mxu1 %v8887_v46  ;;  %10716 = vmatprep.subr.mxu0 %v8885_v26 }
 0x2e0   : > { %v11472_v12 = vld [vmem:[#allocation2 + $0x2cc] ss:$240 sps:$4 sm:$0xff]   ;;  %10762 = vmatpush3.msra.mxu1 %v8887_v46  ;;  %10717 = vmatpush3.msra.mxu0 %v8885_v26 }
 0x2e1   : > { %8843 = vmatprep.mubr.bf16.mxu1 %v11472_v12  ;;  %10747 = vmatprep.subr.mxu1 %v8886_v3 }
 0x2e2   : > { %8844 = vmatmul.mubr.bf16.gmra.mxu1 %v11470_v35  ;;  %10718 = vmatprep.subr.mxu0 %v8884_v34 }
 0x2e3   : > { %v14380_v57 = vpop.f32.mrf.mxu0  ;;  %10763 = vmatpush3.msra.mxu1 %v8886_v3  ;;  %10719 = vmatpush3.msra.mxu0 %v8884_v34 }
 0x2e4   : > { %10748 = vmatprep.subr.mxu1 %v8885_v26  ;;  %10720 = vmatprep.subr.mxu0 %v8883_v19 }
 0x2e5   : > { %v14390_v48 = vpop.f32.mrf.mxu0  ;;  %10764 = vmatpush3.msra.mxu1 %v8885_v26  ;;  %10721 = vmatpush3.msra.mxu0 %v8883_v19 }
 0x2e6   : > { %10749 = vmatprep.subr.mxu1 %v8884_v34  ;;  %10722 = vmatprep.subr.mxu0 %v8882_v61 }
 0x2e7   : > { %v14400_v21 = vpop.f32.mrf.mxu0  ;;  %10765 = vmatpush3.msra.mxu1 %v8884_v34  ;;  %10723 = vmatpush3.msra.mxu0 %v8882_v61 }
 0x2e8   : > { %10750 = vmatprep.subr.mxu1 %v8883_v19  ;;  %10724 = vmatprep.subr.mxu0 %v8881_v50 }
 0x2e9   : > { %v14410_v29 = vpop.f32.mrf.mxu0  ;;  %10766 = vmatpush3.msra.mxu1 %v8883_v19  ;;  %10725 = vmatpush3.msra.mxu0 %v8881_v50 }
 0x2ea   : > { %v14412_v10 = vpop.f32.mrf.mxu1  ;;  %10751 = vmatprep.subr.mxu1 %v8882_v61  ;;  %10726 = vmatprep.subr.mxu0 %v8880_v59 }
 0x2eb   : > { %10767 = vmatpush3.msra.mxu1 %v8882_v61  ;;  %10727 = vmatpush3.msra.mxu0 %v8880_v59 }
 0x2ec   : > { %v14422_v51 = vpop.f32.mrf.mxu1  ;;  %10752 = vmatprep.subr.mxu1 %v8881_v50  ;;  %10728 = vmatprep.subr.mxu0 %v8879_v14 }
 0x2ed   : > { %10768 = vmatpush3.msra.mxu1 %v8881_v50  ;;  %10729 = vmatpush3.msra.mxu0 %v8879_v14 }
 0x2ee   : > { %v14432_v25 = vpop.f32.mrf.mxu1  ;;  %10753 = vmatprep.subr.mxu1 %v8880_v59  ;;  %10730 = vmatprep.subr.mxu0 %v8878_v54 }
 0x2ef   : > { %10769 = vmatpush3.msra.mxu1 %v8880_v59  ;;  %10731 = vmatpush3.msra.mxu0 %v8878_v54 }
 0x2f0   : > { %10754 = vmatprep.subr.mxu1 %v8879_v14  ;;  %v14442_v63 = vpop.f32.mrf.mxu1  ;;  %10732 = vmatprep.subr.mxu0 %v8877_v20 }
 0x2f1   : > { %10770 = vmatpush3.msra.mxu1 %v8879_v14  ;;  %10733 = vmatpush3.msra.mxu0 %v8877_v20  ;;  %v10366_v14 = vadd.f32 %v14155_v4, %v14149_v13 }
 0x2f2   : > { %10755 = vmatprep.subr.mxu1 %v8878_v54  ;;  %10734 = vmatprep.subr.mxu0 %v8876_v7 }
 0x2f3   : > { %10771 = vmatpush3.msra.mxu1 %v8878_v54  ;;  %10735 = vmatpush3.msra.mxu0 %v8876_v7 }
 0x2f4   : > { %10756 = vmatprep.subr.mxu1 %v8877_v20 }
 0x2f5   : > { %v14417_v43 = vpop.f32.mrf.mxu0  ;;  %10772 = vmatpush3.msra.mxu1 %v8877_v20 }
 0x2f6   : > { %10757 = vmatprep.subr.mxu1 %v8876_v7 }
 0x2f7   : > { %v14427_v55 = vpop.f32.mrf.mxu0  ;;  %10773 = vmatpush3.msra.mxu1 %v8876_v7  ;;  %v8299_v7 = vadd.f32 %v10366_v14, %v13999_v33 }
 0x2f9   : > { %v14437_v5 = vpop.f32.mrf.mxu0 }
 0x2fb   : > { %v14450_v39 = vpop.f32.mrf.mxu0 }
 0x2fe   : > { %v14452_v0 = vpop.f32.mrf.mxu1 }
 0x300   : > { %v10505_v62 = vpop.f32.mrf.mxu1 }
 0x302   : > { %v14461_v2 = vpop.f32.mrf.mxu1 }
 0x304   : > { %v10508_v37 = vpop.f32.mrf.mxu1 }
 0x305   : > { %v14457_v28 = vpop.f32.mrf.mxu0 }
 0x307   : > { %v14459_v40 = vpop.f32.mrf.mxu0 }
 0x309   : > { %v14463_v41 = vpop.f32.mrf.mxu0 }
 0x30b   : > { %v14467_v23 = vpop.f32.mrf.mxu0 }
 0x30f   : > { %v14465_v18 = vpop.f32.mrf.mxu1 }
 0x311   : > { %v14469_v22 = vpop.f32.mrf.mxu1 }
 0x313   : > { %v14471_v32 = vpop.f32.mrf.mxu1 }
 0x314   : > { %14614 = vst [vmem:[#allocation6_spill] sm:$0xff] %v14471_v32 }
 0x315   : > { %v14473_v35 = vpop.f32.mrf.mxu1 }
 0x316   : > { %14615 = vst [vmem:[#allocation7_spill] sm:$0xff] %v14473_v35 }
 0x323   : > { %v10532_v44 = vpop.f32.mrf.mxu0 }
 0x325   : > { %v10533_v56 = vpop.f32.mrf.mxu0 }
 0x327   : > { %v10535_v17 = vpop.f32.mrf.mxu0 }
 0x329   : > { %v10536_v30 = vpop.f32.mrf.mxu0 }
 0x32c   : > { %v10560_v12 = vpop.f32.mrf.mxu1 }
 0x32e   : > { %v10561_v60 = vpop.f32.mrf.mxu1 }
 0x330   : > { %v14477_v49 = vpop.f32.mrf.mxu1 }
 0x332   : > { %v14481_v3 = vpop.f32.mrf.mxu1 }
 0x334   : > { %v14475_v31 = vpop.f32.mrf.mxu0 }
 0x336   : > { %v14479_v46 = vpop.f32.mrf.mxu0 }
 0x338   : > { %v14483_v26 = vpop.f32.mrf.mxu0 }
 0x339   : > { %14616 = vst [vmem:[#allocation8_spill] sm:$0xff] %v14483_v26  ;;  %v10394_v26 = vadd.f32 %v14196_v36, %v14174_v15  ;;  %v10450_v15 = vadd.f32 %v14385_v8, %v14375_v58  ;;  %v10478_v36 = vadd.f32 %v14427_v55, %v14417_v43  ;;  %v10481_v58 = vadd.f32 %v14450_v39, %v14437_v5 }
 0x33a   : > { %v14487_v19 = vpop.f32.mrf.mxu0  ;;  %v10534_v55 = vadd.f32 %v10533_v56, %v10532_v44  ;;  %v10431_v5 = vadd.f32 %v14410_v29, %v14400_v21  ;;  %v10509_v39 = vadd.f32 %v10508_v37, %v14461_v2  ;;  %v10512_v37 = vadd.f32 %v14469_v22, %v14465_v18 }
 0x33b   : > { %14618 = vst [vmem:[#allocation10_spill] sm:$0xff] %v14487_v19 }
 0x33e   : > { %v14485_v34 = vpop.f32.mrf.mxu1 }
 0x33f   : > { %14617 = vst [vmem:[#allocation9_spill] sm:$0xff] %v14485_v34  ;;  %v10369_v34 = vadd.f32 %v14189_v38, %v14170_v53  ;;  %v10425_v53 = vadd.f32 %v14373_v27, %v14371_v9  ;;  %v10428_v9 = vadd.f32 %v14390_v48, %v14380_v57  ;;  %v10562_v57 = vadd.f32 %v10561_v60, %v10560_v12 }
 0x340   : > { %v14489_v61 = vpop.f32.mrf.mxu1  ;;  %v10537_v48 = vadd.f32 %v10536_v30, %v10535_v17  ;;  %v10565_v17 = vadd.f32 %v14481_v3, %v14477_v49 }
 0x341   : > { %14619 = vst [vmem:[#allocation11_spill] sm:$0xff] %v14489_v61  ;;  %v10422_v61 = vadd.f32 %v14369_v24, %v14367_v6  ;;  %v8302_v32 = vadd.f32 %v10369_v34, %v14021_v11  ;;  %v10453_v34 = vadd.f32 %v14405_v47, %v14395_v16  ;;  %v8405_v16 = vadd.f32 %v10428_v9, %v14257_v52 }
 0x342   : > { %v14491_v59 = vpop.f32.mrf.mxu1  ;;  %v10456_v47 = vadd.f32 %v14422_v51, %v14412_v10  ;;  %v8408_v52 = vadd.f32 %v10431_v5, %v14268_v1  ;;  %v10459_v10 = vadd.f32 %v14442_v63, %v14432_v25  ;;  %v10540_v25 = vadd.f32 %v14479_v46, %v14475_v31  ;;  %v14627_v31 = vld [vmem:[#allocation10_spill] sm:$0xff] }
 0x343   : > { %14620 = vst [vmem:[#allocation12_spill] sm:$0xff] %v14491_v59  ;;  %v8348_v59 = vadd.f32 %v10394_v26, %v8299_v7 }
 0x344   : > { %v14495_v20 = vpop.f32.mrf.mxu1  ;;  %v8457_v63 = vadd.f32 %v10459_v10, %v8408_v52 }
 0x345   : > { %14621 = vst [vmem:[#allocation13_spill] sm:$0xff] %v14495_v20  ;;  %v10397_v20 = vadd.f32 %v14230_v42, %v14217_v45  ;;  %v8397_v33 = vadd.f32 %v10422_v61, %v8348_v59  ;;  %v10506_v42 = vadd.f32 %v10505_v62, %v14452_v0  ;;  %v10484_v62 = vadd.f32 %v14459_v40, %v14457_v28 }
 0x346   : > { %v10487_v28 = vadd.f32 %v14467_v23, %v14463_v41  ;;  %v14623_v41 = vld [vmem:[#allocation7_spill] sm:$0xff] }
 0x347   : > { %v8351_v38 = vadd.f32 %v10397_v20, %v8302_v32  ;;  %v8446_v11 = vadd.f32 %v10450_v15, %v8397_v33  ;;  %v8454_v33 = vadd.f32 %v10456_v47, %v8405_v16 }
 0x348   : > { %v8506_v22 = vadd.f32 %v10487_v28, %v8457_v63 }
 0x349   : > { %v8400_v26 = vadd.f32 %v10425_v53, %v8351_v38  ;;  %v8495_v45 = vadd.f32 %v10478_v36, %v8446_v11  ;;  %v8503_v2 = vadd.f32 %v10484_v62, %v8454_v33  ;;  %v14622_v38 = vld [vmem:[#allocation6_spill] sm:$0xff] }
 0x34a   : > { %v10515_v23 = vadd.f32 %v14623_v41, %v14622_v38  ;;  %v14628_v5 = vld [vmem:[#allocation12_spill] sm:$0xff] }
 0x34b   : > { %v8449_v43 = vadd.f32 %v10453_v34, %v8400_v26  ;;  %v8544_v61 = vadd.f32 %v10506_v42, %v8495_v45  ;;  %v8552_v53 = vadd.f32 %v10512_v37, %v8503_v2  ;;  %v14626_v26 = vld [vmem:[#allocation8_spill] sm:$0xff] }
 0x34c   : > { %v10543_v46 = vadd.f32 %v14627_v31, %v14626_v26 }
 0x34d   : > { %v8498_v59 = vadd.f32 %v10481_v58, %v8449_v43  ;;  %v8593_v0 = vadd.f32 %v10534_v55, %v8544_v61  ;;  %v8601_v3 = vadd.f32 %v10540_v25, %v8552_v53  ;;  %v8555_v43 = vadd.f32 %v10515_v23, %v8506_v22 }
 0x34f   : > { %v8547_v56 = vadd.f32 %v10509_v39, %v8498_v59  ;;  %v8642_v51 = vadd.f32 %v10562_v57, %v8593_v0  ;;  %v8604_v47 = vadd.f32 %v10543_v46, %v8555_v43  ;;  %v14629_v39 = vld [vmem:[#allocation13_spill] sm:$0xff] }
 0x350   : > { %v10571_v0 = vadd.f32 %v14629_v39, %v14628_v5 }
 0x351   : > { %v8596_v21 = vadd.f32 %v10537_v48, %v8547_v56 }
 0x352   : > { %v8653_v52 = vadd.f32 %v10571_v0, %v8604_v47 }
 0x364   : > { %v10588_v50 = vpop.f32.mrf.mxu0 }
 0x366   : > { %v10589_v54 = vpop.f32.mrf.mxu0 }
 0x367   : > { %v10590_v20 = vadd.f32 %v10589_v54, %v10588_v50  ;;  %v8645_v50 = vadd.f32 %v10565_v17, %v8596_v21 }
 0x368   : > { %v10591_v19 = vpop.f32.mrf.mxu0 }
 0x369   : > { %v8691_v12 = vadd.f32 %v10590_v20, %v8642_v51 }
 0x36a   : > { %v10592_v13 = vpop.f32.mrf.mxu0 }
 0x36b   : > { %v10593_v1 = vadd.f32 %v10592_v13, %v10591_v19  ;;  %v14625_v19 = vld [vmem:[#allocation11_spill] sm:$0xff] }
 0x36c   : > { %v10616_v35 = vpop.f32.mrf.mxu1 }
 0x36d   : > { %v8694_v11 = vadd.f32 %v10593_v1, %v8645_v50 }
 0x36e   : > { %v10617_v4 = vpop.f32.mrf.mxu1 }
 0x36f   : > { %v14513_v6 = vpop.f32.mrf.mxu0  ;;  %v10618_v30 = vadd.f32 %v10617_v4, %v10616_v35  ;;  %v14624_v35 = vld [vmem:[#allocation9_spill] sm:$0xff] }
 0x370   : > { %v10619_v24 = vpop.f32.mrf.mxu1  ;;  %v10568_v13 = vadd.f32 %v14625_v19, %v14624_v35 }
 0x371   : > { %v10595_v8 = vpop.f32.mrf.mxu0  ;;  %v8740_v36 = vadd.f32 %v10618_v30, %v8691_v12 }
 0x372   : > { %v10620_v27 = vpop.f32.mrf.mxu1  ;;  %v10596_v58 = vadd.f32 %v10595_v8, %v14513_v6  ;;  %v8650_v59 = vadd.f32 %v10568_v13, %v8601_v3 }
 0x373   : > { %v10597_v14 = vpop.f32.mrf.mxu0  ;;  %v10621_v34 = vadd.f32 %v10620_v27, %v10619_v24 }
 0x374   : > { %v8699_v62 = vadd.f32 %v10596_v58, %v8650_v59  ;;  %v8988_v59 = vld [vmem:[%s14594_s4] sm:$0x1] }
 0x375   : > { %v10598_v7 = vpop.f32.mrf.mxu0  ;;  %v8743_v55 = vadd.f32 %v10621_v34, %v8694_v11 }
 0x376   : > { %v10599_v27 = vadd.f32 %v10598_v7, %v10597_v14 }
 0x377   : > { %v14522_v32 = vpop.f32.mrf.mxu1 }
 0x378   : > { %v8702_v2 = vadd.f32 %v10599_v27, %v8653_v52 }
 0x379   : > { %v10623_v44 = vpop.f32.mrf.mxu1 }
 0x37a   : > { %v10624_v24 = vadd.f32 %v10623_v44, %v14522_v32 }
 0x37b   : > { %v10625_v40 = vpop.f32.mrf.mxu1 }
 0x37d   : > { %v10626_v18 = vpop.f32.mrf.mxu1 }
 0x37e   : > { %v10627_v37 = vadd.f32 %v10626_v18, %v10625_v40 }
 0x380   : > { %v8751_v32 = vadd.f32 %v10627_v37, %v8702_v2 }
 0x391   : > { %v10644_v29 = vpop.f32.mrf.mxu0 }
 0x393   : > { %v10645_v60 = vpop.f32.mrf.mxu0 }
 0x394   : > { %v10646_v54 = vadd.f32 %v10645_v60, %v10644_v29  ;;  %v8748_v29 = vadd.f32 %v10624_v24, %v8699_v62 }
 0x395   : > { %v10647_v15 = vpop.f32.mrf.mxu0 }
 0x396   : > { %v8789_v45 = vadd.f32 %v10646_v54, %v8740_v36 }
 0x397   : > { %v10648_v49 = vpop.f32.mrf.mxu0  ;;  %v10672_v4 = vpop.f32.mrf.mxu1 }
 0x398   : > { %v10649_v42 = vadd.f32 %v10648_v49, %v10647_v15 }
 0x399   : > { %v10673_v9 = vpop.f32.mrf.mxu1 }
 0x39a   : > { %v10674_v61 = vadd.f32 %v10673_v9, %v10672_v4  ;;  %v8792_v48 = vadd.f32 %v10649_v42, %v8743_v55 }
 0x39b   : > { %v10675_v16 = vpop.f32.mrf.mxu1 }
 0x39c   : > { %v8838_v57 = vadd.f32 %v10674_v61, %v8789_v45 }
 0x39d   : > { %v10676_v56 = vpop.f32.mrf.mxu1  ;;  %v10650_v20 = vpop.f32.mrf.mxu0 }
 0x39e   : > { %v9836_v33 = vmul.f32 -1.442695, %v8838_v57  ;;  %v10677_v6 = vadd.f32 %v10676_v56, %v10675_v16 }
 0x39f   : > { %v10651_v8 = vpop.f32.mrf.mxu0 }
 0x3a0   : > { %11473 = vpow2.f32 %v9836_v33  ;;  %v8841_v10 = vadd.f32 %v10677_v6, %v8792_v48  ;;  %v10652_v51 = vadd.f32 %v10651_v8, %v10650_v20 }
 0x3a1   : > { %v10653_v21 = vpop.f32.mrf.mxu0 }
 0x3a2   : > { %v9837_v28 = vmul.f32 -1.442695, %v8841_v10  ;;  %v10678_v17 = vpop.f32.mrf.mxu1  ;;  %v8797_v30 = vadd.f32 %v10652_v51, %v8748_v29 }
 0x3a3   : > { %v10654_v12 = vpop.f32.mrf.mxu0 }
 0x3a4   : > { %11475 = vpow2.f32 %v9837_v28  ;;  %v10655_v1 = vadd.f32 %v10654_v12, %v10653_v21  ;;  %v10679_v60 = vpop.f32.mrf.mxu1 }
 0x3a5   : > { %v10680_v14 = vadd.f32 %v10679_v60, %v10678_v17 }
 0x3a6   : > { %v10681_v44 = vpop.f32.mrf.mxu1  ;;  %v8800_v25 = vadd.f32 %v10655_v1, %v8751_v32 }
 0x3a7   : > { %v8846_v7 = vadd.f32 %v10680_v14, %v8797_v30 }
 0x3a8   : > { %v10682_v63 = vpop.f32.mrf.mxu1 }
 0x3a9   : > { %v9838_v50 = vmul.f32 -1.442695, %v8846_v7  ;;  %v10683_v54 = vadd.f32 %v10682_v63, %v10681_v44 }
 0x3ab   : > { %11477 = vpow2.f32 %v9838_v50  ;;  %v8849_v15 = vadd.f32 %v10683_v54, %v8800_v25 }
 0x3ad   : > { %v11474_v53 = vpop.eup %11473  ;;  %v9839_v40 = vmul.f32 -1.442695, %v8849_v15 }
 0x3ae   : > { %v8864_v22 = vadd.f32 1.0, %v11474_v53 }
 0x3b0   : > { %11479 = vrcp.f32 %v8864_v22 }
 0x3b1   : > { %v11476_v18 = vpop.eup %11475  ;;  %11481 = vpow2.f32 %v9839_v40 }
 0x3b2   : > { %v8865_v38 = vadd.f32 1.0, %v11476_v18 }
 0x3b4   : > { %11483 = vrcp.f32 %v8865_v38 }
 0x3b8   : > { %v11478_v41 = vpop.eup %11477 }
 0x3b9   : > { %v8866_v23 = vadd.f32 1.0, %v11478_v41 }
 0x3bb   : > { %11485 = vrcp.f32 %v8866_v23 }
 0x3bd   : > { %v11480_v36 = vpop.eup %11479 }
 0x3be   : > { %v11482_v11 = vpop.eup %11481  ;;  %10736 = vmatprep.mubr.f32.mxu0 %v11480_v36 }
 0x3bf   : > { %v8867_v49 = vadd.f32 1.0, %v11482_v11 }
 0x3c1   : > { %v11484_v3 = vpop.eup %11483  ;;  %11487 = vrcp.f32 %v8867_v49 }
 0x3c2   : > { %10737 = vmatmul.mubr.f32.vlgmr.msra.gmra.mxu0 %v11484_v3 }
 0x3c8   : > { %v11486_v35 = vpop.eup %11485 }
 0x3c9   : > { %10739 = vmatprep.mubr.f32.mxu1 %v11486_v35 }
 0x3ce   : > { %v11488_v19 = vpop.eup %11487 }
 0x3cf   : > { %10740 = vmatmul.mubr.f32.vlgmr.msra.gmra.mxu1 %v11488_v19 }
 0x482   : > { %v10738_v13 = vpop.f32.mrf.mxu0 }
 0x484   : > { %v8958_v4 = vpop.f32.mrf.mxu0 }
 0x485   : > { %v8977_v31 = vadd.f32 %v10738_v13, %v8958_v4 }
 0x48f   : > { %v10741_v26 = vpop.f32.mrf.mxu1 }
 0x490   : > { %v8980_v45 = vsel %vm8979_vm4, %v10741_v26, 0.0 }
 0x491   : > { %v8968_v46 = vpop.f32.mrf.mxu1 }
 0x492   : > { %v8978_v34 = vadd.f32 %v8977_v31, %v8968_v46 }
 0x494   : > { %v8981_v42 = vadd.f32 %v8980_v45, %v8978_v34 }
 0x496   : > { %v8982_v58 = vrot.slane %v8981_v42, 4 }
 0x498   : > { %v8983_v9 = vadd.f32 %v8982_v58, %v8981_v42 }
 0x49a   : > { %v8984_v43 = vrot.slane %v8983_v9, 2 }
 0x49c   : > { %v8985_v55 = vadd.f32 %v8984_v43, %v8983_v9 }
 0x49e   : > { %v8986_v61 = vrot.slane %v8985_v55, 1 }
 0x4a0   : > { %v8987_v16 = vadd.f32 %v8986_v61, %v8985_v55 }
 0x4a2   : > { %v8989_v47 = vadd.f32 %v8988_v59, %v8987_v16 }
 0x4a4   : > { %8990 = vst [vmem:[%s216_s11] sm:$0x1] %v8989_v47 }
 0x4a5   : > { %11502 = shalt.err (!%p11499_p3)
}
 0x4a6   : > { %s11503_s26 = scalar_lea.hbm %s9002_s15, 16  ;;  %s11507_s8 = scalar_lea.hbm %s14595_s5, 32 }
 0x4a7   : > { %p11504_p4 = scmp.ne.s32.totalorder %s9002_s15, %s11503_s26  ;;  %p11508_p9 = scmp.lt.s32.totalorder %s9002_s15, %s14595_s5 }
 0x4a8   : > { %p11509_p10 = scmp.lt.s32.totalorder %s11507_s8, %s11503_s26 }
 0x4a9   : > { %p11505_p7 = pnand %p11504_p4, %p11620_p5 }
 0x4aa   : > { %p11510_p11 = por %p11509_p10, %p11508_p9 }
 0x4ab   : > { %p11506_p8 = pneg %p11505_p7 }
 0x4ad   : > { %p11511_p12 = pnand %p11510_p11, %p11506_p8 }
 0x4af   : > { %11514 = shalt.err (!%p11511_p12)
}
 0x4b0   : > { %10774 = dma.vmem_to_hbm [thread:$0]  (%p11620_p5), %s9005_s12, 16, %s9002_s15, %s8992_s16  }
 0x4b1 PF: > { %p10780_p13 = scmp.ge.s32.totalorder %s11549_s21, 2  ;;  %s9016_s10 = sand.u32 1, %s11537_s18  }
 0x4b2   : > { %s9017_s11 = scalar_lea.sflag [#allocation4], %s9016_s10 }
 0x4b3   : > { %p10777_p0 = pnand %p10780_p13, %p11624_p6 }
 0x4b5   : > { %p10778_p1 = pneg %p10777_p0 }
 0x4b7   : > { %11532 = dma.done.wait (%p10778_p1), %s9017_s11, 16  }
 0x4b8   : > { %11534 = vsyncadd (%p10778_p1), %s9017_s11, 4294967280  ;;  %p15_p2 = scmp.ge.s32.totalorder %s11607_s24, 4   ;;  %s14630_s18 = smov %s11541_s19 }
 0x4b9   : > { %s14631_s19 = smov %s11545_s20  ;;  %s14632_s20 = smov %s11618_s27 }
 0x4ba   : > { %s14633_s21 = smov %s11607_s24  ;;  %17 = sbr.rel (!%p15_p2) target bundleno = 3 (0x3), region = 76 }
 0x4bf   :  { %9021 = vsyncpa [#allocation4], 1 }
 0x4c0   :  { %9023 = vsyncpa [#allocation4 + $0x1], 1 }

</bundles_post_ra>
